<compile_context>
chip_gen: v6e
topology: v6e:2x2x1
jax: 0.10.0
libtpu: 0.0.40
codegen_flags: <defaults>
</compile_context>

<pallas_src>
import functools

import jax
import jax.numpy as jnp
from jax.experimental import pallas as pl
from jax.experimental.pallas import tpu as pltpu

_VMEM_SPEC = pl.BlockSpec(memory_space=pltpu.MemorySpace.VMEM)


def _round_up(x, m):
    return (x + m - 1) // m * m


def _pad_k(k):
    """Pad a contraction dim so tk can be >= 256 (256-deep MXU on v6e/v7x).

    Small K (<256) stays at 128 to avoid a 2x inflation of tiny 1x1 convs.
    """
    kp = _round_up(k, 128)
    if kp >= 256 and kp % 256 != 0:
        kp = _round_up(kp, 256)
    return kp


# ----------------------------- Pallas kernels ------------------------------ #

def _gemm_kernel(x_ref, w_ref, b_ref, o_ref, acc_ref, *, relu):
    """out = act((x @ w) + bias), accumulated over the K grid axis."""
    k = pl.program_id(2)

    @pl.when(k == 0)
    def _():
        acc_ref[...] = jnp.zeros_like(acc_ref)

    acc_ref[...] += jnp.dot(x_ref[...], w_ref[...],
                            preferred_element_type=jnp.float32)

    @pl.when(k == pl.num_programs(2) - 1)
    def _():
        r = acc_ref[...] + b_ref[...]
        if relu:
            r = jnp.maximum(r, 0.0)
        o_ref[...] = r.astype(o_ref.dtype)


def _gemm_res_kernel(x_ref, w_ref, b_ref, res_ref, o_ref, acc_ref):
    """out = relu((x @ w) + bias + residual); residual seeds the accumulator."""
    k = pl.program_id(2)

    @pl.when(k == 0)
    def _():
        acc_ref[...] = res_ref[...].astype(jnp.float32)

    acc_ref[...] += jnp.dot(x_ref[...], w_ref[...],
                            preferred_element_type=jnp.float32)

    @pl.when(k == pl.num_programs(2) - 1)
    def _():
        o_ref[...] = jnp.maximum(acc_ref[...] + b_ref[...],
                                 0.0).astype(o_ref.dtype)


def _maxpool_kernel(x_ref, o_ref):
    """x_ref: (9, TR, Wo*C) stacked 3x3 taps -> elementwise max over taps."""
    o_ref[...] = jnp.max(x_ref[...], axis=0)


def _head_kernel(x_ref, w_ref, b_ref, o_ref):
    """Fused global average pool + FC: (N,HW,C) -> (N,num_classes)."""
    feat = jnp.mean(x_ref[...].astype(jnp.float32), axis=1)        # (N, C)
    o_ref[...] = jnp.dot(feat, w_ref[...],
                         preferred_element_type=jnp.float32) + b_ref[...]


# ------------------------------ GEMM wrapper ------------------------------- #

def gemm_bias_act(x_rows, w_pad, b_pad, c_out, *, relu, residual_rows=None):
    """act((x_rows @ w) + bias [+ residual]) with pre-padded bf16 weights.

    x_rows: (M, K) activations (cast to bf16 for the MXU),
    w_pad:  (kp, np_) bf16, BN scale already folded in, pre-padded/transposed,
    b_pad:  (1, np_) f32 (BN shift),
    residual_rows: (M, c_out) bf16 or None.
    Accumulation and epilogue in f32; output stored as bf16.
    """
    M, K = x_rows.shape
    kp, np_ = w_pad.shape

    # Tile sizes: lane-dense (multiples of 128) on K / Cout, sublane-aligned M.
    tn = min(512, np_)
    if np_ % tn:
        tn = 128
    tm = min(512, _round_up(M, 16))
    mp = _round_up(M, tm)
    tk = 512 if kp % 512 == 0 else (256 if kp % 256 == 0 else 128)
    tk = min(tk, kp)

    # v7x megacore: make sure the parallel (i, j) grid has >= 2 blocks so both
    # TensorCores get work on the small-M deep layers (cheap on 1-TC chips).
    if (mp // tm) * (np_ // tn) < 2:
        if tn >= 256:
            tn //= 2
        elif tm >= 256:
            tm //= 2

    xb = x_rows.astype(jnp.bfloat16)
    if mp != M or kp != K:
        xb = jnp.pad(xb, ((0, mp - M), (0, kp - K)))

    in_specs = [
        pl.BlockSpec((tm, tk), lambda i, j, k: (i, k)),
        pl.BlockSpec((tk, tn), lambda i, j, k: (k, j)),
        pl.BlockSpec((1, tn), lambda i, j, k: (0, j)),
    ]
    args = [xb, w_pad, b_pad]

    if residual_rows is None:
        kernel = functools.partial(_gemm_kernel, relu=relu)
    else:
        rb = residual_rows.astype(jnp.bfloat16)
        if mp != M or np_ != c_out:
            rb = jnp.pad(rb, ((0, mp - M), (0, np_ - c_out)))
        in_specs.append(pl.BlockSpec((tm, tn), lambda i, j, k: (i, j)))
        args.append(rb)
        kernel = _gemm_res_kernel

    out = pl.pallas_call(
        kernel,
        out_shape=jax.ShapeDtypeStruct((mp, np_), jnp.bfloat16),
        grid_spec=pltpu.PrefetchScalarGridSpec(
            num_scalar_prefetch=0,
            grid=(mp // tm, np_ // tn, kp // tk),
            in_specs=in_specs,
            out_specs=pl.BlockSpec((tm, tn), lambda i, j, k: (i, j)),
            scratch_shapes=[pltpu.VMEM((tm, tn), jnp.float32)],
        ),
        compiler_params=pltpu.CompilerParams(
            dimension_semantics=("parallel", "parallel", "arbitrary")),
    )(*args)
    return out[:M, :c_out]


# ------------------------------ conv plumbing ------------------------------ #

def _im2col_nhwc(x, kh, kw, stride, pad):
    """x: NHWC -> patch rows (N*Ho*Wo, C*kh*kw); K order = c*(kh*kw) + tap."""
    N, H, W, C = x.shape
    Ho = (H + 2 * pad - kh) // stride + 1
    Wo = (W + 2 * pad - kw) // stride + 1
    xp = jnp.pad(x, ((0, 0), (pad, pad), (pad, pad), (0, 0))) if pad else x
    taps = []
    for i in range(kh):
        for j in range(kw):
            taps.append(xp[:, i:i + stride * Ho:stride,
                           j:j + stride * Wo:stride, :])     # (N, Ho, Wo, C)
    if kh == 1 and kw == 1:
        return taps[0].reshape(N * Ho * Wo, C), N, Ho, Wo
    patches = jnp.stack(taps, axis=-1)                        # (N,Ho,Wo,C,kh*kw)
    return patches.reshape(N * Ho * Wo, C * kh * kw), N, Ho, Wo


def conv_bn(x, prep, kh, kw, stride, pad, c_out, relu, residual=None):
    """Conv2d(bias=False) + folded BN (+ optional residual, ReLU). NHWC in/out."""
    cols, N, Ho, Wo = _im2col_nhwc(x, kh, kw, stride, pad)
    res_rows = None
    if residual is not None:
        res_rows = residual.reshape(N * Ho * Wo, c_out)
    out = gemm_bias_act(cols, prep["w"], prep["b"], c_out, relu=relu,
                        residual_rows=res_rows)
    return out.reshape(N, Ho, Wo, c_out)


def maxpool_3x3_s2_p1(x):
    """3x3/stride-2/pad-1 max pool on NHWC (bf16), lane-dense tap layout."""
    N, H, W, C = x.shape
    Ho = (H + 2 - 3) // 2 + 1
    Wo = (W + 2 - 3) // 2 + 1
    xp = jnp.pad(x, ((0, 0), (1, 1), (1, 1), (0, 0)),
                 constant_values=-jnp.inf)
    taps = [xp[:, i:i + 2 * Ho:2, j:j + 2 * Wo:2, :]
            for i in range(3) for j in range(3)]
    stacked = jnp.stack(taps, axis=0).reshape(9, N * Ho, Wo * C)

    rows, cols = N * Ho, Wo * C
    itemsize = stacked.dtype.itemsize
    # Keep the (9, tr, cols) tap block ~<= 4 MiB so double-buffering fits even
    # v7x's smaller VMEM at realistic resolutions; tr stays a multiple of 8.
    tr = 256
    while tr > 8 and 9 * tr * cols * itemsize > (4 << 20):
        tr //= 2
    tr = min(tr, _round_up(rows, 8))
    rows_p = _round_up(rows, tr)
    if rows_p != rows:
        stacked = jnp.pad(stacked, ((0, 0), (0, rows_p - rows), (0, 0)))

    out = pl.pallas_call(
        _maxpool_kernel,
        out_shape=jax.ShapeDtypeStruct((rows_p, cols), x.dtype),
        grid_spec=pltpu.PrefetchScalarGridSpec(
            num_scalar_prefetch=0,
            grid=(rows_p // tr,),
            in_specs=[pl.BlockSpec((9, tr, cols), lambda r: (0, r, 0))],
            out_specs=pl.BlockSpec((tr, cols), lambda r: (r, 0)),
        ),
        compiler_params=pltpu.CompilerParams(
            dimension_semantics=("parallel",)),
    )(stacked)
    return out[:rows].reshape(N, Ho, Wo, C)


def avgpool_fc(x, fc_w, fc_b):
    """Fused adaptive-avg-pool(1,1) + flatten + Linear: NHWC -> (N, classes)."""
    N, H, W, C = x.shape
    xr = x.reshape(N, H * W, C)
    num_classes = fc_w.shape[1]
    return pl.pallas_call(
        _head_kernel,
        out_shape=jax.ShapeDtypeStruct((N, num_classes), jnp.float32),
        in_specs=[_VMEM_SPEC, _VMEM_SPEC, _VMEM_SPEC],
        out_specs=_VMEM_SPEC,
    )(xr, fc_w, fc_b)


# ---------------------------- parameter creation --------------------------- #

def _bn_params(key, c):
    k1, k2, k3, k4 = jax.random.split(key, 4)
    gamma = 1.0 + 0.1 * jax.random.normal(k1, (c,), jnp.float32)
    beta = 0.1 * jax.random.normal(k2, (c,), jnp.float32)
    running_mean = 0.1 * jax.random.normal(k3, (c,), jnp.float32)
    running_var = 1.0 + 0.1 * jax.random.uniform(k4, (c,), jnp.float32)
    scale = gamma * jax.lax.rsqrt(running_var + 1e-5)
    shift = beta - running_mean * scale
    return scale, shift


def _conv_w(key, c_out, c_in, kh, kw):
    return 0.05 * jax.random.normal(key, (c_out, c_in, kh, kw), jnp.float32)


def _prep_conv(w, bn_scale, bn_shift):
    """Fold BN into the conv, transpose to (K, Cout), pad lane-dense, cast bf16.

    Done once at parameter-build time so no per-forward weight transpose / pad
    / cast traffic hits HBM.
    """
    c_out, c_in, kh, kw = w.shape
    k = c_in * kh * kw
    w_mat = (w.reshape(c_out, k) * bn_scale[:, None]).T          # (K, Cout) f32
    kp, np_ = _pad_k(k), _round_up(c_out, 128)
    w_mat = jnp.pad(w_mat, ((0, kp - k), (0, np_ - c_out))).astype(jnp.bfloat16)
    b = jnp.pad(bn_shift.reshape(1, -1).astype(jnp.float32),
                ((0, 0), (0, np_ - c_out)))
    return {"w": w_mat, "b": b}


def _block_params(key, c_in, c_out):
    ks = jax.random.split(key, 6)
    s1, b1 = _bn_params(ks[2], c_out)
    s2, b2 = _bn_params(ks[3], c_out)
    p = {
        "conv1": _prep_conv(_conv_w(ks[0], c_out, c_in, 3, 3), s1, b1),
        "conv2": _prep_conv(_conv_w(ks[1], c_out, c_out, 3, 3), s2, b2),
    }
    if c_in != c_out:  # stride-2 downsample path (1x1 conv + BN)
        sd, bd = _bn_params(ks[5], c_out)
        p["down"] = _prep_conv(_conv_w(ks[4], c_out, c_in, 1, 1), sd, bd)
    return p


def make_resnet_params(key, num_classes, segments):
    keys = jax.random.split(key, 4 + len(segments))
    pre_s, pre_b = _bn_params(keys[1], 64)
    params = {"pre": _prep_conv(_conv_w(keys[0], 64, 3, 7, 7), pre_s, pre_b)}
    layers = []
    c_in = 64
    for si, (c_out, blocks) in enumerate(segments):
        bkeys = jax.random.split(keys[2 + si], blocks)
        layer = [_block_params(bkeys[0], c_in, c_out)]
        for b in range(1, blocks):
            layer.append(_block_params(bkeys[b], c_out, c_out))
        layers.append(layer)
        c_in = c_out
    params["layers"] = layers
    kfc_w, kfc_b = jax.random.split(keys[-1])
    fc_w = 0.05 * jax.random.normal(kfc_w, (num_classes, 512), jnp.float32)
    fc_b = 0.05 * jax.random.normal(kfc_b, (num_classes,), jnp.float32)
    params["fc_w"] = fc_w.T                       # (512, num_classes), f32
    params["fc_b"] = fc_b.reshape(1, -1)
    return params


# ------------------------------- forward pass ------------------------------ #

def resnet_block_forward(p, x, c_out):
    if "down" in p:  # downsample (stride-2) block
        stride = 2
        residual = conv_bn(x, p["down"], 1, 1, stride=2, pad=0,
                           c_out=c_out, relu=False)
    else:
        stride = 1
        residual = x
    out = conv_bn(x, p["conv1"], 3, 3, stride=stride, pad=1,
                  c_out=c_out, relu=True)
    out = conv_bn(out, p["conv2"], 3, 3, stride=1, pad=1,
                  c_out=c_out, relu=False, residual=residual)
    return out


@functools.partial(jax.jit, static_argnames=("segments",))
def resnet_forward(params, x_nchw, *, segments):
    # NCHW -> NHWC bf16 once at the boundary; activations stay NHWC bf16.
    x = jnp.transpose(x_nchw, (0, 2, 3, 1)).astype(jnp.bfloat16)
    # preambula: conv7x7 s2 p3 + BN + ReLU, maxpool 3x3 s2 p1
    x = conv_bn(x, params["pre"], 7, 7, stride=2, pad=3, c_out=64, relu=True)
    x = maxpool_3x3_s2_p1(x)
    # residual segments
    for layer, (c_out, _) in zip(params["layers"], segments):
        for block in layer:
            x = resnet_block_forward(block, x, c_out)
    # adaptive avg pool (1,1) + flatten + fc (fused into one kernel)
    logits = avgpool_fc(x, params["fc_w"], params["fc_b"])
    return logits


# ----------------------------------- main ----------------------------------- #

if __name__ == "__main__":
    key = jax.random.PRNGKey(0)
    kx, kp = jax.random.split(key)

    # Small ResNet: segments (out_channels, num_blocks); last segment must be
    # 512 channels because fc is Linear(512, num_classes).
    segments = ((64, 1), (128, 1), (256, 1), (512, 1))
    num_classes = 10

    params = make_resnet_params(kp, num_classes, segments)

    # Input: NCHW, batch=2, 3 channels, 64x64 spatial (module expects 3 chans).
    x = jax.random.normal(kx, (2, 3, 64, 64), jnp.float32)

    logits = resnet_forward(params, x, segments=segments)
    logits = jax.block_until_ready(logits)

    assert logits.shape == (2, num_classes), logits.shape
    assert logits.dtype == jnp.float32
    assert bool(jnp.all(jnp.isfinite(logits)))
    print("KERNEL_OK")
</pallas_src>

<mosaic_0001>
module attributes {stable_mosaic.version = 11 : i64} {
  func.func @_gemm_kernel(%arg0: i32, %arg1: i32, %arg2: i32, %arg3: memref<512x256xbf16, #tpu.memory_space<vmem>>, %arg4: memref<256x128xbf16, #tpu.memory_space<vmem>>, %arg5: memref<1x128xf32, #tpu.memory_space<vmem>>, %arg6: memref<512x128xbf16, #tpu.memory_space<vmem>>, %arg7: memref<512x128xf32, #tpu.memory_space<vmem>>) attributes {dimension_semantics = [#tpu.dimension_semantics<parallel>, #tpu.dimension_semantics<parallel>, #tpu.dimension_semantics<arbitrary>], iteration_bounds = array<i64: 4, 1, 1>, scalar_prefetch = 0 : i64, scratch_operands = 1 : i64, tpu.core_type = #tpu.core_type<tc>, window_params = [{transform_indices = @transform_0, window_bounds = array<i64: 512, 256>}, {transform_indices = @transform_1, window_bounds = array<i64: 256, 128>}, {transform_indices = @transform_2, window_bounds = array<i64: 1, 128>}, {transform_indices = @transform_3, window_bounds = array<i64: 512, 128>}]} {
    %c0_i32 = arith.constant 0 : i32
    %0 = arith.cmpi eq, %arg2, %c0_i32 : i32
    %1 = arith.extui %0 : i1 to i32
    %c0_i32_0 = arith.constant 0 : i32
    %2 = arith.cmpi ne, %1, %c0_i32_0 : i32
    scf.if %2 {
      %cst_10 = arith.constant 0.000000e+00 : f32
      %12 = vector.broadcast %cst_10 : f32 to vector<512x128xf32>
      %c0_11 = arith.constant 0 : index
      %c0_12 = arith.constant 0 : index
      %13 = vector.load %arg7[%c0_11, %c0_12] : memref<512x128xf32, #tpu.memory_space<vmem>>, vector<512x128xf32>
      tpu.vector_store %arg7[%c0_11, %c0_12], %12 {strides = array<i32>} : memref<512x128xf32, #tpu.memory_space<vmem>>, vector<512x128xf32>,
    } else {
    }
    %c0 = arith.constant 0 : index
    %c0_1 = arith.constant 0 : index
    %3 = vector.load %arg7[%c0, %c0_1] : memref<512x128xf32, #tpu.memory_space<vmem>>, vector<512x128xf32>
    %c0_2 = arith.constant 0 : index
    %c0_3 = arith.constant 0 : index
    %4 = vector.load %arg3[%c0_2, %c0_3] : memref<512x256xbf16, #tpu.memory_space<vmem>>, vector<512x256xbf16>
    %c0_4 = arith.constant 0 : index
    %c0_5 = arith.constant 0 : index
    %5 = vector.load %arg4[%c0_4, %c0_5] : memref<256x128xbf16, #tpu.memory_space<vmem>>, vector<256x128xbf16>
    %cst = arith.constant dense<0.000000e+00> : vector<512x128xf32>
    %6 = tpu.matmul %4, %5, %cst {dimension_numbers = #tpu.dot_dimension_numbers<[1], [0], [0], [1], [0, 0, 1, 1], [], []>} : vector<512x256xbf16>, vector<256x128xbf16>, vector<512x128xf32> -> vector<512x128xf32>
    %7 = arith.addf %3, %6 : vector<512x128xf32>
    %c0_6 = arith.constant 0 : index
    %c0_7 = arith.constant 0 : index
    %8 = vector.load %arg7[%c0_6, %c0_7] : memref<512x128xf32, #tpu.memory_space<vmem>>, vector<512x128xf32>
    tpu.vector_store %arg7[%c0_6, %c0_7], %7 {strides = array<i32>} : memref<512x128xf32, #tpu.memory_space<vmem>>, vector<512x128xf32>,
    %c0_i32_8 = arith.constant 0 : i32
    %9 = arith.cmpi eq, %arg2, %c0_i32_8 : i32
    %10 = arith.extui %9 : i1 to i32
    %c0_i32_9 = arith.constant 0 : i32
    %11 = arith.cmpi ne, %10, %c0_i32_9 : i32
    scf.if %11 {
      %c0_10 = arith.constant 0 : index
      %c0_11 = arith.constant 0 : index
      %12 = vector.load %arg7[%c0_10, %c0_11] : memref<512x128xf32, #tpu.memory_space<vmem>>, vector<512x128xf32>
      %c0_12 = arith.constant 0 : index
      %c0_13 = arith.constant 0 : index
      %13 = vector.load %arg5[%c0_12, %c0_13] : memref<1x128xf32, #tpu.memory_space<vmem>>, vector<1x128xf32>
      %14 = vector.broadcast %13 : vector<1x128xf32> to vector<512x128xf32>
      %15 = arith.addf %12, %14 : vector<512x128xf32>
      %cst_14 = arith.constant 0.000000e+00 : f32
      %16 = vector.broadcast %cst_14 : f32 to vector<512x128xf32>
      %17 = arith.maximumf %15, %16 : vector<512x128xf32>
      %18 = arith.truncf %17 : vector<512x128xf32> to vector<512x128xbf16>
      %c0_15 = arith.constant 0 : index
      %c0_16 = arith.constant 0 : index
      %19 = vector.load %arg6[%c0_15, %c0_16] : memref<512x128xbf16, #tpu.memory_space<vmem>>, vector<512x128xbf16>
      tpu.vector_store %arg6[%c0_15, %c0_16], %18 {strides = array<i32>} : memref<512x128xbf16, #tpu.memory_space<vmem>>, vector<512x128xbf16>,
    } else {
    }
    return
  }
  func.func @transform_0(%arg0: i32, %arg1: i32, %arg2: i32) -> (i32, i32) {
    %c0_i32 = arith.constant 0 : i32
    return %arg0, %arg2 : i32, i32
  }
  func.func @transform_1(%arg0: i32, %arg1: i32, %arg2: i32) -> (i32, i32) {
    %c0_i32 = arith.constant 0 : i32
    return %arg2, %arg1 : i32, i32
  }
  func.func @transform_2(%arg0: i32, %arg1: i32, %arg2: i32) -> (i32, i32) {
    %c0_i32 = arith.constant 0 : i32
    %c0_i32_0 = arith.constant 0 : i32
    return %c0_i32, %arg1 : i32, i32
  }
  func.func @transform_3(%arg0: i32, %arg1: i32, %arg2: i32) -> (i32, i32) {
    %c0_i32 = arith.constant 0 : i32
    return %arg0, %arg1 : i32, i32
  }
}

module attributes {stable_mosaic.version = 11 : i64} {
  func.func @_maxpool_kernel(%arg0: i32, %arg1: memref<9x32x1024xbf16, #tpu.memory_space<vmem>>, %arg2: memref<32x1024xbf16, #tpu.memory_space<vmem>>) attributes {dimension_semantics = [#tpu.dimension_semantics<parallel>], iteration_bounds = array<i64: 1>, scalar_prefetch = 0 : i64, scratch_operands = 0 : i64, tpu.core_type = #tpu.core_type<tc>, window_params = [{transform_indices = @transform_0, window_bounds = array<i64: 9, 32, 1024>}, {transform_indices = @transform_1, window_bounds = array<i64: 32, 1024>}]} {
    %c0 = arith.constant 0 : index
    %c0_0 = arith.constant 0 : index
    %c0_1 = arith.constant 0 : index
    %0 = vector.load %arg1[%c0, %c0_0, %c0_1] : memref<9x32x1024xbf16, #tpu.memory_space<vmem>>, vector<9x32x1024xbf16>
    %cst = arith.constant dense<0xFF80> : vector<32x1024xbf16>
    %1 = vector.multi_reduction <maximumf>, %0, %cst [0] : vector<9x32x1024xbf16> to vector<32x1024xbf16>
    %c0_2 = arith.constant 0 : index
    %c0_3 = arith.constant 0 : index
    %2 = vector.load %arg2[%c0_2, %c0_3] : memref<32x1024xbf16, #tpu.memory_space<vmem>>, vector<32x1024xbf16>
    tpu.vector_store %arg2[%c0_2, %c0_3], %1 {strides = array<i32>} : memref<32x1024xbf16, #tpu.memory_space<vmem>>, vector<32x1024xbf16>,
    return
  }
  func.func @transform_0(%arg0: i32) -> (i32, i32, i32) {
    %c0_i32 = arith.constant 0 : i32
    %c0_i32_0 = arith.constant 0 : i32
    %c0_i32_1 = arith.constant 0 : i32
    return %c0_i32, %arg0, %c0_i32_0 : i32, i32, i32
  }
  func.func @transform_1(%arg0: i32) -> (i32, i32) {
    %c0_i32 = arith.constant 0 : i32
    %c0_i32_0 = arith.constant 0 : i32
    return %arg0, %c0_i32 : i32, i32
  }
}

module attributes {stable_mosaic.version = 11 : i64} {
  func.func @_gemm_kernel(%arg0: i32, %arg1: i32, %arg2: i32, %arg3: memref<256x256xbf16, #tpu.memory_space<vmem>>, %arg4: memref<256x128xbf16, #tpu.memory_space<vmem>>, %arg5: memref<1x128xf32, #tpu.memory_space<vmem>>, %arg6: memref<256x128xbf16, #tpu.memory_space<vmem>>, %arg7: memref<256x128xf32, #tpu.memory_space<vmem>>) attributes {dimension_semantics = [#tpu.dimension_semantics<parallel>, #tpu.dimension_semantics<parallel>, #tpu.dimension_semantics<arbitrary>], iteration_bounds = array<i64: 2, 1, 3>, scalar_prefetch = 0 : i64, scratch_operands = 1 : i64, tpu.core_type = #tpu.core_type<tc>, window_params = [{transform_indices = @transform_0, window_bounds = array<i64: 256, 256>}, {transform_indices = @transform_1, window_bounds = array<i64: 256, 128>}, {transform_indices = @transform_2, window_bounds = array<i64: 1, 128>}, {transform_indices = @transform_3, window_bounds = array<i64: 256, 128>}]} {
    %c0_i32 = arith.constant 0 : i32
    %0 = arith.cmpi eq, %arg2, %c0_i32 : i32
    %1 = arith.extui %0 : i1 to i32
    %c0_i32_0 = arith.constant 0 : i32
    %2 = arith.cmpi ne, %1, %c0_i32_0 : i32
    scf.if %2 {
      %cst_9 = arith.constant 0.000000e+00 : f32
      %12 = vector.broadcast %cst_9 : f32 to vector<256x128xf32>
      %c0_10 = arith.constant 0 : index
      %c0_11 = arith.constant 0 : index
      %13 = vector.load %arg7[%c0_10, %c0_11] : memref<256x128xf32, #tpu.memory_space<vmem>>, vector<256x128xf32>
      tpu.vector_store %arg7[%c0_10, %c0_11], %12 {strides = array<i32>} : memref<256x128xf32, #tpu.memory_space<vmem>>, vector<256x128xf32>,
    } else {
    }
    %c0 = arith.constant 0 : index
    %c0_1 = arith.constant 0 : index
    %3 = vector.load %arg7[%c0, %c0_1] : memref<256x128xf32, #tpu.memory_space<vmem>>, vector<256x128xf32>
    %c0_2 = arith.constant 0 : index
    %c0_3 = arith.constant 0 : index
    %4 = vector.load %arg3[%c0_2, %c0_3] : memref<256x256xbf16, #tpu.memory_space<vmem>>, vector<256x256xbf16>
    %c0_4 = arith.constant 0 : index
    %c0_5 = arith.constant 0 : index
    %5 = vector.load %arg4[%c0_4, %c0_5] : memref<256x128xbf16, #tpu.memory_space<vmem>>, vector<256x128xbf16>
    %cst = arith.constant dense<0.000000e+00> : vector<256x128xf32>
    %6 = tpu.matmul %4, %5, %cst {dimension_numbers = #tpu.dot_dimension_numbers<[1], [0], [0], [1], [0, 0, 1, 1], [], []>} : vector<256x256xbf16>, vector<256x128xbf16>, vector<256x128xf32> -> vector<256x128xf32>
    %7 = arith.addf %3, %6 : vector<256x128xf32>
    %c0_6 = arith.constant 0 : index
    %c0_7 = arith.constant 0 : index
    %8 = vector.load %arg7[%c0_6, %c0_7] : memref<256x128xf32, #tpu.memory_space<vmem>>, vector<256x128xf32>
    tpu.vector_store %arg7[%c0_6, %c0_7], %7 {strides = array<i32>} : memref<256x128xf32, #tpu.memory_space<vmem>>, vector<256x128xf32>,
    %c2_i32 = arith.constant 2 : i32
    %9 = arith.cmpi eq, %arg2, %c2_i32 : i32
    %10 = arith.extui %9 : i1 to i32
    %c0_i32_8 = arith.constant 0 : i32
    %11 = arith.cmpi ne, %10, %c0_i32_8 : i32
    scf.if %11 {
      %c0_9 = arith.constant 0 : index
      %c0_10 = arith.constant 0 : index
      %12 = vector.load %arg7[%c0_9, %c0_10] : memref<256x128xf32, #tpu.memory_space<vmem>>, vector<256x128xf32>
      %c0_11 = arith.constant 0 : index
      %c0_12 = arith.constant 0 : index
      %13 = vector.load %arg5[%c0_11, %c0_12] : memref<1x128xf32, #tpu.memory_space<vmem>>, vector<1x128xf32>
      %14 = vector.broadcast %13 : vector<1x128xf32> to vector<256x128xf32>
      %15 = arith.addf %12, %14 : vector<256x128xf32>
      %cst_13 = arith.constant 0.000000e+00 : f32
      %16 = vector.broadcast %cst_13 : f32 to vector<256x128xf32>
      %17 = arith.maximumf %15, %16 : vector<256x128xf32>
      %18 = arith.truncf %17 : vector<256x128xf32> to vector<256x128xbf16>
      %c0_14 = arith.constant 0 : index
      %c0_15 = arith.constant 0 : index
      %19 = vector.load %arg6[%c0_14, %c0_15] : memref<256x128xbf16, #tpu.memory_space<vmem>>, vector<256x128xbf16>
      tpu.vector_store %arg6[%c0_14, %c0_15], %18 {strides = array<i32>} : memref<256x128xbf16, #tpu.memory_space<vmem>>, vector<256x128xbf16>,
    } else {
    }
    return
  }
  func.func @transform_0(%arg0: i32, %arg1: i32, %arg2: i32) -> (i32, i32) {
    %c0_i32 = arith.constant 0 : i32
    return %arg0, %arg2 : i32, i32
  }
  func.func @transform_1(%arg0: i32, %arg1: i32, %arg2: i32) -> (i32, i32) {
    %c0_i32 = arith.constant 0 : i32
    return %arg2, %arg1 : i32, i32
  }
  func.func @transform_2(%arg0: i32, %arg1: i32, %arg2: i32) -> (i32, i32) {
    %c0_i32 = arith.constant 0 : i32
    %c0_i32_0 = arith.constant 0 : i32
    return %c0_i32, %arg1 : i32, i32
  }
  func.func @transform_3(%arg0: i32, %arg1: i32, %arg2: i32) -> (i32, i32) {
    %c0_i32 = arith.constant 0 : i32
    return %arg0, %arg1 : i32, i32
  }
}

module attributes {stable_mosaic.version = 11 : i64} {
  func.func @_gemm_res_kernel(%arg0: i32, %arg1: i32, %arg2: i32, %arg3: memref<256x256xbf16, #tpu.memory_space<vmem>>, %arg4: memref<256x128xbf16, #tpu.memory_space<vmem>>, %arg5: memref<1x128xf32, #tpu.memory_space<vmem>>, %arg6: memref<256x128xbf16, #tpu.memory_space<vmem>>, %arg7: memref<256x128xbf16, #tpu.memory_space<vmem>>, %arg8: memref<256x128xf32, #tpu.memory_space<vmem>>) attributes {dimension_semantics = [#tpu.dimension_semantics<parallel>, #tpu.dimension_semantics<parallel>, #tpu.dimension_semantics<arbitrary>], iteration_bounds = array<i64: 2, 1, 3>, scalar_prefetch = 0 : i64, scratch_operands = 1 : i64, tpu.core_type = #tpu.core_type<tc>, window_params = [{transform_indices = @transform_0, window_bounds = array<i64: 256, 256>}, {transform_indices = @transform_1, window_bounds = array<i64: 256, 128>}, {transform_indices = @transform_2, window_bounds = array<i64: 1, 128>}, {transform_indices = @transform_3, window_bounds = array<i64: 256, 128>}, {transform_indices = @transform_4, window_bounds = array<i64: 256, 128>}]} {
    %c0_i32 = arith.constant 0 : i32
    %0 = arith.cmpi eq, %arg2, %c0_i32 : i32
    %1 = arith.extui %0 : i1 to i32
    %c0_i32_0 = arith.constant 0 : i32
    %2 = arith.cmpi ne, %1, %c0_i32_0 : i32
    scf.if %2 {
      %c0_9 = arith.constant 0 : index
      %c0_10 = arith.constant 0 : index
      %12 = vector.load %arg6[%c0_9, %c0_10] : memref<256x128xbf16, #tpu.memory_space<vmem>>, vector<256x128xbf16>
      %13 = arith.extf %12 : vector<256x128xbf16> to vector<256x128xf32>
      %c0_11 = arith.constant 0 : index
      %c0_12 = arith.constant 0 : index
      %14 = vector.load %arg8[%c0_11, %c0_12] : memref<256x128xf32, #tpu.memory_space<vmem>>, vector<256x128xf32>
      tpu.vector_store %arg8[%c0_11, %c0_12], %13 {strides = array<i32>} : memref<256x128xf32, #tpu.memory_space<vmem>>, vector<256x128xf32>,
    } else {
    }
    %c0 = arith.constant 0 : index
    %c0_1 = arith.constant 0 : index
    %3 = vector.load %arg8[%c0, %c0_1] : memref<256x128xf32, #tpu.memory_space<vmem>>, vector<256x128xf32>
    %c0_2 = arith.constant 0 : index
    %c0_3 = arith.constant 0 : index
    %4 = vector.load %arg3[%c0_2, %c0_3] : memref<256x256xbf16, #tpu.memory_space<vmem>>, vector<256x256xbf16>
    %c0_4 = arith.constant 0 : index
    %c0_5 = arith.constant 0 : index
    %5 = vector.load %arg4[%c0_4, %c0_5] : memref<256x128xbf16, #tpu.memory_space<vmem>>, vector<256x128xbf16>
    %cst = arith.constant dense<0.000000e+00> : vector<256x128xf32>
    %6 = tpu.matmul %4, %5, %cst {dimension_numbers = #tpu.dot_dimension_numbers<[1], [0], [0], [1], [0, 0, 1, 1], [], []>} : vector<256x256xbf16>, vector<256x128xbf16>, vector<256x128xf32> -> vector<256x128xf32>
    %7 = arith.addf %3, %6 : vector<256x128xf32>
    %c0_6 = arith.constant 0 : index
    %c0_7 = arith.constant 0 : index
    %8 = vector.load %arg8[%c0_6, %c0_7] : memref<256x128xf32, #tpu.memory_space<vmem>>, vector<256x128xf32>
    tpu.vector_store %arg8[%c0_6, %c0_7], %7 {strides = array<i32>} : memref<256x128xf32, #tpu.memory_space<vmem>>, vector<256x128xf32>,
    %c2_i32 = arith.constant 2 : i32
    %9 = arith.cmpi eq, %arg2, %c2_i32 : i32
    %10 = arith.extui %9 : i1 to i32
    %c0_i32_8 = arith.constant 0 : i32
    %11 = arith.cmpi ne, %10, %c0_i32_8 : i32
    scf.if %11 {
      %c0_9 = arith.constant 0 : index
      %c0_10 = arith.constant 0 : index
      %12 = vector.load %arg8[%c0_9, %c0_10] : memref<256x128xf32, #tpu.memory_space<vmem>>, vector<256x128xf32>
      %c0_11 = arith.constant 0 : index
      %c0_12 = arith.constant 0 : index
      %13 = vector.load %arg5[%c0_11, %c0_12] : memref<1x128xf32, #tpu.memory_space<vmem>>, vector<1x128xf32>
      %14 = vector.broadcast %13 : vector<1x128xf32> to vector<256x128xf32>
      %15 = arith.addf %12, %14 : vector<256x128xf32>
      %cst_13 = arith.constant 0.000000e+00 : f32
      %16 = vector.broadcast %cst_13 : f32 to vector<256x128xf32>
      %17 = arith.maximumf %15, %16 : vector<256x128xf32>
      %18 = arith.truncf %17 : vector<256x128xf32> to vector<256x128xbf16>
      %c0_14 = arith.constant 0 : index
      %c0_15 = arith.constant 0 : index
      %19 = vector.load %arg7[%c0_14, %c0_15] : memref<256x128xbf16, #tpu.memory_space<vmem>>, vector<256x128xbf16>
      tpu.vector_store %arg7[%c0_14, %c0_15], %18 {strides = array<i32>} : memref<256x128xbf16, #tpu.memory_space<vmem>>, vector<256x128xbf16>,
    } else {
    }
    return
  }
  func.func @transform_0(%arg0: i32, %arg1: i32, %arg2: i32) -> (i32, i32) {
    %c0_i32 = arith.constant 0 : i32
    return %arg0, %arg2 : i32, i32
  }
  func.func @transform_1(%arg0: i32, %arg1: i32, %arg2: i32) -> (i32, i32) {
    %c0_i32 = arith.constant 0 : i32
    return %arg2, %arg1 : i32, i32
  }
  func.func @transform_2(%arg0: i32, %arg1: i32, %arg2: i32) -> (i32, i32) {
    %c0_i32 = arith.constant 0 : i32
    %c0_i32_0 = arith.constant 0 : i32
    return %c0_i32, %arg1 : i32, i32
  }
  func.func @transform_3(%arg0: i32, %arg1: i32, %arg2: i32) -> (i32, i32) {
    %c0_i32 = arith.constant 0 : i32
    return %arg0, %arg1 : i32, i32
  }
  func.func @transform_4(%arg0: i32, %arg1: i32, %arg2: i32) -> (i32, i32) {
    %c0_i32 = arith.constant 0 : i32
    return %arg0, %arg1 : i32, i32
  }
}

module attributes {stable_mosaic.version = 11 : i64} {
  func.func @_gemm_kernel(%arg0: i32, %arg1: i32, %arg2: i32, %arg3: memref<128x256xbf16, #tpu.memory_space<vmem>>, %arg4: memref<256x128xbf16, #tpu.memory_space<vmem>>, %arg5: memref<1x128xf32, #tpu.memory_space<vmem>>, %arg6: memref<128x128xbf16, #tpu.memory_space<vmem>>, %arg7: memref<128x128xf32, #tpu.memory_space<vmem>>) attributes {dimension_semantics = [#tpu.dimension_semantics<parallel>, #tpu.dimension_semantics<parallel>, #tpu.dimension_semantics<arbitrary>], iteration_bounds = array<i64: 1, 1, 3>, scalar_prefetch = 0 : i64, scratch_operands = 1 : i64, tpu.core_type = #tpu.core_type<tc>, window_params = [{transform_indices = @transform_0, window_bounds = array<i64: 128, 256>}, {transform_indices = @transform_1, window_bounds = array<i64: 256, 128>}, {transform_indices = @transform_2, window_bounds = array<i64: 1, 128>}, {transform_indices = @transform_3, window_bounds = array<i64: 128, 128>}]} {
    %c0_i32 = arith.constant 0 : i32
    %0 = arith.cmpi eq, %arg2, %c0_i32 : i32
    %1 = arith.extui %0 : i1 to i32
    %c0_i32_0 = arith.constant 0 : i32
    %2 = arith.cmpi ne, %1, %c0_i32_0 : i32
    scf.if %2 {
      %cst_9 = arith.constant 0.000000e+00 : f32
      %12 = vector.broadcast %cst_9 : f32 to vector<128x128xf32>
      %c0_10 = arith.constant 0 : index
      %c0_11 = arith.constant 0 : index
      %13 = vector.load %arg7[%c0_10, %c0_11] : memref<128x128xf32, #tpu.memory_space<vmem>>, vector<128x128xf32>
      tpu.vector_store %arg7[%c0_10, %c0_11], %12 {strides = array<i32>} : memref<128x128xf32, #tpu.memory_space<vmem>>, vector<128x128xf32>,
    } else {
    }
    %c0 = arith.constant 0 : index
    %c0_1 = arith.constant 0 : index
    %3 = vector.load %arg7[%c0, %c0_1] : memref<128x128xf32, #tpu.memory_space<vmem>>, vector<128x128xf32>
    %c0_2 = arith.constant 0 : index
    %c0_3 = arith.constant 0 : index
    %4 = vector.load %arg3[%c0_2, %c0_3] : memref<128x256xbf16, #tpu.memory_space<vmem>>, vector<128x256xbf16>
    %c0_4 = arith.constant 0 : index
    %c0_5 = arith.constant 0 : index
    %5 = vector.load %arg4[%c0_4, %c0_5] : memref<256x128xbf16, #tpu.memory_space<vmem>>, vector<256x128xbf16>
    %cst = arith.constant dense<0.000000e+00> : vector<128x128xf32>
    %6 = tpu.matmul %4, %5, %cst {dimension_numbers = #tpu.dot_dimension_numbers<[1], [0], [0], [1], [0, 0, 1, 1], [], []>} : vector<128x256xbf16>, vector<256x128xbf16>, vector<128x128xf32> -> vector<128x128xf32>
    %7 = arith.addf %3, %6 : vector<128x128xf32>
    %c0_6 = arith.constant 0 : index
    %c0_7 = arith.constant 0 : index
    %8 = vector.load %arg7[%c0_6, %c0_7] : memref<128x128xf32, #tpu.memory_space<vmem>>, vector<128x128xf32>
    tpu.vector_store %arg7[%c0_6, %c0_7], %7 {strides = array<i32>} : memref<128x128xf32, #tpu.memory_space<vmem>>, vector<128x128xf32>,
    %c2_i32 = arith.constant 2 : i32
    %9 = arith.cmpi eq, %arg2, %c2_i32 : i32
    %10 = arith.extui %9 : i1 to i32
    %c0_i32_8 = arith.constant 0 : i32
    %11 = arith.cmpi ne, %10, %c0_i32_8 : i32
    scf.if %11 {
      %c0_9 = arith.constant 0 : index
      %c0_10 = arith.constant 0 : index
      %12 = vector.load %arg7[%c0_9, %c0_10] : memref<128x128xf32, #tpu.memory_space<vmem>>, vector<128x128xf32>
      %c0_11 = arith.constant 0 : index
      %c0_12 = arith.constant 0 : index
      %13 = vector.load %arg5[%c0_11, %c0_12] : memref<1x128xf32, #tpu.memory_space<vmem>>, vector<1x128xf32>
      %14 = vector.broadcast %13 : vector<1x128xf32> to vector<128x128xf32>
      %15 = arith.addf %12, %14 : vector<128x128xf32>
      %cst_13 = arith.constant 0.000000e+00 : f32
      %16 = vector.broadcast %cst_13 : f32 to vector<128x128xf32>
      %17 = arith.maximumf %15, %16 : vector<128x128xf32>
      %18 = arith.truncf %17 : vector<128x128xf32> to vector<128x128xbf16>
      %c0_14 = arith.constant 0 : index
      %c0_15 = arith.constant 0 : index
      %19 = vector.load %arg6[%c0_14, %c0_15] : memref<128x128xbf16, #tpu.memory_space<vmem>>, vector<128x128xbf16>
      tpu.vector_store %arg6[%c0_14, %c0_15], %18 {strides = array<i32>} : memref<128x128xbf16, #tpu.memory_space<vmem>>, vector<128x128xbf16>,
    } else {
    }
    return
  }
  func.func @transform_0(%arg0: i32, %arg1: i32, %arg2: i32) -> (i32, i32) {
    %c0_i32 = arith.constant 0 : i32
    return %arg0, %arg2 : i32, i32
  }
  func.func @transform_1(%arg0: i32, %arg1: i32, %arg2: i32) -> (i32, i32) {
    %c0_i32 = arith.constant 0 : i32
    return %arg2, %arg1 : i32, i32
  }
  func.func @transform_2(%arg0: i32, %arg1: i32, %arg2: i32) -> (i32, i32) {
    %c0_i32 = arith.constant 0 : i32
    %c0_i32_0 = arith.constant 0 : i32
    return %c0_i32, %arg1 : i32, i32
  }
  func.func @transform_3(%arg0: i32, %arg1: i32, %arg2: i32) -> (i32, i32) {
    %c0_i32 = arith.constant 0 : i32
    return %arg0, %arg1 : i32, i32
  }
}

module attributes {stable_mosaic.version = 11 : i64} {
  func.func @_gemm_kernel(%arg0: i32, %arg1: i32, %arg2: i32, %arg3: memref<128x128xbf16, #tpu.memory_space<vmem>>, %arg4: memref<128x128xbf16, #tpu.memory_space<vmem>>, %arg5: memref<1x128xf32, #tpu.memory_space<vmem>>, %arg6: memref<128x128xbf16, #tpu.memory_space<vmem>>, %arg7: memref<128x128xf32, #tpu.memory_space<vmem>>) attributes {dimension_semantics = [#tpu.dimension_semantics<parallel>, #tpu.dimension_semantics<parallel>, #tpu.dimension_semantics<arbitrary>], iteration_bounds = array<i64: 1, 1, 1>, scalar_prefetch = 0 : i64, scratch_operands = 1 : i64, tpu.core_type = #tpu.core_type<tc>, window_params = [{transform_indices = @transform_0, window_bounds = array<i64: 128, 128>}, {transform_indices = @transform_1, window_bounds = array<i64: 128, 128>}, {transform_indices = @transform_2, window_bounds = array<i64: 1, 128>}, {transform_indices = @transform_3, window_bounds = array<i64: 128, 128>}]} {
    %c0_i32 = arith.constant 0 : i32
    %0 = arith.cmpi eq, %arg2, %c0_i32 : i32
    %1 = arith.extui %0 : i1 to i32
    %c0_i32_0 = arith.constant 0 : i32
    %2 = arith.cmpi ne, %1, %c0_i32_0 : i32
    scf.if %2 {
      %cst_10 = arith.constant 0.000000e+00 : f32
      %12 = vector.broadcast %cst_10 : f32 to vector<128x128xf32>
      %c0_11 = arith.constant 0 : index
      %c0_12 = arith.constant 0 : index
      %13 = vector.load %arg7[%c0_11, %c0_12] : memref<128x128xf32, #tpu.memory_space<vmem>>, vector<128x128xf32>
      tpu.vector_store %arg7[%c0_11, %c0_12], %12 {strides = array<i32>} : memref<128x128xf32, #tpu.memory_space<vmem>>, vector<128x128xf32>,
    } else {
    }
    %c0 = arith.constant 0 : index
    %c0_1 = arith.constant 0 : index
    %3 = vector.load %arg7[%c0, %c0_1] : memref<128x128xf32, #tpu.memory_space<vmem>>, vector<128x128xf32>
    %c0_2 = arith.constant 0 : index
    %c0_3 = arith.constant 0 : index
    %4 = vector.load %arg3[%c0_2, %c0_3] : memref<128x128xbf16, #tpu.memory_space<vmem>>, vector<128x128xbf16>
    %c0_4 = arith.constant 0 : index
    %c0_5 = arith.constant 0 : index
    %5 = vector.load %arg4[%c0_4, %c0_5] : memref<128x128xbf16, #tpu.memory_space<vmem>>, vector<128x128xbf16>
    %cst = arith.constant dense<0.000000e+00> : vector<128x128xf32>
    %6 = tpu.matmul %4, %5, %cst {dimension_numbers = #tpu.dot_dimension_numbers<[1], [0], [0], [1], [0, 0, 1, 1], [], []>} : vector<128x128xbf16>, vector<128x128xbf16>, vector<128x128xf32> -> vector<128x128xf32>
    %7 = arith.addf %3, %6 : vector<128x128xf32>
    %c0_6 = arith.constant 0 : index
    %c0_7 = arith.constant 0 : index
    %8 = vector.load %arg7[%c0_6, %c0_7] : memref<128x128xf32, #tpu.memory_space<vmem>>, vector<128x128xf32>
    tpu.vector_store %arg7[%c0_6, %c0_7], %7 {strides = array<i32>} : memref<128x128xf32, #tpu.memory_space<vmem>>, vector<128x128xf32>,
    %c0_i32_8 = arith.constant 0 : i32
    %9 = arith.cmpi eq, %arg2, %c0_i32_8 : i32
    %10 = arith.extui %9 : i1 to i32
    %c0_i32_9 = arith.constant 0 : i32
    %11 = arith.cmpi ne, %10, %c0_i32_9 : i32
    scf.if %11 {
      %c0_10 = arith.constant 0 : index
      %c0_11 = arith.constant 0 : index
      %12 = vector.load %arg7[%c0_10, %c0_11] : memref<128x128xf32, #tpu.memory_space<vmem>>, vector<128x128xf32>
      %c0_12 = arith.constant 0 : index
      %c0_13 = arith.constant 0 : index
      %13 = vector.load %arg5[%c0_12, %c0_13] : memref<1x128xf32, #tpu.memory_space<vmem>>, vector<1x128xf32>
      %14 = vector.broadcast %13 : vector<1x128xf32> to vector<128x128xf32>
      %15 = arith.addf %12, %14 : vector<128x128xf32>
      %16 = arith.truncf %15 : vector<128x128xf32> to vector<128x128xbf16>
      %c0_14 = arith.constant 0 : index
      %c0_15 = arith.constant 0 : index
      %17 = vector.load %arg6[%c0_14, %c0_15] : memref<128x128xbf16, #tpu.memory_space<vmem>>, vector<128x128xbf16>
      tpu.vector_store %arg6[%c0_14, %c0_15], %16 {strides = array<i32>} : memref<128x128xbf16, #tpu.memory_space<vmem>>, vector<128x128xbf16>,
    } else {
    }
    return
  }
  func.func @transform_0(%arg0: i32, %arg1: i32, %arg2: i32) -> (i32, i32) {
    %c0_i32 = arith.constant 0 : i32
    return %arg0, %arg2 : i32, i32
  }
  func.func @transform_1(%arg0: i32, %arg1: i32, %arg2: i32) -> (i32, i32) {
    %c0_i32 = arith.constant 0 : i32
    return %arg2, %arg1 : i32, i32
  }
  func.func @transform_2(%arg0: i32, %arg1: i32, %arg2: i32) -> (i32, i32) {
    %c0_i32 = arith.constant 0 : i32
    %c0_i32_0 = arith.constant 0 : i32
    return %c0_i32, %arg1 : i32, i32
  }
  func.func @transform_3(%arg0: i32, %arg1: i32, %arg2: i32) -> (i32, i32) {
    %c0_i32 = arith.constant 0 : i32
    return %arg0, %arg1 : i32, i32
  }
}

module attributes {stable_mosaic.version = 11 : i64} {
  func.func @_gemm_res_kernel(%arg0: i32, %arg1: i32, %arg2: i32, %arg3: memref<128x256xbf16, #tpu.memory_space<vmem>>, %arg4: memref<256x128xbf16, #tpu.memory_space<vmem>>, %arg5: memref<1x128xf32, #tpu.memory_space<vmem>>, %arg6: memref<128x128xbf16, #tpu.memory_space<vmem>>, %arg7: memref<128x128xbf16, #tpu.memory_space<vmem>>, %arg8: memref<128x128xf32, #tpu.memory_space<vmem>>) attributes {dimension_semantics = [#tpu.dimension_semantics<parallel>, #tpu.dimension_semantics<parallel>, #tpu.dimension_semantics<arbitrary>], iteration_bounds = array<i64: 1, 1, 5>, scalar_prefetch = 0 : i64, scratch_operands = 1 : i64, tpu.core_type = #tpu.core_type<tc>, window_params = [{transform_indices = @transform_0, window_bounds = array<i64: 128, 256>}, {transform_indices = @transform_1, window_bounds = array<i64: 256, 128>}, {transform_indices = @transform_2, window_bounds = array<i64: 1, 128>}, {transform_indices = @transform_3, window_bounds = array<i64: 128, 128>}, {transform_indices = @transform_4, window_bounds = array<i64: 128, 128>}]} {
    %c0_i32 = arith.constant 0 : i32
    %0 = arith.cmpi eq, %arg2, %c0_i32 : i32
    %1 = arith.extui %0 : i1 to i32
    %c0_i32_0 = arith.constant 0 : i32
    %2 = arith.cmpi ne, %1, %c0_i32_0 : i32
    scf.if %2 {
      %c0_9 = arith.constant 0 : index
      %c0_10 = arith.constant 0 : index
      %12 = vector.load %arg6[%c0_9, %c0_10] : memref<128x128xbf16, #tpu.memory_space<vmem>>, vector<128x128xbf16>
      %13 = arith.extf %12 : vector<128x128xbf16> to vector<128x128xf32>
      %c0_11 = arith.constant 0 : index
      %c0_12 = arith.constant 0 : index
      %14 = vector.load %arg8[%c0_11, %c0_12] : memref<128x128xf32, #tpu.memory_space<vmem>>, vector<128x128xf32>
      tpu.vector_store %arg8[%c0_11, %c0_12], %13 {strides = array<i32>} : memref<128x128xf32, #tpu.memory_space<vmem>>, vector<128x128xf32>,
    } else {
    }
    %c0 = arith.constant 0 : index
    %c0_1 = arith.constant 0 : index
    %3 = vector.load %arg8[%c0, %c0_1] : memref<128x128xf32, #tpu.memory_space<vmem>>, vector<128x128xf32>
    %c0_2 = arith.constant 0 : index
    %c0_3 = arith.constant 0 : index
    %4 = vector.load %arg3[%c0_2, %c0_3] : memref<128x256xbf16, #tpu.memory_space<vmem>>, vector<128x256xbf16>
    %c0_4 = arith.constant 0 : index
    %c0_5 = arith.constant 0 : index
    %5 = vector.load %arg4[%c0_4, %c0_5] : memref<256x128xbf16, #tpu.memory_space<vmem>>, vector<256x128xbf16>
    %cst = arith.constant dense<0.000000e+00> : vector<128x128xf32>
    %6 = tpu.matmul %4, %5, %cst {dimension_numbers = #tpu.dot_dimension_numbers<[1], [0], [0], [1], [0, 0, 1, 1], [], []>} : vector<128x256xbf16>, vector<256x128xbf16>, vector<128x128xf32> -> vector<128x128xf32>
    %7 = arith.addf %3, %6 : vector<128x128xf32>
    %c0_6 = arith.constant 0 : index
    %c0_7 = arith.constant 0 : index
    %8 = vector.load %arg8[%c0_6, %c0_7] : memref<128x128xf32, #tpu.memory_space<vmem>>, vector<128x128xf32>
    tpu.vector_store %arg8[%c0_6, %c0_7], %7 {strides = array<i32>} : memref<128x128xf32, #tpu.memory_space<vmem>>, vector<128x128xf32>,
    %c4_i32 = arith.constant 4 : i32
    %9 = arith.cmpi eq, %arg2, %c4_i32 : i32
    %10 = arith.extui %9 : i1 to i32
    %c0_i32_8 = arith.constant 0 : i32
    %11 = arith.cmpi ne, %10, %c0_i32_8 : i32
    scf.if %11 {
      %c0_9 = arith.constant 0 : index
      %c0_10 = arith.constant 0 : index
      %12 = vector.load %arg8[%c0_9, %c0_10] : memref<128x128xf32, #tpu.memory_space<vmem>>, vector<128x128xf32>
      %c0_11 = arith.constant 0 : index
      %c0_12 = arith.constant 0 : index
      %13 = vector.load %arg5[%c0_11, %c0_12] : memref<1x128xf32, #tpu.memory_space<vmem>>, vector<1x128xf32>
      %14 = vector.broadcast %13 : vector<1x128xf32> to vector<128x128xf32>
      %15 = arith.addf %12, %14 : vector<128x128xf32>
      %cst_13 = arith.constant 0.000000e+00 : f32
      %16 = vector.broadcast %cst_13 : f32 to vector<128x128xf32>
      %17 = arith.maximumf %15, %16 : vector<128x128xf32>
      %18 = arith.truncf %17 : vector<128x128xf32> to vector<128x128xbf16>
      %c0_14 = arith.constant 0 : index
      %c0_15 = arith.constant 0 : index
      %19 = vector.load %arg7[%c0_14, %c0_15] : memref<128x128xbf16, #tpu.memory_space<vmem>>, vector<128x128xbf16>
      tpu.vector_store %arg7[%c0_14, %c0_15], %18 {strides = array<i32>} : memref<128x128xbf16, #tpu.memory_space<vmem>>, vector<128x128xbf16>,
    } else {
    }
    return
  }
  func.func @transform_0(%arg0: i32, %arg1: i32, %arg2: i32) -> (i32, i32) {
    %c0_i32 = arith.constant 0 : i32
    return %arg0, %arg2 : i32, i32
  }
  func.func @transform_1(%arg0: i32, %arg1: i32, %arg2: i32) -> (i32, i32) {
    %c0_i32 = arith.constant 0 : i32
    return %arg2, %arg1 : i32, i32
  }
  func.func @transform_2(%arg0: i32, %arg1: i32, %arg2: i32) -> (i32, i32) {
    %c0_i32 = arith.constant 0 : i32
    %c0_i32_0 = arith.constant 0 : i32
    return %c0_i32, %arg1 : i32, i32
  }
  func.func @transform_3(%arg0: i32, %arg1: i32, %arg2: i32) -> (i32, i32) {
    %c0_i32 = arith.constant 0 : i32
    return %arg0, %arg1 : i32, i32
  }
  func.func @transform_4(%arg0: i32, %arg1: i32, %arg2: i32) -> (i32, i32) {
    %c0_i32 = arith.constant 0 : i32
    return %arg0, %arg1 : i32, i32
  }
}

module attributes {stable_mosaic.version = 11 : i64} {
  func.func @_gemm_kernel(%arg0: i32, %arg1: i32, %arg2: i32, %arg3: memref<32x256xbf16, #tpu.memory_space<vmem>>, %arg4: memref<256x128xbf16, #tpu.memory_space<vmem>>, %arg5: memref<1x128xf32, #tpu.memory_space<vmem>>, %arg6: memref<32x128xbf16, #tpu.memory_space<vmem>>, %arg7: memref<32x128xf32, #tpu.memory_space<vmem>>) attributes {dimension_semantics = [#tpu.dimension_semantics<parallel>, #tpu.dimension_semantics<parallel>, #tpu.dimension_semantics<arbitrary>], iteration_bounds = array<i64: 1, 2, 5>, scalar_prefetch = 0 : i64, scratch_operands = 1 : i64, tpu.core_type = #tpu.core_type<tc>, window_params = [{transform_indices = @transform_0, window_bounds = array<i64: 32, 256>}, {transform_indices = @transform_1, window_bounds = array<i64: 256, 128>}, {transform_indices = @transform_2, window_bounds = array<i64: 1, 128>}, {transform_indices = @transform_3, window_bounds = array<i64: 32, 128>}]} {
    %c0_i32 = arith.constant 0 : i32
    %0 = arith.cmpi eq, %arg2, %c0_i32 : i32
    %1 = arith.extui %0 : i1 to i32
    %c0_i32_0 = arith.constant 0 : i32
    %2 = arith.cmpi ne, %1, %c0_i32_0 : i32
    scf.if %2 {
      %cst_9 = arith.constant 0.000000e+00 : f32
      %12 = vector.broadcast %cst_9 : f32 to vector<32x128xf32>
      %c0_10 = arith.constant 0 : index
      %c0_11 = arith.constant 0 : index
      %13 = vector.load %arg7[%c0_10, %c0_11] : memref<32x128xf32, #tpu.memory_space<vmem>>, vector<32x128xf32>
      tpu.vector_store %arg7[%c0_10, %c0_11], %12 {strides = array<i32>} : memref<32x128xf32, #tpu.memory_space<vmem>>, vector<32x128xf32>,
    } else {
    }
    %c0 = arith.constant 0 : index
    %c0_1 = arith.constant 0 : index
    %3 = vector.load %arg7[%c0, %c0_1] : memref<32x128xf32, #tpu.memory_space<vmem>>, vector<32x128xf32>
    %c0_2 = arith.constant 0 : index
    %c0_3 = arith.constant 0 : index
    %4 = vector.load %arg3[%c0_2, %c0_3] : memref<32x256xbf16, #tpu.memory_space<vmem>>, vector<32x256xbf16>
    %c0_4 = arith.constant 0 : index
    %c0_5 = arith.constant 0 : index
    %5 = vector.load %arg4[%c0_4, %c0_5] : memref<256x128xbf16, #tpu.memory_space<vmem>>, vector<256x128xbf16>
    %cst = arith.constant dense<0.000000e+00> : vector<32x128xf32>
    %6 = tpu.matmul %4, %5, %cst {dimension_numbers = #tpu.dot_dimension_numbers<[1], [0], [0], [1], [0, 0, 1, 1], [], []>} : vector<32x256xbf16>, vector<256x128xbf16>, vector<32x128xf32> -> vector<32x128xf32>
    %7 = arith.addf %3, %6 : vector<32x128xf32>
    %c0_6 = arith.constant 0 : index
    %c0_7 = arith.constant 0 : index
    %8 = vector.load %arg7[%c0_6, %c0_7] : memref<32x128xf32, #tpu.memory_space<vmem>>, vector<32x128xf32>
    tpu.vector_store %arg7[%c0_6, %c0_7], %7 {strides = array<i32>} : memref<32x128xf32, #tpu.memory_space<vmem>>, vector<32x128xf32>,
    %c4_i32 = arith.constant 4 : i32
    %9 = arith.cmpi eq, %arg2, %c4_i32 : i32
    %10 = arith.extui %9 : i1 to i32
    %c0_i32_8 = arith.constant 0 : i32
    %11 = arith.cmpi ne, %10, %c0_i32_8 : i32
    scf.if %11 {
      %c0_9 = arith.constant 0 : index
      %c0_10 = arith.constant 0 : index
      %12 = vector.load %arg7[%c0_9, %c0_10] : memref<32x128xf32, #tpu.memory_space<vmem>>, vector<32x128xf32>
      %c0_11 = arith.constant 0 : index
      %c0_12 = arith.constant 0 : index
      %13 = vector.load %arg5[%c0_11, %c0_12] : memref<1x128xf32, #tpu.memory_space<vmem>>, vector<1x128xf32>
      %14 = vector.broadcast %13 : vector<1x128xf32> to vector<32x128xf32>
      %15 = arith.addf %12, %14 : vector<32x128xf32>
      %cst_13 = arith.constant 0.000000e+00 : f32
      %16 = vector.broadcast %cst_13 : f32 to vector<32x128xf32>
      %17 = arith.maximumf %15, %16 : vector<32x128xf32>
      %18 = arith.truncf %17 : vector<32x128xf32> to vector<32x128xbf16>
      %c0_14 = arith.constant 0 : index
      %c0_15 = arith.constant 0 : index
      %19 = vector.load %arg6[%c0_14, %c0_15] : memref<32x128xbf16, #tpu.memory_space<vmem>>, vector<32x128xbf16>
      tpu.vector_store %arg6[%c0_14, %c0_15], %18 {strides = array<i32>} : memref<32x128xbf16, #tpu.memory_space<vmem>>, vector<32x128xbf16>,
    } else {
    }
    return
  }
  func.func @transform_0(%arg0: i32, %arg1: i32, %arg2: i32) -> (i32, i32) {
    %c0_i32 = arith.constant 0 : i32
    return %arg0, %arg2 : i32, i32
  }
  func.func @transform_1(%arg0: i32, %arg1: i32, %arg2: i32) -> (i32, i32) {
    %c0_i32 = arith.constant 0 : i32
    return %arg2, %arg1 : i32, i32
  }
  func.func @transform_2(%arg0: i32, %arg1: i32, %arg2: i32) -> (i32, i32) {
    %c0_i32 = arith.constant 0 : i32
    %c0_i32_0 = arith.constant 0 : i32
    return %c0_i32, %arg1 : i32, i32
  }
  func.func @transform_3(%arg0: i32, %arg1: i32, %arg2: i32) -> (i32, i32) {
    %c0_i32 = arith.constant 0 : i32
    return %arg0, %arg1 : i32, i32
  }
}

module attributes {stable_mosaic.version = 11 : i64} {
  func.func @_gemm_kernel(%arg0: i32, %arg1: i32, %arg2: i32, %arg3: memref<32x128xbf16, #tpu.memory_space<vmem>>, %arg4: memref<128x128xbf16, #tpu.memory_space<vmem>>, %arg5: memref<1x128xf32, #tpu.memory_space<vmem>>, %arg6: memref<32x128xbf16, #tpu.memory_space<vmem>>, %arg7: memref<32x128xf32, #tpu.memory_space<vmem>>) attributes {dimension_semantics = [#tpu.dimension_semantics<parallel>, #tpu.dimension_semantics<parallel>, #tpu.dimension_semantics<arbitrary>], iteration_bounds = array<i64: 1, 2, 1>, scalar_prefetch = 0 : i64, scratch_operands = 1 : i64, tpu.core_type = #tpu.core_type<tc>, window_params = [{transform_indices = @transform_0, window_bounds = array<i64: 32, 128>}, {transform_indices = @transform_1, window_bounds = array<i64: 128, 128>}, {transform_indices = @transform_2, window_bounds = array<i64: 1, 128>}, {transform_indices = @transform_3, window_bounds = array<i64: 32, 128>}]} {
    %c0_i32 = arith.constant 0 : i32
    %0 = arith.cmpi eq, %arg2, %c0_i32 : i32
    %1 = arith.extui %0 : i1 to i32
    %c0_i32_0 = arith.constant 0 : i32
    %2 = arith.cmpi ne, %1, %c0_i32_0 : i32
    scf.if %2 {
      %cst_10 = arith.constant 0.000000e+00 : f32
      %12 = vector.broadcast %cst_10 : f32 to vector<32x128xf32>
      %c0_11 = arith.constant 0 : index
      %c0_12 = arith.constant 0 : index
      %13 = vector.load %arg7[%c0_11, %c0_12] : memref<32x128xf32, #tpu.memory_space<vmem>>, vector<32x128xf32>
      tpu.vector_store %arg7[%c0_11, %c0_12], %12 {strides = array<i32>} : memref<32x128xf32, #tpu.memory_space<vmem>>, vector<32x128xf32>,
    } else {
    }
    %c0 = arith.constant 0 : index
    %c0_1 = arith.constant 0 : index
    %3 = vector.load %arg7[%c0, %c0_1] : memref<32x128xf32, #tpu.memory_space<vmem>>, vector<32x128xf32>
    %c0_2 = arith.constant 0 : index
    %c0_3 = arith.constant 0 : index
    %4 = vector.load %arg3[%c0_2, %c0_3] : memref<32x128xbf16, #tpu.memory_space<vmem>>, vector<32x128xbf16>
    %c0_4 = arith.constant 0 : index
    %c0_5 = arith.constant 0 : index
    %5 = vector.load %arg4[%c0_4, %c0_5] : memref<128x128xbf16, #tpu.memory_space<vmem>>, vector<128x128xbf16>
    %cst = arith.constant dense<0.000000e+00> : vector<32x128xf32>
    %6 = tpu.matmul %4, %5, %cst {dimension_numbers = #tpu.dot_dimension_numbers<[1], [0], [0], [1], [0, 0, 1, 1], [], []>} : vector<32x128xbf16>, vector<128x128xbf16>, vector<32x128xf32> -> vector<32x128xf32>
    %7 = arith.addf %3, %6 : vector<32x128xf32>
    %c0_6 = arith.constant 0 : index
    %c0_7 = arith.constant 0 : index
    %8 = vector.load %arg7[%c0_6, %c0_7] : memref<32x128xf32, #tpu.memory_space<vmem>>, vector<32x128xf32>
    tpu.vector_store %arg7[%c0_6, %c0_7], %7 {strides = array<i32>} : memref<32x128xf32, #tpu.memory_space<vmem>>, vector<32x128xf32>,
    %c0_i32_8 = arith.constant 0 : i32
    %9 = arith.cmpi eq, %arg2, %c0_i32_8 : i32
    %10 = arith.extui %9 : i1 to i32
    %c0_i32_9 = arith.constant 0 : i32
    %11 = arith.cmpi ne, %10, %c0_i32_9 : i32
    scf.if %11 {
      %c0_10 = arith.constant 0 : index
      %c0_11 = arith.constant 0 : index
      %12 = vector.load %arg7[%c0_10, %c0_11] : memref<32x128xf32, #tpu.memory_space<vmem>>, vector<32x128xf32>
      %c0_12 = arith.constant 0 : index
      %c0_13 = arith.constant 0 : index
      %13 = vector.load %arg5[%c0_12, %c0_13] : memref<1x128xf32, #tpu.memory_space<vmem>>, vector<1x128xf32>
      %14 = vector.broadcast %13 : vector<1x128xf32> to vector<32x128xf32>
      %15 = arith.addf %12, %14 : vector<32x128xf32>
      %16 = arith.truncf %15 : vector<32x128xf32> to vector<32x128xbf16>
      %c0_14 = arith.constant 0 : index
      %c0_15 = arith.constant 0 : index
      %17 = vector.load %arg6[%c0_14, %c0_15] : memref<32x128xbf16, #tpu.memory_space<vmem>>, vector<32x128xbf16>
      tpu.vector_store %arg6[%c0_14, %c0_15], %16 {strides = array<i32>} : memref<32x128xbf16, #tpu.memory_space<vmem>>, vector<32x128xbf16>,
    } else {
    }
    return
  }
  func.func @transform_0(%arg0: i32, %arg1: i32, %arg2: i32) -> (i32, i32) {
    %c0_i32 = arith.constant 0 : i32
    return %arg0, %arg2 : i32, i32
  }
  func.func @transform_1(%arg0: i32, %arg1: i32, %arg2: i32) -> (i32, i32) {
    %c0_i32 = arith.constant 0 : i32
    return %arg2, %arg1 : i32, i32
  }
  func.func @transform_2(%arg0: i32, %arg1: i32, %arg2: i32) -> (i32, i32) {
    %c0_i32 = arith.constant 0 : i32
    %c0_i32_0 = arith.constant 0 : i32
    return %c0_i32, %arg1 : i32, i32
  }
  func.func @transform_3(%arg0: i32, %arg1: i32, %arg2: i32) -> (i32, i32) {
    %c0_i32 = arith.constant 0 : i32
    return %arg0, %arg1 : i32, i32
  }
}

module attributes {stable_mosaic.version = 11 : i64} {
  func.func @_gemm_res_kernel(%arg0: i32, %arg1: i32, %arg2: i32, %arg3: memref<32x256xbf16, #tpu.memory_space<vmem>>, %arg4: memref<256x128xbf16, #tpu.memory_space<vmem>>, %arg5: memref<1x128xf32, #tpu.memory_space<vmem>>, %arg6: memref<32x128xbf16, #tpu.memory_space<vmem>>, %arg7: memref<32x128xbf16, #tpu.memory_space<vmem>>, %arg8: memref<32x128xf32, #tpu.memory_space<vmem>>) attributes {dimension_semantics = [#tpu.dimension_semantics<parallel>, #tpu.dimension_semantics<parallel>, #tpu.dimension_semantics<arbitrary>], iteration_bounds = array<i64: 1, 2, 9>, scalar_prefetch = 0 : i64, scratch_operands = 1 : i64, tpu.core_type = #tpu.core_type<tc>, window_params = [{transform_indices = @transform_0, window_bounds = array<i64: 32, 256>}, {transform_indices = @transform_1, window_bounds = array<i64: 256, 128>}, {transform_indices = @transform_2, window_bounds = array<i64: 1, 128>}, {transform_indices = @transform_3, window_bounds = array<i64: 32, 128>}, {transform_indices = @transform_4, window_bounds = array<i64: 32, 128>}]} {
    %c0_i32 = arith.constant 0 : i32
    %0 = arith.cmpi eq, %arg2, %c0_i32 : i32
    %1 = arith.extui %0 : i1 to i32
    %c0_i32_0 = arith.constant 0 : i32
    %2 = arith.cmpi ne, %1, %c0_i32_0 : i32
    scf.if %2 {
      %c0_9 = arith.constant 0 : index
      %c0_10 = arith.constant 0 : index
      %12 = vector.load %arg6[%c0_9, %c0_10] : memref<32x128xbf16, #tpu.memory_space<vmem>>, vector<32x128xbf16>
      %13 = arith.extf %12 : vector<32x128xbf16> to vector<32x128xf32>
      %c0_11 = arith.constant 0 : index
      %c0_12 = arith.constant 0 : index
      %14 = vector.load %arg8[%c0_11, %c0_12] : memref<32x128xf32, #tpu.memory_space<vmem>>, vector<32x128xf32>
      tpu.vector_store %arg8[%c0_11, %c0_12], %13 {strides = array<i32>} : memref<32x128xf32, #tpu.memory_space<vmem>>, vector<32x128xf32>,
    } else {
    }
    %c0 = arith.constant 0 : index
    %c0_1 = arith.constant 0 : index
    %3 = vector.load %arg8[%c0, %c0_1] : memref<32x128xf32, #tpu.memory_space<vmem>>, vector<32x128xf32>
    %c0_2 = arith.constant 0 : index
    %c0_3 = arith.constant 0 : index
    %4 = vector.load %arg3[%c0_2, %c0_3] : memref<32x256xbf16, #tpu.memory_space<vmem>>, vector<32x256xbf16>
    %c0_4 = arith.constant 0 : index
    %c0_5 = arith.constant 0 : index
    %5 = vector.load %arg4[%c0_4, %c0_5] : memref<256x128xbf16, #tpu.memory_space<vmem>>, vector<256x128xbf16>
    %cst = arith.constant dense<0.000000e+00> : vector<32x128xf32>
    %6 = tpu.matmul %4, %5, %cst {dimension_numbers = #tpu.dot_dimension_numbers<[1], [0], [0], [1], [0, 0, 1, 1], [], []>} : vector<32x256xbf16>, vector<256x128xbf16>, vector<32x128xf32> -> vector<32x128xf32>
    %7 = arith.addf %3, %6 : vector<32x128xf32>
    %c0_6 = arith.constant 0 : index
    %c0_7 = arith.constant 0 : index
    %8 = vector.load %arg8[%c0_6, %c0_7] : memref<32x128xf32, #tpu.memory_space<vmem>>, vector<32x128xf32>
    tpu.vector_store %arg8[%c0_6, %c0_7], %7 {strides = array<i32>} : memref<32x128xf32, #tpu.memory_space<vmem>>, vector<32x128xf32>,
    %c8_i32 = arith.constant 8 : i32
    %9 = arith.cmpi eq, %arg2, %c8_i32 : i32
    %10 = arith.extui %9 : i1 to i32
    %c0_i32_8 = arith.constant 0 : i32
    %11 = arith.cmpi ne, %10, %c0_i32_8 : i32
    scf.if %11 {
      %c0_9 = arith.constant 0 : index
      %c0_10 = arith.constant 0 : index
      %12 = vector.load %arg8[%c0_9, %c0_10] : memref<32x128xf32, #tpu.memory_space<vmem>>, vector<32x128xf32>
      %c0_11 = arith.constant 0 : index
      %c0_12 = arith.constant 0 : index
      %13 = vector.load %arg5[%c0_11, %c0_12] : memref<1x128xf32, #tpu.memory_space<vmem>>, vector<1x128xf32>
      %14 = vector.broadcast %13 : vector<1x128xf32> to vector<32x128xf32>
      %15 = arith.addf %12, %14 : vector<32x128xf32>
      %cst_13 = arith.constant 0.000000e+00 : f32
      %16 = vector.broadcast %cst_13 : f32 to vector<32x128xf32>
      %17 = arith.maximumf %15, %16 : vector<32x128xf32>
      %18 = arith.truncf %17 : vector<32x128xf32> to vector<32x128xbf16>
      %c0_14 = arith.constant 0 : index
      %c0_15 = arith.constant 0 : index
      %19 = vector.load %arg7[%c0_14, %c0_15] : memref<32x128xbf16, #tpu.memory_space<vmem>>, vector<32x128xbf16>
      tpu.vector_store %arg7[%c0_14, %c0_15], %18 {strides = array<i32>} : memref<32x128xbf16, #tpu.memory_space<vmem>>, vector<32x128xbf16>,
    } else {
    }
    return
  }
  func.func @transform_0(%arg0: i32, %arg1: i32, %arg2: i32) -> (i32, i32) {
    %c0_i32 = arith.constant 0 : i32
    return %arg0, %arg2 : i32, i32
  }
  func.func @transform_1(%arg0: i32, %arg1: i32, %arg2: i32) -> (i32, i32) {
    %c0_i32 = arith.constant 0 : i32
    return %arg2, %arg1 : i32, i32
  }
  func.func @transform_2(%arg0: i32, %arg1: i32, %arg2: i32) -> (i32, i32) {
    %c0_i32 = arith.constant 0 : i32
    %c0_i32_0 = arith.constant 0 : i32
    return %c0_i32, %arg1 : i32, i32
  }
  func.func @transform_3(%arg0: i32, %arg1: i32, %arg2: i32) -> (i32, i32) {
    %c0_i32 = arith.constant 0 : i32
    return %arg0, %arg1 : i32, i32
  }
  func.func @transform_4(%arg0: i32, %arg1: i32, %arg2: i32) -> (i32, i32) {
    %c0_i32 = arith.constant 0 : i32
    return %arg0, %arg1 : i32, i32
  }
}

module attributes {stable_mosaic.version = 11 : i64} {
  func.func @_gemm_kernel(%arg0: i32, %arg1: i32, %arg2: i32, %arg3: memref<16x256xbf16, #tpu.memory_space<vmem>>, %arg4: memref<256x256xbf16, #tpu.memory_space<vmem>>, %arg5: memref<1x256xf32, #tpu.memory_space<vmem>>, %arg6: memref<16x256xbf16, #tpu.memory_space<vmem>>, %arg7: memref<16x256xf32, #tpu.memory_space<vmem>>) attributes {dimension_semantics = [#tpu.dimension_semantics<parallel>, #tpu.dimension_semantics<parallel>, #tpu.dimension_semantics<arbitrary>], iteration_bounds = array<i64: 1, 2, 9>, scalar_prefetch = 0 : i64, scratch_operands = 1 : i64, tpu.core_type = #tpu.core_type<tc>, window_params = [{transform_indices = @transform_0, window_bounds = array<i64: 16, 256>}, {transform_indices = @transform_1, window_bounds = array<i64: 256, 256>}, {transform_indices = @transform_2, window_bounds = array<i64: 1, 256>}, {transform_indices = @transform_3, window_bounds = array<i64: 16, 256>}]} {
    %c0_i32 = arith.constant 0 : i32
    %0 = arith.cmpi eq, %arg2, %c0_i32 : i32
    %1 = arith.extui %0 : i1 to i32
    %c0_i32_0 = arith.constant 0 : i32
    %2 = arith.cmpi ne, %1, %c0_i32_0 : i32
    scf.if %2 {
      %cst_9 = arith.constant 0.000000e+00 : f32
      %12 = vector.broadcast %cst_9 : f32 to vector<16x256xf32>
      %c0_10 = arith.constant 0 : index
      %c0_11 = arith.constant 0 : index
      %13 = vector.load %arg7[%c0_10, %c0_11] : memref<16x256xf32, #tpu.memory_space<vmem>>, vector<16x256xf32>
      tpu.vector_store %arg7[%c0_10, %c0_11], %12 {strides = array<i32>} : memref<16x256xf32, #tpu.memory_space<vmem>>, vector<16x256xf32>,
    } else {
    }
    %c0 = arith.constant 0 : index
    %c0_1 = arith.constant 0 : index
    %3 = vector.load %arg7[%c0, %c0_1] : memref<16x256xf32, #tpu.memory_space<vmem>>, vector<16x256xf32>
    %c0_2 = arith.constant 0 : index
    %c0_3 = arith.constant 0 : index
    %4 = vector.load %arg3[%c0_2, %c0_3] : memref<16x256xbf16, #tpu.memory_space<vmem>>, vector<16x256xbf16>
    %c0_4 = arith.constant 0 : index
    %c0_5 = arith.constant 0 : index
    %5 = vector.load %arg4[%c0_4, %c0_5] : memref<256x256xbf16, #tpu.memory_space<vmem>>, vector<256x256xbf16>
    %cst = arith.constant dense<0.000000e+00> : vector<16x256xf32>
    %6 = tpu.matmul %4, %5, %cst {dimension_numbers = #tpu.dot_dimension_numbers<[1], [0], [0], [1], [0, 0, 1, 1], [], []>} : vector<16x256xbf16>, vector<256x256xbf16>, vector<16x256xf32> -> vector<16x256xf32>
    %7 = arith.addf %3, %6 : vector<16x256xf32>
    %c0_6 = arith.constant 0 : index
    %c0_7 = arith.constant 0 : index
    %8 = vector.load %arg7[%c0_6, %c0_7] : memref<16x256xf32, #tpu.memory_space<vmem>>, vector<16x256xf32>
    tpu.vector_store %arg7[%c0_6, %c0_7], %7 {strides = array<i32>} : memref<16x256xf32, #tpu.memory_space<vmem>>, vector<16x256xf32>,
    %c8_i32 = arith.constant 8 : i32
    %9 = arith.cmpi eq, %arg2, %c8_i32 : i32
    %10 = arith.extui %9 : i1 to i32
    %c0_i32_8 = arith.constant 0 : i32
    %11 = arith.cmpi ne, %10, %c0_i32_8 : i32
    scf.if %11 {
      %c0_9 = arith.constant 0 : index
      %c0_10 = arith.constant 0 : index
      %12 = vector.load %arg7[%c0_9, %c0_10] : memref<16x256xf32, #tpu.memory_space<vmem>>, vector<16x256xf32>
      %c0_11 = arith.constant 0 : index
      %c0_12 = arith.constant 0 : index
      %13 = vector.load %arg5[%c0_11, %c0_12] : memref<1x256xf32, #tpu.memory_space<vmem>>, vector<1x256xf32>
      %14 = vector.broadcast %13 : vector<1x256xf32> to vector<16x256xf32>
      %15 = arith.addf %12, %14 : vector<16x256xf32>
      %cst_13 = arith.constant 0.000000e+00 : f32
      %16 = vector.broadcast %cst_13 : f32 to vector<16x256xf32>
      %17 = arith.maximumf %15, %16 : vector<16x256xf32>
      %18 = arith.truncf %17 : vector<16x256xf32> to vector<16x256xbf16>
      %c0_14 = arith.constant 0 : index
      %c0_15 = arith.constant 0 : index
      %19 = vector.load %arg6[%c0_14, %c0_15] : memref<16x256xbf16, #tpu.memory_space<vmem>>, vector<16x256xbf16>
      tpu.vector_store %arg6[%c0_14, %c0_15], %18 {strides = array<i32>} : memref<16x256xbf16, #tpu.memory_space<vmem>>, vector<16x256xbf16>,
    } else {
    }
    return
  }
  func.func @transform_0(%arg0: i32, %arg1: i32, %arg2: i32) -> (i32, i32) {
    %c0_i32 = arith.constant 0 : i32
    return %arg0, %arg2 : i32, i32
  }
  func.func @transform_1(%arg0: i32, %arg1: i32, %arg2: i32) -> (i32, i32) {
    %c0_i32 = arith.constant 0 : i32
    return %arg2, %arg1 : i32, i32
  }
  func.func @transform_2(%arg0: i32, %arg1: i32, %arg2: i32) -> (i32, i32) {
    %c0_i32 = arith.constant 0 : i32
    %c0_i32_0 = arith.constant 0 : i32
    return %c0_i32, %arg1 : i32, i32
  }
  func.func @transform_3(%arg0: i32, %arg1: i32, %arg2: i32) -> (i32, i32) {
    %c0_i32 = arith.constant 0 : i32
    return %arg0, %arg1 : i32, i32
  }
}

module attributes {stable_mosaic.version = 11 : i64} {
  func.func @_gemm_kernel(%arg0: i32, %arg1: i32, %arg2: i32, %arg3: memref<16x256xbf16, #tpu.memory_space<vmem>>, %arg4: memref<256x256xbf16, #tpu.memory_space<vmem>>, %arg5: memref<1x256xf32, #tpu.memory_space<vmem>>, %arg6: memref<16x256xbf16, #tpu.memory_space<vmem>>, %arg7: memref<16x256xf32, #tpu.memory_space<vmem>>) attributes {dimension_semantics = [#tpu.dimension_semantics<parallel>, #tpu.dimension_semantics<parallel>, #tpu.dimension_semantics<arbitrary>], iteration_bounds = array<i64: 1, 2, 1>, scalar_prefetch = 0 : i64, scratch_operands = 1 : i64, tpu.core_type = #tpu.core_type<tc>, window_params = [{transform_indices = @transform_0, window_bounds = array<i64: 16, 256>}, {transform_indices = @transform_1, window_bounds = array<i64: 256, 256>}, {transform_indices = @transform_2, window_bounds = array<i64: 1, 256>}, {transform_indices = @transform_3, window_bounds = array<i64: 16, 256>}]} {
    %c0_i32 = arith.constant 0 : i32
    %0 = arith.cmpi eq, %arg2, %c0_i32 : i32
    %1 = arith.extui %0 : i1 to i32
    %c0_i32_0 = arith.constant 0 : i32
    %2 = arith.cmpi ne, %1, %c0_i32_0 : i32
    scf.if %2 {
      %cst_10 = arith.constant 0.000000e+00 : f32
      %12 = vector.broadcast %cst_10 : f32 to vector<16x256xf32>
      %c0_11 = arith.constant 0 : index
      %c0_12 = arith.constant 0 : index
      %13 = vector.load %arg7[%c0_11, %c0_12] : memref<16x256xf32, #tpu.memory_space<vmem>>, vector<16x256xf32>
      tpu.vector_store %arg7[%c0_11, %c0_12], %12 {strides = array<i32>} : memref<16x256xf32, #tpu.memory_space<vmem>>, vector<16x256xf32>,
    } else {
    }
    %c0 = arith.constant 0 : index
    %c0_1 = arith.constant 0 : index
    %3 = vector.load %arg7[%c0, %c0_1] : memref<16x256xf32, #tpu.memory_space<vmem>>, vector<16x256xf32>
    %c0_2 = arith.constant 0 : index
    %c0_3 = arith.constant 0 : index
    %4 = vector.load %arg3[%c0_2, %c0_3] : memref<16x256xbf16, #tpu.memory_space<vmem>>, vector<16x256xbf16>
    %c0_4 = arith.constant 0 : index
    %c0_5 = arith.constant 0 : index
    %5 = vector.load %arg4[%c0_4, %c0_5] : memref<256x256xbf16, #tpu.memory_space<vmem>>, vector<256x256xbf16>
    %cst = arith.constant dense<0.000000e+00> : vector<16x256xf32>
    %6 = tpu.matmul %4, %5, %cst {dimension_numbers = #tpu.dot_dimension_numbers<[1], [0], [0], [1], [0, 0, 1, 1], [], []>} : vector<16x256xbf16>, vector<256x256xbf16>, vector<16x256xf32> -> vector<16x256xf32>
    %7 = arith.addf %3, %6 : vector<16x256xf32>
    %c0_6 = arith.constant 0 : index
    %c0_7 = arith.constant 0 : index
    %8 = vector.load %arg7[%c0_6, %c0_7] : memref<16x256xf32, #tpu.memory_space<vmem>>, vector<16x256xf32>
    tpu.vector_store %arg7[%c0_6, %c0_7], %7 {strides = array<i32>} : memref<16x256xf32, #tpu.memory_space<vmem>>, vector<16x256xf32>,
    %c0_i32_8 = arith.constant 0 : i32
    %9 = arith.cmpi eq, %arg2, %c0_i32_8 : i32
    %10 = arith.extui %9 : i1 to i32
    %c0_i32_9 = arith.constant 0 : i32
    %11 = arith.cmpi ne, %10, %c0_i32_9 : i32
    scf.if %11 {
      %c0_10 = arith.constant 0 : index
      %c0_11 = arith.constant 0 : index
      %12 = vector.load %arg7[%c0_10, %c0_11] : memref<16x256xf32, #tpu.memory_space<vmem>>, vector<16x256xf32>
      %c0_12 = arith.constant 0 : index
      %c0_13 = arith.constant 0 : index
      %13 = vector.load %arg5[%c0_12, %c0_13] : memref<1x256xf32, #tpu.memory_space<vmem>>, vector<1x256xf32>
      %14 = vector.broadcast %13 : vector<1x256xf32> to vector<16x256xf32>
      %15 = arith.addf %12, %14 : vector<16x256xf32>
      %16 = arith.truncf %15 : vector<16x256xf32> to vector<16x256xbf16>
      %c0_14 = arith.constant 0 : index
      %c0_15 = arith.constant 0 : index
      %17 = vector.load %arg6[%c0_14, %c0_15] : memref<16x256xbf16, #tpu.memory_space<vmem>>, vector<16x256xbf16>
      tpu.vector_store %arg6[%c0_14, %c0_15], %16 {strides = array<i32>} : memref<16x256xbf16, #tpu.memory_space<vmem>>, vector<16x256xbf16>,
    } else {
    }
    return
  }
  func.func @transform_0(%arg0: i32, %arg1: i32, %arg2: i32) -> (i32, i32) {
    %c0_i32 = arith.constant 0 : i32
    return %arg0, %arg2 : i32, i32
  }
  func.func @transform_1(%arg0: i32, %arg1: i32, %arg2: i32) -> (i32, i32) {
    %c0_i32 = arith.constant 0 : i32
    return %arg2, %arg1 : i32, i32
  }
  func.func @transform_2(%arg0: i32, %arg1: i32, %arg2: i32) -> (i32, i32) {
    %c0_i32 = arith.constant 0 : i32
    %c0_i32_0 = arith.constant 0 : i32
    return %c0_i32, %arg1 : i32, i32
  }
  func.func @transform_3(%arg0: i32, %arg1: i32, %arg2: i32) -> (i32, i32) {
    %c0_i32 = arith.constant 0 : i32
    return %arg0, %arg1 : i32, i32
  }
}

module attributes {stable_mosaic.version = 11 : i64} {
  func.func @_gemm_res_kernel(%arg0: i32, %arg1: i32, %arg2: i32, %arg3: memref<16x512xbf16, #tpu.memory_space<vmem>>, %arg4: memref<512x256xbf16, #tpu.memory_space<vmem>>, %arg5: memref<1x256xf32, #tpu.memory_space<vmem>>, %arg6: memref<16x256xbf16, #tpu.memory_space<vmem>>, %arg7: memref<16x256xbf16, #tpu.memory_space<vmem>>, %arg8: memref<16x256xf32, #tpu.memory_space<vmem>>) attributes {dimension_semantics = [#tpu.dimension_semantics<parallel>, #tpu.dimension_semantics<parallel>, #tpu.dimension_semantics<arbitrary>], iteration_bounds = array<i64: 1, 2, 9>, scalar_prefetch = 0 : i64, scratch_operands = 1 : i64, tpu.core_type = #tpu.core_type<tc>, window_params = [{transform_indices = @transform_0, window_bounds = array<i64: 16, 512>}, {transform_indices = @transform_1, window_bounds = array<i64: 512, 256>}, {transform_indices = @transform_2, window_bounds = array<i64: 1, 256>}, {transform_indices = @transform_3, window_bounds = array<i64: 16, 256>}, {transform_indices = @transform_4, window_bounds = array<i64: 16, 256>}]} {
    %c0_i32 = arith.constant 0 : i32
    %0 = arith.cmpi eq, %arg2, %c0_i32 : i32
    %1 = arith.extui %0 : i1 to i32
    %c0_i32_0 = arith.constant 0 : i32
    %2 = arith.cmpi ne, %1, %c0_i32_0 : i32
    scf.if %2 {
      %c0_9 = arith.constant 0 : index
      %c0_10 = arith.constant 0 : index
      %12 = vector.load %arg6[%c0_9, %c0_10] : memref<16x256xbf16, #tpu.memory_space<vmem>>, vector<16x256xbf16>
      %13 = arith.extf %12 : vector<16x256xbf16> to vector<16x256xf32>
      %c0_11 = arith.constant 0 : index
      %c0_12 = arith.constant 0 : index
      %14 = vector.load %arg8[%c0_11, %c0_12] : memref<16x256xf32, #tpu.memory_space<vmem>>, vector<16x256xf32>
      tpu.vector_store %arg8[%c0_11, %c0_12], %13 {strides = array<i32>} : memref<16x256xf32, #tpu.memory_space<vmem>>, vector<16x256xf32>,
    } else {
    }
    %c0 = arith.constant 0 : index
    %c0_1 = arith.constant 0 : index
    %3 = vector.load %arg8[%c0, %c0_1] : memref<16x256xf32, #tpu.memory_space<vmem>>, vector<16x256xf32>
    %c0_2 = arith.constant 0 : index
    %c0_3 = arith.constant 0 : index
    %4 = vector.load %arg3[%c0_2, %c0_3] : memref<16x512xbf16, #tpu.memory_space<vmem>>, vector<16x512xbf16>
    %c0_4 = arith.constant 0 : index
    %c0_5 = arith.constant 0 : index
    %5 = vector.load %arg4[%c0_4, %c0_5] : memref<512x256xbf16, #tpu.memory_space<vmem>>, vector<512x256xbf16>
    %cst = arith.constant dense<0.000000e+00> : vector<16x256xf32>
    %6 = tpu.matmul %4, %5, %cst {dimension_numbers = #tpu.dot_dimension_numbers<[1], [0], [0], [1], [0, 0, 1, 1], [], []>} : vector<16x512xbf16>, vector<512x256xbf16>, vector<16x256xf32> -> vector<16x256xf32>
    %7 = arith.addf %3, %6 : vector<16x256xf32>
    %c0_6 = arith.constant 0 : index
    %c0_7 = arith.constant 0 : index
    %8 = vector.load %arg8[%c0_6, %c0_7] : memref<16x256xf32, #tpu.memory_space<vmem>>, vector<16x256xf32>
    tpu.vector_store %arg8[%c0_6, %c0_7], %7 {strides = array<i32>} : memref<16x256xf32, #tpu.memory_space<vmem>>, vector<16x256xf32>,
    %c8_i32 = arith.constant 8 : i32
    %9 = arith.cmpi eq, %arg2, %c8_i32 : i32
    %10 = arith.extui %9 : i1 to i32
    %c0_i32_8 = arith.constant 0 : i32
    %11 = arith.cmpi ne, %10, %c0_i32_8 : i32
    scf.if %11 {
      %c0_9 = arith.constant 0 : index
      %c0_10 = arith.constant 0 : index
      %12 = vector.load %arg8[%c0_9, %c0_10] : memref<16x256xf32, #tpu.memory_space<vmem>>, vector<16x256xf32>
      %c0_11 = arith.constant 0 : index
      %c0_12 = arith.constant 0 : index
      %13 = vector.load %arg5[%c0_11, %c0_12] : memref<1x256xf32, #tpu.memory_space<vmem>>, vector<1x256xf32>
      %14 = vector.broadcast %13 : vector<1x256xf32> to vector<16x256xf32>
      %15 = arith.addf %12, %14 : vector<16x256xf32>
      %cst_13 = arith.constant 0.000000e+00 : f32
      %16 = vector.broadcast %cst_13 : f32 to vector<16x256xf32>
      %17 = arith.maximumf %15, %16 : vector<16x256xf32>
      %18 = arith.truncf %17 : vector<16x256xf32> to vector<16x256xbf16>
      %c0_14 = arith.constant 0 : index
      %c0_15 = arith.constant 0 : index
      %19 = vector.load %arg7[%c0_14, %c0_15] : memref<16x256xbf16, #tpu.memory_space<vmem>>, vector<16x256xbf16>
      tpu.vector_store %arg7[%c0_14, %c0_15], %18 {strides = array<i32>} : memref<16x256xbf16, #tpu.memory_space<vmem>>, vector<16x256xbf16>,
    } else {
    }
    return
  }
  func.func @transform_0(%arg0: i32, %arg1: i32, %arg2: i32) -> (i32, i32) {
    %c0_i32 = arith.constant 0 : i32
    return %arg0, %arg2 : i32, i32
  }
  func.func @transform_1(%arg0: i32, %arg1: i32, %arg2: i32) -> (i32, i32) {
    %c0_i32 = arith.constant 0 : i32
    return %arg2, %arg1 : i32, i32
  }
  func.func @transform_2(%arg0: i32, %arg1: i32, %arg2: i32) -> (i32, i32) {
    %c0_i32 = arith.constant 0 : i32
    %c0_i32_0 = arith.constant 0 : i32
    return %c0_i32, %arg1 : i32, i32
  }
  func.func @transform_3(%arg0: i32, %arg1: i32, %arg2: i32) -> (i32, i32) {
    %c0_i32 = arith.constant 0 : i32
    return %arg0, %arg1 : i32, i32
  }
  func.func @transform_4(%arg0: i32, %arg1: i32, %arg2: i32) -> (i32, i32) {
    %c0_i32 = arith.constant 0 : i32
    return %arg0, %arg1 : i32, i32
  }
}

module attributes {stable_mosaic.version = 11 : i64} {
  func.func @_head_kernel(%arg0: memref<2x4x512xbf16, #tpu.memory_space<vmem>>, %arg1: memref<512x10xf32, #tpu.memory_space<vmem>>, %arg2: memref<1x10xf32, #tpu.memory_space<vmem>>, %arg3: memref<2x10xf32, #tpu.memory_space<vmem>>) attributes {dimension_semantics = [], scalar_prefetch = 0 : i64, scratch_operands = 0 : i64, tpu.core_type = #tpu.core_type<tc>} {
    %c0 = arith.constant 0 : index
    %c0_0 = arith.constant 0 : index
    %c0_1 = arith.constant 0 : index
    %0 = vector.load %arg0[%c0, %c0_0, %c0_1] : memref<2x4x512xbf16, #tpu.memory_space<vmem>>, vector<2x4x512xbf16>
    %1 = arith.extf %0 : vector<2x4x512xbf16> to vector<2x4x512xf32>
    %cst = arith.constant dense<0.000000e+00> : vector<2x512xf32>
    %2 = vector.multi_reduction <add>, %1, %cst [1] : vector<2x4x512xf32> to vector<2x512xf32>
    %cst_2 = arith.constant 4.000000e+00 : f32
    %3 = vector.broadcast %cst_2 : f32 to vector<2x512xf32>
    %4 = arith.divf %2, %3 : vector<2x512xf32>
    %c0_3 = arith.constant 0 : index
    %c0_4 = arith.constant 0 : index
    %5 = vector.load %arg1[%c0_3, %c0_4] : memref<512x10xf32, #tpu.memory_space<vmem>>, vector<512x10xf32>
    %cst_5 = arith.constant dense<0.000000e+00> : vector<2x10xf32>
    %6 = tpu.matmul %4, %5, %cst_5 {dimension_numbers = #tpu.dot_dimension_numbers<[1], [0], [0], [1], [0, 0, 1, 1], [], []>} : vector<2x512xf32>, vector<512x10xf32>, vector<2x10xf32> -> vector<2x10xf32>
    %c0_6 = arith.constant 0 : index
    %c0_7 = arith.constant 0 : index
    %7 = vector.load %arg2[%c0_6, %c0_7] : memref<1x10xf32, #tpu.memory_space<vmem>>, vector<1x10xf32>
    %8 = vector.broadcast %7 : vector<1x10xf32> to vector<2x10xf32>
    %9 = arith.addf %6, %8 : vector<2x10xf32>
    %c0_8 = arith.constant 0 : index
    %c0_9 = arith.constant 0 : index
    %10 = vector.load %arg3[%c0_8, %c0_9] : memref<2x10xf32, #tpu.memory_space<vmem>>, vector<2x10xf32>
    tpu.vector_store %arg3[%c0_8, %c0_9], %9 {strides = array<i32>} : memref<2x10xf32, #tpu.memory_space<vmem>>, vector<2x10xf32>,
    return
  }
}

</mosaic_0001>

<bundles_post_ra>
// kernel: resnet_forward.14
= control target key start
LH: loop header
LB: loop body
LE: loop exit
PB: predicated region body
PF: predicated region fallthrough
CT: control target
= control target key end

     0   :  { %s2594_s12 = smov 0   ;;  %s2596_s13 = smov 0   ;;  %s2880_s0 = inlined_call_operand.vmem [shape: bf16[2048,256], index: 0, kind: input, shape index: {}]   ;;  %s2881_s1 = inlined_call_operand.vmem [shape: bf16[256,128], index: 1, kind: input, shape index: {}]   ;;  %s2882_s2 = inlined_call_operand.vmem [shape: f32[1,128], index: 2, kind: input, shape index: {}]   ;;  %s2883_s3 = inlined_call_operand.vmem [shape: bf16[2048,128], index: 3, kind: output, shape index: {}]  }
   0x1   :  { %s2598_s14 = smov 0  }
   0x2 LB: > { %s32_s15 = sadd.s32 1, %s2567_s13  ;;  %p1971_p0 = scmp.ge.s32.totalorder %s2571_s14, 1  ;;  %s2571_s14 = sphi %s2598_s14, %s13_s14   ;;  %s2567_s13 = sphi %s2596_s13, %s2885_s13   ;;  %s2563_s12 = sphi %s2594_s12, %s2884_s12  }
   0x3   : > { %p34_p1 = scmp.ge.s32.totalorder %s32_s15, 4  ;;  %p191_p2 = scmp.lt.s32.totalorder %s2571_s14, 5 }
   0x5   : > { %s2887_s15 = smov (%p34_p1, %s32_s15), 0  ;;  %p192_p3 = pnand %p1971_p0, %p191_p2 }
   0x6   : > { %s1972_s18 = sshll.u32 (!%p192_p3), %s2563_s12, 6 }
   0x7   : > { %195 = sbr.rel (%p192_p3) target bundleno = 401 (0x191), region = 32  ;;  %p236_p4 = scmp.lt.s32.totalorder (!%p192_p3), %s1972_s18, 255 }
   0xc   : > { %v2437_v0 = vld [vmem:[%s2881_s1 + $0x38] sm:$0xff]   ;;  %v2573_v1 = vmov 0   ;;  %v2438_v2 = vld [vmem:[%s2881_s1 + $0x30] sm:$0xff]   ;;  %v2439_v3 = vld [vmem:[%s2881_s1 + $0x28] sm:$0xff]   ;;  %s2889_s18 = smov (!%p236_p4, %s1972_s18), 255 }
   0xd   : > { %912 = vmatprep.subr.bf16.mxu0 %v2573_v1  ;;  %2380 = vmatprep.subr.bf16.mxu1 %v2573_v1  ;;  %v2440_v4 = vld [vmem:[%s2881_s1 + $0x20] sm:$0xff]   ;;  %s2124_s25 = sshll.u32 %s2889_s18, 3  ;;  %v2441_v5 = vld [vmem:[%s2881_s1 + $0x18] sm:$0xff]   ;;  %v2442_v7 = vld [vmem:[%s2881_s1 + $0x10] sm:$0xff]   ;;  %s1976_s6 = sshll.u32 %s2889_s18, 2 }
   0xe   : > { %913 = vmatpush1.bf16.msra.mxu0 %v2437_v0  ;;  %2396 = vmatpush1.bf16.msra.mxu1 %v2437_v0  ;;  %s2641_s30 = scalar_lea.vmem %s2880_s0, %s2124_s25  ;;  %v2443_v9 = vld [vmem:[%s2881_s1 + $0x8] sm:$0xff]   ;;  %v2444_v10 = vld [vmem:[%s2881_s1] sm:$0xff]   ;;  %v2445_v11 = vld [vmem:[%s2881_s1 + $0x78] sm:$0xff]   ;;  %s2777_s8 = scalar_lea.vmem %s2883_s3, %s1976_s6 }
   0xf   : > { %914 = vmatprep.subr.bf16.mxu0 %v2573_v1  ;;  %2381 = vmatprep.subr.bf16.mxu1 %v2573_v1  ;;  %v2455_v6 = vld [vmem:[%s2641_s30 + $0x4] ss:$8 sps:$4 sm:$0xff]   ;;  %v2446_v12 = vld [vmem:[%s2881_s1 + $0x70] sm:$0xff]   ;;  %v2449_v15 = vld [vmem:[%s2881_s1 + $0x58] sm:$0xff]  }
  0x10   : > { %v2458_v8 = vld [vmem:[%s2641_s30 + $0x104] ss:$8 sps:$4 sm:$0xff]   ;;  %944 = vmatprep.mubr.bf16.mxu0 %v2455_v6  ;;  %v2450_v16 = vld [vmem:[%s2881_s1 + $0x50] sm:$0xff]   ;;  %v2453_v19 = vld [vmem:[%s2641_s30] ss:$8 sps:$4 sm:$0xff]  }
  0x11   : > { %1072 = vmatprep.mubr.bf16.mxu1 %v2458_v8  ;;  %v2447_v13 = vld [vmem:[%s2881_s1 + $0x68] sm:$0xff]   ;;  %v2448_v14 = vld [vmem:[%s2881_s1 + $0x60] sm:$0xff]   ;;  %v2459_v21 = vld [vmem:[%s2641_s30 + $0x14] ss:$8 sps:$4 sm:$0xff]  }
  0x12   : > { %915 = vmatpush1.bf16.msra.mxu0 %v2438_v2  ;;  %2397 = vmatpush1.bf16.msra.mxu1 %v2438_v2  ;;  %v2451_v17 = vld [vmem:[%s2881_s1 + $0x48] sm:$0xff]   ;;  %v2452_v18 = vld [vmem:[%s2881_s1 + $0x40] sm:$0xff]   ;;  %v2461_v22 = vld [vmem:[%s2641_s30 + $0x114] ss:$8 sps:$4 sm:$0xff]  }
  0x13   : > { %916 = vmatprep.subr.bf16.mxu0 %v2573_v1  ;;  %2382 = vmatprep.subr.bf16.mxu1 %v2573_v1  ;;  %v2456_v20 = vld [vmem:[%s2641_s30 + $0x100] ss:$8 sps:$4 sm:$0xff]   ;;  %v2463_v23 = vld [vmem:[%s2641_s30 + $0x10] ss:$8 sps:$4 sm:$0xff]   ;;  %v2465_v25 = vld [vmem:[%s2641_s30 + $0x24] ss:$8 sps:$4 sm:$0xff]  }
  0x14   : > { %v2464_v24 = vld [vmem:[%s2641_s30 + $0x110] ss:$8 sps:$4 sm:$0xff]   ;;  %v2467_v26 = vld [vmem:[%s2641_s30 + $0x124] ss:$8 sps:$4 sm:$0xff]   ;;  %v2469_v27 = vld [vmem:[%s2641_s30 + $0x20] ss:$8 sps:$4 sm:$0xff]  }
  0x15   : > { %v2470_v28 = vld [vmem:[%s2641_s30 + $0x120] ss:$8 sps:$4 sm:$0xff]   ;;  %v2471_v29 = vld [vmem:[%s2641_s30 + $0x34] ss:$8 sps:$4 sm:$0xff]   ;;  %v2475_v31 = vld [vmem:[%s2641_s30 + $0x30] ss:$8 sps:$4 sm:$0xff]  }
  0x16   : > { %917 = vmatpush1.bf16.msra.mxu0 %v2439_v3  ;;  %2398 = vmatpush1.bf16.msra.mxu1 %v2439_v3  ;;  %v2473_v30 = vld [vmem:[%s2641_s30 + $0x134] ss:$8 sps:$4 sm:$0xff]   ;;  %v2476_v32 = vld [vmem:[%s2641_s30 + $0x130] ss:$8 sps:$4 sm:$0xff]   ;;  %v2477_v33 = vld [vmem:[%s2641_s30 + $0x44] ss:$8 sps:$4 sm:$0xff]  }
  0x17   : > { %918 = vmatprep.subr.bf16.mxu0 %v2573_v1  ;;  %2383 = vmatprep.subr.bf16.mxu1 %v2573_v1  ;;  %v2479_v34 = vld [vmem:[%s2641_s30 + $0x144] ss:$8 sps:$4 sm:$0xff]   ;;  %v2481_v35 = vld [vmem:[%s2641_s30 + $0x40] ss:$8 sps:$4 sm:$0xff]   ;;  %v2483_v37 = vld [vmem:[%s2641_s30 + $0x54] ss:$8 sps:$4 sm:$0xff]  }
  0x18   : > { %v2482_v36 = vld [vmem:[%s2641_s30 + $0x140] ss:$8 sps:$4 sm:$0xff]   ;;  %v2485_v38 = vld [vmem:[%s2641_s30 + $0x154] ss:$8 sps:$4 sm:$0xff]   ;;  %v2487_v39 = vld [vmem:[%s2641_s30 + $0x50] ss:$8 sps:$4 sm:$0xff]  }
  0x19   : > { %v2488_v40 = vld [vmem:[%s2641_s30 + $0x150] ss:$8 sps:$4 sm:$0xff]   ;;  %v2489_v41 = vld [vmem:[%s2641_s30 + $0x64] ss:$8 sps:$4 sm:$0xff]   ;;  %v2493_v43 = vld [vmem:[%s2641_s30 + $0x60] ss:$8 sps:$4 sm:$0xff]  }
  0x1a   : > { %919 = vmatpush1.bf16.msra.mxu0 %v2440_v4  ;;  %2399 = vmatpush1.bf16.msra.mxu1 %v2440_v4  ;;  %v2491_v42 = vld [vmem:[%s2641_s30 + $0x164] ss:$8 sps:$4 sm:$0xff]   ;;  %v2494_v44 = vld [vmem:[%s2641_s30 + $0x160] ss:$8 sps:$4 sm:$0xff]   ;;  %v2495_v45 = vld [vmem:[%s2641_s30 + $0x74] ss:$8 sps:$4 sm:$0xff]  }
  0x1b   : > { %920 = vmatprep.subr.bf16.mxu0 %v2573_v1  ;;  %2384 = vmatprep.subr.bf16.mxu1 %v2573_v1  ;;  %v2497_v46 = vld [vmem:[%s2641_s30 + $0x174] ss:$8 sps:$4 sm:$0xff]   ;;  %v2499_v47 = vld [vmem:[%s2641_s30 + $0x70] ss:$8 sps:$4 sm:$0xff]   ;;  %v2501_v49 = vld [vmem:[%s2641_s30 + $0x84] ss:$8 sps:$4 sm:$0xff]  }
  0x1c   : > { %v2500_v48 = vld [vmem:[%s2641_s30 + $0x170] ss:$8 sps:$4 sm:$0xff]   ;;  %v2503_v50 = vld [vmem:[%s2641_s30 + $0x184] ss:$8 sps:$4 sm:$0xff]   ;;  %v2505_v51 = vld [vmem:[%s2641_s30 + $0x80] ss:$8 sps:$4 sm:$0xff]  }
  0x1d   : > { %v2506_v52 = vld [vmem:[%s2641_s30 + $0x180] ss:$8 sps:$4 sm:$0xff]   ;;  %v2507_v53 = vld [vmem:[%s2641_s30 + $0x94] ss:$8 sps:$4 sm:$0xff]   ;;  %v2511_v55 = vld [vmem:[%s2641_s30 + $0x90] ss:$8 sps:$4 sm:$0xff]  }
  0x1e   : > { %921 = vmatpush1.bf16.msra.mxu0 %v2441_v5  ;;  %2400 = vmatpush1.bf16.msra.mxu1 %v2441_v5  ;;  %v2509_v54 = vld [vmem:[%s2641_s30 + $0x194] ss:$8 sps:$4 sm:$0xff]   ;;  %v2512_v56 = vld [vmem:[%s2641_s30 + $0x190] ss:$8 sps:$4 sm:$0xff]   ;;  %v2513_v57 = vld [vmem:[%s2641_s30 + $0xa4] ss:$8 sps:$4 sm:$0xff]  }
  0x1f   : > { %922 = vmatprep.subr.bf16.mxu0 %v2573_v1  ;;  %2385 = vmatprep.subr.bf16.mxu1 %v2573_v1  ;;  %v2515_v58 = vld [vmem:[%s2641_s30 + $0x1a4] ss:$8 sps:$4 sm:$0xff]   ;;  %v2517_v59 = vld [vmem:[%s2641_s30 + $0xa0] ss:$8 sps:$4 sm:$0xff]   ;;  %v2519_v61 = vld [vmem:[%s2641_s30 + $0xb4] ss:$8 sps:$4 sm:$0xff]  }
  0x20   : > { %v2518_v60 = vld [vmem:[%s2641_s30 + $0x1a0] ss:$8 sps:$4 sm:$0xff]   ;;  %v2521_v62 = vld [vmem:[%s2641_s30 + $0x1b4] ss:$8 sps:$4 sm:$0xff]   ;;  %v2523_v63 = vld [vmem:[%s2641_s30 + $0xb0] ss:$8 sps:$4 sm:$0xff]  }
  0x21   : > { %v2524_v0 = vld [vmem:[%s2641_s30 + $0x1b0] ss:$8 sps:$4 sm:$0xff]   ;;  %v2527_v2 = vld [vmem:[%s2641_s30 + $0x1c4] ss:$8 sps:$4 sm:$0xff]   ;;  %v2529_v3 = vld [vmem:[%s2641_s30 + $0xc0] ss:$8 sps:$4 sm:$0xff]  }
  0x22   : > { %923 = vmatpush1.bf16.msra.mxu0 %v2442_v7  ;;  %2401 = vmatpush1.bf16.msra.mxu1 %v2442_v7  ;;  %v2530_v4 = vld [vmem:[%s2641_s30 + $0x1c0] ss:$8 sps:$4 sm:$0xff]   ;;  %v2531_v5 = vld [vmem:[%s2641_s30 + $0xd4] ss:$8 sps:$4 sm:$0xff]   ;;  %v2535_v7 = vld [vmem:[%s2641_s30 + $0xd0] ss:$8 sps:$4 sm:$0xff]  }
  0x23   : > { %924 = vmatprep.subr.bf16.mxu0 %v2573_v1  ;;  %2386 = vmatprep.subr.bf16.mxu1 %v2573_v1  ;;  %v2533_v6 = vld [vmem:[%s2641_s30 + $0x1d4] ss:$8 sps:$4 sm:$0xff]   ;;  %v2536_v8 = vld [vmem:[%s2641_s30 + $0x1d0] ss:$8 sps:$4 sm:$0xff]  }
  0x26   : > { %925 = vmatpush1.bf16.msra.mxu0 %v2443_v9  ;;  %2402 = vmatpush1.bf16.msra.mxu1 %v2443_v9  ;;  %v2537_v9 = vld [vmem:[%s2641_s30 + $0xe4] ss:$8 sps:$4 sm:$0xff]  }
  0x27   : > { %926 = vmatprep.subr.bf16.mxu0 %v2573_v1  ;;  %2387 = vmatprep.subr.bf16.mxu1 %v2573_v1 }
  0x2a   : > { %927 = vmatpush1.bf16.msra.mxu0 %v2444_v10  ;;  %2403 = vmatpush1.bf16.msra.mxu1 %v2444_v10  ;;  %v2539_v10 = vld [vmem:[%s2641_s30 + $0x1e4] ss:$8 sps:$4 sm:$0xff]  }
  0x2b   : > { %928 = vmatprep.subr.bf16.mxu0 %v2573_v1  ;;  %2388 = vmatprep.subr.bf16.mxu1 %v2573_v1 }
  0x2e   : > { %929 = vmatpush2.bf16.msra.mxu0 %v2445_v11  ;;  %2404 = vmatpush2.bf16.msra.mxu1 %v2445_v11  ;;  %v2541_v11 = vld [vmem:[%s2641_s30 + $0xe0] ss:$8 sps:$4 sm:$0xff]  }
  0x2f   : > { %930 = vmatprep.subr.bf16.mxu0 %v2573_v1  ;;  %2389 = vmatprep.subr.bf16.mxu1 %v2573_v1 }
  0x32   : > { %931 = vmatpush2.bf16.msra.mxu0 %v2446_v12  ;;  %2405 = vmatpush2.bf16.msra.mxu1 %v2446_v12  ;;  %v2542_v12 = vld [vmem:[%s2641_s30 + $0x1e0] ss:$8 sps:$4 sm:$0xff]  }
  0x33   : > { %932 = vmatprep.subr.bf16.mxu0 %v2573_v1  ;;  %2390 = vmatprep.subr.bf16.mxu1 %v2573_v1 }
  0x36   : > { %933 = vmatpush2.bf16.msra.mxu0 %v2447_v13  ;;  %2406 = vmatpush2.bf16.msra.mxu1 %v2447_v13  ;;  %v2543_v13 = vld [vmem:[%s2641_s30 + $0xf4] ss:$8 sps:$4 sm:$0xff]  }
  0x37   : > { %934 = vmatprep.subr.bf16.mxu0 %v2573_v1  ;;  %2391 = vmatprep.subr.bf16.mxu1 %v2573_v1 }
  0x3a   : > { %935 = vmatpush2.bf16.msra.mxu0 %v2448_v14  ;;  %2407 = vmatpush2.bf16.msra.mxu1 %v2448_v14  ;;  %v2545_v14 = vld [vmem:[%s2641_s30 + $0x1f4] ss:$8 sps:$4 sm:$0xff]  }
  0x3b   : > { %936 = vmatprep.subr.bf16.mxu0 %v2573_v1  ;;  %2392 = vmatprep.subr.bf16.mxu1 %v2573_v1 }
  0x3e   : > { %937 = vmatpush2.bf16.msra.mxu0 %v2449_v15  ;;  %2408 = vmatpush2.bf16.msra.mxu1 %v2449_v15  ;;  %v2547_v15 = vld [vmem:[%s2641_s30 + $0xf0] ss:$8 sps:$4 sm:$0xff]  }
  0x3f   : > { %938 = vmatprep.subr.bf16.mxu0 %v2573_v1  ;;  %2393 = vmatprep.subr.bf16.mxu1 %v2573_v1 }
  0x42   : > { %939 = vmatpush2.bf16.msra.mxu0 %v2450_v16  ;;  %2409 = vmatpush2.bf16.msra.mxu1 %v2450_v16  ;;  %v2548_v16 = vld [vmem:[%s2641_s30 + $0x1f0] ss:$8 sps:$4 sm:$0xff]  }
  0x43   : > { %940 = vmatprep.subr.bf16.mxu0 %v2573_v1  ;;  %2394 = vmatprep.subr.bf16.mxu1 %v2573_v1 }
  0x46   : > { %941 = vmatpush2.bf16.msra.mxu0 %v2451_v17  ;;  %2410 = vmatpush2.bf16.msra.mxu1 %v2451_v17 }
  0x47   : > { %942 = vmatprep.subr.bf16.mxu0 %v2573_v1  ;;  %2395 = vmatprep.subr.bf16.mxu1 %v2573_v1  ;;  %v2525_v1 = vld [vmem:[%s2641_s30 + $0xc4] ss:$8 sps:$4 sm:$0xff]  }
  0x4a   : > { %943 = vmatpush2.bf16.msra.mxu0 %v2452_v18  ;;  %2411 = vmatpush2.bf16.msra.mxu1 %v2452_v18  ;;  %v2767_v18 = vld [vmem:[%s2882_s2] ss:$0 sm:$0xff] }
  0x4d   : > { %945 = vmatmul.mubr.bf16.vlgmr.msra.gmra.mxu0 %v2453_v19  ;;  %1073 = vmatmul.mubr.bf16.vlgmr.msra.gmra.mxu1 %v2456_v20 }
  0x4e   : > { %952 = vmatprep.mubr.bf16.mxu0 %v2459_v21  ;;  %1080 = vmatprep.mubr.bf16.mxu1 %v2461_v22 }
  0x55   : > { %953 = vmatmul.mubr.bf16.gmra.mxu0 %v2463_v23  ;;  %1081 = vmatmul.mubr.bf16.gmra.mxu1 %v2464_v24 }
  0x56   : > { %960 = vmatprep.mubr.bf16.mxu0 %v2465_v25  ;;  %1088 = vmatprep.mubr.bf16.mxu1 %v2467_v26 }
  0x5d   : > { %961 = vmatmul.mubr.bf16.gmra.mxu0 %v2469_v27  ;;  %1089 = vmatmul.mubr.bf16.gmra.mxu1 %v2470_v28 }
  0x5e   : > { %968 = vmatprep.mubr.bf16.mxu0 %v2471_v29  ;;  %1096 = vmatprep.mubr.bf16.mxu1 %v2473_v30 }
  0x65   : > { %969 = vmatmul.mubr.bf16.gmra.mxu0 %v2475_v31  ;;  %1097 = vmatmul.mubr.bf16.gmra.mxu1 %v2476_v32 }
  0x66   : > { %976 = vmatprep.mubr.bf16.mxu0 %v2477_v33  ;;  %1104 = vmatprep.mubr.bf16.mxu1 %v2479_v34 }
  0x6d   : > { %977 = vmatmul.mubr.bf16.gmra.mxu0 %v2481_v35  ;;  %1105 = vmatmul.mubr.bf16.gmra.mxu1 %v2482_v36 }
  0x6e   : > { %984 = vmatprep.mubr.bf16.mxu0 %v2483_v37  ;;  %1112 = vmatprep.mubr.bf16.mxu1 %v2485_v38 }
  0x75   : > { %985 = vmatmul.mubr.bf16.gmra.mxu0 %v2487_v39  ;;  %1113 = vmatmul.mubr.bf16.gmra.mxu1 %v2488_v40 }
  0x76   : > { %992 = vmatprep.mubr.bf16.mxu0 %v2489_v41  ;;  %1120 = vmatprep.mubr.bf16.mxu1 %v2491_v42 }
  0x7d   : > { %993 = vmatmul.mubr.bf16.gmra.mxu0 %v2493_v43  ;;  %1121 = vmatmul.mubr.bf16.gmra.mxu1 %v2494_v44 }
  0x7e   : > { %1000 = vmatprep.mubr.bf16.mxu0 %v2495_v45  ;;  %1128 = vmatprep.mubr.bf16.mxu1 %v2497_v46 }
  0x85   : > { %1001 = vmatmul.mubr.bf16.gmra.mxu0 %v2499_v47  ;;  %1129 = vmatmul.mubr.bf16.gmra.mxu1 %v2500_v48 }
  0x86   : > { %1008 = vmatprep.mubr.bf16.mxu0 %v2501_v49  ;;  %1136 = vmatprep.mubr.bf16.mxu1 %v2503_v50 }
  0x8d   : > { %1009 = vmatmul.mubr.bf16.gmra.mxu0 %v2505_v51  ;;  %1137 = vmatmul.mubr.bf16.gmra.mxu1 %v2506_v52 }
  0x8e   : > { %1016 = vmatprep.mubr.bf16.mxu0 %v2507_v53  ;;  %1144 = vmatprep.mubr.bf16.mxu1 %v2509_v54 }
  0x95   : > { %1017 = vmatmul.mubr.bf16.gmra.mxu0 %v2511_v55  ;;  %1145 = vmatmul.mubr.bf16.gmra.mxu1 %v2512_v56 }
  0x96   : > { %1024 = vmatprep.mubr.bf16.mxu0 %v2513_v57  ;;  %1152 = vmatprep.mubr.bf16.mxu1 %v2515_v58 }
  0x9d   : > { %1025 = vmatmul.mubr.bf16.gmra.mxu0 %v2517_v59  ;;  %1153 = vmatmul.mubr.bf16.gmra.mxu1 %v2518_v60 }
  0x9e   : > { %1032 = vmatprep.mubr.bf16.mxu0 %v2519_v61  ;;  %1160 = vmatprep.mubr.bf16.mxu1 %v2521_v62 }
  0xa5   : > { %1033 = vmatmul.mubr.bf16.gmra.mxu0 %v2523_v63  ;;  %1161 = vmatmul.mubr.bf16.gmra.mxu1 %v2524_v0 }
  0xa6   : > { %1040 = vmatprep.mubr.bf16.mxu0 %v2525_v1  ;;  %1168 = vmatprep.mubr.bf16.mxu1 %v2527_v2 }
  0xad   : > { %1041 = vmatmul.mubr.bf16.gmra.mxu0 %v2529_v3  ;;  %1169 = vmatmul.mubr.bf16.gmra.mxu1 %v2530_v4 }
  0xae   : > { %1048 = vmatprep.mubr.bf16.mxu0 %v2531_v5  ;;  %1176 = vmatprep.mubr.bf16.mxu1 %v2533_v6 }
  0xb5   : > { %1049 = vmatmul.mubr.bf16.gmra.mxu0 %v2535_v7  ;;  %1177 = vmatmul.mubr.bf16.gmra.mxu1 %v2536_v8 }
  0xb6   : > { %1056 = vmatprep.mubr.bf16.mxu0 %v2537_v9  ;;  %1184 = vmatprep.mubr.bf16.mxu1 %v2539_v10 }
  0xbd   : > { %1057 = vmatmul.mubr.bf16.gmra.mxu0 %v2541_v11  ;;  %1185 = vmatmul.mubr.bf16.gmra.mxu1 %v2542_v12 }
  0xbe   : > { %1064 = vmatprep.mubr.bf16.mxu0 %v2543_v13  ;;  %1192 = vmatprep.mubr.bf16.mxu1 %v2545_v14 }
  0xc5   : > { %1065 = vmatmul.mubr.bf16.gmra.mxu0 %v2547_v15  ;;  %1193 = vmatmul.mubr.bf16.gmra.mxu1 %v2548_v16 }
 0x10d   : > { %v946_v17 = vpop.f32.mrf.mxu0  ;;  %v1074_v19 = vpop.f32.mrf.mxu1 }
 0x10e   : > { %v1403_v22 = vadd.f32 %v2767_v18, %v946_v17  ;;  %v1435_v23 = vadd.f32 %v2767_v18, %v1074_v19 }
 0x10f   : > { %v948_v20 = vpop.f32.mrf.mxu0  ;;  %v1076_v21 = vpop.f32.mrf.mxu1 }
 0x110   : > { %v1467_v30 = vmax.f32 %v1403_v22, 0.0  ;;  %v1499_v31 = vmax.f32 %v1435_v23, 0.0 }
 0x111   : > { %v949_v24 = vpop.f32.mrf.mxu0  ;;  %v1077_v25 = vpop.f32.mrf.mxu1 }
 0x112   : > { %v1404_v26 = vadd.f32 %v2767_v18, %v949_v24  ;;  %v1436_v27 = vadd.f32 %v2767_v18, %v1077_v25 }
 0x113   : > { %v951_v28 = vpop.f32.mrf.mxu0  ;;  %v1079_v29 = vpop.f32.mrf.mxu1 }
 0x114   : > { %v1468_v32 = vmax.f32 %v1404_v26, 0.0  ;;  %v1500_v33 = vmax.f32 %v1436_v27, 0.0 }
 0x115   : > { %v954_v34 = vpop.f32.mrf.mxu0  ;;  %v1082_v35 = vpop.f32.mrf.mxu1 }
 0x116   : > { %v2192_v36 = vpack.c.bf16 %v1468_v32, %v1467_v30  ;;  %v2272_v37 = vpack.c.bf16 %v1500_v33, %v1499_v31  ;;  %v1405_v40 = vadd.f32 %v2767_v18, %v954_v34  ;;  %v1437_v41 = vadd.f32 %v2767_v18, %v1082_v35 }
 0x117   : > { %v956_v38 = vpop.f32.mrf.mxu0  ;;  %v1084_v39 = vpop.f32.mrf.mxu1 }
 0x118   : > { %2193 = vst [vmem:[%s2777_s8] sm:$0xff] %v2192_v36   ;;  %2364 = vst [vmem:[%s2777_s8 + $0x80] sm:$0xff] %v2272_v37   ;;  %v1469_v48 = vmax.f32 %v1405_v40, 0.0  ;;  %v1501_v49 = vmax.f32 %v1437_v41, 0.0 }
 0x119   : > { %v957_v42 = vpop.f32.mrf.mxu0  ;;  %v1085_v43 = vpop.f32.mrf.mxu1 }
 0x11a   : > { %v1406_v44 = vadd.f32 %v2767_v18, %v957_v42  ;;  %v1438_v45 = vadd.f32 %v2767_v18, %v1085_v43 }
 0x11b   : > { %v959_v46 = vpop.f32.mrf.mxu0  ;;  %v1087_v47 = vpop.f32.mrf.mxu1 }
 0x11c   : > { %v1470_v50 = vmax.f32 %v1406_v44, 0.0  ;;  %v1502_v51 = vmax.f32 %v1438_v45, 0.0 }
 0x11d   : > { %v962_v52 = vpop.f32.mrf.mxu0  ;;  %v1090_v53 = vpop.f32.mrf.mxu1 }
 0x11e   : > { %v2197_v54 = vpack.c.bf16 %v1470_v50, %v1469_v48  ;;  %v2277_v55 = vpack.c.bf16 %v1502_v51, %v1501_v49  ;;  %v1407_v58 = vadd.f32 %v2767_v18, %v962_v52  ;;  %v1439_v59 = vadd.f32 %v2767_v18, %v1090_v53 }
 0x11f   : > { %v964_v56 = vpop.f32.mrf.mxu0  ;;  %v1092_v57 = vpop.f32.mrf.mxu1 }
 0x120   : > { %2349 = vst [vmem:[%s2777_s8 + $0x8] sm:$0xff] %v2197_v54   ;;  %2365 = vst [vmem:[%s2777_s8 + $0x88] sm:$0xff] %v2277_v55   ;;  %v1471_v2 = vmax.f32 %v1407_v58, 0.0  ;;  %v1503_v3 = vmax.f32 %v1439_v59, 0.0 }
 0x121   : > { %v965_v60 = vpop.f32.mrf.mxu0  ;;  %v1093_v61 = vpop.f32.mrf.mxu1 }
 0x122   : > { %v1408_v62 = vadd.f32 %v2767_v18, %v965_v60  ;;  %v1440_v63 = vadd.f32 %v2767_v18, %v1093_v61 }
 0x123   : > { %v967_v0 = vpop.f32.mrf.mxu0  ;;  %v1095_v1 = vpop.f32.mrf.mxu1 }
 0x124   : > { %v1472_v4 = vmax.f32 %v1408_v62, 0.0  ;;  %v1504_v5 = vmax.f32 %v1440_v63, 0.0 }
 0x125   : > { %v970_v6 = vpop.f32.mrf.mxu0  ;;  %v1098_v7 = vpop.f32.mrf.mxu1 }
 0x126   : > { %v2202_v8 = vpack.c.bf16 %v1472_v4, %v1471_v2  ;;  %v2282_v9 = vpack.c.bf16 %v1504_v5, %v1503_v3  ;;  %v1409_v12 = vadd.f32 %v2767_v18, %v970_v6  ;;  %v1441_v13 = vadd.f32 %v2767_v18, %v1098_v7 }
 0x127   : > { %v972_v10 = vpop.f32.mrf.mxu0  ;;  %v1100_v11 = vpop.f32.mrf.mxu1 }
 0x128   : > { %2350 = vst [vmem:[%s2777_s8 + $0x10] sm:$0xff] %v2202_v8   ;;  %2366 = vst [vmem:[%s2777_s8 + $0x90] sm:$0xff] %v2282_v9   ;;  %v1473_v21 = vmax.f32 %v1409_v12, 0.0  ;;  %v1505_v22 = vmax.f32 %v1441_v13, 0.0 }
 0x129   : > { %v973_v14 = vpop.f32.mrf.mxu0  ;;  %v1101_v15 = vpop.f32.mrf.mxu1 }
 0x12a   : > { %v1410_v16 = vadd.f32 %v2767_v18, %v973_v14  ;;  %v1442_v17 = vadd.f32 %v2767_v18, %v1101_v15 }
 0x12b   : > { %v975_v19 = vpop.f32.mrf.mxu0  ;;  %v1103_v20 = vpop.f32.mrf.mxu1 }
 0x12c   : > { %v1474_v23 = vmax.f32 %v1410_v16, 0.0  ;;  %v1506_v24 = vmax.f32 %v1442_v17, 0.0 }
 0x12d   : > { %v978_v25 = vpop.f32.mrf.mxu0  ;;  %v1106_v26 = vpop.f32.mrf.mxu1 }
 0x12e   : > { %v2207_v27 = vpack.c.bf16 %v1474_v23, %v1473_v21  ;;  %v2287_v28 = vpack.c.bf16 %v1506_v24, %v1505_v22  ;;  %v1411_v31 = vadd.f32 %v2767_v18, %v978_v25  ;;  %v1443_v32 = vadd.f32 %v2767_v18, %v1106_v26 }
 0x12f   : > { %v980_v29 = vpop.f32.mrf.mxu0  ;;  %v1108_v30 = vpop.f32.mrf.mxu1 }
 0x130   : > { %2351 = vst [vmem:[%s2777_s8 + $0x18] sm:$0xff] %v2207_v27   ;;  %2367 = vst [vmem:[%s2777_s8 + $0x98] sm:$0xff] %v2287_v28   ;;  %v1475_v39 = vmax.f32 %v1411_v31, 0.0  ;;  %v1507_v40 = vmax.f32 %v1443_v32, 0.0 }
 0x131   : > { %v981_v33 = vpop.f32.mrf.mxu0  ;;  %v1109_v34 = vpop.f32.mrf.mxu1 }
 0x132   : > { %v1412_v35 = vadd.f32 %v2767_v18, %v981_v33  ;;  %v1444_v36 = vadd.f32 %v2767_v18, %v1109_v34 }
 0x133   : > { %v983_v37 = vpop.f32.mrf.mxu0  ;;  %v1111_v38 = vpop.f32.mrf.mxu1 }
 0x134   : > { %v1476_v41 = vmax.f32 %v1412_v35, 0.0  ;;  %v1508_v42 = vmax.f32 %v1444_v36, 0.0 }
 0x135   : > { %v986_v43 = vpop.f32.mrf.mxu0  ;;  %v1114_v44 = vpop.f32.mrf.mxu1 }
 0x136   : > { %v2212_v45 = vpack.c.bf16 %v1476_v41, %v1475_v39  ;;  %v2292_v46 = vpack.c.bf16 %v1508_v42, %v1507_v40  ;;  %v1413_v49 = vadd.f32 %v2767_v18, %v986_v43  ;;  %v1445_v50 = vadd.f32 %v2767_v18, %v1114_v44 }
 0x137   : > { %v988_v47 = vpop.f32.mrf.mxu0  ;;  %v1116_v48 = vpop.f32.mrf.mxu1 }
 0x138   : > { %2352 = vst [vmem:[%s2777_s8 + $0x20] sm:$0xff] %v2212_v45   ;;  %2368 = vst [vmem:[%s2777_s8 + $0xa0] sm:$0xff] %v2292_v46   ;;  %v1477_v57 = vmax.f32 %v1413_v49, 0.0  ;;  %v1509_v58 = vmax.f32 %v1445_v50, 0.0 }
 0x139   : > { %v989_v51 = vpop.f32.mrf.mxu0  ;;  %v1117_v52 = vpop.f32.mrf.mxu1 }
 0x13a   : > { %v1414_v53 = vadd.f32 %v2767_v18, %v989_v51  ;;  %v1446_v54 = vadd.f32 %v2767_v18, %v1117_v52 }
 0x13b   : > { %v991_v55 = vpop.f32.mrf.mxu0  ;;  %v1119_v56 = vpop.f32.mrf.mxu1 }
 0x13c   : > { %v1478_v59 = vmax.f32 %v1414_v53, 0.0  ;;  %v1510_v60 = vmax.f32 %v1446_v54, 0.0 }
 0x13d   : > { %v994_v61 = vpop.f32.mrf.mxu0  ;;  %v1122_v62 = vpop.f32.mrf.mxu1 }
 0x13e   : > { %v2217_v63 = vpack.c.bf16 %v1478_v59, %v1477_v57  ;;  %v2297_v0 = vpack.c.bf16 %v1510_v60, %v1509_v58  ;;  %v1415_v3 = vadd.f32 %v2767_v18, %v994_v61  ;;  %v1447_v4 = vadd.f32 %v2767_v18, %v1122_v62 }
 0x13f   : > { %v996_v1 = vpop.f32.mrf.mxu0  ;;  %v1124_v2 = vpop.f32.mrf.mxu1 }
 0x140   : > { %2353 = vst [vmem:[%s2777_s8 + $0x28] sm:$0xff] %v2217_v63   ;;  %2369 = vst [vmem:[%s2777_s8 + $0xa8] sm:$0xff] %v2297_v0   ;;  %v1479_v11 = vmax.f32 %v1415_v3, 0.0  ;;  %v1511_v12 = vmax.f32 %v1447_v4, 0.0 }
 0x141   : > { %v997_v5 = vpop.f32.mrf.mxu0  ;;  %v1125_v6 = vpop.f32.mrf.mxu1 }
 0x142   : > { %v1416_v7 = vadd.f32 %v2767_v18, %v997_v5  ;;  %v1448_v8 = vadd.f32 %v2767_v18, %v1125_v6 }
 0x143   : > { %v999_v9 = vpop.f32.mrf.mxu0  ;;  %v1127_v10 = vpop.f32.mrf.mxu1 }
 0x144   : > { %v1480_v13 = vmax.f32 %v1416_v7, 0.0  ;;  %v1512_v14 = vmax.f32 %v1448_v8, 0.0 }
 0x145   : > { %v1002_v15 = vpop.f32.mrf.mxu0  ;;  %v1130_v16 = vpop.f32.mrf.mxu1 }
 0x146   : > { %v2222_v17 = vpack.c.bf16 %v1480_v13, %v1479_v11  ;;  %v2302_v19 = vpack.c.bf16 %v1512_v14, %v1511_v12  ;;  %v1417_v22 = vadd.f32 %v2767_v18, %v1002_v15  ;;  %v1449_v23 = vadd.f32 %v2767_v18, %v1130_v16 }
 0x147   : > { %v1004_v20 = vpop.f32.mrf.mxu0  ;;  %v1132_v21 = vpop.f32.mrf.mxu1 }
 0x148   : > { %2354 = vst [vmem:[%s2777_s8 + $0x30] sm:$0xff] %v2222_v17   ;;  %2370 = vst [vmem:[%s2777_s8 + $0xb0] sm:$0xff] %v2302_v19   ;;  %v1481_v30 = vmax.f32 %v1417_v22, 0.0  ;;  %v1513_v31 = vmax.f32 %v1449_v23, 0.0 }
 0x149   : > { %v1005_v24 = vpop.f32.mrf.mxu0  ;;  %v1133_v25 = vpop.f32.mrf.mxu1 }
 0x14a   : > { %v1418_v26 = vadd.f32 %v2767_v18, %v1005_v24  ;;  %v1450_v27 = vadd.f32 %v2767_v18, %v1133_v25 }
 0x14b   : > { %v1007_v28 = vpop.f32.mrf.mxu0  ;;  %v1135_v29 = vpop.f32.mrf.mxu1 }
 0x14c   : > { %v1482_v32 = vmax.f32 %v1418_v26, 0.0  ;;  %v1514_v33 = vmax.f32 %v1450_v27, 0.0 }
 0x14d   : > { %v1010_v34 = vpop.f32.mrf.mxu0  ;;  %v1138_v35 = vpop.f32.mrf.mxu1 }
 0x14e   : > { %v2227_v36 = vpack.c.bf16 %v1482_v32, %v1481_v30  ;;  %v2307_v37 = vpack.c.bf16 %v1514_v33, %v1513_v31  ;;  %v1419_v40 = vadd.f32 %v2767_v18, %v1010_v34  ;;  %v1451_v41 = vadd.f32 %v2767_v18, %v1138_v35 }
 0x14f   : > { %v1012_v38 = vpop.f32.mrf.mxu0  ;;  %v1140_v39 = vpop.f32.mrf.mxu1 }
 0x150   : > { %2355 = vst [vmem:[%s2777_s8 + $0x38] sm:$0xff] %v2227_v36   ;;  %2371 = vst [vmem:[%s2777_s8 + $0xb8] sm:$0xff] %v2307_v37   ;;  %v1483_v48 = vmax.f32 %v1419_v40, 0.0  ;;  %v1515_v49 = vmax.f32 %v1451_v41, 0.0 }
 0x151   : > { %v1013_v42 = vpop.f32.mrf.mxu0  ;;  %v1141_v43 = vpop.f32.mrf.mxu1 }
 0x152   : > { %v1420_v44 = vadd.f32 %v2767_v18, %v1013_v42  ;;  %v1452_v45 = vadd.f32 %v2767_v18, %v1141_v43 }
 0x153   : > { %v1015_v46 = vpop.f32.mrf.mxu0  ;;  %v1143_v47 = vpop.f32.mrf.mxu1 }
 0x154   : > { %v1484_v50 = vmax.f32 %v1420_v44, 0.0  ;;  %v1516_v51 = vmax.f32 %v1452_v45, 0.0 }
 0x155   : > { %v1018_v52 = vpop.f32.mrf.mxu0  ;;  %v1146_v53 = vpop.f32.mrf.mxu1 }
 0x156   : > { %v2232_v54 = vpack.c.bf16 %v1484_v50, %v1483_v48  ;;  %v2312_v55 = vpack.c.bf16 %v1516_v51, %v1515_v49  ;;  %v1421_v58 = vadd.f32 %v2767_v18, %v1018_v52  ;;  %v1453_v59 = vadd.f32 %v2767_v18, %v1146_v53 }
 0x157   : > { %v1020_v56 = vpop.f32.mrf.mxu0  ;;  %v1148_v57 = vpop.f32.mrf.mxu1 }
 0x158   : > { %2356 = vst [vmem:[%s2777_s8 + $0x40] sm:$0xff] %v2232_v54   ;;  %2372 = vst [vmem:[%s2777_s8 + $0xc0] sm:$0xff] %v2312_v55   ;;  %v1485_v2 = vmax.f32 %v1421_v58, 0.0  ;;  %v1517_v3 = vmax.f32 %v1453_v59, 0.0 }
 0x159   : > { %v1021_v60 = vpop.f32.mrf.mxu0  ;;  %v1149_v61 = vpop.f32.mrf.mxu1 }
 0x15a   : > { %v1422_v62 = vadd.f32 %v2767_v18, %v1021_v60  ;;  %v1454_v63 = vadd.f32 %v2767_v18, %v1149_v61 }
 0x15b   : > { %v1023_v0 = vpop.f32.mrf.mxu0  ;;  %v1151_v1 = vpop.f32.mrf.mxu1 }
 0x15c   : > { %v1486_v4 = vmax.f32 %v1422_v62, 0.0  ;;  %v1518_v5 = vmax.f32 %v1454_v63, 0.0 }
 0x15d   : > { %v1026_v6 = vpop.f32.mrf.mxu0  ;;  %v1154_v7 = vpop.f32.mrf.mxu1 }
 0x15e   : > { %v2237_v8 = vpack.c.bf16 %v1486_v4, %v1485_v2  ;;  %v2317_v9 = vpack.c.bf16 %v1518_v5, %v1517_v3  ;;  %v1423_v12 = vadd.f32 %v2767_v18, %v1026_v6  ;;  %v1455_v13 = vadd.f32 %v2767_v18, %v1154_v7 }
 0x15f   : > { %v1028_v10 = vpop.f32.mrf.mxu0  ;;  %v1156_v11 = vpop.f32.mrf.mxu1 }
 0x160   : > { %2357 = vst [vmem:[%s2777_s8 + $0x48] sm:$0xff] %v2237_v8   ;;  %2373 = vst [vmem:[%s2777_s8 + $0xc8] sm:$0xff] %v2317_v9   ;;  %v1487_v21 = vmax.f32 %v1423_v12, 0.0  ;;  %v1519_v22 = vmax.f32 %v1455_v13, 0.0 }
 0x161   : > { %v1029_v14 = vpop.f32.mrf.mxu0  ;;  %v1157_v15 = vpop.f32.mrf.mxu1 }
 0x162   : > { %v1424_v16 = vadd.f32 %v2767_v18, %v1029_v14  ;;  %v1456_v17 = vadd.f32 %v2767_v18, %v1157_v15 }
 0x163   : > { %v1031_v19 = vpop.f32.mrf.mxu0  ;;  %v1159_v20 = vpop.f32.mrf.mxu1 }
 0x164   : > { %v1488_v23 = vmax.f32 %v1424_v16, 0.0  ;;  %v1520_v24 = vmax.f32 %v1456_v17, 0.0 }
 0x165   : > { %v1034_v25 = vpop.f32.mrf.mxu0  ;;  %v1162_v26 = vpop.f32.mrf.mxu1 }
 0x166   : > { %v2242_v27 = vpack.c.bf16 %v1488_v23, %v1487_v21  ;;  %v2322_v28 = vpack.c.bf16 %v1520_v24, %v1519_v22  ;;  %v1425_v31 = vadd.f32 %v2767_v18, %v1034_v25  ;;  %v1457_v32 = vadd.f32 %v2767_v18, %v1162_v26 }
 0x167   : > { %v1036_v29 = vpop.f32.mrf.mxu0  ;;  %v1164_v30 = vpop.f32.mrf.mxu1 }
 0x168   : > { %2358 = vst [vmem:[%s2777_s8 + $0x50] sm:$0xff] %v2242_v27   ;;  %2374 = vst [vmem:[%s2777_s8 + $0xd0] sm:$0xff] %v2322_v28   ;;  %v1489_v39 = vmax.f32 %v1425_v31, 0.0  ;;  %v1521_v40 = vmax.f32 %v1457_v32, 0.0 }
 0x169   : > { %v1037_v33 = vpop.f32.mrf.mxu0  ;;  %v1165_v34 = vpop.f32.mrf.mxu1 }
 0x16a   : > { %v1426_v35 = vadd.f32 %v2767_v18, %v1037_v33  ;;  %v1458_v36 = vadd.f32 %v2767_v18, %v1165_v34 }
 0x16b   : > { %v1039_v37 = vpop.f32.mrf.mxu0  ;;  %v1167_v38 = vpop.f32.mrf.mxu1 }
 0x16c   : > { %v1490_v41 = vmax.f32 %v1426_v35, 0.0  ;;  %v1522_v42 = vmax.f32 %v1458_v36, 0.0 }
 0x16d   : > { %v1042_v43 = vpop.f32.mrf.mxu0  ;;  %v1170_v44 = vpop.f32.mrf.mxu1 }
 0x16e   : > { %v2247_v45 = vpack.c.bf16 %v1490_v41, %v1489_v39  ;;  %v2327_v46 = vpack.c.bf16 %v1522_v42, %v1521_v40  ;;  %v1427_v49 = vadd.f32 %v2767_v18, %v1042_v43  ;;  %v1459_v50 = vadd.f32 %v2767_v18, %v1170_v44 }
 0x16f   : > { %v1044_v47 = vpop.f32.mrf.mxu0  ;;  %v1172_v48 = vpop.f32.mrf.mxu1 }
 0x170   : > { %2359 = vst [vmem:[%s2777_s8 + $0x58] sm:$0xff] %v2247_v45   ;;  %2375 = vst [vmem:[%s2777_s8 + $0xd8] sm:$0xff] %v2327_v46   ;;  %v1491_v57 = vmax.f32 %v1427_v49, 0.0  ;;  %v1523_v58 = vmax.f32 %v1459_v50, 0.0 }
 0x171   : > { %v1045_v51 = vpop.f32.mrf.mxu0  ;;  %v1173_v52 = vpop.f32.mrf.mxu1 }
 0x172   : > { %v1428_v53 = vadd.f32 %v2767_v18, %v1045_v51  ;;  %v1460_v54 = vadd.f32 %v2767_v18, %v1173_v52 }
 0x173   : > { %v1047_v55 = vpop.f32.mrf.mxu0  ;;  %v1175_v56 = vpop.f32.mrf.mxu1 }
 0x174   : > { %v1492_v59 = vmax.f32 %v1428_v53, 0.0  ;;  %v1524_v60 = vmax.f32 %v1460_v54, 0.0 }
 0x175   : > { %v1050_v61 = vpop.f32.mrf.mxu0  ;;  %v1178_v62 = vpop.f32.mrf.mxu1 }
 0x176   : > { %v2252_v63 = vpack.c.bf16 %v1492_v59, %v1491_v57  ;;  %v2332_v0 = vpack.c.bf16 %v1524_v60, %v1523_v58  ;;  %v1429_v3 = vadd.f32 %v2767_v18, %v1050_v61  ;;  %v1461_v4 = vadd.f32 %v2767_v18, %v1178_v62 }
 0x177   : > { %v1052_v1 = vpop.f32.mrf.mxu0  ;;  %v1180_v2 = vpop.f32.mrf.mxu1 }
 0x178   : > { %2360 = vst [vmem:[%s2777_s8 + $0x60] sm:$0xff] %v2252_v63   ;;  %2376 = vst [vmem:[%s2777_s8 + $0xe0] sm:$0xff] %v2332_v0   ;;  %v1493_v11 = vmax.f32 %v1429_v3, 0.0  ;;  %v1525_v12 = vmax.f32 %v1461_v4, 0.0 }
 0x179   : > { %v1053_v5 = vpop.f32.mrf.mxu0  ;;  %v1181_v6 = vpop.f32.mrf.mxu1 }
 0x17a   : > { %v1430_v7 = vadd.f32 %v2767_v18, %v1053_v5  ;;  %v1462_v8 = vadd.f32 %v2767_v18, %v1181_v6 }
 0x17b   : > { %v1055_v9 = vpop.f32.mrf.mxu0  ;;  %v1183_v10 = vpop.f32.mrf.mxu1 }
 0x17c   : > { %v1494_v13 = vmax.f32 %v1430_v7, 0.0  ;;  %v1526_v14 = vmax.f32 %v1462_v8, 0.0 }
 0x17d   : > { %v1058_v15 = vpop.f32.mrf.mxu0  ;;  %v1186_v16 = vpop.f32.mrf.mxu1 }
 0x17e   : > { %v2257_v17 = vpack.c.bf16 %v1494_v13, %v1493_v11  ;;  %v2337_v19 = vpack.c.bf16 %v1526_v14, %v1525_v12  ;;  %v1431_v22 = vadd.f32 %v2767_v18, %v1058_v15  ;;  %v1463_v23 = vadd.f32 %v2767_v18, %v1186_v16 }
 0x17f   : > { %v1060_v20 = vpop.f32.mrf.mxu0  ;;  %v1188_v21 = vpop.f32.mrf.mxu1 }
 0x180   : > { %2361 = vst [vmem:[%s2777_s8 + $0x68] sm:$0xff] %v2257_v17   ;;  %2377 = vst [vmem:[%s2777_s8 + $0xe8] sm:$0xff] %v2337_v19   ;;  %v1495_v30 = vmax.f32 %v1431_v22, 0.0  ;;  %v1527_v31 = vmax.f32 %v1463_v23, 0.0 }
 0x181   : > { %v1061_v24 = vpop.f32.mrf.mxu0  ;;  %v1189_v25 = vpop.f32.mrf.mxu1 }
 0x182   : > { %v1432_v26 = vadd.f32 %v2767_v18, %v1061_v24  ;;  %v1464_v27 = vadd.f32 %v2767_v18, %v1189_v25 }
 0x183   : > { %v1063_v28 = vpop.f32.mrf.mxu0  ;;  %v1191_v29 = vpop.f32.mrf.mxu1 }
 0x184   : > { %v1496_v32 = vmax.f32 %v1432_v26, 0.0  ;;  %v1528_v33 = vmax.f32 %v1464_v27, 0.0 }
 0x185   : > { %v1066_v34 = vpop.f32.mrf.mxu0  ;;  %v1194_v35 = vpop.f32.mrf.mxu1 }
 0x186   : > { %v2262_v36 = vpack.c.bf16 %v1496_v32, %v1495_v30  ;;  %v2342_v37 = vpack.c.bf16 %v1528_v33, %v1527_v31  ;;  %v1433_v40 = vadd.f32 %v2767_v18, %v1066_v34  ;;  %v1465_v41 = vadd.f32 %v2767_v18, %v1194_v35 }
 0x187   : > { %v1068_v38 = vpop.f32.mrf.mxu0  ;;  %v1196_v39 = vpop.f32.mrf.mxu1 }
 0x188   : > { %2362 = vst [vmem:[%s2777_s8 + $0x70] sm:$0xff] %v2262_v36   ;;  %2378 = vst [vmem:[%s2777_s8 + $0xf0] sm:$0xff] %v2342_v37   ;;  %v1497_v48 = vmax.f32 %v1433_v40, 0.0  ;;  %v1529_v49 = vmax.f32 %v1465_v41, 0.0 }
 0x189   : > { %v1069_v42 = vpop.f32.mrf.mxu0  ;;  %v1197_v43 = vpop.f32.mrf.mxu1 }
 0x18a   : > { %v1434_v44 = vadd.f32 %v2767_v18, %v1069_v42  ;;  %v1466_v45 = vadd.f32 %v2767_v18, %v1197_v43 }
 0x18b   : > { %v1071_v46 = vpop.f32.mrf.mxu0  ;;  %v1199_v47 = vpop.f32.mrf.mxu1 }
 0x18c   : > { %v1498_v50 = vmax.f32 %v1434_v44, 0.0  ;;  %v1530_v51 = vmax.f32 %v1466_v45, 0.0 }
 0x18e   : > { %v2267_v52 = vpack.c.bf16 %v1498_v50, %v1497_v48  ;;  %v2347_v53 = vpack.c.bf16 %v1530_v51, %v1529_v49 }
 0x190   : > { %2363 = vst [vmem:[%s2777_s8 + $0x78] sm:$0xff] %v2267_v52   ;;  %2379 = vst [vmem:[%s2777_s8 + $0xf8] sm:$0xff] %v2347_v53  }
 0x191 PF: > { %s13_s14 = sadd.s32 1, %s2571_s14   ;;  %s2884_s12 = smov %s2567_s13 }
 0x192   : > { %p10_p5 = scmp.ge.s32.totalorder %s13_s14, 6   ;;  %s2885_s13 = smov %s2887_s15 }
 0x194   :  { %12 = sbr.rel (!%p10_p5) target bundleno = 2 (0x2), region = 76 }

// kernel: resnet_forward.15
= control target key start
LH: loop header
LB: loop body
LE: loop exit
PB: predicated region body
PF: predicated region fallthrough
CT: control target
= control target key end

     0   :  { %s790_s0 = inlined_call_operand.vmem [shape: bf16[9,32,1024], index: 0, kind: input, shape index: {}]   ;;  %s791_s1 = inlined_call_operand.vmem [shape: bf16[32,1024], index: 1, kind: output, shape index: {}]  }
   0x1   :  { %v8_v0 = vld [vmem:[%s790_s0] sm:$0xff]  ;;  %v9_v6 = vld [vmem:[%s790_s0 + $0x8] sm:$0xff]  ;;  %v10_v15 = vld [vmem:[%s790_s0 + $0x10] sm:$0xff] }
   0x2   :  { %v24_v1 = vld [vmem:[%s790_s0 + $0x80] sm:$0xff]  ;;  %v25_v7 = vld [vmem:[%s790_s0 + $0x88] sm:$0xff]  ;;  %v26_v16 = vld [vmem:[%s790_s0 + $0x90] sm:$0xff] }
   0x3   :  { %v40_v2 = vld [vmem:[%s790_s0 + $0x100] sm:$0xff]  ;;  %v152_v3 = vmax.bf16 %v24_v1, %v8_v0  ;;  %v41_v8 = vld [vmem:[%s790_s0 + $0x108] sm:$0xff]  ;;  %v160_v10 = vmax.bf16 %v25_v7, %v9_v6  ;;  %v42_v17 = vld [vmem:[%s790_s0 + $0x110] sm:$0xff]  ;;  %v168_v20 = vmax.bf16 %v26_v16, %v10_v15 }
   0x4   :  { %v56_v4 = vld [vmem:[%s790_s0 + $0x180] sm:$0xff]  ;;  %v57_v13 = vld [vmem:[%s790_s0 + $0x188] sm:$0xff]  ;;  %v58_v24 = vld [vmem:[%s790_s0 + $0x190] sm:$0xff] }
   0x5   :  { %v153_v5 = vmax.bf16 %v152_v3, %v40_v2  ;;  %v72_v9 = vld [vmem:[%s790_s0 + $0x200] sm:$0xff]  ;;  %v161_v14 = vmax.bf16 %v160_v10, %v41_v8  ;;  %v73_v19 = vld [vmem:[%s790_s0 + $0x208] sm:$0xff]  ;;  %v169_v26 = vmax.bf16 %v168_v20, %v42_v17  ;;  %v11_v27 = vld [vmem:[%s790_s0 + $0x18] sm:$0xff] }
   0x6   :  { %v88_v11 = vld [vmem:[%s790_s0 + $0x280] sm:$0xff]  ;;  %v89_v22 = vld [vmem:[%s790_s0 + $0x288] sm:$0xff]  ;;  %v27_v28 = vld [vmem:[%s790_s0 + $0x98] sm:$0xff] }
   0x7   :  { %v154_v12 = vmax.bf16 %v153_v5, %v56_v4  ;;  %v104_v21 = vld [vmem:[%s790_s0 + $0x300] sm:$0xff]  ;;  %v162_v23 = vmax.bf16 %v161_v14, %v57_v13  ;;  %v43_v29 = vld [vmem:[%s790_s0 + $0x118] sm:$0xff]  ;;  %v74_v33 = vld [vmem:[%s790_s0 + $0x210] sm:$0xff]  ;;  %v176_v34 = vmax.bf16 %v27_v28, %v11_v27  ;;  %v170_v38 = vmax.bf16 %v169_v26, %v58_v24 }
   0x8   :  { %v120_v30 = vld [vmem:[%s790_s0 + $0x380] sm:$0xff]  ;;  %v105_v36 = vld [vmem:[%s790_s0 + $0x308] sm:$0xff]  ;;  %v90_v37 = vld [vmem:[%s790_s0 + $0x290] sm:$0xff] }
   0x9   :  { %v155_v18 = vmax.bf16 %v154_v12, %v72_v9  ;;  %v136_v31 = vld [vmem:[%s790_s0 + $0x400] sm:$0xff]  ;;  %v163_v32 = vmax.bf16 %v162_v23, %v73_v19  ;;  %v59_v39 = vld [vmem:[%s790_s0 + $0x198] sm:$0xff]  ;;  %v177_v41 = vmax.bf16 %v176_v34, %v43_v29  ;;  %v121_v46 = vld [vmem:[%s790_s0 + $0x388] sm:$0xff]  ;;  %v171_v48 = vmax.bf16 %v170_v38, %v74_v33 }
   0xa   :  { %v12_v42 = vld [vmem:[%s790_s0 + $0x20] sm:$0xff]  ;;  %v137_v47 = vld [vmem:[%s790_s0 + $0x408] sm:$0xff]  ;;  %v75_v49 = vld [vmem:[%s790_s0 + $0x218] sm:$0xff] }
   0xb   :  { %v156_v25 = vmax.bf16 %v155_v18, %v88_v11  ;;  %v164_v40 = vmax.bf16 %v163_v32, %v89_v22  ;;  %v28_v43 = vld [vmem:[%s790_s0 + $0xa0] sm:$0xff]  ;;  %v106_v52 = vld [vmem:[%s790_s0 + $0x310] sm:$0xff]  ;;  %v91_v53 = vld [vmem:[%s790_s0 + $0x298] sm:$0xff]  ;;  %v178_v54 = vmax.bf16 %v177_v41, %v59_v39  ;;  %v172_v57 = vmax.bf16 %v171_v48, %v90_v37 }
   0xc   :  { %v44_v44 = vld [vmem:[%s790_s0 + $0x120] sm:$0xff]  ;;  %v184_v50 = vmax.bf16 %v28_v43, %v12_v42  ;;  %v13_v59 = vld [vmem:[%s790_s0 + $0x28] sm:$0xff]  ;;  %v122_v63 = vld [vmem:[%s790_s0 + $0x390] sm:$0xff] }
   0xd   :  { %v157_v35 = vmax.bf16 %v156_v25, %v104_v21  ;;  %v165_v51 = vmax.bf16 %v164_v40, %v105_v36  ;;  %v60_v55 = vld [vmem:[%s790_s0 + $0x1a0] sm:$0xff]  ;;  %v29_v60 = vld [vmem:[%s790_s0 + $0xa8] sm:$0xff]  ;;  %v138_v0 = vld [vmem:[%s790_s0 + $0x410] sm:$0xff]  ;;  %v179_v1 = vmax.bf16 %v178_v54, %v75_v49  ;;  %v173_v4 = vmax.bf16 %v172_v57, %v106_v52 }
   0xe   :  { %v185_v58 = vmax.bf16 %v184_v50, %v44_v44  ;;  %v45_v61 = vld [vmem:[%s790_s0 + $0x128] sm:$0xff]  ;;  %v76_v2 = vld [vmem:[%s790_s0 + $0x220] sm:$0xff]  ;;  %v192_v3 = vmax.bf16 %v29_v60, %v13_v59  ;;  %v107_v5 = vld [vmem:[%s790_s0 + $0x318] sm:$0xff] }
   0xf   :  { %v158_v45 = vmax.bf16 %v157_v35, %v120_v30  ;;  %v166_v62 = vmax.bf16 %v165_v51, %v121_v46  ;;  %v92_v6 = vld [vmem:[%s790_s0 + $0x2a0] sm:$0xff]  ;;  %v61_v8 = vld [vmem:[%s790_s0 + $0x1a8] sm:$0xff]  ;;  %v180_v10 = vmax.bf16 %v179_v1, %v91_v53  ;;  %v14_v12 = vld [vmem:[%s790_s0 + $0x30] sm:$0xff]  ;;  %v174_v15 = vmax.bf16 %v173_v4, %v122_v63 }
  0x10   :  { %v186_v7 = vmax.bf16 %v185_v58, %v60_v55  ;;  %v193_v11 = vmax.bf16 %v192_v3, %v45_v61  ;;  %v30_v13 = vld [vmem:[%s790_s0 + $0xb0] sm:$0xff]  ;;  %v123_v16 = vld [vmem:[%s790_s0 + $0x398] sm:$0xff]  ;;  %v77_v19 = vld [vmem:[%s790_s0 + $0x228] sm:$0xff] }
  0x11   :  { %v159_v56 = vmax.bf16 %v158_v45, %v136_v31  ;;  %v167_v9 = vmax.bf16 %v166_v62, %v137_v47  ;;  %v46_v14 = vld [vmem:[%s790_s0 + $0x130] sm:$0xff]  ;;  %v139_v17 = vld [vmem:[%s790_s0 + $0x418] sm:$0xff]  ;;  %v200_v20 = vmax.bf16 %v30_v13, %v14_v12  ;;  %v181_v21 = vmax.bf16 %v180_v10, %v107_v5  ;;  %v108_v22 = vld [vmem:[%s790_s0 + $0x320] sm:$0xff] }
  0x12   :  { %v187_v18 = vmax.bf16 %v186_v7, %v76_v2  ;;  %v93_v23 = vld [vmem:[%s790_s0 + $0x2a8] sm:$0xff]  ;;  %v194_v24 = vmax.bf16 %v193_v11, %v61_v8  ;;  %v62_v25 = vld [vmem:[%s790_s0 + $0x1b0] sm:$0xff]  ;;  %v175_v26 = vmax.bf16 %v174_v15, %v138_v0  ;;  %v15_v29 = vld [vmem:[%s790_s0 + $0x38] sm:$0xff] }
  0x13   :  { %280 = vst [vmem:[%s791_s1] sm:$0xff] %v159_v56  ;;  %281 = vst [vmem:[%s791_s1 + $0x8] sm:$0xff] %v167_v9  ;;  %v201_v28 = vmax.bf16 %v200_v20, %v46_v14  ;;  %v31_v30 = vld [vmem:[%s790_s0 + $0xb8] sm:$0xff]  ;;  %v182_v32 = vmax.bf16 %v181_v21, %v123_v16  ;;  %v124_v33 = vld [vmem:[%s790_s0 + $0x3a0] sm:$0xff] }
  0x14   :  { %v188_v27 = vmax.bf16 %v187_v18, %v92_v6  ;;  %v47_v31 = vld [vmem:[%s790_s0 + $0x138] sm:$0xff]  ;;  %v140_v34 = vld [vmem:[%s790_s0 + $0x420] sm:$0xff]  ;;  %v195_v35 = vmax.bf16 %v194_v24, %v77_v19  ;;  %v78_v36 = vld [vmem:[%s790_s0 + $0x230] sm:$0xff]  ;;  %v208_v37 = vmax.bf16 %v31_v30, %v15_v29  ;;  %282 = vst [vmem:[%s791_s1 + $0x10] sm:$0xff] %v175_v26 }
  0x15   :  { %v109_v39 = vld [vmem:[%s790_s0 + $0x328] sm:$0xff]  ;;  %v94_v40 = vld [vmem:[%s790_s0 + $0x2b0] sm:$0xff]  ;;  %v202_v41 = vmax.bf16 %v201_v28, %v62_v25  ;;  %v63_v42 = vld [vmem:[%s790_s0 + $0x1b8] sm:$0xff]  ;;  %v183_v43 = vmax.bf16 %v182_v32, %v139_v17 }
  0x16   :  { %v189_v38 = vmax.bf16 %v188_v27, %v108_v22  ;;  %v196_v44 = vmax.bf16 %v195_v35, %v93_v23  ;;  %v209_v45 = vmax.bf16 %v208_v37, %v47_v31  ;;  %v16_v46 = vld [vmem:[%s790_s0 + $0x40] sm:$0xff]  ;;  %v125_v50 = vld [vmem:[%s790_s0 + $0x3a8] sm:$0xff]  ;;  %v79_v53 = vld [vmem:[%s790_s0 + $0x238] sm:$0xff] }
  0x17   :  { %v32_v47 = vld [vmem:[%s790_s0 + $0xc0] sm:$0xff]  ;;  %v141_v51 = vld [vmem:[%s790_s0 + $0x428] sm:$0xff]  ;;  %v203_v52 = vmax.bf16 %v202_v41, %v78_v36  ;;  %283 = vst [vmem:[%s791_s1 + $0x18] sm:$0xff] %v183_v43  ;;  %v110_v56 = vld [vmem:[%s790_s0 + $0x330] sm:$0xff] }
  0x18   :  { %v48_v48 = vld [vmem:[%s790_s0 + $0x140] sm:$0xff]  ;;  %v190_v49 = vmax.bf16 %v189_v38, %v124_v33  ;;  %v216_v54 = vmax.bf16 %v32_v47, %v16_v46  ;;  %v197_v55 = vmax.bf16 %v196_v44, %v109_v39  ;;  %v95_v57 = vld [vmem:[%s790_s0 + $0x2b8] sm:$0xff]  ;;  %v210_v58 = vmax.bf16 %v209_v45, %v63_v42  ;;  %v17_v63 = vld [vmem:[%s790_s0 + $0x48] sm:$0xff] }
  0x19   :  { %v64_v59 = vld [vmem:[%s790_s0 + $0x1c0] sm:$0xff]  ;;  %v204_v61 = vmax.bf16 %v203_v52, %v94_v40  ;;  %v33_v0 = vld [vmem:[%s790_s0 + $0xc8] sm:$0xff]  ;;  %v126_v3 = vld [vmem:[%s790_s0 + $0x3b0] sm:$0xff] }
  0x1a   :  { %v191_v60 = vmax.bf16 %v190_v49, %v140_v34  ;;  %v217_v62 = vmax.bf16 %v216_v54, %v48_v48  ;;  %v49_v1 = vld [vmem:[%s790_s0 + $0x148] sm:$0xff]  ;;  %v198_v2 = vmax.bf16 %v197_v55, %v125_v50  ;;  %v142_v4 = vld [vmem:[%s790_s0 + $0x430] sm:$0xff]  ;;  %v211_v5 = vmax.bf16 %v210_v58, %v79_v53  ;;  %v80_v6 = vld [vmem:[%s790_s0 + $0x240] sm:$0xff] }
  0x1b   :  { %v224_v7 = vmax.bf16 %v33_v0, %v17_v63  ;;  %v205_v8 = vmax.bf16 %v204_v61, %v110_v56  ;;  %v111_v9 = vld [vmem:[%s790_s0 + $0x338] sm:$0xff]  ;;  %v96_v10 = vld [vmem:[%s790_s0 + $0x2c0] sm:$0xff]  ;;  %v65_v12 = vld [vmem:[%s790_s0 + $0x1c8] sm:$0xff] }
  0x1c   :  { %284 = vst [vmem:[%s791_s1 + $0x20] sm:$0xff] %v191_v60  ;;  %v218_v11 = vmax.bf16 %v217_v62, %v64_v59  ;;  %v199_v13 = vmax.bf16 %v198_v2, %v141_v51  ;;  %v212_v14 = vmax.bf16 %v211_v5, %v95_v57  ;;  %v18_v16 = vld [vmem:[%s790_s0 + $0x50] sm:$0xff]  ;;  %v127_v20 = vld [vmem:[%s790_s0 + $0x3b8] sm:$0xff]  ;;  %v81_v23 = vld [vmem:[%s790_s0 + $0x248] sm:$0xff] }
  0x1d   :  { %v225_v15 = vmax.bf16 %v224_v7, %v49_v1  ;;  %v34_v17 = vld [vmem:[%s790_s0 + $0xd0] sm:$0xff]  ;;  %v206_v19 = vmax.bf16 %v205_v8, %v126_v3  ;;  %v143_v21 = vld [vmem:[%s790_s0 + $0x438] sm:$0xff]  ;;  %v112_v26 = vld [vmem:[%s790_s0 + $0x340] sm:$0xff] }
  0x1e   :  { %v50_v18 = vld [vmem:[%s790_s0 + $0x150] sm:$0xff]  ;;  %v219_v22 = vmax.bf16 %v218_v11, %v80_v6  ;;  %v232_v24 = vmax.bf16 %v34_v17, %v18_v16  ;;  %285 = vst [vmem:[%s791_s1 + $0x28] sm:$0xff] %v199_v13  ;;  %v213_v25 = vmax.bf16 %v212_v14, %v111_v9  ;;  %v97_v27 = vld [vmem:[%s790_s0 + $0x2c8] sm:$0xff]  ;;  %v19_v33 = vld [vmem:[%s790_s0 + $0x58] sm:$0xff] }
  0x1f   :  { %v226_v28 = vmax.bf16 %v225_v15, %v65_v12  ;;  %v66_v29 = vld [vmem:[%s790_s0 + $0x1d0] sm:$0xff]  ;;  %v207_v30 = vmax.bf16 %v206_v19, %v142_v4  ;;  %v35_v34 = vld [vmem:[%s790_s0 + $0xd8] sm:$0xff]  ;;  %v128_v37 = vld [vmem:[%s790_s0 + $0x3c0] sm:$0xff] }
  0x20   :  { %v220_v31 = vmax.bf16 %v219_v22, %v96_v10  ;;  %v233_v32 = vmax.bf16 %v232_v24, %v50_v18  ;;  %v51_v35 = vld [vmem:[%s790_s0 + $0x158] sm:$0xff]  ;;  %v214_v36 = vmax.bf16 %v213_v25, %v127_v20  ;;  %v144_v38 = vld [vmem:[%s790_s0 + $0x440] sm:$0xff]  ;;  %v82_v40 = vld [vmem:[%s790_s0 + $0x250] sm:$0xff]  ;;  %v240_v41 = vmax.bf16 %v35_v34, %v19_v33 }
  0x21   :  { %v227_v39 = vmax.bf16 %v226_v28, %v81_v23  ;;  %286 = vst [vmem:[%s791_s1 + $0x30] sm:$0xff] %v207_v30  ;;  %v113_v43 = vld [vmem:[%s790_s0 + $0x348] sm:$0xff]  ;;  %v98_v44 = vld [vmem:[%s790_s0 + $0x2d0] sm:$0xff]  ;;  %v67_v46 = vld [vmem:[%s790_s0 + $0x1d8] sm:$0xff] }
  0x22   :  { %v221_v42 = vmax.bf16 %v220_v31, %v112_v26  ;;  %v234_v45 = vmax.bf16 %v233_v32, %v66_v29  ;;  %v215_v47 = vmax.bf16 %v214_v36, %v143_v21  ;;  %v241_v49 = vmax.bf16 %v240_v41, %v51_v35  ;;  %v20_v50 = vld [vmem:[%s790_s0 + $0x60] sm:$0xff]  ;;  %v129_v54 = vld [vmem:[%s790_s0 + $0x3c8] sm:$0xff]  ;;  %v83_v57 = vld [vmem:[%s790_s0 + $0x258] sm:$0xff] }
  0x23   :  { %v228_v48 = vmax.bf16 %v227_v39, %v97_v27  ;;  %v36_v51 = vld [vmem:[%s790_s0 + $0xe0] sm:$0xff]  ;;  %v145_v55 = vld [vmem:[%s790_s0 + $0x448] sm:$0xff]  ;;  %v114_v60 = vld [vmem:[%s790_s0 + $0x350] sm:$0xff] }
  0x24   :  { %v52_v52 = vld [vmem:[%s790_s0 + $0x160] sm:$0xff]  ;;  %v222_v53 = vmax.bf16 %v221_v42, %v128_v37  ;;  %v235_v56 = vmax.bf16 %v234_v45, %v82_v40  ;;  %v248_v58 = vmax.bf16 %v36_v51, %v20_v50  ;;  %287 = vst [vmem:[%s791_s1 + $0x38] sm:$0xff] %v215_v47  ;;  %v99_v61 = vld [vmem:[%s790_s0 + $0x2d8] sm:$0xff]  ;;  %v242_v62 = vmax.bf16 %v241_v49, %v67_v46  ;;  %v21_v3 = vld [vmem:[%s790_s0 + $0x68] sm:$0xff] }
  0x25   :  { %v229_v59 = vmax.bf16 %v228_v48, %v113_v43  ;;  %v68_v63 = vld [vmem:[%s790_s0 + $0x1e0] sm:$0xff]  ;;  %v37_v4 = vld [vmem:[%s790_s0 + $0xe8] sm:$0xff]  ;;  %v130_v7 = vld [vmem:[%s790_s0 + $0x3d0] sm:$0xff] }
  0x26   :  { %v223_v0 = vmax.bf16 %v222_v53, %v144_v38  ;;  %v236_v1 = vmax.bf16 %v235_v56, %v98_v44  ;;  %v249_v2 = vmax.bf16 %v248_v58, %v52_v52  ;;  %v53_v5 = vld [vmem:[%s790_s0 + $0x168] sm:$0xff]  ;;  %v146_v8 = vld [vmem:[%s790_s0 + $0x450] sm:$0xff]  ;;  %v243_v9 = vmax.bf16 %v242_v62, %v83_v57  ;;  %v84_v10 = vld [vmem:[%s790_s0 + $0x260] sm:$0xff] }
  0x27   :  { %v230_v6 = vmax.bf16 %v229_v59, %v129_v54  ;;  %v256_v11 = vmax.bf16 %v37_v4, %v21_v3  ;;  %v115_v13 = vld [vmem:[%s790_s0 + $0x358] sm:$0xff]  ;;  %v100_v14 = vld [vmem:[%s790_s0 + $0x2e0] sm:$0xff]  ;;  %v69_v16 = vld [vmem:[%s790_s0 + $0x1e8] sm:$0xff] }
  0x28   :  { %288 = vst [vmem:[%s791_s1 + $0x40] sm:$0xff] %v223_v0  ;;  %v237_v12 = vmax.bf16 %v236_v1, %v114_v60  ;;  %v250_v15 = vmax.bf16 %v249_v2, %v68_v63  ;;  %v244_v18 = vmax.bf16 %v243_v9, %v99_v61  ;;  %v22_v20 = vld [vmem:[%s790_s0 + $0x70] sm:$0xff]  ;;  %v131_v24 = vld [vmem:[%s790_s0 + $0x3d8] sm:$0xff]  ;;  %v85_v27 = vld [vmem:[%s790_s0 + $0x268] sm:$0xff] }
  0x29   :  { %v231_v17 = vmax.bf16 %v230_v6, %v145_v55  ;;  %v257_v19 = vmax.bf16 %v256_v11, %v53_v5  ;;  %v38_v21 = vld [vmem:[%s790_s0 + $0xf0] sm:$0xff]  ;;  %v147_v25 = vld [vmem:[%s790_s0 + $0x458] sm:$0xff]  ;;  %v116_v30 = vld [vmem:[%s790_s0 + $0x360] sm:$0xff] }
  0x2a   :  { %v54_v22 = vld [vmem:[%s790_s0 + $0x170] sm:$0xff]  ;;  %v238_v23 = vmax.bf16 %v237_v12, %v130_v7  ;;  %v251_v26 = vmax.bf16 %v250_v15, %v84_v10  ;;  %v264_v28 = vmax.bf16 %v38_v21, %v22_v20  ;;  %v245_v29 = vmax.bf16 %v244_v18, %v115_v13  ;;  %v101_v31 = vld [vmem:[%s790_s0 + $0x2e8] sm:$0xff]  ;;  %v23_v37 = vld [vmem:[%s790_s0 + $0x78] sm:$0xff] }
  0x2b   :  { %289 = vst [vmem:[%s791_s1 + $0x48] sm:$0xff] %v231_v17  ;;  %v258_v32 = vmax.bf16 %v257_v19, %v69_v16  ;;  %v70_v33 = vld [vmem:[%s790_s0 + $0x1f0] sm:$0xff]  ;;  %v39_v38 = vld [vmem:[%s790_s0 + $0xf8] sm:$0xff]  ;;  %v132_v41 = vld [vmem:[%s790_s0 + $0x3e0] sm:$0xff] }
  0x2c   :  { %v239_v34 = vmax.bf16 %v238_v23, %v146_v8  ;;  %v252_v35 = vmax.bf16 %v251_v26, %v100_v14  ;;  %v265_v36 = vmax.bf16 %v264_v28, %v54_v22  ;;  %v55_v39 = vld [vmem:[%s790_s0 + $0x178] sm:$0xff]  ;;  %v246_v40 = vmax.bf16 %v245_v29, %v131_v24  ;;  %v86_v43 = vld [vmem:[%s790_s0 + $0x270] sm:$0xff]  ;;  %v117_v46 = vld [vmem:[%s790_s0 + $0x368] sm:$0xff] }
  0x2d   :  { %v259_v42 = vmax.bf16 %v258_v32, %v85_v27  ;;  %v272_v44 = vmax.bf16 %v39_v38, %v23_v37  ;;  %v71_v48 = vld [vmem:[%s790_s0 + $0x1f8] sm:$0xff]  ;;  %v148_v50 = vld [vmem:[%s790_s0 + $0x460] sm:$0xff]  ;;  %v102_v52 = vld [vmem:[%s790_s0 + $0x2f0] sm:$0xff] }
  0x2e   :  { %290 = vst [vmem:[%s791_s1 + $0x50] sm:$0xff] %v239_v34  ;;  %v253_v45 = vmax.bf16 %v252_v35, %v116_v30  ;;  %v266_v47 = vmax.bf16 %v265_v36, %v70_v33  ;;  %v247_v49 = vmax.bf16 %v246_v40, %v147_v25  ;;  %v133_v55 = vld [vmem:[%s790_s0 + $0x3e8] sm:$0xff]  ;;  %v87_v57 = vld [vmem:[%s790_s0 + $0x278] sm:$0xff]  ;;  %v118_v59 = vld [vmem:[%s790_s0 + $0x370] sm:$0xff] }
  0x2f   :  { %v260_v51 = vmax.bf16 %v259_v42, %v101_v31  ;;  %v273_v53 = vmax.bf16 %v272_v44, %v55_v39  ;;  %v149_v62 = vld [vmem:[%s790_s0 + $0x468] sm:$0xff]  ;;  %v103_v0 = vld [vmem:[%s790_s0 + $0x2f8] sm:$0xff]  ;;  %v134_v2 = vld [vmem:[%s790_s0 + $0x3f0] sm:$0xff] }
  0x30   :  { %v254_v54 = vmax.bf16 %v253_v45, %v132_v41  ;;  %v267_v56 = vmax.bf16 %v266_v47, %v86_v43  ;;  %291 = vst [vmem:[%s791_s1 + $0x58] sm:$0xff] %v247_v49  ;;  %v119_v5 = vld [vmem:[%s790_s0 + $0x378] sm:$0xff]  ;;  %v150_v7 = vld [vmem:[%s790_s0 + $0x470] sm:$0xff] }
  0x31   :  { %v261_v58 = vmax.bf16 %v260_v51, %v117_v46  ;;  %v274_v60 = vmax.bf16 %v273_v53, %v71_v48  ;;  %v135_v10 = vld [vmem:[%s790_s0 + $0x3f8] sm:$0xff] }
  0x32   :  { %v255_v61 = vmax.bf16 %v254_v54, %v148_v50  ;;  %v268_v63 = vmax.bf16 %v267_v56, %v102_v52  ;;  %v151_v13 = vld [vmem:[%s790_s0 + $0x478] sm:$0xff] }
  0x33   :  { %v262_v1 = vmax.bf16 %v261_v58, %v133_v55  ;;  %v275_v3 = vmax.bf16 %v274_v60, %v87_v57 }
  0x34   :  { %292 = vst [vmem:[%s791_s1 + $0x60] sm:$0xff] %v255_v61  ;;  %v269_v4 = vmax.bf16 %v268_v63, %v118_v59 }
  0x35   :  { %v263_v6 = vmax.bf16 %v262_v1, %v149_v62  ;;  %v276_v8 = vmax.bf16 %v275_v3, %v103_v0 }
  0x36   :  { %v270_v9 = vmax.bf16 %v269_v4, %v134_v2 }
  0x37   :  { %293 = vst [vmem:[%s791_s1 + $0x68] sm:$0xff] %v263_v6  ;;  %v277_v11 = vmax.bf16 %v276_v8, %v119_v5 }
  0x38   :  { %v271_v12 = vmax.bf16 %v270_v9, %v150_v7 }
  0x39   :  { %v278_v14 = vmax.bf16 %v277_v11, %v135_v10 }
  0x3a   :  { %294 = vst [vmem:[%s791_s1 + $0x70] sm:$0xff] %v271_v12 }
  0x3b   :  { %v279_v15 = vmax.bf16 %v278_v14, %v151_v13 }
  0x3d   :  { %295 = vst [vmem:[%s791_s1 + $0x78] sm:$0xff] %v279_v15 }

// kernel: resnet_forward.16
= control target key start
LH: loop header
LB: loop body
LE: loop exit
PB: predicated region body
PF: predicated region fallthrough
CT: control target
= control target key end

     0   :  { %s1966_s12 = smov 0   ;;  %s1968_s13 = smov 0   ;;  %s2235_s0 = inlined_call_operand.vmem [shape: bf16[512,768], index: 0, kind: input, shape index: {}]   ;;  %s2236_s1 = inlined_call_operand.vmem [shape: bf16[768,128], index: 1, kind: input, shape index: {}]   ;;  %s2237_s2 = inlined_call_operand.vmem [shape: f32[1,128], index: 2, kind: input, shape index: {}]   ;;  %s2238_s3 = inlined_call_operand.vmem [shape: bf16[512,128], index: 3, kind: output, shape index: {}]  }
   0x1   :  { %s1970_s14 = smov 0   ;;  %s1972_s15 = smov 0  }
   0x2   :  { %s1974_s16 = smov 0   ;;  %s1976_s17 = smov 0  }
   0x3   :  { %s1978_s18 = smov 0  }
   0x4 LB: > { %s25_s19 = sadd.s32 1, %s1935_s16  ;;  %s32_s20 = sadd.s32 1, %s1939_s17  ;;  %s1943_s18 = sphi %s1978_s18, %s13_s18   ;;  %s1939_s17 = sphi %s1976_s17, %s2244_s17   ;;  %s1935_s16 = sphi %s1974_s16, %s2243_s16   ;;  %s1931_s15 = sphi %s1972_s15, %s2242_s15   ;;  %s1927_s14 = sphi %s1970_s14, %s2241_s14   ;;  %s1923_s13 = sphi %s1968_s13, %s2240_s13   ;;  %s1919_s12 = sphi %s1966_s12, %s2239_s12  }
   0x5   : > { %p26_p0 = scmp.ge.s32.totalorder %s25_s19, 3  ;;  %p48_p1 = scmp.ne.s32.totalorder %s1923_s13, %s1919_s12 }
   0x6   : > { %p49_p2 = scmp.eq.s32.totalorder %s1943_s18, 0  ;;  %s41_s24 = sadd.s32 1, %s1923_s13 }
   0x7   : > { %s2246_s19 = smov (%p26_p0, %s25_s19), 0  ;;  %s2248_s20 = smov (!%p26_p0, %s32_s20), %s1939_s17 }
   0x8   : > { %p50_p3 = por %p49_p2, %p48_p1  ;;  %p34_p4 = scmp.ge.s32.totalorder %s2248_s20, 2 }
   0x9   : > { %s37_s21 = ssub.s32 %s1935_s16, %s2246_s19  ;;  %p1415_p6 = scmp.ge.s32.totalorder %s1943_s18, 6 }
   0xa   : > { %s2250_s20 = smov (%p34_p4, %s2248_s20), 0 }
   0xb   : > { %s36_s22 = ssub.s32 %s1939_s17, %s2250_s20  ;;  %162 = sbr.rel (%p1415_p6) target bundleno = 40 (0x28), region = 20 }
   0xc   : > { %s38_s23 = sor.u32 %s37_s21, %s36_s22 }
   0xd   : > { %p39_p5 = scmp.eq.s32.totalorder %s38_s23, 0 }
   0xf   : > { %s2017_s25 = scalar_select %p39_p5, %s1923_s13, %s41_s24  }
  0x10   : > { %165 = sbr.rel (!%p50_p3) target bundleno = 40 (0x28), region = 24  ;;  %s167_s26 = sand.u32 (%p50_p3), 1, %s1923_s13  }
  0x11   : > { %s1418_s27 = sshll.u32 (%p50_p3), %s1935_s16, 1  ;;  %s1416_s28 = sshll.u32 (%p50_p3), %s167_s26, 8 }
  0x12   : > { %s1767_s29 = smul.u32 (%p50_p3), 192, %s1939_s17  ;;  %s2031_s8 = scalar_lea.vmem (%p50_p3), [#allocation3], %s1416_s28 }
  0x14   : > { %s173_s30 = sadd.s32 (%p50_p3), %s1767_s29, %s1418_s27 }
  0x15   : > { %s1420_s4 = sshll.u32 %s173_s30, 2 }
  0x16   : > { %s2026_s7 = scalar_lea.vmem %s2235_s0, %s1420_s4 }
  0x17   : > { %v266_v0 = vld [vmem:[%s2026_s7] sm:$0xff]  ;;  %v268_v1 = vld [vmem:[%s2026_s7 + $0x18] sm:$0xff]  ;;  %v270_v2 = vld [vmem:[%s2026_s7 + $0x30] sm:$0xff] }
  0x18   : > { %267 = vst [vmem:[%s2031_s8] sm:$0xff] %v266_v0  ;;  %269 = vst [vmem:[%s2031_s8 + $0x8] sm:$0xff] %v268_v1  ;;  %v272_v3 = vld [vmem:[%s2026_s7 + $0x48] sm:$0xff]  ;;  %v274_v4 = vld [vmem:[%s2026_s7 + $0x60] sm:$0xff] }
  0x19   : > { %271 = vst [vmem:[%s2031_s8 + $0x10] sm:$0xff] %v270_v2  ;;  %v276_v5 = vld [vmem:[%s2026_s7 + $0x78] sm:$0xff]  ;;  %273 = vst [vmem:[%s2031_s8 + $0x18] sm:$0xff] %v272_v3  ;;  %v278_v6 = vld [vmem:[%s2026_s7 + $0x90] sm:$0xff] }
  0x1a   : > { %275 = vst [vmem:[%s2031_s8 + $0x20] sm:$0xff] %v274_v4  ;;  %277 = vst [vmem:[%s2031_s8 + $0x28] sm:$0xff] %v276_v5  ;;  %v280_v7 = vld [vmem:[%s2026_s7 + $0xa8] sm:$0xff]  ;;  %v282_v8 = vld [vmem:[%s2026_s7 + $0xc0] sm:$0xff] }
  0x1b   : > { %279 = vst [vmem:[%s2031_s8 + $0x30] sm:$0xff] %v278_v6  ;;  %281 = vst [vmem:[%s2031_s8 + $0x38] sm:$0xff] %v280_v7  ;;  %v284_v9 = vld [vmem:[%s2026_s7 + $0xd8] sm:$0xff]  ;;  %v286_v10 = vld [vmem:[%s2026_s7 + $0xf0] sm:$0xff] }
  0x1c   : > { %283 = vst [vmem:[%s2031_s8 + $0x40] sm:$0xff] %v282_v8  ;;  %v288_v11 = vld [vmem:[%s2026_s7 + $0x108] sm:$0xff]  ;;  %285 = vst [vmem:[%s2031_s8 + $0x48] sm:$0xff] %v284_v9  ;;  %v290_v12 = vld [vmem:[%s2026_s7 + $0x120] sm:$0xff] }
  0x1d   : > { %287 = vst [vmem:[%s2031_s8 + $0x50] sm:$0xff] %v286_v10  ;;  %289 = vst [vmem:[%s2031_s8 + $0x58] sm:$0xff] %v288_v11  ;;  %v292_v13 = vld [vmem:[%s2026_s7 + $0x138] sm:$0xff]  ;;  %v294_v14 = vld [vmem:[%s2026_s7 + $0x150] sm:$0xff] }
  0x1e   : > { %291 = vst [vmem:[%s2031_s8 + $0x60] sm:$0xff] %v290_v12  ;;  %293 = vst [vmem:[%s2031_s8 + $0x68] sm:$0xff] %v292_v13  ;;  %v296_v15 = vld [vmem:[%s2026_s7 + $0x168] sm:$0xff]  ;;  %v298_v16 = vld [vmem:[%s2026_s7 + $0x180] sm:$0xff] }
  0x1f   : > { %295 = vst [vmem:[%s2031_s8 + $0x70] sm:$0xff] %v294_v14  ;;  %v300_v17 = vld [vmem:[%s2026_s7 + $0x198] sm:$0xff]  ;;  %297 = vst [vmem:[%s2031_s8 + $0x78] sm:$0xff] %v296_v15  ;;  %v302_v18 = vld [vmem:[%s2026_s7 + $0x1b0] sm:$0xff] }
  0x20   : > { %299 = vst [vmem:[%s2031_s8 + $0x80] sm:$0xff] %v298_v16  ;;  %301 = vst [vmem:[%s2031_s8 + $0x88] sm:$0xff] %v300_v17  ;;  %v304_v19 = vld [vmem:[%s2026_s7 + $0x1c8] sm:$0xff]  ;;  %v306_v20 = vld [vmem:[%s2026_s7 + $0x1e0] sm:$0xff] }
  0x21   : > { %303 = vst [vmem:[%s2031_s8 + $0x90] sm:$0xff] %v302_v18  ;;  %305 = vst [vmem:[%s2031_s8 + $0x98] sm:$0xff] %v304_v19  ;;  %v308_v21 = vld [vmem:[%s2026_s7 + $0x1f8] sm:$0xff]  ;;  %v310_v22 = vld [vmem:[%s2026_s7 + $0x210] sm:$0xff] }
  0x22   : > { %307 = vst [vmem:[%s2031_s8 + $0xa0] sm:$0xff] %v306_v20  ;;  %v312_v23 = vld [vmem:[%s2026_s7 + $0x228] sm:$0xff]  ;;  %309 = vst [vmem:[%s2031_s8 + $0xa8] sm:$0xff] %v308_v21  ;;  %v314_v24 = vld [vmem:[%s2026_s7 + $0x240] sm:$0xff] }
  0x23   : > { %311 = vst [vmem:[%s2031_s8 + $0xb0] sm:$0xff] %v310_v22  ;;  %313 = vst [vmem:[%s2031_s8 + $0xb8] sm:$0xff] %v312_v23  ;;  %v316_v25 = vld [vmem:[%s2026_s7 + $0x258] sm:$0xff]  ;;  %v318_v26 = vld [vmem:[%s2026_s7 + $0x270] sm:$0xff] }
  0x24   : > { %315 = vst [vmem:[%s2031_s8 + $0xc0] sm:$0xff] %v314_v24  ;;  %317 = vst [vmem:[%s2031_s8 + $0xc8] sm:$0xff] %v316_v25  ;;  %v320_v27 = vld [vmem:[%s2026_s7 + $0x288] sm:$0xff]  ;;  %v322_v28 = vld [vmem:[%s2026_s7 + $0x2a0] sm:$0xff] }
  0x25   : > { %319 = vst [vmem:[%s2031_s8 + $0xd0] sm:$0xff] %v318_v26  ;;  %v324_v29 = vld [vmem:[%s2026_s7 + $0x2b8] sm:$0xff]  ;;  %321 = vst [vmem:[%s2031_s8 + $0xd8] sm:$0xff] %v320_v27  ;;  %v326_v30 = vld [vmem:[%s2026_s7 + $0x2d0] sm:$0xff] }
  0x26   : > { %323 = vst [vmem:[%s2031_s8 + $0xe0] sm:$0xff] %v322_v28  ;;  %325 = vst [vmem:[%s2031_s8 + $0xe8] sm:$0xff] %v324_v29  ;;  %v328_v31 = vld [vmem:[%s2026_s7 + $0x2e8] sm:$0xff] }
  0x27   : > { %327 = vst [vmem:[%s2031_s8 + $0xf0] sm:$0xff] %v326_v30  ;;  %329 = vst [vmem:[%s2031_s8 + $0xf8] sm:$0xff] %v328_v31 }
  0x28 PF: > { %p1421_p7 = scmp.ge.s32.totalorder %s1943_s18, 1  ;;  %p346_p8 = scmp.lt.s32.totalorder %s1943_s18, 7 }
  0x2a   : > { %p347_p9 = pnand %p1421_p7, %p346_p8 }
  0x2b   : > { %s353_s9 = sand.u32 (!%p347_p9), 1, %s1919_s12   ;;  %s1423_s10 = sshll.u32 (!%p347_p9), %s1927_s14, 5 }
  0x2c   : > { %350 = sbr.rel (%p347_p9) target bundleno = 393 (0x189), region = 66  ;;  %s1422_s11 = sshll.u32 (!%p347_p9), %s353_s9, 8 }
  0x2d   : > { %p393_p10 = scmp.lt.s32.totalorder (!%p347_p9), %s1423_s10, 95  ;;  %s1425_s21 = sshll.u32 (!%p347_p9), %s1931_s15, 5 }
  0x2e   : > { %p405_p11 = scmp.lt.s32.totalorder (!%p347_p9), %s1425_s21, 63  ;;  %s2109_s12 = scalar_lea.vmem (!%p347_p9), [#allocation3], %s1422_s11 }
  0x2f   : > { %p1427_p12 = scmp.ne.s32.totalorder (!%p347_p9), %s1927_s14, 0 }
  0x31   : > { %s2252_s10 = smov (!%p393_p10, %s1423_s10), 95  ;;  %s2254_s21 = smov (!%p405_p11, %s1425_s21), 63 }
  0x32   : > { %s1424_s22 = sshll.u32 %s2252_s10, 2  ;;  %s1426_s27 = sshll.u32 %s2254_s21, 2 }
  0x33   : > { %s2102_s26 = scalar_lea.vmem %s2236_s1, %s1424_s22  ;;  %s2107_s30 = scalar_lea.vmem %s2238_s3, %s1426_s27 }
  0x34   : > { %417 = sbr.rel (%p1427_p12) target bundleno = 74 (0x4a), region = 74 }
  0x39   : > { %v1945_v32 = vmov 0.0  }
  0x3a   : > { %418 = vst [vmem:[#allocation2 + $0xb0] sm:$0xff] %v1945_v32  ;;  %419 = vst [vmem:[#allocation2] sm:$0xff] %v1945_v32 }
  0x3b   : > { %420 = vst [vmem:[#allocation2 + $0xd8] sm:$0xff] %v1945_v32  ;;  %421 = vst [vmem:[#allocation2 + $0x18] sm:$0xff] %v1945_v32 }
  0x3c   : > { %422 = vst [vmem:[#allocation2 + $0x50] sm:$0xff] %v1945_v32  ;;  %423 = vst [vmem:[#allocation2 + $0x68] sm:$0xff] %v1945_v32 }
  0x3d   : > { %424 = vst [vmem:[#allocation2 + $0x30] sm:$0xff] %v1945_v32  ;;  %425 = vst [vmem:[#allocation2 + $0x48] sm:$0xff] %v1945_v32 }
  0x3e   : > { %426 = vst [vmem:[#allocation2 + $0x80] sm:$0xff] %v1945_v32  ;;  %427 = vst [vmem:[#allocation2 + $0x88] sm:$0xff] %v1945_v32 }
  0x3f   : > { %428 = vst [vmem:[#allocation2 + $0xe8] sm:$0xff] %v1945_v32  ;;  %429 = vst [vmem:[#allocation2 + $0xb8] sm:$0xff] %v1945_v32 }
  0x40   : > { %430 = vst [vmem:[#allocation2 + $0x60] sm:$0xff] %v1945_v32  ;;  %431 = vst [vmem:[#allocation2 + $0xf0] sm:$0xff] %v1945_v32 }
  0x41   : > { %432 = vst [vmem:[#allocation2 + $0x8] sm:$0xff] %v1945_v32  ;;  %433 = vst [vmem:[#allocation2 + $0x78] sm:$0xff] %v1945_v32 }
  0x42   : > { %434 = vst [vmem:[#allocation2 + $0x38] sm:$0xff] %v1945_v32  ;;  %435 = vst [vmem:[#allocation2 + $0x58] sm:$0xff] %v1945_v32 }
  0x43   : > { %436 = vst [vmem:[#allocation2 + $0x40] sm:$0xff] %v1945_v32  ;;  %437 = vst [vmem:[#allocation2 + $0xc8] sm:$0xff] %v1945_v32 }
  0x44   : > { %438 = vst [vmem:[#allocation2 + $0xe0] sm:$0xff] %v1945_v32  ;;  %439 = vst [vmem:[#allocation2 + $0x90] sm:$0xff] %v1945_v32 }
  0x45   : > { %440 = vst [vmem:[#allocation2 + $0x70] sm:$0xff] %v1945_v32  ;;  %441 = vst [vmem:[#allocation2 + $0xc0] sm:$0xff] %v1945_v32 }
  0x46   : > { %442 = vst [vmem:[#allocation2 + $0xa8] sm:$0xff] %v1945_v32  ;;  %443 = vst [vmem:[#allocation2 + $0xd0] sm:$0xff] %v1945_v32 }
  0x47   : > { %444 = vst [vmem:[#allocation2 + $0x10] sm:$0xff] %v1945_v32  ;;  %445 = vst [vmem:[#allocation2 + $0x28] sm:$0xff] %v1945_v32 }
  0x48   : > { %446 = vst [vmem:[#allocation2 + $0xa0] sm:$0xff] %v1945_v32  ;;  %447 = vst [vmem:[#allocation2 + $0xf8] sm:$0xff] %v1945_v32 }
  0x49   : > { %448 = vst [vmem:[#allocation2 + $0x20] sm:$0xff] %v1945_v32  ;;  %449 = vst [vmem:[#allocation2 + $0x98] sm:$0xff] %v1945_v32 }
  0x4a PF: > { %v1825_v33 = vld [vmem:[%s2102_s26 + $0x78] sm:$0xff]   ;;  %v1827_v35 = vld [vmem:[%s2102_s26 + $0x70] sm:$0xff]   ;;  %v1829_v37 = vld [vmem:[%s2102_s26 + $0x68] sm:$0xff]   ;;  %p1476_p13 = scmp.ne.s32.totalorder %s1927_s14, 2 }
  0x4b   : > { %v1826_v34 = vld [vmem:[%s2102_s26 + $0x38] sm:$0xff]   ;;  %1639 = vmatprep.subr.bf16.mxu0 %v1825_v33  ;;  %1751 = vmatprep.subr.bf16.mxu1 %v1825_v33  ;;  %v1828_v36 = vld [vmem:[%s2102_s26 + $0x30] sm:$0xff]   ;;  %v1830_v38 = vld [vmem:[%s2102_s26 + $0x28] sm:$0xff]  }
  0x4c   : > { %1640 = vmatpush3.bf16.msra.mxu0 %v1826_v34  ;;  %1759 = vmatpush3.bf16.msra.mxu1 %v1826_v34  ;;  %v1831_v39 = vld [vmem:[%s2102_s26 + $0x60] sm:$0xff]   ;;  %v1833_v41 = vld [vmem:[%s2102_s26 + $0x58] sm:$0xff]   ;;  %v1835_v43 = vld [vmem:[%s2102_s26 + $0x50] sm:$0xff]  }
  0x4d   : > { %1641 = vmatprep.subr.bf16.mxu0 %v1827_v35  ;;  %1752 = vmatprep.subr.bf16.mxu1 %v1827_v35  ;;  %v1832_v40 = vld [vmem:[%s2102_s26 + $0x20] sm:$0xff]   ;;  %v1834_v42 = vld [vmem:[%s2102_s26 + $0x18] sm:$0xff]   ;;  %v1836_v46 = vld [vmem:[%s2102_s26 + $0x10] sm:$0xff]  }
  0x4e   : > { %v1843_v44 = vld [vmem:[%s2109_s12 + $0x4] ss:$8 sps:$4 sm:$0xff]   ;;  %v1841_v51 = vld [vmem:[%s2109_s12] ss:$8 sps:$4 sm:$0xff]   ;;  %v1847_v53 = vld [vmem:[%s2109_s12 + $0x14] ss:$8 sps:$4 sm:$0xff]  }
  0x4f   : > { %v1846_v45 = vld [vmem:[%s2109_s12 + $0x84] ss:$8 sps:$4 sm:$0xff]   ;;  %834 = vmatprep.mubr.bf16.mxu0 %v1843_v44  ;;  %v1844_v52 = vld [vmem:[%s2109_s12 + $0x80] ss:$8 sps:$4 sm:$0xff]   ;;  %v1849_v54 = vld [vmem:[%s2109_s12 + $0x94] ss:$8 sps:$4 sm:$0xff]  }
  0x50   : > { %1642 = vmatpush3.bf16.msra.mxu0 %v1828_v36  ;;  %1760 = vmatpush3.bf16.msra.mxu1 %v1828_v36  ;;  %v1837_v47 = vld [vmem:[%s2102_s26 + $0x48] sm:$0xff]   ;;  %v1839_v49 = vld [vmem:[%s2102_s26 + $0x40] sm:$0xff]   ;;  %v1851_v55 = vld [vmem:[%s2109_s12 + $0x10] ss:$8 sps:$4 sm:$0xff]  }
  0x51   : > { %1643 = vmatprep.subr.bf16.mxu0 %v1829_v37  ;;  %1753 = vmatprep.subr.bf16.mxu1 %v1829_v37  ;;  %v1838_v48 = vld [vmem:[%s2102_s26 + $0x8] sm:$0xff]   ;;  %v1840_v50 = vld [vmem:[%s2102_s26] sm:$0xff]   ;;  %v1852_v56 = vld [vmem:[%s2109_s12 + $0x90] ss:$8 sps:$4 sm:$0xff]  }
  0x52   : > { %898 = vmatprep.mubr.bf16.mxu1 %v1846_v45  ;;  %v1853_v57 = vld [vmem:[%s2109_s12 + $0x24] ss:$8 sps:$4 sm:$0xff]   ;;  %v1857_v59 = vld [vmem:[%s2109_s12 + $0x20] ss:$8 sps:$4 sm:$0xff]   ;;  %v1859_v61 = vld [vmem:[%s2109_s12 + $0x34] ss:$8 sps:$4 sm:$0xff]  }
  0x53   : > { %v1855_v58 = vld [vmem:[%s2109_s12 + $0xa4] ss:$8 sps:$4 sm:$0xff]   ;;  %v1858_v60 = vld [vmem:[%s2109_s12 + $0xa0] ss:$8 sps:$4 sm:$0xff]   ;;  %v1861_v62 = vld [vmem:[%s2109_s12 + $0xb4] ss:$8 sps:$4 sm:$0xff]  }
  0x54   : > { %1644 = vmatpush3.bf16.msra.mxu0 %v1830_v38  ;;  %1761 = vmatpush3.bf16.msra.mxu1 %v1830_v38  ;;  %v1863_v63 = vld [vmem:[%s2109_s12 + $0x30] ss:$8 sps:$4 sm:$0xff]   ;;  %v1865_v1 = vld [vmem:[%s2109_s12 + $0x44] ss:$8 sps:$4 sm:$0xff]   ;;  %v1869_v3 = vld [vmem:[%s2109_s12 + $0x40] ss:$8 sps:$4 sm:$0xff]  }
  0x55   : > { %1645 = vmatprep.subr.bf16.mxu0 %v1831_v39  ;;  %1754 = vmatprep.subr.bf16.mxu1 %v1831_v39  ;;  %v1864_v0 = vld [vmem:[%s2109_s12 + $0xb0] ss:$8 sps:$4 sm:$0xff]   ;;  %v1867_v2 = vld [vmem:[%s2109_s12 + $0xc4] ss:$8 sps:$4 sm:$0xff]   ;;  %v1870_v4 = vld [vmem:[%s2109_s12 + $0xc0] ss:$8 sps:$4 sm:$0xff]  }
  0x56   : > { %v1871_v5 = vld [vmem:[%s2109_s12 + $0x54] ss:$8 sps:$4 sm:$0xff]   ;;  %v1875_v7 = vld [vmem:[%s2109_s12 + $0x50] ss:$8 sps:$4 sm:$0xff]   ;;  %v1877_v9 = vld [vmem:[%s2109_s12 + $0x64] ss:$8 sps:$4 sm:$0xff]  }
  0x57   : > { %v1873_v6 = vld [vmem:[%s2109_s12 + $0xd4] ss:$8 sps:$4 sm:$0xff]   ;;  %v1876_v8 = vld [vmem:[%s2109_s12 + $0xd0] ss:$8 sps:$4 sm:$0xff]   ;;  %v1879_v10 = vld [vmem:[%s2109_s12 + $0xe4] ss:$8 sps:$4 sm:$0xff]  }
  0x58   : > { %1646 = vmatpush3.bf16.msra.mxu0 %v1832_v40  ;;  %1762 = vmatpush3.bf16.msra.mxu1 %v1832_v40  ;;  %v1881_v11 = vld [vmem:[%s2109_s12 + $0x60] ss:$8 sps:$4 sm:$0xff]   ;;  %v1883_v13 = vld [vmem:[%s2109_s12 + $0x74] ss:$8 sps:$4 sm:$0xff]   ;;  %v1887_v15 = vld [vmem:[%s2109_s12 + $0x70] ss:$8 sps:$4 sm:$0xff]  }
  0x59   : > { %1647 = vmatprep.subr.bf16.mxu0 %v1833_v41  ;;  %1755 = vmatprep.subr.bf16.mxu1 %v1833_v41  ;;  %v1882_v12 = vld [vmem:[%s2109_s12 + $0xe0] ss:$8 sps:$4 sm:$0xff]   ;;  %v1885_v14 = vld [vmem:[%s2109_s12 + $0xf4] ss:$8 sps:$4 sm:$0xff]   ;;  %v1888_v16 = vld [vmem:[%s2109_s12 + $0xf0] ss:$8 sps:$4 sm:$0xff]  }
  0x5a   : > { %v450_v19 = vld [vmem:[#allocation2 + $0xb0] sm:$0xff]  ;;  %v466_v21 = vld [vmem:[#allocation2 + $0x38] sm:$0xff]  ;;  %v451_v29 = vld [vmem:[#allocation2] sm:$0xff] }
  0x5b   : > { %v467_v31 = vld [vmem:[#allocation2 + $0x58] sm:$0xff]  ;;  %v468_v41 = vld [vmem:[#allocation2 + $0x40] sm:$0xff] }
  0x5c   : > { %1648 = vmatpush3.bf16.msra.mxu0 %v1834_v42  ;;  %1763 = vmatpush3.bf16.msra.mxu1 %v1834_v42  ;;  %v452_v39 = vld [vmem:[#allocation2 + $0xd8] sm:$0xff] }
  0x5d   : > { %1649 = vmatprep.subr.bf16.mxu0 %v1835_v43  ;;  %1756 = vmatprep.subr.bf16.mxu1 %v1835_v43 }
  0x60   : > { %1650 = vmatpush3.bf16.msra.mxu0 %v1836_v46  ;;  %1764 = vmatpush3.bf16.msra.mxu1 %v1836_v46 }
  0x61   : > { %1651 = vmatprep.subr.bf16.mxu0 %v1837_v47  ;;  %1757 = vmatprep.subr.bf16.mxu1 %v1837_v47 }
  0x64   : > { %1652 = vmatpush3.bf16.msra.mxu0 %v1838_v48  ;;  %1765 = vmatpush3.bf16.msra.mxu1 %v1838_v48 }
  0x65   : > { %1653 = vmatprep.subr.bf16.mxu0 %v1839_v49  ;;  %1758 = vmatprep.subr.bf16.mxu1 %v1839_v49  ;;  %v453_v49 = vld [vmem:[#allocation2 + $0x18] sm:$0xff] }
  0x68   : > { %1654 = vmatpush3.bf16.msra.mxu0 %v1840_v50  ;;  %1766 = vmatpush3.bf16.msra.mxu1 %v1840_v50 }
  0x6b   : > { %835 = vmatmul.mubr.bf16.vlgmr.msra.gmra.mxu0 %v1841_v51  ;;  %899 = vmatmul.mubr.bf16.vlgmr.msra.gmra.mxu1 %v1844_v52  ;;  %v469_v51 = vld [vmem:[#allocation2 + $0xc8] sm:$0xff] }
  0x6c   : > { %842 = vmatprep.mubr.bf16.mxu0 %v1847_v53  ;;  %906 = vmatprep.mubr.bf16.mxu1 %v1849_v54 }
  0x73   : > { %843 = vmatmul.mubr.bf16.gmra.mxu0 %v1851_v55  ;;  %907 = vmatmul.mubr.bf16.gmra.mxu1 %v1852_v56 }
  0x74   : > { %850 = vmatprep.mubr.bf16.mxu0 %v1853_v57  ;;  %914 = vmatprep.mubr.bf16.mxu1 %v1855_v58 }
  0x7b   : > { %851 = vmatmul.mubr.bf16.gmra.mxu0 %v1857_v59  ;;  %915 = vmatmul.mubr.bf16.gmra.mxu1 %v1858_v60  ;;  %v454_v59 = vld [vmem:[#allocation2 + $0x50] sm:$0xff] }
  0x7c   : > { %858 = vmatprep.mubr.bf16.mxu0 %v1859_v61  ;;  %922 = vmatprep.mubr.bf16.mxu1 %v1861_v62  ;;  %v470_v61 = vld [vmem:[#allocation2 + $0xe0] sm:$0xff] }
  0x83   : > { %859 = vmatmul.mubr.bf16.gmra.mxu0 %v1863_v63  ;;  %923 = vmatmul.mubr.bf16.gmra.mxu1 %v1864_v0 }
  0x84   : > { %866 = vmatprep.mubr.bf16.mxu0 %v1865_v1  ;;  %930 = vmatprep.mubr.bf16.mxu1 %v1867_v2 }
  0x8b   : > { %867 = vmatmul.mubr.bf16.gmra.mxu0 %v1869_v3  ;;  %931 = vmatmul.mubr.bf16.gmra.mxu1 %v1870_v4 }
  0x8c   : > { %874 = vmatprep.mubr.bf16.mxu0 %v1871_v5  ;;  %938 = vmatprep.mubr.bf16.mxu1 %v1873_v6  ;;  %v455_v5 = vld [vmem:[#allocation2 + $0x68] sm:$0xff] }
  0x93   : > { %875 = vmatmul.mubr.bf16.gmra.mxu0 %v1875_v7  ;;  %939 = vmatmul.mubr.bf16.gmra.mxu1 %v1876_v8  ;;  %v471_v7 = vld [vmem:[#allocation2 + $0x90] sm:$0xff] }
  0x94   : > { %882 = vmatprep.mubr.bf16.mxu0 %v1877_v9  ;;  %946 = vmatprep.mubr.bf16.mxu1 %v1879_v10 }
  0x9b   : > { %883 = vmatmul.mubr.bf16.gmra.mxu0 %v1881_v11  ;;  %947 = vmatmul.mubr.bf16.gmra.mxu1 %v1882_v12 }
  0x9c   : > { %890 = vmatprep.mubr.bf16.mxu0 %v1883_v13  ;;  %954 = vmatprep.mubr.bf16.mxu1 %v1885_v14 }
  0xa3   : > { %891 = vmatmul.mubr.bf16.gmra.mxu0 %v1887_v15  ;;  %955 = vmatmul.mubr.bf16.gmra.mxu1 %v1888_v16  ;;  %v456_v15 = vld [vmem:[#allocation2 + $0x30] sm:$0xff] }
 0x12b   : > { %v1655_v17 = vpop.f32.mrf.mxu0  ;;  %v1703_v18 = vpop.f32.mrf.mxu1 }
 0x12d   : > { %v1656_v20 = vpop.f32.mrf.mxu0  ;;  %v1704_v22 = vpop.f32.mrf.mxu1 }
 0x12e   : > { %v1657_v23 = vadd.f32 %v1656_v20, %v1655_v17  ;;  %v1705_v24 = vadd.f32 %v1704_v22, %v1703_v18  ;;  %v472_v17 = vld [vmem:[#allocation2 + $0x70] sm:$0xff] }
 0x12f   : > { %v1658_v25 = vpop.f32.mrf.mxu0  ;;  %v1706_v26 = vpop.f32.mrf.mxu1 }
 0x130   : > { %v963_v27 = vadd.f32 %v1657_v23, %v450_v19  ;;  %v979_v28 = vadd.f32 %v1705_v24, %v466_v21 }
 0x131   : > { %v1659_v30 = vpop.f32.mrf.mxu0  ;;  %v1707_v32 = vpop.f32.mrf.mxu1 }
 0x132   : > { %995 = vst [vmem:[#allocation2 + $0xb0] sm:$0xff] %v963_v27  ;;  %1011 = vst [vmem:[#allocation2 + $0x38] sm:$0xff] %v979_v28  ;;  %v1660_v33 = vadd.f32 %v1659_v30, %v1658_v25  ;;  %v1708_v34 = vadd.f32 %v1707_v32, %v1706_v26  ;;  %v457_v25 = vld [vmem:[#allocation2 + $0x48] sm:$0xff]  ;;  %v473_v27 = vld [vmem:[#allocation2 + $0xc0] sm:$0xff] }
 0x133   : > { %v1661_v35 = vpop.f32.mrf.mxu0  ;;  %v1709_v36 = vpop.f32.mrf.mxu1 }
 0x134   : > { %v964_v37 = vadd.f32 %v1660_v33, %v451_v29  ;;  %v980_v38 = vadd.f32 %v1708_v34, %v467_v31 }
 0x135   : > { %v1662_v40 = vpop.f32.mrf.mxu0  ;;  %v1710_v42 = vpop.f32.mrf.mxu1 }
 0x136   : > { %996 = vst [vmem:[#allocation2] sm:$0xff] %v964_v37  ;;  %1012 = vst [vmem:[#allocation2 + $0x58] sm:$0xff] %v980_v38  ;;  %v1663_v43 = vadd.f32 %v1662_v40, %v1661_v35  ;;  %v1711_v44 = vadd.f32 %v1710_v42, %v1709_v36  ;;  %v458_v35 = vld [vmem:[#allocation2 + $0x80] sm:$0xff]  ;;  %v474_v37 = vld [vmem:[#allocation2 + $0xa8] sm:$0xff] }
 0x137   : > { %v1664_v45 = vpop.f32.mrf.mxu0  ;;  %v1712_v46 = vpop.f32.mrf.mxu1 }
 0x138   : > { %v965_v47 = vadd.f32 %v1663_v43, %v452_v39  ;;  %v981_v48 = vadd.f32 %v1711_v44, %v468_v41 }
 0x139   : > { %v1665_v50 = vpop.f32.mrf.mxu0  ;;  %v1713_v52 = vpop.f32.mrf.mxu1 }
 0x13a   : > { %997 = vst [vmem:[#allocation2 + $0xd8] sm:$0xff] %v965_v47  ;;  %1013 = vst [vmem:[#allocation2 + $0x40] sm:$0xff] %v981_v48  ;;  %v1666_v53 = vadd.f32 %v1665_v50, %v1664_v45  ;;  %v1714_v54 = vadd.f32 %v1713_v52, %v1712_v46  ;;  %v459_v45 = vld [vmem:[#allocation2 + $0x88] sm:$0xff]  ;;  %v475_v47 = vld [vmem:[#allocation2 + $0xd0] sm:$0xff] }
 0x13b   : > { %v1667_v55 = vpop.f32.mrf.mxu0  ;;  %v1715_v56 = vpop.f32.mrf.mxu1 }
 0x13c   : > { %v966_v57 = vadd.f32 %v1666_v53, %v453_v49  ;;  %v982_v58 = vadd.f32 %v1714_v54, %v469_v51 }
 0x13d   : > { %v1668_v60 = vpop.f32.mrf.mxu0  ;;  %v1716_v62 = vpop.f32.mrf.mxu1 }
 0x13e   : > { %998 = vst [vmem:[#allocation2 + $0x18] sm:$0xff] %v966_v57  ;;  %1014 = vst [vmem:[#allocation2 + $0xc8] sm:$0xff] %v982_v58  ;;  %v1669_v63 = vadd.f32 %v1668_v60, %v1667_v55  ;;  %v1717_v0 = vadd.f32 %v1716_v62, %v1715_v56  ;;  %v460_v55 = vld [vmem:[#allocation2 + $0xe8] sm:$0xff]  ;;  %v476_v57 = vld [vmem:[#allocation2 + $0x10] sm:$0xff] }
 0x13f   : > { %v1670_v1 = vpop.f32.mrf.mxu0  ;;  %v1718_v2 = vpop.f32.mrf.mxu1 }
 0x140   : > { %v967_v3 = vadd.f32 %v1669_v63, %v454_v59  ;;  %v983_v4 = vadd.f32 %v1717_v0, %v470_v61 }
 0x141   : > { %v1671_v6 = vpop.f32.mrf.mxu0  ;;  %v1719_v8 = vpop.f32.mrf.mxu1 }
 0x142   : > { %999 = vst [vmem:[#allocation2 + $0x50] sm:$0xff] %v967_v3  ;;  %1015 = vst [vmem:[#allocation2 + $0xe0] sm:$0xff] %v983_v4  ;;  %v1672_v9 = vadd.f32 %v1671_v6, %v1670_v1  ;;  %v1720_v10 = vadd.f32 %v1719_v8, %v1718_v2  ;;  %v461_v1 = vld [vmem:[#allocation2 + $0xb8] sm:$0xff]  ;;  %v477_v3 = vld [vmem:[#allocation2 + $0x28] sm:$0xff] }
 0x143   : > { %v1673_v11 = vpop.f32.mrf.mxu0  ;;  %v1721_v12 = vpop.f32.mrf.mxu1 }
 0x144   : > { %v968_v13 = vadd.f32 %v1672_v9, %v455_v5  ;;  %v984_v14 = vadd.f32 %v1720_v10, %v471_v7 }
 0x145   : > { %v1674_v16 = vpop.f32.mrf.mxu0  ;;  %v1722_v18 = vpop.f32.mrf.mxu1 }
 0x146   : > { %1000 = vst [vmem:[#allocation2 + $0x68] sm:$0xff] %v968_v13  ;;  %1016 = vst [vmem:[#allocation2 + $0x90] sm:$0xff] %v984_v14  ;;  %v1675_v19 = vadd.f32 %v1674_v16, %v1673_v11  ;;  %v1723_v20 = vadd.f32 %v1722_v18, %v1721_v12  ;;  %v462_v11 = vld [vmem:[#allocation2 + $0x60] sm:$0xff] }
 0x147   : > { %v1676_v21 = vpop.f32.mrf.mxu0  ;;  %v1724_v22 = vpop.f32.mrf.mxu1  ;;  %v478_v13 = vld [vmem:[#allocation2 + $0xa0] sm:$0xff] }
 0x148   : > { %v969_v23 = vadd.f32 %v1675_v19, %v456_v15  ;;  %v985_v24 = vadd.f32 %v1723_v20, %v472_v17 }
 0x149   : > { %v1677_v26 = vpop.f32.mrf.mxu0  ;;  %v1725_v28 = vpop.f32.mrf.mxu1 }
 0x14a   : > { %1001 = vst [vmem:[#allocation2 + $0x30] sm:$0xff] %v969_v23  ;;  %1017 = vst [vmem:[#allocation2 + $0x70] sm:$0xff] %v985_v24  ;;  %v1678_v29 = vadd.f32 %v1677_v26, %v1676_v21  ;;  %v1726_v30 = vadd.f32 %v1725_v28, %v1724_v22  ;;  %v463_v21 = vld [vmem:[#allocation2 + $0xf0] sm:$0xff]  ;;  %v479_v23 = vld [vmem:[#allocation2 + $0xf8] sm:$0xff] }
 0x14b   : > { %v1679_v31 = vpop.f32.mrf.mxu0  ;;  %v1727_v32 = vpop.f32.mrf.mxu1 }
 0x14c   : > { %v970_v33 = vadd.f32 %v1678_v29, %v457_v25  ;;  %v986_v34 = vadd.f32 %v1726_v30, %v473_v27 }
 0x14d   : > { %v1680_v36 = vpop.f32.mrf.mxu0  ;;  %v1728_v38 = vpop.f32.mrf.mxu1 }
 0x14e   : > { %1002 = vst [vmem:[#allocation2 + $0x48] sm:$0xff] %v970_v33  ;;  %1018 = vst [vmem:[#allocation2 + $0xc0] sm:$0xff] %v986_v34  ;;  %v1681_v39 = vadd.f32 %v1680_v36, %v1679_v31  ;;  %v1729_v40 = vadd.f32 %v1728_v38, %v1727_v32  ;;  %v464_v31 = vld [vmem:[#allocation2 + $0x8] sm:$0xff]  ;;  %v480_v33 = vld [vmem:[#allocation2 + $0x20] sm:$0xff] }
 0x14f   : > { %v1682_v41 = vpop.f32.mrf.mxu0  ;;  %v1730_v42 = vpop.f32.mrf.mxu1 }
 0x150   : > { %v971_v43 = vadd.f32 %v1681_v39, %v458_v35  ;;  %v987_v44 = vadd.f32 %v1729_v40, %v474_v37 }
 0x151   : > { %v1683_v46 = vpop.f32.mrf.mxu0  ;;  %v1731_v48 = vpop.f32.mrf.mxu1 }
 0x152   : > { %1003 = vst [vmem:[#allocation2 + $0x80] sm:$0xff] %v971_v43  ;;  %1019 = vst [vmem:[#allocation2 + $0xa8] sm:$0xff] %v987_v44  ;;  %v1684_v49 = vadd.f32 %v1683_v46, %v1682_v41  ;;  %v1732_v50 = vadd.f32 %v1731_v48, %v1730_v42  ;;  %v465_v41 = vld [vmem:[#allocation2 + $0x78] sm:$0xff] }
 0x153   : > { %v1685_v51 = vpop.f32.mrf.mxu0  ;;  %v1733_v52 = vpop.f32.mrf.mxu1  ;;  %v481_v43 = vld [vmem:[#allocation2 + $0x98] sm:$0xff] }
 0x154   : > { %v972_v53 = vadd.f32 %v1684_v49, %v459_v45  ;;  %v988_v54 = vadd.f32 %v1732_v50, %v475_v47 }
 0x155   : > { %v1686_v56 = vpop.f32.mrf.mxu0  ;;  %v1734_v58 = vpop.f32.mrf.mxu1 }
 0x156   : > { %1004 = vst [vmem:[#allocation2 + $0x88] sm:$0xff] %v972_v53  ;;  %1020 = vst [vmem:[#allocation2 + $0xd0] sm:$0xff] %v988_v54  ;;  %v1687_v59 = vadd.f32 %v1686_v56, %v1685_v51  ;;  %v1735_v60 = vadd.f32 %v1734_v58, %v1733_v52 }
 0x157   : > { %v1688_v61 = vpop.f32.mrf.mxu0  ;;  %v1736_v62 = vpop.f32.mrf.mxu1 }
 0x158   : > { %v973_v63 = vadd.f32 %v1687_v59, %v460_v55  ;;  %v989_v0 = vadd.f32 %v1735_v60, %v476_v57 }
 0x159   : > { %v1689_v2 = vpop.f32.mrf.mxu0  ;;  %v1737_v4 = vpop.f32.mrf.mxu1 }
 0x15a   : > { %1005 = vst [vmem:[#allocation2 + $0xe8] sm:$0xff] %v973_v63  ;;  %1021 = vst [vmem:[#allocation2 + $0x10] sm:$0xff] %v989_v0  ;;  %v1690_v5 = vadd.f32 %v1689_v2, %v1688_v61  ;;  %v1738_v6 = vadd.f32 %v1737_v4, %v1736_v62 }
 0x15b   : > { %v1691_v7 = vpop.f32.mrf.mxu0  ;;  %v1739_v8 = vpop.f32.mrf.mxu1 }
 0x15c   : > { %v974_v9 = vadd.f32 %v1690_v5, %v461_v1  ;;  %v990_v10 = vadd.f32 %v1738_v6, %v477_v3 }
 0x15d   : > { %v1692_v12 = vpop.f32.mrf.mxu0  ;;  %v1740_v14 = vpop.f32.mrf.mxu1 }
 0x15e   : > { %1006 = vst [vmem:[#allocation2 + $0xb8] sm:$0xff] %v974_v9  ;;  %1022 = vst [vmem:[#allocation2 + $0x28] sm:$0xff] %v990_v10  ;;  %v1693_v15 = vadd.f32 %v1692_v12, %v1691_v7  ;;  %v1741_v16 = vadd.f32 %v1740_v14, %v1739_v8 }
 0x15f   : > { %v1694_v17 = vpop.f32.mrf.mxu0  ;;  %v1742_v18 = vpop.f32.mrf.mxu1 }
 0x160   : > { %v975_v19 = vadd.f32 %v1693_v15, %v462_v11  ;;  %v991_v20 = vadd.f32 %v1741_v16, %v478_v13 }
 0x161   : > { %v1695_v22 = vpop.f32.mrf.mxu0  ;;  %v1743_v24 = vpop.f32.mrf.mxu1 }
 0x162   : > { %1007 = vst [vmem:[#allocation2 + $0x60] sm:$0xff] %v975_v19  ;;  %1023 = vst [vmem:[#allocation2 + $0xa0] sm:$0xff] %v991_v20  ;;  %v1696_v25 = vadd.f32 %v1695_v22, %v1694_v17  ;;  %v1744_v26 = vadd.f32 %v1743_v24, %v1742_v18 }
 0x163   : > { %v1697_v27 = vpop.f32.mrf.mxu0  ;;  %v1745_v28 = vpop.f32.mrf.mxu1 }
 0x164   : > { %v976_v29 = vadd.f32 %v1696_v25, %v463_v21  ;;  %v992_v30 = vadd.f32 %v1744_v26, %v479_v23 }
 0x165   : > { %v1698_v32 = vpop.f32.mrf.mxu0  ;;  %v1746_v34 = vpop.f32.mrf.mxu1 }
 0x166   : > { %1008 = vst [vmem:[#allocation2 + $0xf0] sm:$0xff] %v976_v29  ;;  %1024 = vst [vmem:[#allocation2 + $0xf8] sm:$0xff] %v992_v30  ;;  %v1699_v35 = vadd.f32 %v1698_v32, %v1697_v27  ;;  %v1747_v36 = vadd.f32 %v1746_v34, %v1745_v28 }
 0x167   : > { %v1700_v37 = vpop.f32.mrf.mxu0  ;;  %v1748_v38 = vpop.f32.mrf.mxu1 }
 0x168   : > { %v977_v39 = vadd.f32 %v1699_v35, %v464_v31  ;;  %v993_v40 = vadd.f32 %v1747_v36, %v480_v33 }
 0x169   : > { %v1701_v42 = vpop.f32.mrf.mxu0  ;;  %v1749_v44 = vpop.f32.mrf.mxu1 }
 0x16a   : > { %1009 = vst [vmem:[#allocation2 + $0x8] sm:$0xff] %v977_v39  ;;  %1025 = vst [vmem:[#allocation2 + $0x20] sm:$0xff] %v993_v40  ;;  %v1702_v45 = vadd.f32 %v1701_v42, %v1700_v37  ;;  %v1750_v46 = vadd.f32 %v1749_v44, %v1748_v38  ;;  %1030 = sbr.rel (%p1476_p13) target bundleno = 393 (0x189), region = 78 }
 0x16c   : > { %v978_v47 = vadd.f32 %v1702_v45, %v465_v41  ;;  %v994_v48 = vadd.f32 %v1750_v46, %v481_v43 }
 0x16e   : > { %1010 = vst [vmem:[#allocation2 + $0x78] sm:$0xff] %v978_v47  ;;  %1026 = vst [vmem:[#allocation2 + $0x98] sm:$0xff] %v994_v48 }
 0x16f   : > { %v1031_v49 = vld [vmem:[#allocation2 + $0xb0] sm:$0xff]  ;;  %v1032_v50 = vld [vmem:[#allocation2] sm:$0xff]  ;;  %v1033_v54 = vld [vmem:[#allocation2 + $0xd8] sm:$0xff] }
 0x170   : > { %v2164_v51 = vld [vmem:[%s2237_s2] ss:$0 sm:$0xff]  ;;  %v1034_v55 = vld [vmem:[#allocation2 + $0x18] sm:$0xff]  ;;  %v1035_v56 = vld [vmem:[#allocation2 + $0x50] sm:$0xff] }
 0x171   : > { %v1070_v52 = vadd.f32 %v2164_v51, %v1031_v49  ;;  %v1071_v53 = vadd.f32 %v2164_v51, %v1032_v50  ;;  %v1072_v57 = vadd.f32 %v2164_v51, %v1033_v54  ;;  %v1073_v58 = vadd.f32 %v2164_v51, %v1034_v55  ;;  %v1036_v59 = vld [vmem:[#allocation2 + $0x68] sm:$0xff]  ;;  %v1037_v61 = vld [vmem:[#allocation2 + $0x30] sm:$0xff]  ;;  %v1039_v3 = vld [vmem:[#allocation2 + $0x80] sm:$0xff] }
 0x172   : > { %v1074_v60 = vadd.f32 %v2164_v51, %v1035_v56  ;;  %v1038_v62 = vld [vmem:[#allocation2 + $0x48] sm:$0xff]  ;;  %v1075_v1 = vadd.f32 %v2164_v51, %v1036_v59  ;;  %v1076_v2 = vadd.f32 %v2164_v51, %v1037_v61  ;;  %v1042_v10 = vld [vmem:[#allocation2 + $0xb8] sm:$0xff]  ;;  %v1043_v11 = vld [vmem:[#allocation2 + $0x60] sm:$0xff]  ;;  %v1078_v15 = vadd.f32 %v2164_v51, %v1039_v3 }
 0x173   : > { %v1102_v63 = vmax.f32 %v1070_v52, 0.0  ;;  %v1103_v0 = vmax.f32 %v1071_v53, 0.0  ;;  %v1040_v4 = vld [vmem:[#allocation2 + $0x88] sm:$0xff]  ;;  %v1104_v6 = vmax.f32 %v1072_v57, 0.0  ;;  %v1105_v7 = vmax.f32 %v1073_v58, 0.0  ;;  %v1044_v16 = vld [vmem:[#allocation2 + $0xf0] sm:$0xff] }
 0x174   : > { %v1041_v5 = vld [vmem:[#allocation2 + $0xe8] sm:$0xff]  ;;  %v1106_v8 = vmax.f32 %v1074_v60, 0.0  ;;  %v1077_v9 = vadd.f32 %v2164_v51, %v1038_v62  ;;  %v1107_v13 = vmax.f32 %v1075_v1, 0.0  ;;  %v1108_v14 = vmax.f32 %v1076_v2, 0.0  ;;  %v1047_v27 = vld [vmem:[#allocation2 + $0x38] sm:$0xff]  ;;  %v1049_v33 = vld [vmem:[#allocation2 + $0x40] sm:$0xff] }
 0x175   : > { %v1547_v12 = vpack.c.bf16 %v1103_v0, %v1102_v63  ;;  %v1552_v17 = vpack.c.bf16 %v1105_v7, %v1104_v6  ;;  %v1079_v19 = vadd.f32 %v2164_v51, %v1040_v4  ;;  %v1080_v20 = vadd.f32 %v2164_v51, %v1041_v5  ;;  %v1045_v21 = vld [vmem:[#allocation2 + $0x8] sm:$0xff]  ;;  %v1046_v22 = vld [vmem:[#allocation2 + $0x78] sm:$0xff]  ;;  %v1051_v43 = vld [vmem:[#allocation2 + $0xe0] sm:$0xff] }
 0x176   : > { %v1109_v18 = vmax.f32 %v1077_v9, 0.0  ;;  %v1557_v23 = vpack.c.bf16 %v1107_v13, %v1106_v8  ;;  %v1110_v24 = vmax.f32 %v1078_v15, 0.0  ;;  %v1081_v25 = vadd.f32 %v2164_v51, %v1042_v10  ;;  %v1048_v28 = vld [vmem:[#allocation2 + $0x58] sm:$0xff]  ;;  %v1050_v38 = vld [vmem:[#allocation2 + $0xc8] sm:$0xff]  ;;  %v1052_v44 = vld [vmem:[#allocation2 + $0x90] sm:$0xff] }
 0x177   : > { %1548 = vst [vmem:[%s2107_s30] sm:$0xff] %v1547_v12   ;;  %v1082_v26 = vadd.f32 %v2164_v51, %v1043_v11  ;;  %1624 = vst [vmem:[%s2107_s30 + $0x8] sm:$0xff] %v1552_v17   ;;  %v1111_v30 = vmax.f32 %v1079_v19, 0.0  ;;  %v1112_v31 = vmax.f32 %v1080_v20, 0.0  ;;  %v1083_v32 = vadd.f32 %v2164_v51, %v1044_v16  ;;  %v1053_v49 = vld [vmem:[#allocation2 + $0x70] sm:$0xff]  ;;  %v1054_v50 = vld [vmem:[#allocation2 + $0xc0] sm:$0xff] }
 0x178   : > { %v1562_v29 = vpack.c.bf16 %v1109_v18, %v1108_v14  ;;  %1625 = vst [vmem:[%s2107_s30 + $0x10] sm:$0xff] %v1557_v23   ;;  %v1113_v34 = vmax.f32 %v1081_v25, 0.0  ;;  %v1084_v36 = vadd.f32 %v2164_v51, %v1045_v21  ;;  %v1085_v37 = vadd.f32 %v2164_v51, %v1046_v22  ;;  %v1055_v56 = vld [vmem:[#allocation2 + $0xa8] sm:$0xff]  ;;  %v1056_v57 = vld [vmem:[#allocation2 + $0xd0] sm:$0xff]  ;;  %v1059_v8 = vld [vmem:[#allocation2 + $0xa0] sm:$0xff] }
 0x179   : > { %v1114_v35 = vmax.f32 %v1082_v26, 0.0  ;;  %v1567_v39 = vpack.c.bf16 %v1111_v30, %v1110_v24  ;;  %v1115_v40 = vmax.f32 %v1083_v32, 0.0  ;;  %v1086_v41 = vadd.f32 %v2164_v51, %v1047_v27  ;;  %v1057_v62 = vld [vmem:[#allocation2 + $0x10] sm:$0xff]  ;;  %v1058_v3 = vld [vmem:[#allocation2 + $0x28] sm:$0xff]  ;;  %v1060_v9 = vld [vmem:[#allocation2 + $0xf8] sm:$0xff] }
 0x17a   : > { %1626 = vst [vmem:[%s2107_s30 + $0x18] sm:$0xff] %v1562_v29   ;;  %v1087_v42 = vadd.f32 %v2164_v51, %v1048_v28  ;;  %v1572_v45 = vpack.c.bf16 %v1113_v34, %v1112_v31  ;;  %v1116_v46 = vmax.f32 %v1084_v36, 0.0  ;;  %v1117_v47 = vmax.f32 %v1085_v37, 0.0  ;;  %v1061_v14 = vld [vmem:[#allocation2 + $0x20] sm:$0xff]  ;;  %v1062_v15 = vld [vmem:[#allocation2 + $0x98] sm:$0xff] }
 0x17b   : > { %v1088_v48 = vadd.f32 %v2164_v51, %v1049_v33  ;;  %1627 = vst [vmem:[%s2107_s30 + $0x20] sm:$0xff] %v1567_v39   ;;  %v1577_v52 = vpack.c.bf16 %v1115_v40, %v1114_v35  ;;  %v1118_v53 = vmax.f32 %v1086_v41, 0.0  ;;  %v1089_v55 = vadd.f32 %v2164_v51, %v1050_v38 }
 0x17c   : > { %v1119_v54 = vmax.f32 %v1087_v42, 0.0  ;;  %1628 = vst [vmem:[%s2107_s30 + $0x28] sm:$0xff] %v1572_v45   ;;  %v1582_v58 = vpack.c.bf16 %v1117_v47, %v1116_v46  ;;  %v1090_v60 = vadd.f32 %v2164_v51, %v1051_v43  ;;  %v1091_v61 = vadd.f32 %v2164_v51, %v1052_v44 }
 0x17d   : > { %v1120_v59 = vmax.f32 %v1088_v48, 0.0  ;;  %1629 = vst [vmem:[%s2107_s30 + $0x30] sm:$0xff] %v1577_v52   ;;  %v1121_v0 = vmax.f32 %v1089_v55, 0.0  ;;  %v1092_v1 = vadd.f32 %v2164_v51, %v1053_v49  ;;  %v1093_v2 = vadd.f32 %v2164_v51, %v1054_v50 }
 0x17e   : > { %v1587_v63 = vpack.c.bf16 %v1119_v54, %v1118_v53  ;;  %1630 = vst [vmem:[%s2107_s30 + $0x38] sm:$0xff] %v1582_v58   ;;  %v1122_v4 = vmax.f32 %v1090_v60, 0.0  ;;  %v1123_v5 = vmax.f32 %v1091_v61, 0.0  ;;  %v1094_v6 = vadd.f32 %v2164_v51, %v1055_v56 }
 0x17f   : > { %v1095_v7 = vadd.f32 %v2164_v51, %v1056_v57  ;;  %v1592_v10 = vpack.c.bf16 %v1121_v0, %v1120_v59  ;;  %v1124_v11 = vmax.f32 %v1092_v1, 0.0  ;;  %v1125_v12 = vmax.f32 %v1093_v2, 0.0 }
 0x180   : > { %1631 = vst [vmem:[%s2107_s30 + $0x40] sm:$0xff] %v1587_v63   ;;  %v1096_v13 = vadd.f32 %v2164_v51, %v1057_v62  ;;  %v1597_v16 = vpack.c.bf16 %v1123_v5, %v1122_v4  ;;  %v1126_v17 = vmax.f32 %v1094_v6, 0.0  ;;  %v1097_v19 = vadd.f32 %v2164_v51, %v1058_v3 }
 0x181   : > { %v1127_v18 = vmax.f32 %v1095_v7, 0.0  ;;  %1632 = vst [vmem:[%s2107_s30 + $0x48] sm:$0xff] %v1592_v10   ;;  %v1602_v20 = vpack.c.bf16 %v1125_v12, %v1124_v11  ;;  %v1098_v22 = vadd.f32 %v2164_v51, %v1059_v8  ;;  %v1099_v23 = vadd.f32 %v2164_v51, %v1060_v9 }
 0x182   : > { %v1128_v21 = vmax.f32 %v1096_v13, 0.0  ;;  %1633 = vst [vmem:[%s2107_s30 + $0x50] sm:$0xff] %v1597_v16   ;;  %v1129_v25 = vmax.f32 %v1097_v19, 0.0  ;;  %v1100_v26 = vadd.f32 %v2164_v51, %v1061_v14  ;;  %v1101_v27 = vadd.f32 %v2164_v51, %v1062_v15 }
 0x183   : > { %v1607_v24 = vpack.c.bf16 %v1127_v18, %v1126_v17  ;;  %1634 = vst [vmem:[%s2107_s30 + $0x58] sm:$0xff] %v1602_v20   ;;  %v1130_v28 = vmax.f32 %v1098_v22, 0.0  ;;  %v1131_v29 = vmax.f32 %v1099_v23, 0.0 }
 0x184   : > { %v1612_v30 = vpack.c.bf16 %v1129_v25, %v1128_v21  ;;  %v1132_v31 = vmax.f32 %v1100_v26, 0.0  ;;  %v1133_v32 = vmax.f32 %v1101_v27, 0.0 }
 0x185   : > { %1635 = vst [vmem:[%s2107_s30 + $0x60] sm:$0xff] %v1607_v24   ;;  %v1617_v33 = vpack.c.bf16 %v1131_v29, %v1130_v28 }
 0x186   : > { %1636 = vst [vmem:[%s2107_s30 + $0x68] sm:$0xff] %v1612_v30   ;;  %v1622_v34 = vpack.c.bf16 %v1133_v32, %v1132_v31 }
 0x187   : > { %1637 = vst [vmem:[%s2107_s30 + $0x70] sm:$0xff] %v1617_v33  }
 0x188   : > { %1638 = vst [vmem:[%s2107_s30 + $0x78] sm:$0xff] %v1622_v34  }
 0x189 PF: > { %s13_s18 = sadd.s32 1, %s1943_s18   ;;  %s2239_s12 = smov %s1923_s13 }
 0x18a   : > { %p10_p0 = scmp.ge.s32.totalorder %s13_s18, 8   ;;  %s2240_s13 = smov %s2017_s25 }
 0x18b   : > { %s2241_s14 = smov %s1935_s16  ;;  %s2242_s15 = smov %s1939_s17 }
 0x18c   : > { %s2243_s16 = smov %s2246_s19  ;;  %s2244_s17 = smov %s2250_s20 }
 0x18d   :  { %12 = sbr.rel (!%p10_p0) target bundleno = 4 (0x4), region = 119 }

// kernel: resnet_forward.17
= control target key start
LH: loop header
LB: loop body
LE: loop exit
PB: predicated region body
PF: predicated region fallthrough
CT: control target
= control target key end

     0   :  { %s2189_s15 = smov 0   ;;  %s2191_s16 = smov 0   ;;  %s2479_s0 = inlined_call_operand.vmem [shape: bf16[512,768], index: 0, kind: input, shape index: {}]   ;;  %s2480_s1 = inlined_call_operand.vmem [shape: bf16[768,128], index: 1, kind: input, shape index: {}]   ;;  %s2481_s2 = inlined_call_operand.vmem [shape: f32[1,128], index: 2, kind: input, shape index: {}]   ;;  %s2482_s3 = inlined_call_operand.vmem [shape: bf16[512,128], index: 3, kind: input, shape index: {}]   ;;  %s2483_s4 = inlined_call_operand.vmem [shape: bf16[512,128], index: 4, kind: output, shape index: {}]  }
   0x1   :  { %s2193_s17 = smov 0   ;;  %s2195_s18 = smov 0  }
   0x2   :  { %s2197_s19 = smov 0   ;;  %s2199_s20 = smov 0  }
   0x3   :  { %s2201_s21 = smov 0  }
   0x4 LB: > { %s26_s22 = sadd.s32 1, %s2154_s19  ;;  %s33_s23 = sadd.s32 1, %s2158_s20  ;;  %s2162_s21 = sphi %s2201_s21, %s14_s21   ;;  %s2158_s20 = sphi %s2199_s20, %s2489_s20   ;;  %s2154_s19 = sphi %s2197_s19, %s2488_s19   ;;  %s2150_s18 = sphi %s2195_s18, %s2487_s18   ;;  %s2146_s17 = sphi %s2193_s17, %s2486_s17   ;;  %s2142_s16 = sphi %s2191_s16, %s2485_s16   ;;  %s2138_s15 = sphi %s2189_s15, %s2484_s15  }
   0x5   : > { %p27_p0 = scmp.ge.s32.totalorder %s26_s22, 3  ;;  %p49_p1 = scmp.ne.s32.totalorder %s2142_s16, %s2138_s15 }
   0x6   : > { %p50_p2 = scmp.eq.s32.totalorder %s2162_s21, 0  ;;  %s42_s27 = sadd.s32 1, %s2142_s16 }
   0x7   : > { %s2491_s22 = smov (%p27_p0, %s26_s22), 0  ;;  %s2493_s23 = smov (!%p27_p0, %s33_s23), %s2158_s20 }
   0x8   : > { %p51_p3 = por %p50_p2, %p49_p1  ;;  %p35_p4 = scmp.ge.s32.totalorder %s2493_s23, 2 }
   0x9   : > { %s38_s24 = ssub.s32 %s2154_s19, %s2491_s22  ;;  %p1554_p6 = scmp.ge.s32.totalorder %s2162_s21, 6 }
   0xa   : > { %s2495_s23 = smov (%p35_p4, %s2493_s23), 0 }
   0xb   : > { %s37_s25 = ssub.s32 %s2158_s20, %s2495_s23  ;;  %191 = sbr.rel (%p1554_p6) target bundleno = 40 (0x28), region = 20 }
   0xc   : > { %s39_s26 = sor.u32 %s38_s24, %s37_s25 }
   0xd   : > { %p40_p5 = scmp.eq.s32.totalorder %s39_s26, 0 }
   0xf   : > { %s2240_s28 = scalar_select %p40_p5, %s2142_s16, %s42_s27  }
  0x10   : > { %194 = sbr.rel (!%p51_p3) target bundleno = 40 (0x28), region = 24  ;;  %s196_s29 = sand.u32 (%p51_p3), 1, %s2142_s16  }
  0x11   : > { %s1557_s30 = sshll.u32 (%p51_p3), %s2154_s19, 1  ;;  %s1555_s5 = sshll.u32 (%p51_p3), %s196_s29, 8 }
  0x12   : > { %s1987_s6 = smul.u32 (%p51_p3), 192, %s2158_s20  ;;  %s2254_s12 = scalar_lea.vmem (%p51_p3), [#allocation3], %s1555_s5 }
  0x14   : > { %s202_s7 = sadd.s32 (%p51_p3), %s1987_s6, %s1557_s30 }
  0x15   : > { %s1559_s8 = sshll.u32 %s202_s7, 2 }
  0x16   : > { %s2249_s11 = scalar_lea.vmem %s2479_s0, %s1559_s8 }
  0x17   : > { %v295_v0 = vld [vmem:[%s2249_s11] sm:$0xff]  ;;  %v297_v1 = vld [vmem:[%s2249_s11 + $0x18] sm:$0xff]  ;;  %v299_v2 = vld [vmem:[%s2249_s11 + $0x30] sm:$0xff] }
  0x18   : > { %296 = vst [vmem:[%s2254_s12] sm:$0xff] %v295_v0  ;;  %298 = vst [vmem:[%s2254_s12 + $0x8] sm:$0xff] %v297_v1  ;;  %v301_v3 = vld [vmem:[%s2249_s11 + $0x48] sm:$0xff]  ;;  %v303_v4 = vld [vmem:[%s2249_s11 + $0x60] sm:$0xff] }
  0x19   : > { %300 = vst [vmem:[%s2254_s12 + $0x10] sm:$0xff] %v299_v2  ;;  %v305_v5 = vld [vmem:[%s2249_s11 + $0x78] sm:$0xff]  ;;  %302 = vst [vmem:[%s2254_s12 + $0x18] sm:$0xff] %v301_v3  ;;  %v307_v6 = vld [vmem:[%s2249_s11 + $0x90] sm:$0xff] }
  0x1a   : > { %304 = vst [vmem:[%s2254_s12 + $0x20] sm:$0xff] %v303_v4  ;;  %306 = vst [vmem:[%s2254_s12 + $0x28] sm:$0xff] %v305_v5  ;;  %v309_v7 = vld [vmem:[%s2249_s11 + $0xa8] sm:$0xff]  ;;  %v311_v8 = vld [vmem:[%s2249_s11 + $0xc0] sm:$0xff] }
  0x1b   : > { %308 = vst [vmem:[%s2254_s12 + $0x30] sm:$0xff] %v307_v6  ;;  %310 = vst [vmem:[%s2254_s12 + $0x38] sm:$0xff] %v309_v7  ;;  %v313_v9 = vld [vmem:[%s2249_s11 + $0xd8] sm:$0xff]  ;;  %v315_v10 = vld [vmem:[%s2249_s11 + $0xf0] sm:$0xff] }
  0x1c   : > { %312 = vst [vmem:[%s2254_s12 + $0x40] sm:$0xff] %v311_v8  ;;  %v317_v11 = vld [vmem:[%s2249_s11 + $0x108] sm:$0xff]  ;;  %314 = vst [vmem:[%s2254_s12 + $0x48] sm:$0xff] %v313_v9  ;;  %v319_v12 = vld [vmem:[%s2249_s11 + $0x120] sm:$0xff] }
  0x1d   : > { %316 = vst [vmem:[%s2254_s12 + $0x50] sm:$0xff] %v315_v10  ;;  %318 = vst [vmem:[%s2254_s12 + $0x58] sm:$0xff] %v317_v11  ;;  %v321_v13 = vld [vmem:[%s2249_s11 + $0x138] sm:$0xff]  ;;  %v323_v14 = vld [vmem:[%s2249_s11 + $0x150] sm:$0xff] }
  0x1e   : > { %320 = vst [vmem:[%s2254_s12 + $0x60] sm:$0xff] %v319_v12  ;;  %322 = vst [vmem:[%s2254_s12 + $0x68] sm:$0xff] %v321_v13  ;;  %v325_v15 = vld [vmem:[%s2249_s11 + $0x168] sm:$0xff]  ;;  %v327_v16 = vld [vmem:[%s2249_s11 + $0x180] sm:$0xff] }
  0x1f   : > { %324 = vst [vmem:[%s2254_s12 + $0x70] sm:$0xff] %v323_v14  ;;  %v329_v17 = vld [vmem:[%s2249_s11 + $0x198] sm:$0xff]  ;;  %326 = vst [vmem:[%s2254_s12 + $0x78] sm:$0xff] %v325_v15  ;;  %v331_v18 = vld [vmem:[%s2249_s11 + $0x1b0] sm:$0xff] }
  0x20   : > { %328 = vst [vmem:[%s2254_s12 + $0x80] sm:$0xff] %v327_v16  ;;  %330 = vst [vmem:[%s2254_s12 + $0x88] sm:$0xff] %v329_v17  ;;  %v333_v19 = vld [vmem:[%s2249_s11 + $0x1c8] sm:$0xff]  ;;  %v335_v20 = vld [vmem:[%s2249_s11 + $0x1e0] sm:$0xff] }
  0x21   : > { %332 = vst [vmem:[%s2254_s12 + $0x90] sm:$0xff] %v331_v18  ;;  %334 = vst [vmem:[%s2254_s12 + $0x98] sm:$0xff] %v333_v19  ;;  %v337_v21 = vld [vmem:[%s2249_s11 + $0x1f8] sm:$0xff]  ;;  %v339_v22 = vld [vmem:[%s2249_s11 + $0x210] sm:$0xff] }
  0x22   : > { %336 = vst [vmem:[%s2254_s12 + $0xa0] sm:$0xff] %v335_v20  ;;  %v341_v23 = vld [vmem:[%s2249_s11 + $0x228] sm:$0xff]  ;;  %338 = vst [vmem:[%s2254_s12 + $0xa8] sm:$0xff] %v337_v21  ;;  %v343_v24 = vld [vmem:[%s2249_s11 + $0x240] sm:$0xff] }
  0x23   : > { %340 = vst [vmem:[%s2254_s12 + $0xb0] sm:$0xff] %v339_v22  ;;  %342 = vst [vmem:[%s2254_s12 + $0xb8] sm:$0xff] %v341_v23  ;;  %v345_v25 = vld [vmem:[%s2249_s11 + $0x258] sm:$0xff]  ;;  %v347_v26 = vld [vmem:[%s2249_s11 + $0x270] sm:$0xff] }
  0x24   : > { %344 = vst [vmem:[%s2254_s12 + $0xc0] sm:$0xff] %v343_v24  ;;  %346 = vst [vmem:[%s2254_s12 + $0xc8] sm:$0xff] %v345_v25  ;;  %v349_v27 = vld [vmem:[%s2249_s11 + $0x288] sm:$0xff]  ;;  %v351_v28 = vld [vmem:[%s2249_s11 + $0x2a0] sm:$0xff] }
  0x25   : > { %348 = vst [vmem:[%s2254_s12 + $0xd0] sm:$0xff] %v347_v26  ;;  %v353_v29 = vld [vmem:[%s2249_s11 + $0x2b8] sm:$0xff]  ;;  %350 = vst [vmem:[%s2254_s12 + $0xd8] sm:$0xff] %v349_v27  ;;  %v355_v30 = vld [vmem:[%s2249_s11 + $0x2d0] sm:$0xff] }
  0x26   : > { %352 = vst [vmem:[%s2254_s12 + $0xe0] sm:$0xff] %v351_v28  ;;  %354 = vst [vmem:[%s2254_s12 + $0xe8] sm:$0xff] %v353_v29  ;;  %v357_v31 = vld [vmem:[%s2249_s11 + $0x2e8] sm:$0xff] }
  0x27   : > { %356 = vst [vmem:[%s2254_s12 + $0xf0] sm:$0xff] %v355_v30  ;;  %358 = vst [vmem:[%s2254_s12 + $0xf8] sm:$0xff] %v357_v31 }
  0x28 PF: > { %p1560_p7 = scmp.ge.s32.totalorder %s2162_s21, 1  ;;  %p387_p8 = scmp.lt.s32.totalorder %s2162_s21, 7 }
  0x2a   : > { %p388_p9 = pnand %p1560_p7, %p387_p8 }
  0x2b   : > { %s394_s13 = sand.u32 (!%p388_p9), 1, %s2138_s15   ;;  %s1562_s14 = sshll.u32 (!%p388_p9), %s2146_s17, 5 }
  0x2c   : > { %391 = sbr.rel (%p388_p9) target bundleno = 395 (0x18b), region = 70  ;;  %s1561_s24 = sshll.u32 (!%p388_p9), %s394_s13, 8 }
  0x2d   : > { %p444_p10 = scmp.lt.s32.totalorder (!%p388_p9), %s1562_s14, 95  ;;  %s1564_s25 = sshll.u32 (!%p388_p9), %s2150_s18, 5 }
  0x2e   : > { %p456_p11 = scmp.lt.s32.totalorder (!%p388_p9), %s1564_s25, 63  ;;  %s2337_s18 = scalar_lea.vmem (!%p388_p9), [#allocation3], %s1561_s24 }
  0x2f   : > { %p1568_p12 = scmp.ne.s32.totalorder (!%p388_p9), %s2146_s17, 0 }
  0x31   : > { %s2497_s14 = smov (!%p444_p10, %s1562_s14), 95  ;;  %s2499_s25 = smov (!%p456_p11, %s1564_s25), 63 }
  0x32   : > { %s1563_s26 = sshll.u32 %s2497_s14, 2  ;;  %s1565_s5 = sshll.u32 %s2499_s25, 2 }
  0x33   : > { %s2325_s30 = scalar_lea.vmem %s2480_s1, %s1563_s26  ;;  %s2330_s8 = scalar_lea.vmem %s2482_s3, %s1565_s5 }
  0x34   : > { %s2335_s10 = scalar_lea.vmem %s2483_s4, %s1565_s5  ;;  %477 = sbr.rel (%p1568_p12) target bundleno = 76 (0x4c), region = 78 }
  0x39   : > { %v1686_v32 = vld [vmem:[%s2330_s8] sm:$0xff]   ;;  %v1829_v33 = vld [vmem:[%s2330_s8 + $0x8] sm:$0xff]   ;;  %v1830_v34 = vld [vmem:[%s2330_s8 + $0x10] sm:$0xff]  }
  0x3a   : > { %v1687_v35 = vunpack.c.l.bf16 %v1686_v32  ;;  %v1688_v36 = vunpack.c.h.bf16 %v1686_v32  ;;  %v1691_v37 = vunpack.c.l.bf16 %v1829_v33  ;;  %v1692_v38 = vunpack.c.h.bf16 %v1829_v33  ;;  %v1831_v39 = vld [vmem:[%s2330_s8 + $0x18] sm:$0xff]   ;;  %v1832_v40 = vld [vmem:[%s2330_s8 + $0x20] sm:$0xff]   ;;  %v1833_v41 = vld [vmem:[%s2330_s8 + $0x28] sm:$0xff]  }
  0x3b   : > { %v1695_v42 = vunpack.c.l.bf16 %v1830_v34  ;;  %v1696_v43 = vunpack.c.h.bf16 %v1830_v34  ;;  %v1699_v44 = vunpack.c.l.bf16 %v1831_v39  ;;  %v1700_v45 = vunpack.c.h.bf16 %v1831_v39  ;;  %v1834_v46 = vld [vmem:[%s2330_s8 + $0x30] sm:$0xff]   ;;  %v1835_v47 = vld [vmem:[%s2330_s8 + $0x38] sm:$0xff]   ;;  %v1836_v48 = vld [vmem:[%s2330_s8 + $0x40] sm:$0xff]  }
  0x3c   : > { %542 = vst [vmem:[#allocation2 + $0xb0] sm:$0xff] %v1687_v35  ;;  %543 = vst [vmem:[#allocation2] sm:$0xff] %v1688_v36  ;;  %v1703_v49 = vunpack.c.l.bf16 %v1832_v40  ;;  %v1704_v50 = vunpack.c.h.bf16 %v1832_v40  ;;  %v1707_v51 = vunpack.c.l.bf16 %v1833_v41  ;;  %v1708_v52 = vunpack.c.h.bf16 %v1833_v41  ;;  %v1837_v53 = vld [vmem:[%s2330_s8 + $0x48] sm:$0xff]   ;;  %v1838_v54 = vld [vmem:[%s2330_s8 + $0x50] sm:$0xff]  }
  0x3d   : > { %544 = vst [vmem:[#allocation2 + $0xd8] sm:$0xff] %v1691_v37  ;;  %545 = vst [vmem:[#allocation2 + $0x18] sm:$0xff] %v1692_v38  ;;  %v1839_v55 = vld [vmem:[%s2330_s8 + $0x58] sm:$0xff]   ;;  %v1711_v56 = vunpack.c.l.bf16 %v1834_v46  ;;  %v1712_v57 = vunpack.c.h.bf16 %v1834_v46  ;;  %v1715_v58 = vunpack.c.l.bf16 %v1835_v47  ;;  %v1716_v59 = vunpack.c.h.bf16 %v1835_v47  ;;  %v1840_v60 = vld [vmem:[%s2330_s8 + $0x60] sm:$0xff]  }
  0x3e   : > { %546 = vst [vmem:[#allocation2 + $0x50] sm:$0xff] %v1695_v42  ;;  %547 = vst [vmem:[#allocation2 + $0x68] sm:$0xff] %v1696_v43  ;;  %v1841_v61 = vld [vmem:[%s2330_s8 + $0x68] sm:$0xff]   ;;  %v1719_v62 = vunpack.c.l.bf16 %v1836_v48  ;;  %v1720_v63 = vunpack.c.h.bf16 %v1836_v48  ;;  %v1723_v0 = vunpack.c.l.bf16 %v1837_v53  ;;  %v1724_v1 = vunpack.c.h.bf16 %v1837_v53  ;;  %v1842_v2 = vld [vmem:[%s2330_s8 + $0x70] sm:$0xff]  }
  0x3f   : > { %548 = vst [vmem:[#allocation2 + $0x30] sm:$0xff] %v1699_v44  ;;  %549 = vst [vmem:[#allocation2 + $0x48] sm:$0xff] %v1700_v45  ;;  %v1843_v3 = vld [vmem:[%s2330_s8 + $0x78] sm:$0xff]   ;;  %v1727_v4 = vunpack.c.l.bf16 %v1838_v54  ;;  %v1728_v5 = vunpack.c.h.bf16 %v1838_v54  ;;  %v1731_v6 = vunpack.c.l.bf16 %v1839_v55  ;;  %v1732_v7 = vunpack.c.h.bf16 %v1839_v55 }
  0x40   : > { %550 = vst [vmem:[#allocation2 + $0x80] sm:$0xff] %v1703_v49  ;;  %551 = vst [vmem:[#allocation2 + $0x88] sm:$0xff] %v1704_v50  ;;  %v1735_v8 = vunpack.c.l.bf16 %v1840_v60  ;;  %v1736_v9 = vunpack.c.h.bf16 %v1840_v60  ;;  %v1739_v10 = vunpack.c.l.bf16 %v1841_v61  ;;  %v1740_v11 = vunpack.c.h.bf16 %v1841_v61 }
  0x41   : > { %552 = vst [vmem:[#allocation2 + $0xe8] sm:$0xff] %v1707_v51  ;;  %553 = vst [vmem:[#allocation2 + $0xb8] sm:$0xff] %v1708_v52  ;;  %v1743_v12 = vunpack.c.l.bf16 %v1842_v2  ;;  %v1744_v13 = vunpack.c.h.bf16 %v1842_v2  ;;  %v1747_v14 = vunpack.c.l.bf16 %v1843_v3  ;;  %v1748_v15 = vunpack.c.h.bf16 %v1843_v3 }
  0x42   : > { %554 = vst [vmem:[#allocation2 + $0x60] sm:$0xff] %v1711_v56  ;;  %555 = vst [vmem:[#allocation2 + $0xf0] sm:$0xff] %v1712_v57 }
  0x43   : > { %556 = vst [vmem:[#allocation2 + $0x8] sm:$0xff] %v1715_v58  ;;  %557 = vst [vmem:[#allocation2 + $0x78] sm:$0xff] %v1716_v59 }
  0x44   : > { %558 = vst [vmem:[#allocation2 + $0x38] sm:$0xff] %v1719_v62  ;;  %559 = vst [vmem:[#allocation2 + $0x58] sm:$0xff] %v1720_v63 }
  0x45   : > { %560 = vst [vmem:[#allocation2 + $0x40] sm:$0xff] %v1723_v0  ;;  %561 = vst [vmem:[#allocation2 + $0xc8] sm:$0xff] %v1724_v1 }
  0x46   : > { %562 = vst [vmem:[#allocation2 + $0xe0] sm:$0xff] %v1727_v4  ;;  %563 = vst [vmem:[#allocation2 + $0x90] sm:$0xff] %v1728_v5 }
  0x47   : > { %564 = vst [vmem:[#allocation2 + $0x70] sm:$0xff] %v1731_v6  ;;  %565 = vst [vmem:[#allocation2 + $0xc0] sm:$0xff] %v1732_v7 }
  0x48   : > { %566 = vst [vmem:[#allocation2 + $0xa8] sm:$0xff] %v1735_v8  ;;  %567 = vst [vmem:[#allocation2 + $0xd0] sm:$0xff] %v1736_v9 }
  0x49   : > { %568 = vst [vmem:[#allocation2 + $0x10] sm:$0xff] %v1739_v10  ;;  %569 = vst [vmem:[#allocation2 + $0x28] sm:$0xff] %v1740_v11 }
  0x4a   : > { %570 = vst [vmem:[#allocation2 + $0xa0] sm:$0xff] %v1743_v12  ;;  %571 = vst [vmem:[#allocation2 + $0xf8] sm:$0xff] %v1744_v13 }
  0x4b   : > { %572 = vst [vmem:[#allocation2 + $0x20] sm:$0xff] %v1747_v14  ;;  %573 = vst [vmem:[#allocation2 + $0x98] sm:$0xff] %v1748_v15 }
  0x4c PF: > { %v2044_v16 = vld [vmem:[%s2325_s30 + $0x78] sm:$0xff]   ;;  %v2046_v18 = vld [vmem:[%s2325_s30 + $0x70] sm:$0xff]   ;;  %v2048_v20 = vld [vmem:[%s2325_s30 + $0x68] sm:$0xff]   ;;  %p1617_p13 = scmp.ne.s32.totalorder %s2146_s17, 2 }
  0x4d   : > { %v2045_v17 = vld [vmem:[%s2325_s30 + $0x38] sm:$0xff]   ;;  %1859 = vmatprep.subr.bf16.mxu0 %v2044_v16  ;;  %1971 = vmatprep.subr.bf16.mxu1 %v2044_v16  ;;  %v2047_v19 = vld [vmem:[%s2325_s30 + $0x30] sm:$0xff]   ;;  %v2049_v21 = vld [vmem:[%s2325_s30 + $0x28] sm:$0xff]  }
  0x4e   : > { %1860 = vmatpush3.bf16.msra.mxu0 %v2045_v17  ;;  %1979 = vmatpush3.bf16.msra.mxu1 %v2045_v17  ;;  %v2050_v22 = vld [vmem:[%s2325_s30 + $0x60] sm:$0xff]   ;;  %v2052_v24 = vld [vmem:[%s2325_s30 + $0x58] sm:$0xff]   ;;  %v2054_v26 = vld [vmem:[%s2325_s30 + $0x50] sm:$0xff]  }
  0x4f   : > { %1861 = vmatprep.subr.bf16.mxu0 %v2046_v18  ;;  %1972 = vmatprep.subr.bf16.mxu1 %v2046_v18  ;;  %v2051_v23 = vld [vmem:[%s2325_s30 + $0x20] sm:$0xff]   ;;  %v2053_v25 = vld [vmem:[%s2325_s30 + $0x18] sm:$0xff]   ;;  %v2055_v29 = vld [vmem:[%s2325_s30 + $0x10] sm:$0xff]  }
  0x50   : > { %v2062_v27 = vld [vmem:[%s2337_s18 + $0x4] ss:$8 sps:$4 sm:$0xff]   ;;  %v2060_v34 = vld [vmem:[%s2337_s18] ss:$8 sps:$4 sm:$0xff]   ;;  %v2066_v36 = vld [vmem:[%s2337_s18 + $0x14] ss:$8 sps:$4 sm:$0xff]  }
  0x51   : > { %v2065_v28 = vld [vmem:[%s2337_s18 + $0x84] ss:$8 sps:$4 sm:$0xff]   ;;  %958 = vmatprep.mubr.bf16.mxu0 %v2062_v27  ;;  %v2063_v35 = vld [vmem:[%s2337_s18 + $0x80] ss:$8 sps:$4 sm:$0xff]   ;;  %v2068_v37 = vld [vmem:[%s2337_s18 + $0x94] ss:$8 sps:$4 sm:$0xff]  }
  0x52   : > { %1862 = vmatpush3.bf16.msra.mxu0 %v2047_v19  ;;  %1980 = vmatpush3.bf16.msra.mxu1 %v2047_v19  ;;  %v2056_v30 = vld [vmem:[%s2325_s30 + $0x48] sm:$0xff]   ;;  %v2058_v32 = vld [vmem:[%s2325_s30 + $0x40] sm:$0xff]   ;;  %v2070_v38 = vld [vmem:[%s2337_s18 + $0x10] ss:$8 sps:$4 sm:$0xff]  }
  0x53   : > { %1863 = vmatprep.subr.bf16.mxu0 %v2048_v20  ;;  %1973 = vmatprep.subr.bf16.mxu1 %v2048_v20  ;;  %v2057_v31 = vld [vmem:[%s2325_s30 + $0x8] sm:$0xff]   ;;  %v2059_v33 = vld [vmem:[%s2325_s30] sm:$0xff]   ;;  %v2071_v39 = vld [vmem:[%s2337_s18 + $0x90] ss:$8 sps:$4 sm:$0xff]  }
  0x54   : > { %1022 = vmatprep.mubr.bf16.mxu1 %v2065_v28  ;;  %v2072_v40 = vld [vmem:[%s2337_s18 + $0x24] ss:$8 sps:$4 sm:$0xff]   ;;  %v2076_v42 = vld [vmem:[%s2337_s18 + $0x20] ss:$8 sps:$4 sm:$0xff]   ;;  %v2078_v44 = vld [vmem:[%s2337_s18 + $0x34] ss:$8 sps:$4 sm:$0xff]  }
  0x55   : > { %v2074_v41 = vld [vmem:[%s2337_s18 + $0xa4] ss:$8 sps:$4 sm:$0xff]   ;;  %v2077_v43 = vld [vmem:[%s2337_s18 + $0xa0] ss:$8 sps:$4 sm:$0xff]   ;;  %v2080_v45 = vld [vmem:[%s2337_s18 + $0xb4] ss:$8 sps:$4 sm:$0xff]  }
  0x56   : > { %1864 = vmatpush3.bf16.msra.mxu0 %v2049_v21  ;;  %1981 = vmatpush3.bf16.msra.mxu1 %v2049_v21  ;;  %v2082_v46 = vld [vmem:[%s2337_s18 + $0x30] ss:$8 sps:$4 sm:$0xff]   ;;  %v2084_v48 = vld [vmem:[%s2337_s18 + $0x44] ss:$8 sps:$4 sm:$0xff]   ;;  %v2088_v50 = vld [vmem:[%s2337_s18 + $0x40] ss:$8 sps:$4 sm:$0xff]  }
  0x57   : > { %1865 = vmatprep.subr.bf16.mxu0 %v2050_v22  ;;  %1974 = vmatprep.subr.bf16.mxu1 %v2050_v22  ;;  %v2083_v47 = vld [vmem:[%s2337_s18 + $0xb0] ss:$8 sps:$4 sm:$0xff]   ;;  %v2086_v49 = vld [vmem:[%s2337_s18 + $0xc4] ss:$8 sps:$4 sm:$0xff]   ;;  %v2089_v51 = vld [vmem:[%s2337_s18 + $0xc0] ss:$8 sps:$4 sm:$0xff]  }
  0x58   : > { %v2090_v52 = vld [vmem:[%s2337_s18 + $0x54] ss:$8 sps:$4 sm:$0xff]   ;;  %v2094_v54 = vld [vmem:[%s2337_s18 + $0x50] ss:$8 sps:$4 sm:$0xff]   ;;  %v2096_v56 = vld [vmem:[%s2337_s18 + $0x64] ss:$8 sps:$4 sm:$0xff]  }
  0x59   : > { %v2092_v53 = vld [vmem:[%s2337_s18 + $0xd4] ss:$8 sps:$4 sm:$0xff]   ;;  %v2095_v55 = vld [vmem:[%s2337_s18 + $0xd0] ss:$8 sps:$4 sm:$0xff]   ;;  %v2098_v57 = vld [vmem:[%s2337_s18 + $0xe4] ss:$8 sps:$4 sm:$0xff]  }
  0x5a   : > { %1866 = vmatpush3.bf16.msra.mxu0 %v2051_v23  ;;  %1982 = vmatpush3.bf16.msra.mxu1 %v2051_v23  ;;  %v2100_v58 = vld [vmem:[%s2337_s18 + $0x60] ss:$8 sps:$4 sm:$0xff]   ;;  %v2102_v60 = vld [vmem:[%s2337_s18 + $0x74] ss:$8 sps:$4 sm:$0xff]   ;;  %v2106_v62 = vld [vmem:[%s2337_s18 + $0x70] ss:$8 sps:$4 sm:$0xff]  }
  0x5b   : > { %1867 = vmatprep.subr.bf16.mxu0 %v2052_v24  ;;  %1975 = vmatprep.subr.bf16.mxu1 %v2052_v24  ;;  %v2101_v59 = vld [vmem:[%s2337_s18 + $0xe0] ss:$8 sps:$4 sm:$0xff]   ;;  %v2104_v61 = vld [vmem:[%s2337_s18 + $0xf4] ss:$8 sps:$4 sm:$0xff]   ;;  %v2107_v63 = vld [vmem:[%s2337_s18 + $0xf0] ss:$8 sps:$4 sm:$0xff]  }
  0x5c   : > { %v574_v2 = vld [vmem:[#allocation2 + $0xb0] sm:$0xff]  ;;  %v590_v4 = vld [vmem:[#allocation2 + $0x38] sm:$0xff]  ;;  %v575_v12 = vld [vmem:[#allocation2] sm:$0xff] }
  0x5d   : > { %v591_v14 = vld [vmem:[#allocation2 + $0x58] sm:$0xff]  ;;  %v592_v24 = vld [vmem:[#allocation2 + $0x40] sm:$0xff] }
  0x5e   : > { %1868 = vmatpush3.bf16.msra.mxu0 %v2053_v25  ;;  %1983 = vmatpush3.bf16.msra.mxu1 %v2053_v25  ;;  %v576_v22 = vld [vmem:[#allocation2 + $0xd8] sm:$0xff] }
  0x5f   : > { %1869 = vmatprep.subr.bf16.mxu0 %v2054_v26  ;;  %1976 = vmatprep.subr.bf16.mxu1 %v2054_v26 }
  0x62   : > { %1870 = vmatpush3.bf16.msra.mxu0 %v2055_v29  ;;  %1984 = vmatpush3.bf16.msra.mxu1 %v2055_v29 }
  0x63   : > { %1871 = vmatprep.subr.bf16.mxu0 %v2056_v30  ;;  %1977 = vmatprep.subr.bf16.mxu1 %v2056_v30 }
  0x66   : > { %1872 = vmatpush3.bf16.msra.mxu0 %v2057_v31  ;;  %1985 = vmatpush3.bf16.msra.mxu1 %v2057_v31 }
  0x67   : > { %1873 = vmatprep.subr.bf16.mxu0 %v2058_v32  ;;  %1978 = vmatprep.subr.bf16.mxu1 %v2058_v32  ;;  %v577_v32 = vld [vmem:[#allocation2 + $0x18] sm:$0xff] }
  0x6a   : > { %1874 = vmatpush3.bf16.msra.mxu0 %v2059_v33  ;;  %1986 = vmatpush3.bf16.msra.mxu1 %v2059_v33 }
  0x6d   : > { %959 = vmatmul.mubr.bf16.vlgmr.msra.gmra.mxu0 %v2060_v34  ;;  %1023 = vmatmul.mubr.bf16.vlgmr.msra.gmra.mxu1 %v2063_v35  ;;  %v593_v34 = vld [vmem:[#allocation2 + $0xc8] sm:$0xff] }
  0x6e   : > { %966 = vmatprep.mubr.bf16.mxu0 %v2066_v36  ;;  %1030 = vmatprep.mubr.bf16.mxu1 %v2068_v37 }
  0x75   : > { %967 = vmatmul.mubr.bf16.gmra.mxu0 %v2070_v38  ;;  %1031 = vmatmul.mubr.bf16.gmra.mxu1 %v2071_v39 }
  0x76   : > { %974 = vmatprep.mubr.bf16.mxu0 %v2072_v40  ;;  %1038 = vmatprep.mubr.bf16.mxu1 %v2074_v41 }
  0x7d   : > { %975 = vmatmul.mubr.bf16.gmra.mxu0 %v2076_v42  ;;  %1039 = vmatmul.mubr.bf16.gmra.mxu1 %v2077_v43  ;;  %v578_v42 = vld [vmem:[#allocation2 + $0x50] sm:$0xff] }
  0x7e   : > { %982 = vmatprep.mubr.bf16.mxu0 %v2078_v44  ;;  %1046 = vmatprep.mubr.bf16.mxu1 %v2080_v45  ;;  %v594_v44 = vld [vmem:[#allocation2 + $0xe0] sm:$0xff] }
  0x85   : > { %983 = vmatmul.mubr.bf16.gmra.mxu0 %v2082_v46  ;;  %1047 = vmatmul.mubr.bf16.gmra.mxu1 %v2083_v47 }
  0x86   : > { %990 = vmatprep.mubr.bf16.mxu0 %v2084_v48  ;;  %1054 = vmatprep.mubr.bf16.mxu1 %v2086_v49 }
  0x8d   : > { %991 = vmatmul.mubr.bf16.gmra.mxu0 %v2088_v50  ;;  %1055 = vmatmul.mubr.bf16.gmra.mxu1 %v2089_v51 }
  0x8e   : > { %998 = vmatprep.mubr.bf16.mxu0 %v2090_v52  ;;  %1062 = vmatprep.mubr.bf16.mxu1 %v2092_v53  ;;  %v579_v52 = vld [vmem:[#allocation2 + $0x68] sm:$0xff] }
  0x95   : > { %999 = vmatmul.mubr.bf16.gmra.mxu0 %v2094_v54  ;;  %1063 = vmatmul.mubr.bf16.gmra.mxu1 %v2095_v55  ;;  %v595_v54 = vld [vmem:[#allocation2 + $0x90] sm:$0xff] }
  0x96   : > { %1006 = vmatprep.mubr.bf16.mxu0 %v2096_v56  ;;  %1070 = vmatprep.mubr.bf16.mxu1 %v2098_v57 }
  0x9d   : > { %1007 = vmatmul.mubr.bf16.gmra.mxu0 %v2100_v58  ;;  %1071 = vmatmul.mubr.bf16.gmra.mxu1 %v2101_v59 }
  0x9e   : > { %1014 = vmatprep.mubr.bf16.mxu0 %v2102_v60  ;;  %1078 = vmatprep.mubr.bf16.mxu1 %v2104_v61 }
  0xa5   : > { %1015 = vmatmul.mubr.bf16.gmra.mxu0 %v2106_v62  ;;  %1079 = vmatmul.mubr.bf16.gmra.mxu1 %v2107_v63  ;;  %v580_v62 = vld [vmem:[#allocation2 + $0x30] sm:$0xff] }
 0x12d   : > { %v1875_v0 = vpop.f32.mrf.mxu0  ;;  %v1923_v1 = vpop.f32.mrf.mxu1 }
 0x12f   : > { %v1876_v3 = vpop.f32.mrf.mxu0  ;;  %v1924_v5 = vpop.f32.mrf.mxu1 }
 0x130   : > { %v1877_v6 = vadd.f32 %v1876_v3, %v1875_v0  ;;  %v1925_v7 = vadd.f32 %v1924_v5, %v1923_v1  ;;  %v596_v0 = vld [vmem:[#allocation2 + $0x70] sm:$0xff] }
 0x131   : > { %v1878_v8 = vpop.f32.mrf.mxu0  ;;  %v1926_v9 = vpop.f32.mrf.mxu1 }
 0x132   : > { %v1087_v10 = vadd.f32 %v1877_v6, %v574_v2  ;;  %v1103_v11 = vadd.f32 %v1925_v7, %v590_v4 }
 0x133   : > { %v1879_v13 = vpop.f32.mrf.mxu0  ;;  %v1927_v15 = vpop.f32.mrf.mxu1 }
 0x134   : > { %1119 = vst [vmem:[#allocation2 + $0xb0] sm:$0xff] %v1087_v10  ;;  %1135 = vst [vmem:[#allocation2 + $0x38] sm:$0xff] %v1103_v11  ;;  %v1880_v16 = vadd.f32 %v1879_v13, %v1878_v8  ;;  %v1928_v17 = vadd.f32 %v1927_v15, %v1926_v9  ;;  %v581_v8 = vld [vmem:[#allocation2 + $0x48] sm:$0xff]  ;;  %v597_v10 = vld [vmem:[#allocation2 + $0xc0] sm:$0xff] }
 0x135   : > { %v1881_v18 = vpop.f32.mrf.mxu0  ;;  %v1929_v19 = vpop.f32.mrf.mxu1 }
 0x136   : > { %v1088_v20 = vadd.f32 %v1880_v16, %v575_v12  ;;  %v1104_v21 = vadd.f32 %v1928_v17, %v591_v14 }
 0x137   : > { %v1882_v23 = vpop.f32.mrf.mxu0  ;;  %v1930_v25 = vpop.f32.mrf.mxu1 }
 0x138   : > { %1120 = vst [vmem:[#allocation2] sm:$0xff] %v1088_v20  ;;  %1136 = vst [vmem:[#allocation2 + $0x58] sm:$0xff] %v1104_v21  ;;  %v1883_v26 = vadd.f32 %v1882_v23, %v1881_v18  ;;  %v1931_v27 = vadd.f32 %v1930_v25, %v1929_v19  ;;  %v582_v18 = vld [vmem:[#allocation2 + $0x80] sm:$0xff]  ;;  %v598_v20 = vld [vmem:[#allocation2 + $0xa8] sm:$0xff] }
 0x139   : > { %v1884_v28 = vpop.f32.mrf.mxu0  ;;  %v1932_v29 = vpop.f32.mrf.mxu1 }
 0x13a   : > { %v1089_v30 = vadd.f32 %v1883_v26, %v576_v22  ;;  %v1105_v31 = vadd.f32 %v1931_v27, %v592_v24 }
 0x13b   : > { %v1885_v33 = vpop.f32.mrf.mxu0  ;;  %v1933_v35 = vpop.f32.mrf.mxu1 }
 0x13c   : > { %1121 = vst [vmem:[#allocation2 + $0xd8] sm:$0xff] %v1089_v30  ;;  %1137 = vst [vmem:[#allocation2 + $0x40] sm:$0xff] %v1105_v31  ;;  %v1886_v36 = vadd.f32 %v1885_v33, %v1884_v28  ;;  %v1934_v37 = vadd.f32 %v1933_v35, %v1932_v29  ;;  %v583_v28 = vld [vmem:[#allocation2 + $0x88] sm:$0xff]  ;;  %v599_v30 = vld [vmem:[#allocation2 + $0xd0] sm:$0xff] }
 0x13d   : > { %v1887_v38 = vpop.f32.mrf.mxu0  ;;  %v1935_v39 = vpop.f32.mrf.mxu1 }
 0x13e   : > { %v1090_v40 = vadd.f32 %v1886_v36, %v577_v32  ;;  %v1106_v41 = vadd.f32 %v1934_v37, %v593_v34 }
 0x13f   : > { %v1888_v43 = vpop.f32.mrf.mxu0  ;;  %v1936_v45 = vpop.f32.mrf.mxu1 }
 0x140   : > { %1122 = vst [vmem:[#allocation2 + $0x18] sm:$0xff] %v1090_v40  ;;  %1138 = vst [vmem:[#allocation2 + $0xc8] sm:$0xff] %v1106_v41  ;;  %v1889_v46 = vadd.f32 %v1888_v43, %v1887_v38  ;;  %v1937_v47 = vadd.f32 %v1936_v45, %v1935_v39  ;;  %v584_v38 = vld [vmem:[#allocation2 + $0xe8] sm:$0xff]  ;;  %v600_v40 = vld [vmem:[#allocation2 + $0x10] sm:$0xff] }
 0x141   : > { %v1890_v48 = vpop.f32.mrf.mxu0  ;;  %v1938_v49 = vpop.f32.mrf.mxu1 }
 0x142   : > { %v1091_v50 = vadd.f32 %v1889_v46, %v578_v42  ;;  %v1107_v51 = vadd.f32 %v1937_v47, %v594_v44 }
 0x143   : > { %v1891_v53 = vpop.f32.mrf.mxu0  ;;  %v1939_v55 = vpop.f32.mrf.mxu1 }
 0x144   : > { %1123 = vst [vmem:[#allocation2 + $0x50] sm:$0xff] %v1091_v50  ;;  %1139 = vst [vmem:[#allocation2 + $0xe0] sm:$0xff] %v1107_v51  ;;  %v1892_v56 = vadd.f32 %v1891_v53, %v1890_v48  ;;  %v1940_v57 = vadd.f32 %v1939_v55, %v1938_v49  ;;  %v585_v48 = vld [vmem:[#allocation2 + $0xb8] sm:$0xff]  ;;  %v601_v50 = vld [vmem:[#allocation2 + $0x28] sm:$0xff] }
 0x145   : > { %v1893_v58 = vpop.f32.mrf.mxu0  ;;  %v1941_v59 = vpop.f32.mrf.mxu1 }
 0x146   : > { %v1092_v60 = vadd.f32 %v1892_v56, %v579_v52  ;;  %v1108_v61 = vadd.f32 %v1940_v57, %v595_v54 }
 0x147   : > { %v1894_v63 = vpop.f32.mrf.mxu0  ;;  %v1942_v1 = vpop.f32.mrf.mxu1 }
 0x148   : > { %1124 = vst [vmem:[#allocation2 + $0x68] sm:$0xff] %v1092_v60  ;;  %1140 = vst [vmem:[#allocation2 + $0x90] sm:$0xff] %v1108_v61  ;;  %v1895_v2 = vadd.f32 %v1894_v63, %v1893_v58  ;;  %v1943_v3 = vadd.f32 %v1942_v1, %v1941_v59  ;;  %v586_v58 = vld [vmem:[#allocation2 + $0x60] sm:$0xff] }
 0x149   : > { %v1896_v4 = vpop.f32.mrf.mxu0  ;;  %v1944_v5 = vpop.f32.mrf.mxu1  ;;  %v602_v60 = vld [vmem:[#allocation2 + $0xa0] sm:$0xff] }
 0x14a   : > { %v1093_v6 = vadd.f32 %v1895_v2, %v580_v62  ;;  %v1109_v7 = vadd.f32 %v1943_v3, %v596_v0 }
 0x14b   : > { %v1897_v9 = vpop.f32.mrf.mxu0  ;;  %v1945_v11 = vpop.f32.mrf.mxu1 }
 0x14c   : > { %1125 = vst [vmem:[#allocation2 + $0x30] sm:$0xff] %v1093_v6  ;;  %1141 = vst [vmem:[#allocation2 + $0x70] sm:$0xff] %v1109_v7  ;;  %v1898_v12 = vadd.f32 %v1897_v9, %v1896_v4  ;;  %v1946_v13 = vadd.f32 %v1945_v11, %v1944_v5  ;;  %v587_v4 = vld [vmem:[#allocation2 + $0xf0] sm:$0xff]  ;;  %v603_v6 = vld [vmem:[#allocation2 + $0xf8] sm:$0xff] }
 0x14d   : > { %v1899_v14 = vpop.f32.mrf.mxu0  ;;  %v1947_v15 = vpop.f32.mrf.mxu1 }
 0x14e   : > { %v1094_v16 = vadd.f32 %v1898_v12, %v581_v8  ;;  %v1110_v17 = vadd.f32 %v1946_v13, %v597_v10 }
 0x14f   : > { %v1900_v19 = vpop.f32.mrf.mxu0  ;;  %v1948_v21 = vpop.f32.mrf.mxu1 }
 0x150   : > { %1126 = vst [vmem:[#allocation2 + $0x48] sm:$0xff] %v1094_v16  ;;  %1142 = vst [vmem:[#allocation2 + $0xc0] sm:$0xff] %v1110_v17  ;;  %v1901_v22 = vadd.f32 %v1900_v19, %v1899_v14  ;;  %v1949_v23 = vadd.f32 %v1948_v21, %v1947_v15  ;;  %v588_v14 = vld [vmem:[#allocation2 + $0x8] sm:$0xff]  ;;  %v604_v16 = vld [vmem:[#allocation2 + $0x20] sm:$0xff] }
 0x151   : > { %v1902_v24 = vpop.f32.mrf.mxu0  ;;  %v1950_v25 = vpop.f32.mrf.mxu1 }
 0x152   : > { %v1095_v26 = vadd.f32 %v1901_v22, %v582_v18  ;;  %v1111_v27 = vadd.f32 %v1949_v23, %v598_v20 }
 0x153   : > { %v1903_v29 = vpop.f32.mrf.mxu0  ;;  %v1951_v31 = vpop.f32.mrf.mxu1 }
 0x154   : > { %1127 = vst [vmem:[#allocation2 + $0x80] sm:$0xff] %v1095_v26  ;;  %1143 = vst [vmem:[#allocation2 + $0xa8] sm:$0xff] %v1111_v27  ;;  %v1904_v32 = vadd.f32 %v1903_v29, %v1902_v24  ;;  %v1952_v33 = vadd.f32 %v1951_v31, %v1950_v25  ;;  %v589_v24 = vld [vmem:[#allocation2 + $0x78] sm:$0xff] }
 0x155   : > { %v1905_v34 = vpop.f32.mrf.mxu0  ;;  %v1953_v35 = vpop.f32.mrf.mxu1  ;;  %v605_v26 = vld [vmem:[#allocation2 + $0x98] sm:$0xff] }
 0x156   : > { %v1096_v36 = vadd.f32 %v1904_v32, %v583_v28  ;;  %v1112_v37 = vadd.f32 %v1952_v33, %v599_v30 }
 0x157   : > { %v1906_v39 = vpop.f32.mrf.mxu0  ;;  %v1954_v41 = vpop.f32.mrf.mxu1 }
 0x158   : > { %1128 = vst [vmem:[#allocation2 + $0x88] sm:$0xff] %v1096_v36  ;;  %1144 = vst [vmem:[#allocation2 + $0xd0] sm:$0xff] %v1112_v37  ;;  %v1907_v42 = vadd.f32 %v1906_v39, %v1905_v34  ;;  %v1955_v43 = vadd.f32 %v1954_v41, %v1953_v35 }
 0x159   : > { %v1908_v44 = vpop.f32.mrf.mxu0  ;;  %v1956_v45 = vpop.f32.mrf.mxu1 }
 0x15a   : > { %v1097_v46 = vadd.f32 %v1907_v42, %v584_v38  ;;  %v1113_v47 = vadd.f32 %v1955_v43, %v600_v40 }
 0x15b   : > { %v1909_v49 = vpop.f32.mrf.mxu0  ;;  %v1957_v51 = vpop.f32.mrf.mxu1 }
 0x15c   : > { %1129 = vst [vmem:[#allocation2 + $0xe8] sm:$0xff] %v1097_v46  ;;  %1145 = vst [vmem:[#allocation2 + $0x10] sm:$0xff] %v1113_v47  ;;  %v1910_v52 = vadd.f32 %v1909_v49, %v1908_v44  ;;  %v1958_v53 = vadd.f32 %v1957_v51, %v1956_v45 }
 0x15d   : > { %v1911_v54 = vpop.f32.mrf.mxu0  ;;  %v1959_v55 = vpop.f32.mrf.mxu1 }
 0x15e   : > { %v1098_v56 = vadd.f32 %v1910_v52, %v585_v48  ;;  %v1114_v57 = vadd.f32 %v1958_v53, %v601_v50 }
 0x15f   : > { %v1912_v59 = vpop.f32.mrf.mxu0  ;;  %v1960_v61 = vpop.f32.mrf.mxu1 }
 0x160   : > { %1130 = vst [vmem:[#allocation2 + $0xb8] sm:$0xff] %v1098_v56  ;;  %1146 = vst [vmem:[#allocation2 + $0x28] sm:$0xff] %v1114_v57  ;;  %v1913_v62 = vadd.f32 %v1912_v59, %v1911_v54  ;;  %v1961_v63 = vadd.f32 %v1960_v61, %v1959_v55 }
 0x161   : > { %v1914_v0 = vpop.f32.mrf.mxu0  ;;  %v1962_v1 = vpop.f32.mrf.mxu1 }
 0x162   : > { %v1099_v2 = vadd.f32 %v1913_v62, %v586_v58  ;;  %v1115_v3 = vadd.f32 %v1961_v63, %v602_v60 }
 0x163   : > { %v1915_v5 = vpop.f32.mrf.mxu0  ;;  %v1963_v7 = vpop.f32.mrf.mxu1 }
 0x164   : > { %1131 = vst [vmem:[#allocation2 + $0x60] sm:$0xff] %v1099_v2  ;;  %1147 = vst [vmem:[#allocation2 + $0xa0] sm:$0xff] %v1115_v3  ;;  %v1916_v8 = vadd.f32 %v1915_v5, %v1914_v0  ;;  %v1964_v9 = vadd.f32 %v1963_v7, %v1962_v1 }
 0x165   : > { %v1917_v10 = vpop.f32.mrf.mxu0  ;;  %v1965_v11 = vpop.f32.mrf.mxu1 }
 0x166   : > { %v1100_v12 = vadd.f32 %v1916_v8, %v587_v4  ;;  %v1116_v13 = vadd.f32 %v1964_v9, %v603_v6 }
 0x167   : > { %v1918_v15 = vpop.f32.mrf.mxu0  ;;  %v1966_v17 = vpop.f32.mrf.mxu1 }
 0x168   : > { %1132 = vst [vmem:[#allocation2 + $0xf0] sm:$0xff] %v1100_v12  ;;  %1148 = vst [vmem:[#allocation2 + $0xf8] sm:$0xff] %v1116_v13  ;;  %v1919_v18 = vadd.f32 %v1918_v15, %v1917_v10  ;;  %v1967_v19 = vadd.f32 %v1966_v17, %v1965_v11 }
 0x169   : > { %v1920_v20 = vpop.f32.mrf.mxu0  ;;  %v1968_v21 = vpop.f32.mrf.mxu1 }
 0x16a   : > { %v1101_v22 = vadd.f32 %v1919_v18, %v588_v14  ;;  %v1117_v23 = vadd.f32 %v1967_v19, %v604_v16 }
 0x16b   : > { %v1921_v25 = vpop.f32.mrf.mxu0  ;;  %v1969_v27 = vpop.f32.mrf.mxu1 }
 0x16c   : > { %1133 = vst [vmem:[#allocation2 + $0x8] sm:$0xff] %v1101_v22  ;;  %1149 = vst [vmem:[#allocation2 + $0x20] sm:$0xff] %v1117_v23  ;;  %v1922_v28 = vadd.f32 %v1921_v25, %v1920_v20  ;;  %v1970_v29 = vadd.f32 %v1969_v27, %v1968_v21  ;;  %1154 = sbr.rel (%p1617_p13) target bundleno = 395 (0x18b), region = 82 }
 0x16e   : > { %v1102_v30 = vadd.f32 %v1922_v28, %v589_v24  ;;  %v1118_v31 = vadd.f32 %v1970_v29, %v605_v26 }
 0x170   : > { %1134 = vst [vmem:[#allocation2 + $0x78] sm:$0xff] %v1102_v30  ;;  %1150 = vst [vmem:[#allocation2 + $0x98] sm:$0xff] %v1118_v31 }
 0x171   : > { %v1155_v32 = vld [vmem:[#allocation2 + $0xb0] sm:$0xff]  ;;  %v1156_v33 = vld [vmem:[#allocation2] sm:$0xff]  ;;  %v1157_v37 = vld [vmem:[#allocation2 + $0xd8] sm:$0xff] }
 0x172   : > { %v2408_v34 = vld [vmem:[%s2481_s2] ss:$0 sm:$0xff]  ;;  %v1158_v38 = vld [vmem:[#allocation2 + $0x18] sm:$0xff]  ;;  %v1159_v39 = vld [vmem:[#allocation2 + $0x50] sm:$0xff] }
 0x173   : > { %v1194_v35 = vadd.f32 %v2408_v34, %v1155_v32  ;;  %v1195_v36 = vadd.f32 %v2408_v34, %v1156_v33  ;;  %v1196_v40 = vadd.f32 %v2408_v34, %v1157_v37  ;;  %v1197_v41 = vadd.f32 %v2408_v34, %v1158_v38  ;;  %v1160_v42 = vld [vmem:[#allocation2 + $0x68] sm:$0xff]  ;;  %v1161_v44 = vld [vmem:[#allocation2 + $0x30] sm:$0xff]  ;;  %v1163_v50 = vld [vmem:[#allocation2 + $0x80] sm:$0xff] }
 0x174   : > { %v1198_v43 = vadd.f32 %v2408_v34, %v1159_v39  ;;  %v1162_v45 = vld [vmem:[#allocation2 + $0x48] sm:$0xff]  ;;  %v1199_v48 = vadd.f32 %v2408_v34, %v1160_v42  ;;  %v1200_v49 = vadd.f32 %v2408_v34, %v1161_v44  ;;  %v1166_v57 = vld [vmem:[#allocation2 + $0xb8] sm:$0xff]  ;;  %v1167_v58 = vld [vmem:[#allocation2 + $0x60] sm:$0xff]  ;;  %v1202_v62 = vadd.f32 %v2408_v34, %v1163_v50 }
 0x175   : > { %v1226_v46 = vmax.f32 %v1194_v35, 0.0  ;;  %v1227_v47 = vmax.f32 %v1195_v36, 0.0  ;;  %v1164_v51 = vld [vmem:[#allocation2 + $0x88] sm:$0xff]  ;;  %v1228_v53 = vmax.f32 %v1196_v40, 0.0  ;;  %v1229_v54 = vmax.f32 %v1197_v41, 0.0  ;;  %v1168_v63 = vld [vmem:[#allocation2 + $0xf0] sm:$0xff] }
 0x176   : > { %v1165_v52 = vld [vmem:[#allocation2 + $0xe8] sm:$0xff]  ;;  %v1230_v55 = vmax.f32 %v1198_v43, 0.0  ;;  %v1201_v56 = vadd.f32 %v2408_v34, %v1162_v45  ;;  %v1231_v60 = vmax.f32 %v1199_v48, 0.0  ;;  %v1232_v61 = vmax.f32 %v1200_v49, 0.0  ;;  %v1171_v10 = vld [vmem:[#allocation2 + $0x38] sm:$0xff]  ;;  %v1173_v16 = vld [vmem:[#allocation2 + $0x40] sm:$0xff] }
 0x177   : > { %v1752_v59 = vpack.c.bf16 %v1227_v47, %v1226_v46  ;;  %v1757_v0 = vpack.c.bf16 %v1229_v54, %v1228_v53  ;;  %v1203_v2 = vadd.f32 %v2408_v34, %v1164_v51  ;;  %v1204_v3 = vadd.f32 %v2408_v34, %v1165_v52  ;;  %v1169_v4 = vld [vmem:[#allocation2 + $0x8] sm:$0xff]  ;;  %v1170_v5 = vld [vmem:[#allocation2 + $0x78] sm:$0xff]  ;;  %v1175_v26 = vld [vmem:[#allocation2 + $0xe0] sm:$0xff] }
 0x178   : > { %v1233_v1 = vmax.f32 %v1201_v56, 0.0  ;;  %v1762_v6 = vpack.c.bf16 %v1231_v60, %v1230_v55  ;;  %v1234_v7 = vmax.f32 %v1202_v62, 0.0  ;;  %v1205_v8 = vadd.f32 %v2408_v34, %v1166_v57  ;;  %v1172_v11 = vld [vmem:[#allocation2 + $0x58] sm:$0xff]  ;;  %v1174_v21 = vld [vmem:[#allocation2 + $0xc8] sm:$0xff]  ;;  %v1176_v27 = vld [vmem:[#allocation2 + $0x90] sm:$0xff] }
 0x179   : > { %1753 = vst [vmem:[%s2335_s10] sm:$0xff] %v1752_v59   ;;  %v1206_v9 = vadd.f32 %v2408_v34, %v1167_v58  ;;  %1844 = vst [vmem:[%s2335_s10 + $0x8] sm:$0xff] %v1757_v0   ;;  %v1235_v13 = vmax.f32 %v1203_v2, 0.0  ;;  %v1236_v14 = vmax.f32 %v1204_v3, 0.0  ;;  %v1207_v15 = vadd.f32 %v2408_v34, %v1168_v63  ;;  %v1177_v32 = vld [vmem:[#allocation2 + $0x70] sm:$0xff]  ;;  %v1178_v33 = vld [vmem:[#allocation2 + $0xc0] sm:$0xff] }
 0x17a   : > { %v1767_v12 = vpack.c.bf16 %v1233_v1, %v1232_v61  ;;  %1845 = vst [vmem:[%s2335_s10 + $0x10] sm:$0xff] %v1762_v6   ;;  %v1237_v17 = vmax.f32 %v1205_v8, 0.0  ;;  %v1208_v19 = vadd.f32 %v2408_v34, %v1169_v4  ;;  %v1209_v20 = vadd.f32 %v2408_v34, %v1170_v5  ;;  %v1179_v39 = vld [vmem:[#allocation2 + $0xa8] sm:$0xff]  ;;  %v1180_v40 = vld [vmem:[#allocation2 + $0xd0] sm:$0xff]  ;;  %v1183_v55 = vld [vmem:[#allocation2 + $0xa0] sm:$0xff] }
 0x17b   : > { %v1238_v18 = vmax.f32 %v1206_v9, 0.0  ;;  %v1772_v22 = vpack.c.bf16 %v1235_v13, %v1234_v7  ;;  %v1239_v23 = vmax.f32 %v1207_v15, 0.0  ;;  %v1210_v24 = vadd.f32 %v2408_v34, %v1171_v10  ;;  %v1181_v45 = vld [vmem:[#allocation2 + $0x10] sm:$0xff]  ;;  %v1182_v50 = vld [vmem:[#allocation2 + $0x28] sm:$0xff]  ;;  %v1184_v56 = vld [vmem:[#allocation2 + $0xf8] sm:$0xff] }
 0x17c   : > { %1846 = vst [vmem:[%s2335_s10 + $0x18] sm:$0xff] %v1767_v12   ;;  %v1211_v25 = vadd.f32 %v2408_v34, %v1172_v11  ;;  %v1777_v28 = vpack.c.bf16 %v1237_v17, %v1236_v14  ;;  %v1240_v29 = vmax.f32 %v1208_v19, 0.0  ;;  %v1241_v30 = vmax.f32 %v1209_v20, 0.0  ;;  %v1185_v61 = vld [vmem:[#allocation2 + $0x20] sm:$0xff]  ;;  %v1186_v62 = vld [vmem:[#allocation2 + $0x98] sm:$0xff] }
 0x17d   : > { %v1212_v31 = vadd.f32 %v2408_v34, %v1173_v16  ;;  %1847 = vst [vmem:[%s2335_s10 + $0x20] sm:$0xff] %v1772_v22   ;;  %v1782_v35 = vpack.c.bf16 %v1239_v23, %v1238_v18  ;;  %v1242_v36 = vmax.f32 %v1210_v24, 0.0  ;;  %v1213_v38 = vadd.f32 %v2408_v34, %v1174_v21 }
 0x17e   : > { %v1243_v37 = vmax.f32 %v1211_v25, 0.0  ;;  %1848 = vst [vmem:[%s2335_s10 + $0x28] sm:$0xff] %v1777_v28   ;;  %v1787_v41 = vpack.c.bf16 %v1241_v30, %v1240_v29  ;;  %v1214_v43 = vadd.f32 %v2408_v34, %v1175_v26  ;;  %v1215_v44 = vadd.f32 %v2408_v34, %v1176_v27 }
 0x17f   : > { %v1244_v42 = vmax.f32 %v1212_v31, 0.0  ;;  %1849 = vst [vmem:[%s2335_s10 + $0x30] sm:$0xff] %v1782_v35   ;;  %v1245_v47 = vmax.f32 %v1213_v38, 0.0  ;;  %v1216_v48 = vadd.f32 %v2408_v34, %v1177_v32  ;;  %v1217_v49 = vadd.f32 %v2408_v34, %v1178_v33 }
 0x180   : > { %v1792_v46 = vpack.c.bf16 %v1243_v37, %v1242_v36  ;;  %1850 = vst [vmem:[%s2335_s10 + $0x38] sm:$0xff] %v1787_v41   ;;  %v1246_v51 = vmax.f32 %v1214_v43, 0.0  ;;  %v1247_v52 = vmax.f32 %v1215_v44, 0.0  ;;  %v1218_v53 = vadd.f32 %v2408_v34, %v1179_v39 }
 0x181   : > { %v1219_v54 = vadd.f32 %v2408_v34, %v1180_v40  ;;  %v1797_v57 = vpack.c.bf16 %v1245_v47, %v1244_v42  ;;  %v1248_v58 = vmax.f32 %v1216_v48, 0.0  ;;  %v1249_v59 = vmax.f32 %v1217_v49, 0.0 }
 0x182   : > { %1851 = vst [vmem:[%s2335_s10 + $0x40] sm:$0xff] %v1792_v46   ;;  %v1220_v60 = vadd.f32 %v2408_v34, %v1181_v45  ;;  %v1802_v63 = vpack.c.bf16 %v1247_v52, %v1246_v51  ;;  %v1250_v0 = vmax.f32 %v1218_v53, 0.0  ;;  %v1221_v2 = vadd.f32 %v2408_v34, %v1182_v50 }
 0x183   : > { %v1251_v1 = vmax.f32 %v1219_v54, 0.0  ;;  %1852 = vst [vmem:[%s2335_s10 + $0x48] sm:$0xff] %v1797_v57   ;;  %v1807_v3 = vpack.c.bf16 %v1249_v59, %v1248_v58  ;;  %v1222_v5 = vadd.f32 %v2408_v34, %v1183_v55  ;;  %v1223_v6 = vadd.f32 %v2408_v34, %v1184_v56 }
 0x184   : > { %v1252_v4 = vmax.f32 %v1220_v60, 0.0  ;;  %1853 = vst [vmem:[%s2335_s10 + $0x50] sm:$0xff] %v1802_v63   ;;  %v1253_v8 = vmax.f32 %v1221_v2, 0.0  ;;  %v1224_v9 = vadd.f32 %v2408_v34, %v1185_v61  ;;  %v1225_v10 = vadd.f32 %v2408_v34, %v1186_v62 }
 0x185   : > { %v1812_v7 = vpack.c.bf16 %v1251_v1, %v1250_v0  ;;  %1854 = vst [vmem:[%s2335_s10 + $0x58] sm:$0xff] %v1807_v3   ;;  %v1254_v11 = vmax.f32 %v1222_v5, 0.0  ;;  %v1255_v12 = vmax.f32 %v1223_v6, 0.0 }
 0x186   : > { %v1817_v13 = vpack.c.bf16 %v1253_v8, %v1252_v4  ;;  %v1256_v14 = vmax.f32 %v1224_v9, 0.0  ;;  %v1257_v15 = vmax.f32 %v1225_v10, 0.0 }
 0x187   : > { %1855 = vst [vmem:[%s2335_s10 + $0x60] sm:$0xff] %v1812_v7   ;;  %v1822_v16 = vpack.c.bf16 %v1255_v12, %v1254_v11 }
 0x188   : > { %1856 = vst [vmem:[%s2335_s10 + $0x68] sm:$0xff] %v1817_v13   ;;  %v1827_v17 = vpack.c.bf16 %v1257_v15, %v1256_v14 }
 0x189   : > { %1857 = vst [vmem:[%s2335_s10 + $0x70] sm:$0xff] %v1822_v16  }
 0x18a   : > { %1858 = vst [vmem:[%s2335_s10 + $0x78] sm:$0xff] %v1827_v17  }
 0x18b PF: > { %s14_s21 = sadd.s32 1, %s2162_s21   ;;  %s2484_s15 = smov %s2142_s16 }
 0x18c   : > { %p11_p0 = scmp.ge.s32.totalorder %s14_s21, 8   ;;  %s2485_s16 = smov %s2240_s28 }
 0x18d   : > { %s2486_s17 = smov %s2154_s19  ;;  %s2487_s18 = smov %s2158_s20 }
 0x18e   : > { %s2488_s19 = smov %s2491_s22  ;;  %s2489_s20 = smov %s2495_s23 }
 0x18f   :  { %13 = sbr.rel (!%p11_p0) target bundleno = 4 (0x4), region = 126 }

// kernel: resnet_forward.19
= control target key start
LH: loop header
LB: loop body
LE: loop exit
PB: predicated region body
PF: predicated region fallthrough
CT: control target
= control target key end

     0   :  { %s1341_s12 = smov 0   ;;  %s1343_s13 = smov 0   ;;  %s1489_s0 = inlined_call_operand.vmem [shape: bf16[128,768], index: 0, kind: input, shape index: {}]   ;;  %s1490_s1 = inlined_call_operand.vmem [shape: bf16[768,128], index: 1, kind: input, shape index: {}]   ;;  %s1491_s2 = inlined_call_operand.vmem [shape: f32[1,128], index: 2, kind: input, shape index: {}]   ;;  %s1492_s3 = inlined_call_operand.vmem [shape: bf16[128,128], index: 3, kind: output, shape index: {}]  }
   0x1   :  { %s1345_s14 = smov 0   ;;  %s1347_s15 = smov 0  }
   0x2   :  { %s1349_s16 = smov 0  }
   0x3 LB: > { %s25_s17 = sadd.s32 1, %s1314_s15  ;;  %p48_p1 = scmp.ne.s32.totalorder %s1306_s13, %s1302_s12  ;;  %s1318_s16 = sphi %s1349_s16, %s13_s16   ;;  %s1314_s15 = sphi %s1347_s15, %s1496_s15   ;;  %s1310_s14 = sphi %s1345_s14, %s1495_s14   ;;  %s1306_s13 = sphi %s1343_s13, %s1494_s13   ;;  %s1302_s12 = sphi %s1341_s12, %s1493_s12  }
   0x4   : > { %p26_p0 = scmp.ge.s32.totalorder %s25_s17, 3  ;;  %p49_p2 = scmp.eq.s32.totalorder %s1318_s16, 0 }
   0x5   : > { %s41_s19 = sadd.s32 1, %s1306_s13  ;;  %p992_p5 = scmp.ge.s32.totalorder %s1318_s16, 3 }
   0x6   : > { %s1498_s17 = smov (%p26_p0, %s25_s17), 0  ;;  %p50_p3 = por %p49_p2, %p48_p1 }
   0x7   : > { %s37_s18 = ssub.s32 %s1314_s15, %s1498_s17  ;;  %162 = sbr.rel (%p992_p5) target bundleno = 24 (0x18), region = 20 }
   0x8   : > { %p39_p4 = scmp.eq.s32.totalorder %s37_s18, 0 }
   0xa   : > { %s1376_s20 = scalar_select %p39_p4, %s1306_s13, %s41_s19  }
   0xc   : > { %165 = sbr.rel (!%p50_p3) target bundleno = 24 (0x18), region = 24  ;;  %s167_s21 = sand.u32 (%p50_p3), 1, %s1306_s13  }
   0xd   : > { %s1055_s22 = sshll.u32 (%p50_p3), %s1314_s15, 3  ;;  %s993_s23 = sshll.u32 (%p50_p3), %s167_s21, 7 }
   0xe   : > { %s1384_s26 = scalar_lea.vmem (%p50_p3), %s1489_s0, %s1055_s22  ;;  %s169_s27 = scalar_lea.vmem (%p50_p3), [#allocation3], %s993_s23 }
   0xf   : > { %v234_v0 = vld [vmem:[%s1384_s26] sm:$0xff] (%p50_p3)  ;;  %v236_v1 = vld [vmem:[%s1384_s26 + $0x18] sm:$0xff] (%p50_p3)  ;;  %v238_v2 = vld [vmem:[%s1384_s26 + $0x30] sm:$0xff] (%p50_p3) }
  0x10   : > { %235 = vst [vmem:[%s169_s27] sm:$0xff] (%p50_p3), %v234_v0  ;;  %237 = vst [vmem:[%s169_s27 + $0x8] sm:$0xff] (%p50_p3), %v236_v1  ;;  %v240_v3 = vld [vmem:[%s1384_s26 + $0x48] sm:$0xff] (%p50_p3)  ;;  %v242_v4 = vld [vmem:[%s1384_s26 + $0x60] sm:$0xff] (%p50_p3) }
  0x11   : > { %239 = vst [vmem:[%s169_s27 + $0x10] sm:$0xff] %v238_v2  ;;  %v244_v5 = vld [vmem:[%s1384_s26 + $0x78] sm:$0xff]  ;;  %241 = vst [vmem:[%s169_s27 + $0x18] sm:$0xff] %v240_v3  ;;  %v246_v6 = vld [vmem:[%s1384_s26 + $0x90] sm:$0xff] }
  0x12   : > { %243 = vst [vmem:[%s169_s27 + $0x20] sm:$0xff] %v242_v4  ;;  %245 = vst [vmem:[%s169_s27 + $0x28] sm:$0xff] %v244_v5  ;;  %v248_v7 = vld [vmem:[%s1384_s26 + $0xa8] sm:$0xff]  ;;  %v250_v8 = vld [vmem:[%s1384_s26 + $0xc0] sm:$0xff] }
  0x13   : > { %247 = vst [vmem:[%s169_s27 + $0x30] sm:$0xff] %v246_v6  ;;  %249 = vst [vmem:[%s169_s27 + $0x38] sm:$0xff] %v248_v7  ;;  %v252_v9 = vld [vmem:[%s1384_s26 + $0xd8] sm:$0xff]  ;;  %v254_v10 = vld [vmem:[%s1384_s26 + $0xf0] sm:$0xff] }
  0x14   : > { %251 = vst [vmem:[%s169_s27 + $0x40] sm:$0xff] %v250_v8  ;;  %v256_v11 = vld [vmem:[%s1384_s26 + $0x108] sm:$0xff]  ;;  %253 = vst [vmem:[%s169_s27 + $0x48] sm:$0xff] %v252_v9  ;;  %v258_v12 = vld [vmem:[%s1384_s26 + $0x120] sm:$0xff] }
  0x15   : > { %255 = vst [vmem:[%s169_s27 + $0x50] sm:$0xff] %v254_v10  ;;  %257 = vst [vmem:[%s169_s27 + $0x58] sm:$0xff] %v256_v11  ;;  %v260_v13 = vld [vmem:[%s1384_s26 + $0x138] sm:$0xff]  ;;  %v262_v14 = vld [vmem:[%s1384_s26 + $0x150] sm:$0xff] }
  0x16   : > { %259 = vst [vmem:[%s169_s27 + $0x60] sm:$0xff] %v258_v12  ;;  %261 = vst [vmem:[%s169_s27 + $0x68] sm:$0xff] %v260_v13  ;;  %v264_v15 = vld [vmem:[%s1384_s26 + $0x168] sm:$0xff] }
  0x17   : > { %263 = vst [vmem:[%s169_s27 + $0x70] sm:$0xff] %v262_v14  ;;  %265 = vst [vmem:[%s169_s27 + $0x78] sm:$0xff] %v264_v15 }
  0x18 PF: > { %p996_p6 = scmp.ge.s32.totalorder %s1318_s16, 1  ;;  %p282_p7 = scmp.lt.s32.totalorder %s1318_s16, 4 }
  0x1a   : > { %p283_p8 = pnand %p996_p6, %p282_p7 }
  0x1b   : > { %s289_s28 = sand.u32 (!%p283_p8), 1, %s1302_s12   ;;  %s998_s29 = sshll.u32 (!%p283_p8), %s1310_s14, 5 }
  0x1c   : > { %286 = sbr.rel (%p283_p8) target bundleno = 324 (0x144), region = 66  ;;  %s997_s30 = sshll.u32 (!%p283_p8), %s289_s28, 7 }
  0x1d   : > { %p329_p9 = scmp.lt.s32.totalorder (!%p283_p8), %s998_s29, 95  ;;  %s1411_s8 = scalar_lea.vmem (!%p283_p8), [#allocation3], %s997_s30 }
  0x1e   : > { %p1000_p10 = scmp.ne.s32.totalorder (!%p283_p8), %s1310_s14, 0 }
  0x21   : > { %s1500_s29 = smov (!%p329_p9, %s998_s29), 95  ;;  %353 = sbr.rel (%p1000_p10) target bundleno = 47 (0x2f), region = 74 }
  0x22   : > { %s999_s4 = sshll.u32 %s1500_s29, 2 }
  0x23   : > { %s1409_s7 = scalar_lea.vmem %s1490_s1, %s999_s4 }
  0x26   : > { %v1320_v16 = vmov 0.0  }
  0x27   : > { %354 = vst [vmem:[#allocation2 + $0x30] sm:$0xff] %v1320_v16  ;;  %355 = vst [vmem:[#allocation2] sm:$0xff] %v1320_v16 }
  0x28   : > { %356 = vst [vmem:[#allocation2 + $0x58] sm:$0xff] %v1320_v16  ;;  %357 = vst [vmem:[#allocation2 + $0x18] sm:$0xff] %v1320_v16 }
  0x29   : > { %358 = vst [vmem:[#allocation2 + $0x50] sm:$0xff] %v1320_v16  ;;  %359 = vst [vmem:[#allocation2 + $0x68] sm:$0xff] %v1320_v16 }
  0x2a   : > { %360 = vst [vmem:[#allocation2 + $0x8] sm:$0xff] %v1320_v16  ;;  %361 = vst [vmem:[#allocation2 + $0x48] sm:$0xff] %v1320_v16 }
  0x2b   : > { %362 = vst [vmem:[#allocation2 + $0x40] sm:$0xff] %v1320_v16  ;;  %363 = vst [vmem:[#allocation2 + $0x20] sm:$0xff] %v1320_v16 }
  0x2c   : > { %364 = vst [vmem:[#allocation2 + $0x10] sm:$0xff] %v1320_v16  ;;  %365 = vst [vmem:[#allocation2 + $0x38] sm:$0xff] %v1320_v16 }
  0x2d   : > { %366 = vst [vmem:[#allocation2 + $0x60] sm:$0xff] %v1320_v16  ;;  %367 = vst [vmem:[#allocation2 + $0x70] sm:$0xff] %v1320_v16 }
  0x2e   : > { %368 = vst [vmem:[#allocation2 + $0x78] sm:$0xff] %v1320_v16  ;;  %369 = vst [vmem:[#allocation2 + $0x28] sm:$0xff] %v1320_v16 }
  0x2f PF: > { %v1240_v17 = vld [vmem:[%s1409_s7 + $0x78] sm:$0xff]   ;;  %v1242_v19 = vld [vmem:[%s1409_s7 + $0x70] sm:$0xff]   ;;  %v1244_v21 = vld [vmem:[%s1409_s7 + $0x68] sm:$0xff]   ;;  %p1033_p11 = scmp.ne.s32.totalorder %s1310_s14, 2 }
  0x30   : > { %v1241_v18 = vld [vmem:[%s1409_s7 + $0x38] sm:$0xff]   ;;  %1119 = vmatprep.subr.bf16.mxu0 %v1240_v17  ;;  %1183 = vmatprep.subr.bf16.mxu1 %v1240_v17  ;;  %v1243_v20 = vld [vmem:[%s1409_s7 + $0x30] sm:$0xff]   ;;  %v1245_v22 = vld [vmem:[%s1409_s7 + $0x28] sm:$0xff]  }
  0x31   : > { %1120 = vmatpush3.bf16.msra.mxu0 %v1241_v18  ;;  %1191 = vmatpush3.bf16.msra.mxu1 %v1241_v18  ;;  %v1246_v23 = vld [vmem:[%s1409_s7 + $0x60] sm:$0xff]   ;;  %v1248_v25 = vld [vmem:[%s1409_s7 + $0x58] sm:$0xff]   ;;  %v1250_v27 = vld [vmem:[%s1409_s7 + $0x50] sm:$0xff]  }
  0x32   : > { %1121 = vmatprep.subr.bf16.mxu0 %v1242_v19  ;;  %1184 = vmatprep.subr.bf16.mxu1 %v1242_v19  ;;  %v1247_v24 = vld [vmem:[%s1409_s7 + $0x20] sm:$0xff]   ;;  %v1249_v26 = vld [vmem:[%s1409_s7 + $0x18] sm:$0xff]   ;;  %v1251_v30 = vld [vmem:[%s1409_s7 + $0x10] sm:$0xff]  }
  0x33   : > { %v1258_v28 = vld [vmem:[%s1411_s8 + $0x4] ss:$8 sps:$4 sm:$0xff]   ;;  %v1256_v35 = vld [vmem:[%s1411_s8] ss:$8 sps:$4 sm:$0xff]   ;;  %v1262_v37 = vld [vmem:[%s1411_s8 + $0x14] ss:$8 sps:$4 sm:$0xff]  }
  0x34   : > { %v1261_v29 = vld [vmem:[%s1411_s8 + $0x44] ss:$8 sps:$4 sm:$0xff]   ;;  %642 = vmatprep.mubr.bf16.mxu0 %v1258_v28  ;;  %v1259_v36 = vld [vmem:[%s1411_s8 + $0x40] ss:$8 sps:$4 sm:$0xff]   ;;  %v1264_v38 = vld [vmem:[%s1411_s8 + $0x54] ss:$8 sps:$4 sm:$0xff]  }
  0x35   : > { %1122 = vmatpush3.bf16.msra.mxu0 %v1243_v20  ;;  %1192 = vmatpush3.bf16.msra.mxu1 %v1243_v20  ;;  %v1252_v31 = vld [vmem:[%s1409_s7 + $0x48] sm:$0xff]   ;;  %v1254_v33 = vld [vmem:[%s1409_s7 + $0x40] sm:$0xff]   ;;  %v1266_v39 = vld [vmem:[%s1411_s8 + $0x10] ss:$8 sps:$4 sm:$0xff]  }
  0x36   : > { %1123 = vmatprep.subr.bf16.mxu0 %v1244_v21  ;;  %1185 = vmatprep.subr.bf16.mxu1 %v1244_v21  ;;  %v1253_v32 = vld [vmem:[%s1409_s7 + $0x8] sm:$0xff]   ;;  %v1255_v34 = vld [vmem:[%s1409_s7] sm:$0xff]   ;;  %v1267_v40 = vld [vmem:[%s1411_s8 + $0x50] ss:$8 sps:$4 sm:$0xff]  }
  0x37   : > { %674 = vmatprep.mubr.bf16.mxu1 %v1261_v29  ;;  %v1268_v41 = vld [vmem:[%s1411_s8 + $0x24] ss:$8 sps:$4 sm:$0xff]   ;;  %v1272_v43 = vld [vmem:[%s1411_s8 + $0x20] ss:$8 sps:$4 sm:$0xff]   ;;  %v1274_v45 = vld [vmem:[%s1411_s8 + $0x34] ss:$8 sps:$4 sm:$0xff]  }
  0x38   : > { %v1270_v42 = vld [vmem:[%s1411_s8 + $0x64] ss:$8 sps:$4 sm:$0xff]   ;;  %v1273_v44 = vld [vmem:[%s1411_s8 + $0x60] ss:$8 sps:$4 sm:$0xff]   ;;  %v1276_v46 = vld [vmem:[%s1411_s8 + $0x74] ss:$8 sps:$4 sm:$0xff]  }
  0x39   : > { %1124 = vmatpush3.bf16.msra.mxu0 %v1245_v22  ;;  %1193 = vmatpush3.bf16.msra.mxu1 %v1245_v22  ;;  %v1278_v47 = vld [vmem:[%s1411_s8 + $0x30] ss:$8 sps:$4 sm:$0xff]   ;;  %v378_v53 = vld [vmem:[#allocation2 + $0x40] sm:$0xff] }
  0x3a   : > { %1125 = vmatprep.subr.bf16.mxu0 %v1246_v23  ;;  %1186 = vmatprep.subr.bf16.mxu1 %v1246_v23  ;;  %v1279_v48 = vld [vmem:[%s1411_s8 + $0x70] ss:$8 sps:$4 sm:$0xff]   ;;  %v371_v61 = vld [vmem:[#allocation2] sm:$0xff] }
  0x3b   : > { %v370_v51 = vld [vmem:[#allocation2 + $0x30] sm:$0xff]  ;;  %v379_v63 = vld [vmem:[#allocation2 + $0x20] sm:$0xff]  ;;  %v372_v7 = vld [vmem:[#allocation2 + $0x58] sm:$0xff] }
  0x3c   : > { %v380_v9 = vld [vmem:[#allocation2 + $0x10] sm:$0xff]  ;;  %v373_v17 = vld [vmem:[#allocation2 + $0x18] sm:$0xff]  ;;  %v382_v29 = vld [vmem:[#allocation2 + $0x60] sm:$0xff] }
  0x3d   : > { %1126 = vmatpush3.bf16.msra.mxu0 %v1247_v24  ;;  %1194 = vmatpush3.bf16.msra.mxu1 %v1247_v24  ;;  %v381_v19 = vld [vmem:[#allocation2 + $0x38] sm:$0xff] }
  0x3e   : > { %1127 = vmatprep.subr.bf16.mxu0 %v1248_v25  ;;  %1187 = vmatprep.subr.bf16.mxu1 %v1248_v25 }
  0x41   : > { %1128 = vmatpush3.bf16.msra.mxu0 %v1249_v26  ;;  %1195 = vmatpush3.bf16.msra.mxu1 %v1249_v26 }
  0x42   : > { %1129 = vmatprep.subr.bf16.mxu0 %v1250_v27  ;;  %1188 = vmatprep.subr.bf16.mxu1 %v1250_v27  ;;  %v374_v27 = vld [vmem:[#allocation2 + $0x50] sm:$0xff] }
  0x45   : > { %1130 = vmatpush3.bf16.msra.mxu0 %v1251_v30  ;;  %1196 = vmatpush3.bf16.msra.mxu1 %v1251_v30 }
  0x46   : > { %1131 = vmatprep.subr.bf16.mxu0 %v1252_v31  ;;  %1189 = vmatprep.subr.bf16.mxu1 %v1252_v31 }
  0x49   : > { %1132 = vmatpush3.bf16.msra.mxu0 %v1253_v32  ;;  %1197 = vmatpush3.bf16.msra.mxu1 %v1253_v32 }
  0x4a   : > { %1133 = vmatprep.subr.bf16.mxu0 %v1254_v33  ;;  %1190 = vmatprep.subr.bf16.mxu1 %v1254_v33 }
  0x4d   : > { %1134 = vmatpush3.bf16.msra.mxu0 %v1255_v34  ;;  %1198 = vmatpush3.bf16.msra.mxu1 %v1255_v34 }
  0x50   : > { %643 = vmatmul.mubr.bf16.vlgmr.msra.gmra.mxu0 %v1256_v35  ;;  %675 = vmatmul.mubr.bf16.vlgmr.msra.gmra.mxu1 %v1259_v36 }
  0x51   : > { %650 = vmatprep.mubr.bf16.mxu0 %v1262_v37  ;;  %682 = vmatprep.mubr.bf16.mxu1 %v1264_v38  ;;  %v375_v37 = vld [vmem:[#allocation2 + $0x68] sm:$0xff] }
  0x58   : > { %651 = vmatmul.mubr.bf16.gmra.mxu0 %v1266_v39  ;;  %683 = vmatmul.mubr.bf16.gmra.mxu1 %v1267_v40  ;;  %v383_v39 = vld [vmem:[#allocation2 + $0x70] sm:$0xff] }
  0x59   : > { %658 = vmatprep.mubr.bf16.mxu0 %v1268_v41  ;;  %690 = vmatprep.mubr.bf16.mxu1 %v1270_v42 }
  0x60   : > { %659 = vmatmul.mubr.bf16.gmra.mxu0 %v1272_v43  ;;  %691 = vmatmul.mubr.bf16.gmra.mxu1 %v1273_v44 }
  0x61   : > { %666 = vmatprep.mubr.bf16.mxu0 %v1274_v45  ;;  %698 = vmatprep.mubr.bf16.mxu1 %v1276_v46 }
  0x68   : > { %667 = vmatmul.mubr.bf16.gmra.mxu0 %v1278_v47  ;;  %699 = vmatmul.mubr.bf16.gmra.mxu1 %v1279_v48  ;;  %v376_v47 = vld [vmem:[#allocation2 + $0x8] sm:$0xff] }
 0x110   : > { %v1135_v49 = vpop.f32.mrf.mxu0  ;;  %v1159_v50 = vpop.f32.mrf.mxu1 }
 0x112   : > { %v1136_v52 = vpop.f32.mrf.mxu0  ;;  %v1160_v54 = vpop.f32.mrf.mxu1 }
 0x113   : > { %v1137_v55 = vadd.f32 %v1136_v52, %v1135_v49  ;;  %v1161_v56 = vadd.f32 %v1160_v54, %v1159_v50  ;;  %v384_v49 = vld [vmem:[#allocation2 + $0x78] sm:$0xff] }
 0x114   : > { %v1138_v57 = vpop.f32.mrf.mxu0  ;;  %v1162_v58 = vpop.f32.mrf.mxu1 }
 0x115   : > { %v707_v59 = vadd.f32 %v1137_v55, %v370_v51  ;;  %v715_v60 = vadd.f32 %v1161_v56, %v378_v53 }
 0x116   : > { %v1139_v62 = vpop.f32.mrf.mxu0  ;;  %v1163_v0 = vpop.f32.mrf.mxu1 }
 0x117   : > { %723 = vst [vmem:[#allocation2 + $0x30] sm:$0xff] %v707_v59  ;;  %731 = vst [vmem:[#allocation2 + $0x40] sm:$0xff] %v715_v60  ;;  %v1140_v1 = vadd.f32 %v1139_v62, %v1138_v57  ;;  %v1164_v2 = vadd.f32 %v1163_v0, %v1162_v58  ;;  %v377_v57 = vld [vmem:[#allocation2 + $0x48] sm:$0xff] }
 0x118   : > { %v1141_v3 = vpop.f32.mrf.mxu0  ;;  %v1165_v4 = vpop.f32.mrf.mxu1  ;;  %v385_v59 = vld [vmem:[#allocation2 + $0x28] sm:$0xff] }
 0x119   : > { %v708_v5 = vadd.f32 %v1140_v1, %v371_v61  ;;  %v716_v6 = vadd.f32 %v1164_v2, %v379_v63 }
 0x11a   : > { %v1142_v8 = vpop.f32.mrf.mxu0  ;;  %v1166_v10 = vpop.f32.mrf.mxu1 }
 0x11b   : > { %724 = vst [vmem:[#allocation2] sm:$0xff] %v708_v5  ;;  %732 = vst [vmem:[#allocation2 + $0x20] sm:$0xff] %v716_v6  ;;  %v1143_v11 = vadd.f32 %v1142_v8, %v1141_v3  ;;  %v1167_v12 = vadd.f32 %v1166_v10, %v1165_v4 }
 0x11c   : > { %v1144_v13 = vpop.f32.mrf.mxu0  ;;  %v1168_v14 = vpop.f32.mrf.mxu1 }
 0x11d   : > { %v709_v15 = vadd.f32 %v1143_v11, %v372_v7  ;;  %v717_v16 = vadd.f32 %v1167_v12, %v380_v9 }
 0x11e   : > { %v1145_v18 = vpop.f32.mrf.mxu0  ;;  %v1169_v20 = vpop.f32.mrf.mxu1 }
 0x11f   : > { %725 = vst [vmem:[#allocation2 + $0x58] sm:$0xff] %v709_v15  ;;  %733 = vst [vmem:[#allocation2 + $0x10] sm:$0xff] %v717_v16  ;;  %v1146_v21 = vadd.f32 %v1145_v18, %v1144_v13  ;;  %v1170_v22 = vadd.f32 %v1169_v20, %v1168_v14 }
 0x120   : > { %v1147_v23 = vpop.f32.mrf.mxu0  ;;  %v1171_v24 = vpop.f32.mrf.mxu1 }
 0x121   : > { %v710_v25 = vadd.f32 %v1146_v21, %v373_v17  ;;  %v718_v26 = vadd.f32 %v1170_v22, %v381_v19 }
 0x122   : > { %v1148_v28 = vpop.f32.mrf.mxu0  ;;  %v1172_v30 = vpop.f32.mrf.mxu1 }
 0x123   : > { %726 = vst [vmem:[#allocation2 + $0x18] sm:$0xff] %v710_v25  ;;  %734 = vst [vmem:[#allocation2 + $0x38] sm:$0xff] %v718_v26  ;;  %v1149_v31 = vadd.f32 %v1148_v28, %v1147_v23  ;;  %v1173_v32 = vadd.f32 %v1172_v30, %v1171_v24 }
 0x124   : > { %v1150_v33 = vpop.f32.mrf.mxu0  ;;  %v1174_v34 = vpop.f32.mrf.mxu1 }
 0x125   : > { %v711_v35 = vadd.f32 %v1149_v31, %v374_v27  ;;  %v719_v36 = vadd.f32 %v1173_v32, %v382_v29 }
 0x126   : > { %v1151_v38 = vpop.f32.mrf.mxu0  ;;  %v1175_v40 = vpop.f32.mrf.mxu1 }
 0x127   : > { %727 = vst [vmem:[#allocation2 + $0x50] sm:$0xff] %v711_v35  ;;  %735 = vst [vmem:[#allocation2 + $0x60] sm:$0xff] %v719_v36  ;;  %v1152_v41 = vadd.f32 %v1151_v38, %v1150_v33  ;;  %v1176_v42 = vadd.f32 %v1175_v40, %v1174_v34 }
 0x128   : > { %v1153_v43 = vpop.f32.mrf.mxu0  ;;  %v1177_v44 = vpop.f32.mrf.mxu1 }
 0x129   : > { %v712_v45 = vadd.f32 %v1152_v41, %v375_v37  ;;  %v720_v46 = vadd.f32 %v1176_v42, %v383_v39 }
 0x12a   : > { %v1154_v48 = vpop.f32.mrf.mxu0  ;;  %v1178_v50 = vpop.f32.mrf.mxu1 }
 0x12b   : > { %728 = vst [vmem:[#allocation2 + $0x68] sm:$0xff] %v712_v45  ;;  %736 = vst [vmem:[#allocation2 + $0x70] sm:$0xff] %v720_v46  ;;  %v1155_v51 = vadd.f32 %v1154_v48, %v1153_v43  ;;  %v1179_v52 = vadd.f32 %v1178_v50, %v1177_v44 }
 0x12c   : > { %v1156_v53 = vpop.f32.mrf.mxu0  ;;  %v1180_v54 = vpop.f32.mrf.mxu1 }
 0x12d   : > { %v713_v55 = vadd.f32 %v1155_v51, %v376_v47  ;;  %v721_v56 = vadd.f32 %v1179_v52, %v384_v49 }
 0x12e   : > { %v1157_v58 = vpop.f32.mrf.mxu0  ;;  %v1181_v60 = vpop.f32.mrf.mxu1 }
 0x12f   : > { %729 = vst [vmem:[#allocation2 + $0x8] sm:$0xff] %v713_v55  ;;  %737 = vst [vmem:[#allocation2 + $0x78] sm:$0xff] %v721_v56  ;;  %v1158_v61 = vadd.f32 %v1157_v58, %v1156_v53  ;;  %v1182_v62 = vadd.f32 %v1181_v60, %v1180_v54  ;;  %742 = sbr.rel (%p1033_p11) target bundleno = 324 (0x144), region = 78 }
 0x131   : > { %v714_v63 = vadd.f32 %v1158_v61, %v377_v57  ;;  %v722_v0 = vadd.f32 %v1182_v62, %v385_v59 }
 0x133   : > { %730 = vst [vmem:[#allocation2 + $0x48] sm:$0xff] %v714_v63  ;;  %738 = vst [vmem:[#allocation2 + $0x28] sm:$0xff] %v722_v0 }
 0x134   : > { %v743_v1 = vld [vmem:[#allocation2 + $0x30] sm:$0xff]  ;;  %v744_v2 = vld [vmem:[#allocation2] sm:$0xff]  ;;  %v745_v6 = vld [vmem:[#allocation2 + $0x58] sm:$0xff] }
 0x135   : > { %v1034_v3 = vld [vmem:[%s1491_s2] ss:$0 sm:$0xff]  ;;  %v746_v7 = vld [vmem:[#allocation2 + $0x18] sm:$0xff]  ;;  %v747_v8 = vld [vmem:[#allocation2 + $0x50] sm:$0xff] }
 0x136   : > { %v766_v4 = vadd.f32 %v1034_v3, %v743_v1  ;;  %v767_v5 = vadd.f32 %v1034_v3, %v744_v2  ;;  %v768_v9 = vadd.f32 %v1034_v3, %v745_v6  ;;  %v769_v10 = vadd.f32 %v1034_v3, %v746_v7  ;;  %v748_v11 = vld [vmem:[#allocation2 + $0x68] sm:$0xff]  ;;  %v751_v19 = vld [vmem:[#allocation2 + $0x40] sm:$0xff]  ;;  %v753_v21 = vld [vmem:[#allocation2 + $0x10] sm:$0xff] }
 0x137   : > { %v770_v12 = vadd.f32 %v1034_v3, %v747_v8  ;;  %v749_v13 = vld [vmem:[#allocation2 + $0x8] sm:$0xff]  ;;  %v771_v17 = vadd.f32 %v1034_v3, %v748_v11  ;;  %v752_v20 = vld [vmem:[#allocation2 + $0x20] sm:$0xff]  ;;  %v754_v26 = vld [vmem:[#allocation2 + $0x38] sm:$0xff]  ;;  %v774_v31 = vadd.f32 %v1034_v3, %v751_v19  ;;  %v776_v36 = vadd.f32 %v1034_v3, %v753_v21 }
 0x138   : > { %v782_v15 = vmax.f32 %v766_v4, 0.0  ;;  %v783_v16 = vmax.f32 %v767_v5, 0.0  ;;  %v772_v18 = vadd.f32 %v1034_v3, %v749_v13  ;;  %v784_v22 = vmax.f32 %v768_v9, 0.0  ;;  %v755_v27 = vld [vmem:[#allocation2 + $0x60] sm:$0xff]  ;;  %v756_v32 = vld [vmem:[#allocation2 + $0x70] sm:$0xff]  ;;  %v757_v37 = vld [vmem:[#allocation2 + $0x78] sm:$0xff] }
 0x139   : > { %v785_v23 = vmax.f32 %v769_v10, 0.0  ;;  %v786_v24 = vmax.f32 %v770_v12, 0.0  ;;  %v787_v29 = vmax.f32 %v771_v17, 0.0  ;;  %v775_v35 = vadd.f32 %v1034_v3, %v752_v20 }
 0x13a   : > { %v750_v14 = vld [vmem:[#allocation2 + $0x48] sm:$0xff]  ;;  %v1075_v28 = vpack.c.bf16 %v783_v16, %v782_v15  ;;  %v788_v30 = vmax.f32 %v772_v18, 0.0  ;;  %v790_v40 = vmax.f32 %v774_v31, 0.0  ;;  %v777_v41 = vadd.f32 %v1034_v3, %v754_v26 }
 0x13b   : > { %v773_v25 = vadd.f32 %v1034_v3, %v750_v14  ;;  %v1080_v33 = vpack.c.bf16 %v785_v23, %v784_v22  ;;  %v758_v38 = vld [vmem:[#allocation2 + $0x28] sm:$0xff]  ;;  %v1085_v39 = vpack.c.bf16 %v787_v29, %v786_v24  ;;  %v778_v42 = vadd.f32 %v1034_v3, %v755_v27 }
 0x13c   : > { %1076 = vst [vmem:[%s1492_s3] sm:$0xff] %v1075_v28   ;;  %v791_v44 = vmax.f32 %v775_v35, 0.0  ;;  %v792_v45 = vmax.f32 %v776_v36, 0.0  ;;  %v779_v46 = vadd.f32 %v1034_v3, %v756_v32  ;;  %v793_v47 = vmax.f32 %v777_v41, 0.0 }
 0x13d   : > { %v789_v34 = vmax.f32 %v773_v25, 0.0  ;;  %1112 = vst [vmem:[%s1492_s3 + $0x8] sm:$0xff] %v1080_v33   ;;  %1113 = vst [vmem:[%s1492_s3 + $0x10] sm:$0xff] %v1085_v39   ;;  %v794_v48 = vmax.f32 %v778_v42, 0.0  ;;  %v780_v49 = vadd.f32 %v1034_v3, %v757_v37  ;;  %v781_v50 = vadd.f32 %v1034_v3, %v758_v38 }
 0x13e   : > { %v1095_v51 = vpack.c.bf16 %v791_v44, %v790_v40  ;;  %v795_v52 = vmax.f32 %v779_v46, 0.0  ;;  %v1100_v53 = vpack.c.bf16 %v793_v47, %v792_v45 }
 0x13f   : > { %v1090_v43 = vpack.c.bf16 %v789_v34, %v788_v30  ;;  %v796_v54 = vmax.f32 %v780_v49, 0.0  ;;  %v797_v55 = vmax.f32 %v781_v50, 0.0 }
 0x140   : > { %1115 = vst [vmem:[%s1492_s3 + $0x20] sm:$0xff] %v1095_v51   ;;  %v1105_v56 = vpack.c.bf16 %v795_v52, %v794_v48  ;;  %1116 = vst [vmem:[%s1492_s3 + $0x28] sm:$0xff] %v1100_v53  }
 0x141   : > { %1114 = vst [vmem:[%s1492_s3 + $0x18] sm:$0xff] %v1090_v43   ;;  %v1110_v57 = vpack.c.bf16 %v797_v55, %v796_v54 }
 0x142   : > { %1117 = vst [vmem:[%s1492_s3 + $0x30] sm:$0xff] %v1105_v56  }
 0x143   : > { %1118 = vst [vmem:[%s1492_s3 + $0x38] sm:$0xff] %v1110_v57  }
 0x144 PF: > { %s13_s16 = sadd.s32 1, %s1318_s16   ;;  %s1493_s12 = smov %s1306_s13 }
 0x145   : > { %p10_p12 = scmp.ge.s32.totalorder %s13_s16, 5   ;;  %s1494_s13 = smov %s1376_s20 }
 0x146   : > { %s1495_s14 = smov %s1314_s15  ;;  %s1496_s15 = smov %s1498_s17 }
 0x147   :  { %12 = sbr.rel (!%p10_p12) target bundleno = 3 (0x3), region = 119 }

// kernel: resnet_forward.18
= control target key start
LH: loop header
LB: loop body
LE: loop exit
PB: predicated region body
PF: predicated region fallthrough
CT: control target
= control target key end

     0   :  { %s705_s1 = inlined_call_operand.vmem [shape: bf16[128,128], index: 1, kind: input, shape index: {}]   ;;  %s706_s0 = inlined_call_operand.vmem [shape: bf16[128,128], index: 0, kind: input, shape index: {}]   ;;  %s707_s2 = inlined_call_operand.vmem [shape: f32[1,128], index: 2, kind: input, shape index: {}]   ;;  %s708_s3 = inlined_call_operand.vmem [shape: bf16[128,128], index: 3, kind: output, shape index: {}]  }
   0x1   :  { %v594_v0 = vld [vmem:[%s705_s1 + $0x38] sm:$0xff]   ;;  %v595_v1 = vld [vmem:[%s705_s1 + $0x30] sm:$0xff]   ;;  %v596_v2 = vld [vmem:[%s705_s1 + $0x28] sm:$0xff]  }
   0x2   :  { %546 = vmatprep.subr.bf16.mxu0 %v594_v0  ;;  %578 = vmatprep.subr.bf16.mxu1 %v594_v0  ;;  %v597_v3 = vld [vmem:[%s705_s1 + $0x20] sm:$0xff]   ;;  %v598_v6 = vld [vmem:[%s705_s1 + $0x18] sm:$0xff]   ;;  %v599_v7 = vld [vmem:[%s705_s1 + $0x10] sm:$0xff]  }
   0x3   :  { %547 = vmatpush3.bf16.msra.mxu0 %v594_v0  ;;  %586 = vmatpush3.bf16.msra.mxu1 %v594_v0  ;;  %v602_v4 = vld [vmem:[%s706_s0] sm:$0xff]   ;;  %v600_v8 = vld [vmem:[%s705_s1 + $0x8] sm:$0xff]   ;;  %v606_v12 = vld [vmem:[%s706_s0 + $0x10] sm:$0xff]  }
   0x4   :  { %548 = vmatprep.subr.bf16.mxu0 %v595_v1  ;;  %579 = vmatprep.subr.bf16.mxu1 %v595_v1  ;;  %v603_v5 = vld [vmem:[%s706_s0 + $0x20] sm:$0xff]   ;;  %v604_v10 = vld [vmem:[%s706_s0 + $0x8] sm:$0xff]   ;;  %v607_v13 = vld [vmem:[%s706_s0 + $0x30] sm:$0xff]  }
   0x5   :  { %562 = vmatprep.mubr.bf16.mxu0 %v602_v4  ;;  %570 = vmatprep.mubr.bf16.mxu1 %v603_v5  ;;  %v601_v9 = vld [vmem:[%s705_s1] sm:$0xff]   ;;  %v605_v11 = vld [vmem:[%s706_s0 + $0x28] sm:$0xff]   ;;  %v608_v14 = vld [vmem:[%s706_s0 + $0x18] sm:$0xff]  }
   0x6   :  { %v609_v15 = vld [vmem:[%s706_s0 + $0x38] sm:$0xff]   ;;  %v450_v18 = vld [vmem:[%s707_s2] ss:$0 sm:$0xff] }
   0x7   :  { %549 = vmatpush3.bf16.msra.mxu0 %v595_v1  ;;  %587 = vmatpush3.bf16.msra.mxu1 %v595_v1 }
   0x8   :  { %550 = vmatprep.subr.bf16.mxu0 %v596_v2  ;;  %580 = vmatprep.subr.bf16.mxu1 %v596_v2 }
   0xb   :  { %551 = vmatpush3.bf16.msra.mxu0 %v596_v2  ;;  %588 = vmatpush3.bf16.msra.mxu1 %v596_v2 }
   0xc   :  { %552 = vmatprep.subr.bf16.mxu0 %v597_v3  ;;  %581 = vmatprep.subr.bf16.mxu1 %v597_v3 }
   0xf   :  { %553 = vmatpush3.bf16.msra.mxu0 %v597_v3  ;;  %589 = vmatpush3.bf16.msra.mxu1 %v597_v3 }
  0x10   :  { %554 = vmatprep.subr.bf16.mxu0 %v598_v6  ;;  %582 = vmatprep.subr.bf16.mxu1 %v598_v6 }
  0x13   :  { %555 = vmatpush3.bf16.msra.mxu0 %v598_v6  ;;  %590 = vmatpush3.bf16.msra.mxu1 %v598_v6 }
  0x14   :  { %556 = vmatprep.subr.bf16.mxu0 %v599_v7  ;;  %583 = vmatprep.subr.bf16.mxu1 %v599_v7 }
  0x17   :  { %557 = vmatpush3.bf16.msra.mxu0 %v599_v7  ;;  %591 = vmatpush3.bf16.msra.mxu1 %v599_v7 }
  0x18   :  { %558 = vmatprep.subr.bf16.mxu0 %v600_v8  ;;  %584 = vmatprep.subr.bf16.mxu1 %v600_v8 }
  0x1b   :  { %559 = vmatpush3.bf16.msra.mxu0 %v600_v8  ;;  %592 = vmatpush3.bf16.msra.mxu1 %v600_v8 }
  0x1c   :  { %560 = vmatprep.subr.bf16.mxu0 %v601_v9  ;;  %585 = vmatprep.subr.bf16.mxu1 %v601_v9 }
  0x1f   :  { %561 = vmatpush3.bf16.msra.mxu0 %v601_v9  ;;  %593 = vmatpush3.bf16.msra.mxu1 %v601_v9 }
  0x22   :  { %563 = vmatmul.mubr.bf16.vlgmr.msra.gmra.mxu0 %v604_v10  ;;  %571 = vmatmul.mubr.bf16.vlgmr.msra.gmra.mxu1 %v605_v11 }
  0x23   :  { %566 = vmatprep.mubr.bf16.mxu0 %v606_v12  ;;  %574 = vmatprep.mubr.bf16.mxu1 %v607_v13 }
  0x2a   :  { %567 = vmatmul.mubr.bf16.gmra.mxu0 %v608_v14  ;;  %575 = vmatmul.mubr.bf16.gmra.mxu1 %v609_v15 }
  0xe2   :  { %v564_v16 = vpop.f32.mrf.mxu0  ;;  %v572_v17 = vpop.f32.mrf.mxu1 }
  0xe3   :  { %v336_v23 = vadd.f32 %v564_v16, %v450_v18  ;;  %v344_v24 = vadd.f32 %v572_v17, %v450_v18 }
  0xe4   :  { %v213_v19 = vpop.f32.mrf.mxu0  ;;  %v245_v20 = vpop.f32.mrf.mxu1 }
  0xe5   :  { %v334_v27 = vadd.f32 %v450_v18, %v213_v19  ;;  %v342_v28 = vadd.f32 %v450_v18, %v245_v20 }
  0xe6   :  { %v565_v21 = vpop.f32.mrf.mxu0  ;;  %v573_v22 = vpop.f32.mrf.mxu1 }
  0xe7   :  { %v337_v25 = vadd.f32 %v565_v21, %v450_v18  ;;  %v345_v26 = vadd.f32 %v573_v22, %v450_v18 }
  0xe8   :  { %v216_v29 = vpop.f32.mrf.mxu0  ;;  %v248_v30 = vpop.f32.mrf.mxu1 }
  0xe9   :  { %v491_v31 = vpack.c.bf16 %v337_v25, %v336_v23  ;;  %v511_v32 = vpack.c.bf16 %v345_v26, %v344_v24  ;;  %v335_v33 = vadd.f32 %v450_v18, %v216_v29  ;;  %v343_v34 = vadd.f32 %v450_v18, %v248_v30 }
  0xea   :  { %v568_v35 = vpop.f32.mrf.mxu0  ;;  %v576_v36 = vpop.f32.mrf.mxu1 }
  0xeb   :  { %523 = vst [vmem:[%s708_s3 + $0x8] sm:$0xff] %v491_v31   ;;  %527 = vst [vmem:[%s708_s3 + $0x28] sm:$0xff] %v511_v32   ;;  %v486_v37 = vpack.c.bf16 %v335_v33, %v334_v27  ;;  %v506_v38 = vpack.c.bf16 %v343_v34, %v342_v28  ;;  %v340_v43 = vadd.f32 %v568_v35, %v450_v18 }
  0xec   :  { %v229_v39 = vpop.f32.mrf.mxu0  ;;  %v261_v40 = vpop.f32.mrf.mxu1  ;;  %v348_v44 = vadd.f32 %v576_v36, %v450_v18 }
  0xed   :  { %487 = vst [vmem:[%s708_s3] sm:$0xff] %v486_v37   ;;  %526 = vst [vmem:[%s708_s3 + $0x20] sm:$0xff] %v506_v38   ;;  %v338_v47 = vadd.f32 %v450_v18, %v229_v39  ;;  %v346_v48 = vadd.f32 %v450_v18, %v261_v40 }
  0xee   :  { %v569_v41 = vpop.f32.mrf.mxu0  ;;  %v577_v42 = vpop.f32.mrf.mxu1 }
  0xef   :  { %v341_v45 = vadd.f32 %v569_v41, %v450_v18  ;;  %v349_v46 = vadd.f32 %v577_v42, %v450_v18 }
  0xf0   :  { %v232_v49 = vpop.f32.mrf.mxu0  ;;  %v264_v50 = vpop.f32.mrf.mxu1 }
  0xf1   :  { %v501_v51 = vpack.c.bf16 %v341_v45, %v340_v43  ;;  %v521_v52 = vpack.c.bf16 %v349_v46, %v348_v44  ;;  %v339_v53 = vadd.f32 %v450_v18, %v232_v49  ;;  %v347_v54 = vadd.f32 %v450_v18, %v264_v50 }
  0xf3   :  { %525 = vst [vmem:[%s708_s3 + $0x18] sm:$0xff] %v501_v51   ;;  %529 = vst [vmem:[%s708_s3 + $0x38] sm:$0xff] %v521_v52   ;;  %v496_v55 = vpack.c.bf16 %v339_v53, %v338_v47  ;;  %v516_v56 = vpack.c.bf16 %v347_v54, %v346_v48 }
  0xf5   :  { %524 = vst [vmem:[%s708_s3 + $0x10] sm:$0xff] %v496_v55   ;;  %528 = vst [vmem:[%s708_s3 + $0x30] sm:$0xff] %v516_v56  }

// kernel: resnet_forward.20
= control target key start
LH: loop header
LB: loop body
LE: loop exit
PB: predicated region body
PF: predicated region fallthrough
CT: control target
= control target key end

     0   :  { %s1494_s15 = smov 0   ;;  %s1496_s16 = smov 0   ;;  %s1666_s0 = inlined_call_operand.vmem [shape: bf16[128,1280], index: 0, kind: input, shape index: {}]   ;;  %s1667_s1 = inlined_call_operand.vmem [shape: bf16[1280,128], index: 1, kind: input, shape index: {}]   ;;  %s1668_s2 = inlined_call_operand.vmem [shape: f32[1,128], index: 2, kind: input, shape index: {}]   ;;  %s1669_s3 = inlined_call_operand.vmem [shape: bf16[128,128], index: 3, kind: input, shape index: {}]   ;;  %s1670_s4 = inlined_call_operand.vmem [shape: bf16[128,128], index: 4, kind: output, shape index: {}]  }
   0x1   :  { %s1498_s17 = smov 0   ;;  %s1500_s18 = smov 0  }
   0x2   :  { %s1502_s19 = smov 0  }
   0x3 LB: > { %s26_s20 = sadd.s32 1, %s1463_s18  ;;  %p49_p1 = scmp.ne.s32.totalorder %s1455_s16, %s1451_s15  ;;  %s1467_s19 = sphi %s1502_s19, %s14_s19   ;;  %s1463_s18 = sphi %s1500_s18, %s1674_s18   ;;  %s1459_s17 = sphi %s1498_s17, %s1673_s17   ;;  %s1455_s16 = sphi %s1496_s16, %s1672_s16   ;;  %s1451_s15 = sphi %s1494_s15, %s1671_s15  }
   0x4   : > { %p27_p0 = scmp.ge.s32.totalorder %s26_s20, 5  ;;  %p50_p2 = scmp.eq.s32.totalorder %s1467_s19, 0 }
   0x5   : > { %s42_s22 = sadd.s32 1, %s1455_s16  ;;  %p1103_p5 = scmp.ge.s32.totalorder %s1467_s19, 5 }
   0x6   : > { %s1676_s20 = smov (%p27_p0, %s26_s20), 0  ;;  %p51_p3 = por %p50_p2, %p49_p1 }
   0x7   : > { %s38_s21 = ssub.s32 %s1463_s18, %s1676_s20  ;;  %203 = sbr.rel (%p1103_p5) target bundleno = 24 (0x18), region = 24 }
   0x8   : > { %p40_p4 = scmp.eq.s32.totalorder %s38_s21, 0 }
   0xa   : > { %s1529_s23 = scalar_select %p40_p4, %s1455_s16, %s42_s22  }
   0xc   : > { %206 = sbr.rel (!%p51_p3) target bundleno = 24 (0x18), region = 28  ;;  %s208_s24 = sand.u32 (%p51_p3), 1, %s1455_s16  }
   0xd   : > { %s1166_s25 = sshll.u32 (%p51_p3), %s1463_s18, 3  ;;  %s1104_s26 = sshll.u32 (%p51_p3), %s208_s24, 7 }
   0xe   : > { %s1537_s29 = scalar_lea.vmem (%p51_p3), %s1666_s0, %s1166_s25  ;;  %s210_s30 = scalar_lea.vmem (%p51_p3), [#allocation3], %s1104_s26 }
   0xf   : > { %v275_v0 = vld [vmem:[%s1537_s29] sm:$0xff] (%p51_p3)  ;;  %v277_v1 = vld [vmem:[%s1537_s29 + $0x28] sm:$0xff] (%p51_p3)  ;;  %v279_v2 = vld [vmem:[%s1537_s29 + $0x50] sm:$0xff] (%p51_p3) }
  0x10   : > { %276 = vst [vmem:[%s210_s30] sm:$0xff] (%p51_p3), %v275_v0  ;;  %278 = vst [vmem:[%s210_s30 + $0x8] sm:$0xff] (%p51_p3), %v277_v1  ;;  %v281_v3 = vld [vmem:[%s1537_s29 + $0x78] sm:$0xff] (%p51_p3)  ;;  %v283_v4 = vld [vmem:[%s1537_s29 + $0xa0] sm:$0xff] (%p51_p3) }
  0x11   : > { %280 = vst [vmem:[%s210_s30 + $0x10] sm:$0xff] %v279_v2  ;;  %v285_v5 = vld [vmem:[%s1537_s29 + $0xc8] sm:$0xff]  ;;  %282 = vst [vmem:[%s210_s30 + $0x18] sm:$0xff] %v281_v3  ;;  %v287_v6 = vld [vmem:[%s1537_s29 + $0xf0] sm:$0xff] }
  0x12   : > { %284 = vst [vmem:[%s210_s30 + $0x20] sm:$0xff] %v283_v4  ;;  %286 = vst [vmem:[%s210_s30 + $0x28] sm:$0xff] %v285_v5  ;;  %v289_v7 = vld [vmem:[%s1537_s29 + $0x118] sm:$0xff]  ;;  %v291_v8 = vld [vmem:[%s1537_s29 + $0x140] sm:$0xff] }
  0x13   : > { %288 = vst [vmem:[%s210_s30 + $0x30] sm:$0xff] %v287_v6  ;;  %290 = vst [vmem:[%s210_s30 + $0x38] sm:$0xff] %v289_v7  ;;  %v293_v9 = vld [vmem:[%s1537_s29 + $0x168] sm:$0xff]  ;;  %v295_v10 = vld [vmem:[%s1537_s29 + $0x190] sm:$0xff] }
  0x14   : > { %292 = vst [vmem:[%s210_s30 + $0x40] sm:$0xff] %v291_v8  ;;  %v297_v11 = vld [vmem:[%s1537_s29 + $0x1b8] sm:$0xff]  ;;  %294 = vst [vmem:[%s210_s30 + $0x48] sm:$0xff] %v293_v9  ;;  %v299_v12 = vld [vmem:[%s1537_s29 + $0x1e0] sm:$0xff] }
  0x15   : > { %296 = vst [vmem:[%s210_s30 + $0x50] sm:$0xff] %v295_v10  ;;  %298 = vst [vmem:[%s210_s30 + $0x58] sm:$0xff] %v297_v11  ;;  %v301_v13 = vld [vmem:[%s1537_s29 + $0x208] sm:$0xff]  ;;  %v303_v14 = vld [vmem:[%s1537_s29 + $0x230] sm:$0xff] }
  0x16   : > { %300 = vst [vmem:[%s210_s30 + $0x60] sm:$0xff] %v299_v12  ;;  %302 = vst [vmem:[%s210_s30 + $0x68] sm:$0xff] %v301_v13  ;;  %v305_v15 = vld [vmem:[%s1537_s29 + $0x258] sm:$0xff] }
  0x17   : > { %304 = vst [vmem:[%s210_s30 + $0x70] sm:$0xff] %v303_v14  ;;  %306 = vst [vmem:[%s210_s30 + $0x78] sm:$0xff] %v305_v15 }
  0x18 PF: > { %p1107_p6 = scmp.ge.s32.totalorder %s1467_s19, 1  ;;  %p323_p7 = scmp.lt.s32.totalorder %s1467_s19, 6 }
  0x1a   : > { %p324_p8 = pnand %p1107_p6, %p323_p7 }
  0x1b   : > { %s330_s5 = sand.u32 (!%p324_p8), 1, %s1451_s15   ;;  %s1109_s6 = sshll.u32 (!%p324_p8), %s1459_s17, 5 }
  0x1c   : > { %327 = sbr.rel (%p324_p8) target bundleno = 326 (0x146), region = 70  ;;  %s1108_s7 = sshll.u32 (!%p324_p8), %s330_s5, 7 }
  0x1d   : > { %p380_p9 = scmp.lt.s32.totalorder (!%p324_p8), %s1109_s6, 159  ;;  %s1564_s12 = scalar_lea.vmem (!%p324_p8), [#allocation3], %s1108_s7 }
  0x1e   : > { %p1111_p10 = scmp.ne.s32.totalorder (!%p324_p8), %s1459_s17, 0 }
  0x21   : > { %s1678_s6 = smov (!%p380_p9, %s1109_s6), 159  ;;  %413 = sbr.rel (%p1111_p10) target bundleno = 49 (0x31), region = 78 }
  0x22   : > { %s1110_s8 = sshll.u32 %s1678_s6, 2 }
  0x23   : > { %s1562_s11 = scalar_lea.vmem %s1667_s1, %s1110_s8 }
  0x26   : > { %v1184_v16 = vld [vmem:[%s1669_s3] sm:$0xff]   ;;  %v1255_v17 = vld [vmem:[%s1669_s3 + $0x8] sm:$0xff]   ;;  %v1256_v18 = vld [vmem:[%s1669_s3 + $0x10] sm:$0xff]  }
  0x27   : > { %v1185_v19 = vunpack.c.l.bf16 %v1184_v16  ;;  %v1186_v20 = vunpack.c.h.bf16 %v1184_v16  ;;  %v1189_v21 = vunpack.c.l.bf16 %v1255_v17  ;;  %v1190_v22 = vunpack.c.h.bf16 %v1255_v17  ;;  %v1257_v23 = vld [vmem:[%s1669_s3 + $0x18] sm:$0xff]   ;;  %v1258_v24 = vld [vmem:[%s1669_s3 + $0x20] sm:$0xff]   ;;  %v1259_v25 = vld [vmem:[%s1669_s3 + $0x28] sm:$0xff]  }
  0x28   : > { %v1193_v26 = vunpack.c.l.bf16 %v1256_v18  ;;  %v1194_v27 = vunpack.c.h.bf16 %v1256_v18  ;;  %v1197_v28 = vunpack.c.l.bf16 %v1257_v23  ;;  %v1198_v29 = vunpack.c.h.bf16 %v1257_v23  ;;  %v1260_v30 = vld [vmem:[%s1669_s3 + $0x30] sm:$0xff]   ;;  %v1261_v31 = vld [vmem:[%s1669_s3 + $0x38] sm:$0xff]  }
  0x29   : > { %446 = vst [vmem:[#allocation2 + $0x30] sm:$0xff] %v1185_v19  ;;  %447 = vst [vmem:[#allocation2] sm:$0xff] %v1186_v20  ;;  %v1201_v32 = vunpack.c.l.bf16 %v1258_v24  ;;  %v1202_v33 = vunpack.c.h.bf16 %v1258_v24  ;;  %v1205_v34 = vunpack.c.l.bf16 %v1259_v25  ;;  %v1206_v35 = vunpack.c.h.bf16 %v1259_v25 }
  0x2a   : > { %448 = vst [vmem:[#allocation2 + $0x58] sm:$0xff] %v1189_v21  ;;  %449 = vst [vmem:[#allocation2 + $0x18] sm:$0xff] %v1190_v22  ;;  %v1209_v36 = vunpack.c.l.bf16 %v1260_v30  ;;  %v1210_v37 = vunpack.c.h.bf16 %v1260_v30  ;;  %v1213_v38 = vunpack.c.l.bf16 %v1261_v31  ;;  %v1214_v39 = vunpack.c.h.bf16 %v1261_v31 }
  0x2b   : > { %450 = vst [vmem:[#allocation2 + $0x50] sm:$0xff] %v1193_v26  ;;  %451 = vst [vmem:[#allocation2 + $0x68] sm:$0xff] %v1194_v27 }
  0x2c   : > { %452 = vst [vmem:[#allocation2 + $0x8] sm:$0xff] %v1197_v28  ;;  %453 = vst [vmem:[#allocation2 + $0x48] sm:$0xff] %v1198_v29 }
  0x2d   : > { %454 = vst [vmem:[#allocation2 + $0x40] sm:$0xff] %v1201_v32  ;;  %455 = vst [vmem:[#allocation2 + $0x20] sm:$0xff] %v1202_v33 }
  0x2e   : > { %456 = vst [vmem:[#allocation2 + $0x10] sm:$0xff] %v1205_v34  ;;  %457 = vst [vmem:[#allocation2 + $0x38] sm:$0xff] %v1206_v35 }
  0x2f   : > { %458 = vst [vmem:[#allocation2 + $0x60] sm:$0xff] %v1209_v36  ;;  %459 = vst [vmem:[#allocation2 + $0x70] sm:$0xff] %v1210_v37 }
  0x30   : > { %460 = vst [vmem:[#allocation2 + $0x78] sm:$0xff] %v1213_v38  ;;  %461 = vst [vmem:[#allocation2 + $0x28] sm:$0xff] %v1214_v39 }
  0x31 PF: > { %v1389_v40 = vld [vmem:[%s1562_s11 + $0x78] sm:$0xff]   ;;  %v1391_v42 = vld [vmem:[%s1562_s11 + $0x70] sm:$0xff]   ;;  %v1393_v44 = vld [vmem:[%s1562_s11 + $0x68] sm:$0xff]   ;;  %p1144_p11 = scmp.ne.s32.totalorder %s1459_s17, 4 }
  0x32   : > { %v1390_v41 = vld [vmem:[%s1562_s11 + $0x38] sm:$0xff]   ;;  %1269 = vmatprep.subr.bf16.mxu0 %v1389_v40  ;;  %1333 = vmatprep.subr.bf16.mxu1 %v1389_v40  ;;  %v1392_v43 = vld [vmem:[%s1562_s11 + $0x30] sm:$0xff]   ;;  %v1394_v45 = vld [vmem:[%s1562_s11 + $0x28] sm:$0xff]  }
  0x33   : > { %1270 = vmatpush3.bf16.msra.mxu0 %v1390_v41  ;;  %1341 = vmatpush3.bf16.msra.mxu1 %v1390_v41  ;;  %v1395_v46 = vld [vmem:[%s1562_s11 + $0x60] sm:$0xff]   ;;  %v1397_v48 = vld [vmem:[%s1562_s11 + $0x58] sm:$0xff]   ;;  %v1399_v50 = vld [vmem:[%s1562_s11 + $0x50] sm:$0xff]  }
  0x34   : > { %1271 = vmatprep.subr.bf16.mxu0 %v1391_v42  ;;  %1334 = vmatprep.subr.bf16.mxu1 %v1391_v42  ;;  %v1396_v47 = vld [vmem:[%s1562_s11 + $0x20] sm:$0xff]   ;;  %v1398_v49 = vld [vmem:[%s1562_s11 + $0x18] sm:$0xff]   ;;  %v1400_v53 = vld [vmem:[%s1562_s11 + $0x10] sm:$0xff]  }
  0x35   : > { %v1407_v51 = vld [vmem:[%s1564_s12 + $0x4] ss:$8 sps:$4 sm:$0xff]   ;;  %v1405_v58 = vld [vmem:[%s1564_s12] ss:$8 sps:$4 sm:$0xff]   ;;  %v1411_v60 = vld [vmem:[%s1564_s12 + $0x14] ss:$8 sps:$4 sm:$0xff]  }
  0x36   : > { %v1410_v52 = vld [vmem:[%s1564_s12 + $0x44] ss:$8 sps:$4 sm:$0xff]   ;;  %734 = vmatprep.mubr.bf16.mxu0 %v1407_v51  ;;  %v1408_v59 = vld [vmem:[%s1564_s12 + $0x40] ss:$8 sps:$4 sm:$0xff]   ;;  %v1413_v61 = vld [vmem:[%s1564_s12 + $0x54] ss:$8 sps:$4 sm:$0xff]  }
  0x37   : > { %1272 = vmatpush3.bf16.msra.mxu0 %v1392_v43  ;;  %1342 = vmatpush3.bf16.msra.mxu1 %v1392_v43  ;;  %v1401_v54 = vld [vmem:[%s1562_s11 + $0x48] sm:$0xff]   ;;  %v1403_v56 = vld [vmem:[%s1562_s11 + $0x40] sm:$0xff]   ;;  %v1415_v62 = vld [vmem:[%s1564_s12 + $0x10] ss:$8 sps:$4 sm:$0xff]  }
  0x38   : > { %1273 = vmatprep.subr.bf16.mxu0 %v1393_v44  ;;  %1335 = vmatprep.subr.bf16.mxu1 %v1393_v44  ;;  %v1402_v55 = vld [vmem:[%s1562_s11 + $0x8] sm:$0xff]   ;;  %v1404_v57 = vld [vmem:[%s1562_s11] sm:$0xff]   ;;  %v1416_v63 = vld [vmem:[%s1564_s12 + $0x50] ss:$8 sps:$4 sm:$0xff]  }
  0x39   : > { %766 = vmatprep.mubr.bf16.mxu1 %v1410_v52  ;;  %v1417_v0 = vld [vmem:[%s1564_s12 + $0x24] ss:$8 sps:$4 sm:$0xff]   ;;  %v1421_v2 = vld [vmem:[%s1564_s12 + $0x20] ss:$8 sps:$4 sm:$0xff]   ;;  %v1423_v4 = vld [vmem:[%s1564_s12 + $0x34] ss:$8 sps:$4 sm:$0xff]  }
  0x3a   : > { %v1419_v1 = vld [vmem:[%s1564_s12 + $0x64] ss:$8 sps:$4 sm:$0xff]   ;;  %v1422_v3 = vld [vmem:[%s1564_s12 + $0x60] ss:$8 sps:$4 sm:$0xff]   ;;  %v1425_v5 = vld [vmem:[%s1564_s12 + $0x74] ss:$8 sps:$4 sm:$0xff]  }
  0x3b   : > { %1274 = vmatpush3.bf16.msra.mxu0 %v1394_v45  ;;  %1343 = vmatpush3.bf16.msra.mxu1 %v1394_v45  ;;  %v1427_v6 = vld [vmem:[%s1564_s12 + $0x30] ss:$8 sps:$4 sm:$0xff]   ;;  %v470_v12 = vld [vmem:[#allocation2 + $0x40] sm:$0xff] }
  0x3c   : > { %1275 = vmatprep.subr.bf16.mxu0 %v1395_v46  ;;  %1336 = vmatprep.subr.bf16.mxu1 %v1395_v46  ;;  %v1428_v7 = vld [vmem:[%s1564_s12 + $0x70] ss:$8 sps:$4 sm:$0xff]   ;;  %v463_v20 = vld [vmem:[#allocation2] sm:$0xff] }
  0x3d   : > { %v462_v10 = vld [vmem:[#allocation2 + $0x30] sm:$0xff]  ;;  %v471_v22 = vld [vmem:[#allocation2 + $0x20] sm:$0xff]  ;;  %v464_v30 = vld [vmem:[#allocation2 + $0x58] sm:$0xff] }
  0x3e   : > { %v472_v32 = vld [vmem:[#allocation2 + $0x10] sm:$0xff]  ;;  %v465_v40 = vld [vmem:[#allocation2 + $0x18] sm:$0xff]  ;;  %v474_v52 = vld [vmem:[#allocation2 + $0x60] sm:$0xff] }
  0x3f   : > { %1276 = vmatpush3.bf16.msra.mxu0 %v1396_v47  ;;  %1344 = vmatpush3.bf16.msra.mxu1 %v1396_v47  ;;  %v473_v42 = vld [vmem:[#allocation2 + $0x38] sm:$0xff] }
  0x40   : > { %1277 = vmatprep.subr.bf16.mxu0 %v1397_v48  ;;  %1337 = vmatprep.subr.bf16.mxu1 %v1397_v48 }
  0x43   : > { %1278 = vmatpush3.bf16.msra.mxu0 %v1398_v49  ;;  %1345 = vmatpush3.bf16.msra.mxu1 %v1398_v49 }
  0x44   : > { %1279 = vmatprep.subr.bf16.mxu0 %v1399_v50  ;;  %1338 = vmatprep.subr.bf16.mxu1 %v1399_v50  ;;  %v466_v50 = vld [vmem:[#allocation2 + $0x50] sm:$0xff] }
  0x47   : > { %1280 = vmatpush3.bf16.msra.mxu0 %v1400_v53  ;;  %1346 = vmatpush3.bf16.msra.mxu1 %v1400_v53 }
  0x48   : > { %1281 = vmatprep.subr.bf16.mxu0 %v1401_v54  ;;  %1339 = vmatprep.subr.bf16.mxu1 %v1401_v54 }
  0x4b   : > { %1282 = vmatpush3.bf16.msra.mxu0 %v1402_v55  ;;  %1347 = vmatpush3.bf16.msra.mxu1 %v1402_v55 }
  0x4c   : > { %1283 = vmatprep.subr.bf16.mxu0 %v1403_v56  ;;  %1340 = vmatprep.subr.bf16.mxu1 %v1403_v56 }
  0x4f   : > { %1284 = vmatpush3.bf16.msra.mxu0 %v1404_v57  ;;  %1348 = vmatpush3.bf16.msra.mxu1 %v1404_v57 }
  0x52   : > { %735 = vmatmul.mubr.bf16.vlgmr.msra.gmra.mxu0 %v1405_v58  ;;  %767 = vmatmul.mubr.bf16.vlgmr.msra.gmra.mxu1 %v1408_v59 }
  0x53   : > { %742 = vmatprep.mubr.bf16.mxu0 %v1411_v60  ;;  %774 = vmatprep.mubr.bf16.mxu1 %v1413_v61  ;;  %v467_v60 = vld [vmem:[#allocation2 + $0x68] sm:$0xff] }
  0x5a   : > { %743 = vmatmul.mubr.bf16.gmra.mxu0 %v1415_v62  ;;  %775 = vmatmul.mubr.bf16.gmra.mxu1 %v1416_v63  ;;  %v475_v62 = vld [vmem:[#allocation2 + $0x70] sm:$0xff] }
  0x5b   : > { %750 = vmatprep.mubr.bf16.mxu0 %v1417_v0  ;;  %782 = vmatprep.mubr.bf16.mxu1 %v1419_v1 }
  0x62   : > { %751 = vmatmul.mubr.bf16.gmra.mxu0 %v1421_v2  ;;  %783 = vmatmul.mubr.bf16.gmra.mxu1 %v1422_v3 }
  0x63   : > { %758 = vmatprep.mubr.bf16.mxu0 %v1423_v4  ;;  %790 = vmatprep.mubr.bf16.mxu1 %v1425_v5 }
  0x6a   : > { %759 = vmatmul.mubr.bf16.gmra.mxu0 %v1427_v6  ;;  %791 = vmatmul.mubr.bf16.gmra.mxu1 %v1428_v7  ;;  %v468_v6 = vld [vmem:[#allocation2 + $0x8] sm:$0xff] }
 0x112   : > { %v1285_v8 = vpop.f32.mrf.mxu0  ;;  %v1309_v9 = vpop.f32.mrf.mxu1 }
 0x114   : > { %v1286_v11 = vpop.f32.mrf.mxu0  ;;  %v1310_v13 = vpop.f32.mrf.mxu1 }
 0x115   : > { %v1287_v14 = vadd.f32 %v1286_v11, %v1285_v8  ;;  %v1311_v15 = vadd.f32 %v1310_v13, %v1309_v9  ;;  %v476_v8 = vld [vmem:[#allocation2 + $0x78] sm:$0xff] }
 0x116   : > { %v1288_v16 = vpop.f32.mrf.mxu0  ;;  %v1312_v17 = vpop.f32.mrf.mxu1 }
 0x117   : > { %v799_v18 = vadd.f32 %v1287_v14, %v462_v10  ;;  %v807_v19 = vadd.f32 %v1311_v15, %v470_v12 }
 0x118   : > { %v1289_v21 = vpop.f32.mrf.mxu0  ;;  %v1313_v23 = vpop.f32.mrf.mxu1 }
 0x119   : > { %815 = vst [vmem:[#allocation2 + $0x30] sm:$0xff] %v799_v18  ;;  %823 = vst [vmem:[#allocation2 + $0x40] sm:$0xff] %v807_v19  ;;  %v1290_v24 = vadd.f32 %v1289_v21, %v1288_v16  ;;  %v1314_v25 = vadd.f32 %v1313_v23, %v1312_v17  ;;  %v469_v16 = vld [vmem:[#allocation2 + $0x48] sm:$0xff] }
 0x11a   : > { %v1291_v26 = vpop.f32.mrf.mxu0  ;;  %v1315_v27 = vpop.f32.mrf.mxu1  ;;  %v477_v18 = vld [vmem:[#allocation2 + $0x28] sm:$0xff] }
 0x11b   : > { %v800_v28 = vadd.f32 %v1290_v24, %v463_v20  ;;  %v808_v29 = vadd.f32 %v1314_v25, %v471_v22 }
 0x11c   : > { %v1292_v31 = vpop.f32.mrf.mxu0  ;;  %v1316_v33 = vpop.f32.mrf.mxu1 }
 0x11d   : > { %816 = vst [vmem:[#allocation2] sm:$0xff] %v800_v28  ;;  %824 = vst [vmem:[#allocation2 + $0x20] sm:$0xff] %v808_v29  ;;  %v1293_v34 = vadd.f32 %v1292_v31, %v1291_v26  ;;  %v1317_v35 = vadd.f32 %v1316_v33, %v1315_v27 }
 0x11e   : > { %v1294_v36 = vpop.f32.mrf.mxu0  ;;  %v1318_v37 = vpop.f32.mrf.mxu1 }
 0x11f   : > { %v801_v38 = vadd.f32 %v1293_v34, %v464_v30  ;;  %v809_v39 = vadd.f32 %v1317_v35, %v472_v32 }
 0x120   : > { %v1295_v41 = vpop.f32.mrf.mxu0  ;;  %v1319_v43 = vpop.f32.mrf.mxu1 }
 0x121   : > { %817 = vst [vmem:[#allocation2 + $0x58] sm:$0xff] %v801_v38  ;;  %825 = vst [vmem:[#allocation2 + $0x10] sm:$0xff] %v809_v39  ;;  %v1296_v44 = vadd.f32 %v1295_v41, %v1294_v36  ;;  %v1320_v45 = vadd.f32 %v1319_v43, %v1318_v37 }
 0x122   : > { %v1297_v46 = vpop.f32.mrf.mxu0  ;;  %v1321_v47 = vpop.f32.mrf.mxu1 }
 0x123   : > { %v802_v48 = vadd.f32 %v1296_v44, %v465_v40  ;;  %v810_v49 = vadd.f32 %v1320_v45, %v473_v42 }
 0x124   : > { %v1298_v51 = vpop.f32.mrf.mxu0  ;;  %v1322_v53 = vpop.f32.mrf.mxu1 }
 0x125   : > { %818 = vst [vmem:[#allocation2 + $0x18] sm:$0xff] %v802_v48  ;;  %826 = vst [vmem:[#allocation2 + $0x38] sm:$0xff] %v810_v49  ;;  %v1299_v54 = vadd.f32 %v1298_v51, %v1297_v46  ;;  %v1323_v55 = vadd.f32 %v1322_v53, %v1321_v47 }
 0x126   : > { %v1300_v56 = vpop.f32.mrf.mxu0  ;;  %v1324_v57 = vpop.f32.mrf.mxu1 }
 0x127   : > { %v803_v58 = vadd.f32 %v1299_v54, %v466_v50  ;;  %v811_v59 = vadd.f32 %v1323_v55, %v474_v52 }
 0x128   : > { %v1301_v61 = vpop.f32.mrf.mxu0  ;;  %v1325_v63 = vpop.f32.mrf.mxu1 }
 0x129   : > { %819 = vst [vmem:[#allocation2 + $0x50] sm:$0xff] %v803_v58  ;;  %827 = vst [vmem:[#allocation2 + $0x60] sm:$0xff] %v811_v59  ;;  %v1302_v0 = vadd.f32 %v1301_v61, %v1300_v56  ;;  %v1326_v1 = vadd.f32 %v1325_v63, %v1324_v57 }
 0x12a   : > { %v1303_v2 = vpop.f32.mrf.mxu0  ;;  %v1327_v3 = vpop.f32.mrf.mxu1 }
 0x12b   : > { %v804_v4 = vadd.f32 %v1302_v0, %v467_v60  ;;  %v812_v5 = vadd.f32 %v1326_v1, %v475_v62 }
 0x12c   : > { %v1304_v7 = vpop.f32.mrf.mxu0  ;;  %v1328_v9 = vpop.f32.mrf.mxu1 }
 0x12d   : > { %820 = vst [vmem:[#allocation2 + $0x68] sm:$0xff] %v804_v4  ;;  %828 = vst [vmem:[#allocation2 + $0x70] sm:$0xff] %v812_v5  ;;  %v1305_v10 = vadd.f32 %v1304_v7, %v1303_v2  ;;  %v1329_v11 = vadd.f32 %v1328_v9, %v1327_v3 }
 0x12e   : > { %v1306_v12 = vpop.f32.mrf.mxu0  ;;  %v1330_v13 = vpop.f32.mrf.mxu1 }
 0x12f   : > { %v805_v14 = vadd.f32 %v1305_v10, %v468_v6  ;;  %v813_v15 = vadd.f32 %v1329_v11, %v476_v8 }
 0x130   : > { %v1307_v17 = vpop.f32.mrf.mxu0  ;;  %v1331_v19 = vpop.f32.mrf.mxu1 }
 0x131   : > { %821 = vst [vmem:[#allocation2 + $0x8] sm:$0xff] %v805_v14  ;;  %829 = vst [vmem:[#allocation2 + $0x78] sm:$0xff] %v813_v15  ;;  %v1308_v20 = vadd.f32 %v1307_v17, %v1306_v12  ;;  %v1332_v21 = vadd.f32 %v1331_v19, %v1330_v13  ;;  %834 = sbr.rel (%p1144_p11) target bundleno = 326 (0x146), region = 82 }
 0x133   : > { %v806_v22 = vadd.f32 %v1308_v20, %v469_v16  ;;  %v814_v23 = vadd.f32 %v1332_v21, %v477_v18 }
 0x135   : > { %822 = vst [vmem:[#allocation2 + $0x48] sm:$0xff] %v806_v22  ;;  %830 = vst [vmem:[#allocation2 + $0x28] sm:$0xff] %v814_v23 }
 0x136   : > { %v835_v24 = vld [vmem:[#allocation2 + $0x30] sm:$0xff]  ;;  %v836_v25 = vld [vmem:[#allocation2] sm:$0xff]  ;;  %v837_v29 = vld [vmem:[#allocation2 + $0x58] sm:$0xff] }
 0x137   : > { %v1145_v26 = vld [vmem:[%s1668_s2] ss:$0 sm:$0xff]  ;;  %v838_v30 = vld [vmem:[#allocation2 + $0x18] sm:$0xff]  ;;  %v839_v31 = vld [vmem:[#allocation2 + $0x50] sm:$0xff] }
 0x138   : > { %v858_v27 = vadd.f32 %v1145_v26, %v835_v24  ;;  %v859_v28 = vadd.f32 %v1145_v26, %v836_v25  ;;  %v860_v32 = vadd.f32 %v1145_v26, %v837_v29  ;;  %v861_v33 = vadd.f32 %v1145_v26, %v838_v30  ;;  %v840_v34 = vld [vmem:[#allocation2 + $0x68] sm:$0xff]  ;;  %v843_v42 = vld [vmem:[#allocation2 + $0x40] sm:$0xff]  ;;  %v845_v44 = vld [vmem:[#allocation2 + $0x10] sm:$0xff] }
 0x139   : > { %v862_v35 = vadd.f32 %v1145_v26, %v839_v31  ;;  %v841_v36 = vld [vmem:[#allocation2 + $0x8] sm:$0xff]  ;;  %v863_v40 = vadd.f32 %v1145_v26, %v840_v34  ;;  %v844_v43 = vld [vmem:[#allocation2 + $0x20] sm:$0xff]  ;;  %v846_v49 = vld [vmem:[#allocation2 + $0x38] sm:$0xff]  ;;  %v866_v54 = vadd.f32 %v1145_v26, %v843_v42  ;;  %v868_v59 = vadd.f32 %v1145_v26, %v845_v44 }
 0x13a   : > { %v874_v38 = vmax.f32 %v858_v27, 0.0  ;;  %v875_v39 = vmax.f32 %v859_v28, 0.0  ;;  %v864_v41 = vadd.f32 %v1145_v26, %v841_v36  ;;  %v876_v45 = vmax.f32 %v860_v32, 0.0  ;;  %v847_v50 = vld [vmem:[#allocation2 + $0x60] sm:$0xff]  ;;  %v848_v55 = vld [vmem:[#allocation2 + $0x70] sm:$0xff]  ;;  %v849_v60 = vld [vmem:[#allocation2 + $0x78] sm:$0xff] }
 0x13b   : > { %v877_v46 = vmax.f32 %v861_v33, 0.0  ;;  %v878_v47 = vmax.f32 %v862_v35, 0.0  ;;  %v879_v52 = vmax.f32 %v863_v40, 0.0  ;;  %v867_v58 = vadd.f32 %v1145_v26, %v844_v43 }
 0x13c   : > { %v842_v37 = vld [vmem:[#allocation2 + $0x48] sm:$0xff]  ;;  %v1218_v51 = vpack.c.bf16 %v875_v39, %v874_v38  ;;  %v880_v53 = vmax.f32 %v864_v41, 0.0  ;;  %v882_v63 = vmax.f32 %v866_v54, 0.0  ;;  %v869_v0 = vadd.f32 %v1145_v26, %v846_v49 }
 0x13d   : > { %v865_v48 = vadd.f32 %v1145_v26, %v842_v37  ;;  %v1223_v56 = vpack.c.bf16 %v877_v46, %v876_v45  ;;  %v850_v61 = vld [vmem:[#allocation2 + $0x28] sm:$0xff]  ;;  %v1228_v62 = vpack.c.bf16 %v879_v52, %v878_v47  ;;  %v870_v1 = vadd.f32 %v1145_v26, %v847_v50 }
 0x13e   : > { %1219 = vst [vmem:[%s1670_s4] sm:$0xff] %v1218_v51   ;;  %v883_v3 = vmax.f32 %v867_v58, 0.0  ;;  %v884_v4 = vmax.f32 %v868_v59, 0.0  ;;  %v871_v5 = vadd.f32 %v1145_v26, %v848_v55  ;;  %v885_v6 = vmax.f32 %v869_v0, 0.0 }
 0x13f   : > { %v881_v57 = vmax.f32 %v865_v48, 0.0  ;;  %1262 = vst [vmem:[%s1670_s4 + $0x8] sm:$0xff] %v1223_v56   ;;  %1263 = vst [vmem:[%s1670_s4 + $0x10] sm:$0xff] %v1228_v62   ;;  %v886_v7 = vmax.f32 %v870_v1, 0.0  ;;  %v872_v8 = vadd.f32 %v1145_v26, %v849_v60  ;;  %v873_v9 = vadd.f32 %v1145_v26, %v850_v61 }
 0x140   : > { %v1238_v10 = vpack.c.bf16 %v883_v3, %v882_v63  ;;  %v887_v11 = vmax.f32 %v871_v5, 0.0  ;;  %v1243_v12 = vpack.c.bf16 %v885_v6, %v884_v4 }
 0x141   : > { %v1233_v2 = vpack.c.bf16 %v881_v57, %v880_v53  ;;  %v888_v13 = vmax.f32 %v872_v8, 0.0  ;;  %v889_v14 = vmax.f32 %v873_v9, 0.0 }
 0x142   : > { %1265 = vst [vmem:[%s1670_s4 + $0x20] sm:$0xff] %v1238_v10   ;;  %v1248_v15 = vpack.c.bf16 %v887_v11, %v886_v7  ;;  %1266 = vst [vmem:[%s1670_s4 + $0x28] sm:$0xff] %v1243_v12  }
 0x143   : > { %1264 = vst [vmem:[%s1670_s4 + $0x18] sm:$0xff] %v1233_v2   ;;  %v1253_v16 = vpack.c.bf16 %v889_v14, %v888_v13 }
 0x144   : > { %1267 = vst [vmem:[%s1670_s4 + $0x30] sm:$0xff] %v1248_v15  }
 0x145   : > { %1268 = vst [vmem:[%s1670_s4 + $0x38] sm:$0xff] %v1253_v16  }
 0x146 PF: > { %s14_s19 = sadd.s32 1, %s1467_s19   ;;  %s1671_s15 = smov %s1455_s16 }
 0x147   : > { %p11_p12 = scmp.ge.s32.totalorder %s14_s19, 7   ;;  %s1672_s16 = smov %s1529_s23 }
 0x148   : > { %s1673_s17 = smov %s1463_s18  ;;  %s1674_s18 = smov %s1676_s20 }
 0x149   :  { %13 = sbr.rel (!%p11_p12) target bundleno = 3 (0x3), region = 126 }

// kernel: resnet_forward.22
= control target key start
LH: loop header
LB: loop body
LE: loop exit
PB: predicated region body
PF: predicated region fallthrough
CT: control target
= control target key end

     0   :  { %s1484_s0 = inlined_call_operand.vmem [shape: bf16[32,1280], index: 0, kind: input, shape index: {}]   ;;  %s1485_s1 = inlined_call_operand.vmem [shape: bf16[1280,256], index: 1, kind: input, shape index: {}]   ;;  %s1486_s2 = inlined_call_operand.vmem [shape: f32[1,256], index: 2, kind: input, shape index: {}]   ;;  %s1487_s3 = inlined_call_operand.vmem [shape: bf16[32,256], index: 3, kind: output, shape index: {}]  }
   0x1   :  { %1489 = sst [smem:[#allocation7_spill]] %s1484_s0 }
   0x2   :  { %1490 = sst [smem:[#allocation8_spill]] %s1485_s1 }
   0x3   :  { %s1211_s12 = smov 0   ;;  %s1213_s13 = smov 0  }
   0x4   :  { %s1215_s14 = smov 0   ;;  %s1217_s15 = smov 0  }
   0x5   :  { %s1219_s16 = smov 0   ;;  %s1221_s17 = smov 0  }
   0x6   :  { %s1223_s18 = smov 0   ;;  %s1225_s19 = smov 0  }
   0x7   :  { %s1227_s20 = smov 0   ;;  %s1229_s21 = smov 0  }
   0x8   :  { %s1231_s22 = smov 0  }
   0x9 LB: > { %s884_s23 = sadd.s32 4294967295, %s1188_s22   ;;  %s25_s24 = sadd.s32 1, %s1180_s20  ;;  %s1188_s22 = sphi %s1231_s22, %s13_s22   ;;  %s1184_s21 = sphi %s1229_s21, %s1507_s21   ;;  %s1180_s20 = sphi %s1227_s20, %s1506_s20   ;;  %s1176_s19 = sphi %s1225_s19, %s1505_s19   ;;  %s1172_s18 = sphi %s1223_s18, %s1504_s18   ;;  %s1168_s17 = sphi %s1221_s17, %s1503_s17   ;;  %s1164_s16 = sphi %s1219_s16, %s1502_s16   ;;  %s1160_s15 = sphi %s1217_s15, %s1501_s15   ;;  %s1156_s14 = sphi %s1215_s14, %s1500_s14   ;;  %s1152_s13 = sphi %s1213_s13, %s1499_s13   ;;  %s1148_s12 = sphi %s1211_s12, %s1498_s12  }
   0xa   : > { %p26_p0 = scmp.ge.s32.totalorder %s25_s24, 5  ;;  %s28_s25 = sadd.s32 1, %s1184_s21 }
   0xb   : > { %s41_s26 = sadd.s32 1, %s1168_s17  ;;  %p48_p1 = scmp.ne.s32.totalorder %s1168_s17, %s1164_s16 }
   0xc   : > { %s1509_s24 = smov (%p26_p0, %s25_s24), 0  ;;  %s1511_s25 = smov (!%p26_p0, %s28_s25), %s1184_s21 }
   0xd   : > { %s37_s27 = ssub.s32 %s1180_s20, %s1509_s24  ;;  %p49_p2 = scmp.eq.s32.totalorder %s1188_s22, 0 }
   0xe   : > { %p30_p3 = scmp.ge.s32.totalorder %s1511_s25, 2  ;;  %p39_p4 = scmp.eq.s32.totalorder %s37_s27, 0 }
   0xf   : > { %p1278_p5 = por %p49_p2, %p48_p1  ;;  %s69_s29 = sadd.s32 1, %s1160_s15 }
  0x10   : > { %s1513_s25 = smov (%p30_p3, %s1511_s25), 0  ;;  %p76_p6 = scmp.ne.s32.totalorder %s1160_s15, %s1156_s14 }
  0x11   : > { %1492 = sst [smem:[#allocation6_spill]] %s1513_s25  ;;  %s65_s4 = ssub.s32 %s1184_s21, %s1513_s25 }
  0x12   : > { %s1286_s30 = scalar_select %p39_p4, %s1168_s17, %s41_s26  }
  0x13   : > { %s66_s5 = sor.u32 %s65_s4, %s37_s27  ;;  %p121_p7 = scmp.eq.s32.totalorder %s65_s4, 0 }
  0x14   : > { %p67_p8 = scmp.eq.s32.totalorder %s66_s5, 0  ;;  %p1292_p9 = por %p76_p6, %p49_p2 }
  0x15   : > { %s123_s7 = sadd.s32 1, %s1152_s13  ;;  %p133_p10 = scmp.ne.s32.totalorder %s1152_s13, %s1148_s12 }
  0x16   : > { %s1300_s8 = scalar_select %p67_p8, %s1160_s15, %s69_s29  }
  0x17   : > { %s1303_s9 = scalar_select %p121_p7, %s1152_s13, %s123_s7  }
  0x18   : > { %p134_p11 = scmp.eq.s32.totalorder %s884_s23, 9  ;;  %p887_p13 = scmp.ge.s32.totalorder %s1188_s22, 10 }
  0x1a   : > { %p1305_p12 = por %p134_p11, %p133_p10  ;;  %156 = sbr.rel (%p887_p13) target bundleno = 74 (0x4a), region = 16 }
  0x1f   : > { %159 = sbr.rel (!%p1278_p5) target bundleno = 43 (0x2b), region = 20  ;;  %s161_s11 = sand.u32 (%p1278_p5), 1, %s1168_s17  }
  0x20   : > { %s930_s26 = sshll.u32 (%p1278_p5), %s1180_s20, 3  ;;  %s888_s27 = sshll.u32 (%p1278_p5), %s161_s11, 5 }
  0x21   : > { %s1495_s0 = sld [smem:[#allocation7_spill]] (%p1278_p5)  ;;  %s163_s23 = scalar_lea.vmem (%p1278_p5), [#allocation3], %s888_s27 }
  0x27   : > { %s169_s5 = scalar_lea.vmem %s1495_s0, %s930_s26 }
  0x28   : > { %v204_v0 = vld [vmem:[%s169_s5] sm:$0xff]  ;;  %v206_v1 = vld [vmem:[%s169_s5 + $0x28] sm:$0xff]  ;;  %v208_v2 = vld [vmem:[%s169_s5 + $0x50] sm:$0xff] }
  0x29   : > { %205 = vst [vmem:[%s163_s23] sm:$0xff] %v204_v0  ;;  %207 = vst [vmem:[%s163_s23 + $0x8] sm:$0xff] %v206_v1  ;;  %v210_v3 = vld [vmem:[%s169_s5 + $0x78] sm:$0xff] }
  0x2a   : > { %209 = vst [vmem:[%s163_s23 + $0x10] sm:$0xff] %v208_v2  ;;  %211 = vst [vmem:[%s163_s23 + $0x18] sm:$0xff] %v210_v3 }
  0x2b PF: > { %217 = sbr.rel (!%p1292_p9) target bundleno = 74 (0x4a), region = 58  ;;  %s219_s28 = sand.u32 (%p1292_p9), 1, %s1160_s15  }
  0x2c   : > { %s931_s7 = sshll.u32 (%p1292_p9), %s1180_s20, 6  ;;  %s891_s11 = sshll.u32 (%p1292_p9), %s219_s28, 7 }
  0x2d   : > { %s224_s26 = sadd.s32 (%p1292_p9), %s1184_s21, %s931_s7  ;;  %s1496_s1 = sld [smem:[#allocation8_spill]] (%p1292_p9) }
  0x2e   : > { %s894_s29 = sshll.u32 (%p1292_p9), %s224_s26, 2  ;;  %s1330_s6 = scalar_lea.vmem (%p1292_p9), [#allocation4], %s891_s11 }
  0x33   : > { %s1325_s27 = scalar_lea.vmem %s1496_s1, %s894_s29 }
  0x34   : > { %v243_v4 = vld [vmem:[%s1325_s27] sm:$0xf]  ;;  %v245_v5 = vld [vmem:[%s1325_s27 + $0x8] sm:$0xf]  ;;  %v247_v6 = vld [vmem:[%s1325_s27 + $0x10] sm:$0xf] }
  0x35   : > { %244 = vst [vmem:[%s1330_s6] sm:$0xf] %v243_v4  ;;  %246 = vst [vmem:[%s1330_s6 + $0x4] sm:$0xf] %v245_v5  ;;  %v249_v7 = vld [vmem:[%s1325_s27 + $0x18] sm:$0xf] }
  0x36   : > { %248 = vst [vmem:[%s1330_s6 + $0x8] sm:$0xf] %v247_v6  ;;  %v251_v8 = vld [vmem:[%s1325_s27 + $0x20] sm:$0xf]  ;;  %v253_v9 = vld [vmem:[%s1325_s27 + $0x28] sm:$0xf] }
  0x37   : > { %250 = vst [vmem:[%s1330_s6 + $0xc] sm:$0xf] %v249_v7  ;;  %252 = vst [vmem:[%s1330_s6 + $0x10] sm:$0xf] %v251_v8  ;;  %v255_v10 = vld [vmem:[%s1325_s27 + $0x30] sm:$0xf] }
  0x38   : > { %254 = vst [vmem:[%s1330_s6 + $0x14] sm:$0xf] %v253_v9  ;;  %v257_v11 = vld [vmem:[%s1325_s27 + $0x38] sm:$0xf]  ;;  %v259_v12 = vld [vmem:[%s1325_s27 + $0x40] sm:$0xf] }
  0x39   : > { %256 = vst [vmem:[%s1330_s6 + $0x18] sm:$0xf] %v255_v10  ;;  %258 = vst [vmem:[%s1330_s6 + $0x1c] sm:$0xf] %v257_v11  ;;  %v261_v13 = vld [vmem:[%s1325_s27 + $0x48] sm:$0xf] }
  0x3a   : > { %260 = vst [vmem:[%s1330_s6 + $0x20] sm:$0xf] %v259_v12  ;;  %v263_v14 = vld [vmem:[%s1325_s27 + $0x50] sm:$0xf]  ;;  %v265_v15 = vld [vmem:[%s1325_s27 + $0x58] sm:$0xf] }
  0x3b   : > { %262 = vst [vmem:[%s1330_s6 + $0x24] sm:$0xf] %v261_v13  ;;  %264 = vst [vmem:[%s1330_s6 + $0x28] sm:$0xf] %v263_v14  ;;  %v267_v16 = vld [vmem:[%s1325_s27 + $0x60] sm:$0xf] }
  0x3c   : > { %266 = vst [vmem:[%s1330_s6 + $0x2c] sm:$0xf] %v265_v15  ;;  %v269_v17 = vld [vmem:[%s1325_s27 + $0x68] sm:$0xf]  ;;  %v271_v18 = vld [vmem:[%s1325_s27 + $0x70] sm:$0xf] }
  0x3d   : > { %268 = vst [vmem:[%s1330_s6 + $0x30] sm:$0xf] %v267_v16  ;;  %270 = vst [vmem:[%s1330_s6 + $0x34] sm:$0xf] %v269_v17  ;;  %v273_v19 = vld [vmem:[%s1325_s27 + $0x78] sm:$0xf] }
  0x3e   : > { %272 = vst [vmem:[%s1330_s6 + $0x38] sm:$0xf] %v271_v18  ;;  %v275_v20 = vld [vmem:[%s1325_s27 + $0x80] sm:$0xf]  ;;  %v277_v21 = vld [vmem:[%s1325_s27 + $0x88] sm:$0xf] }
  0x3f   : > { %274 = vst [vmem:[%s1330_s6 + $0x3c] sm:$0xf] %v273_v19  ;;  %276 = vst [vmem:[%s1330_s6 + $0x40] sm:$0xf] %v275_v20  ;;  %v279_v22 = vld [vmem:[%s1325_s27 + $0x90] sm:$0xf] }
  0x40   : > { %278 = vst [vmem:[%s1330_s6 + $0x44] sm:$0xf] %v277_v21  ;;  %v281_v23 = vld [vmem:[%s1325_s27 + $0x98] sm:$0xf]  ;;  %v283_v24 = vld [vmem:[%s1325_s27 + $0xa0] sm:$0xf] }
  0x41   : > { %280 = vst [vmem:[%s1330_s6 + $0x48] sm:$0xf] %v279_v22  ;;  %282 = vst [vmem:[%s1330_s6 + $0x4c] sm:$0xf] %v281_v23  ;;  %v285_v25 = vld [vmem:[%s1325_s27 + $0xa8] sm:$0xf] }
  0x42   : > { %284 = vst [vmem:[%s1330_s6 + $0x50] sm:$0xf] %v283_v24  ;;  %v287_v26 = vld [vmem:[%s1325_s27 + $0xb0] sm:$0xf]  ;;  %v289_v27 = vld [vmem:[%s1325_s27 + $0xb8] sm:$0xf] }
  0x43   : > { %286 = vst [vmem:[%s1330_s6 + $0x54] sm:$0xf] %v285_v25  ;;  %288 = vst [vmem:[%s1330_s6 + $0x58] sm:$0xf] %v287_v26  ;;  %v291_v28 = vld [vmem:[%s1325_s27 + $0xc0] sm:$0xf] }
  0x44   : > { %290 = vst [vmem:[%s1330_s6 + $0x5c] sm:$0xf] %v289_v27  ;;  %v293_v29 = vld [vmem:[%s1325_s27 + $0xc8] sm:$0xf]  ;;  %v295_v30 = vld [vmem:[%s1325_s27 + $0xd0] sm:$0xf] }
  0x45   : > { %292 = vst [vmem:[%s1330_s6 + $0x60] sm:$0xf] %v291_v28  ;;  %294 = vst [vmem:[%s1330_s6 + $0x64] sm:$0xf] %v293_v29  ;;  %v297_v31 = vld [vmem:[%s1325_s27 + $0xd8] sm:$0xf] }
  0x46   : > { %296 = vst [vmem:[%s1330_s6 + $0x68] sm:$0xf] %v295_v30  ;;  %v299_v32 = vld [vmem:[%s1325_s27 + $0xe0] sm:$0xf]  ;;  %v301_v33 = vld [vmem:[%s1325_s27 + $0xe8] sm:$0xf] }
  0x47   : > { %298 = vst [vmem:[%s1330_s6 + $0x6c] sm:$0xf] %v297_v31  ;;  %300 = vst [vmem:[%s1330_s6 + $0x70] sm:$0xf] %v299_v32  ;;  %v303_v34 = vld [vmem:[%s1325_s27 + $0xf0] sm:$0xf] }
  0x48   : > { %302 = vst [vmem:[%s1330_s6 + $0x74] sm:$0xf] %v301_v33  ;;  %v305_v35 = vld [vmem:[%s1325_s27 + $0xf8] sm:$0xf]  ;;  %304 = vst [vmem:[%s1330_s6 + $0x78] sm:$0xf] %v303_v34 }
  0x49   : > { %306 = vst [vmem:[%s1330_s6 + $0x7c] sm:$0xf] %v305_v35 }
  0x4a PF: > { %p895_p0 = scmp.ge.s32.totalorder %s1188_s22, 1  ;;  %p399_p1 = scmp.lt.s32.totalorder %s1188_s22, 11 }
  0x4c   : > { %p400_p2 = pnand %p895_p0, %p399_p1 }
  0x4d   : > { %s406_s0 = sand.u32 (!%p400_p2), 1, %s1164_s16   ;;  %s413_s5 = sand.u32 (!%p400_p2), 1, %s1156_s14  }
  0x4e   : > { %403 = sbr.rel (%p400_p2) target bundleno = 352 (0x160), region = 103  ;;  %s896_s23 = sshll.u32 (!%p400_p2), %s406_s0, 5 }
  0x4f   : > { %s897_s28 = sshll.u32 (!%p400_p2), %s413_s5, 7  ;;  %s439_s7 = sand.u32 (!%p400_p2), 1, %s1148_s12  }
  0x50   : > { %p445_p3 = scmp.lt.s32.totalorder (!%p400_p2), %s1176_s19, 1  ;;  %s898_s11 = sshll.u32 (!%p400_p2), %s439_s7, 4 }
  0x51   : > { %s1406_s6 = scalar_lea.vmem (!%p400_p2), [#allocation3], %s896_s23  ;;  %s1408_s1 = scalar_lea.vmem (!%p400_p2), [#allocation4], %s897_s28 }
  0x52   : > { %s1410_s25 = scalar_lea.vmem (!%p400_p2), [#allocation5], %s898_s11  ;;  %p899_p4 = scmp.ne.s32.totalorder (!%p400_p2), %s1172_s18, 0 }
  0x53   : > { %s1400_s26 = scalar_select %p445_p3, %s1176_s19, 1 }
  0x54   : > { %453 = sbr.rel (%p899_p4) target bundleno = 92 (0x5c), region = 115 }
  0x55   : > { %s447_s27 = scalar_lea.vmem %s1486_s2, %s1400_s26 }
  0x59   : > { %v1190_v36 = vmov 0.0  }
  0x5a   : > { %454 = vst [vmem:[#allocation2 + $0x10] sm:$0xff] %v1190_v36  ;;  %455 = vst [vmem:[#allocation2] sm:$0xff] %v1190_v36 }
  0x5b   : > { %456 = vst [vmem:[#allocation2 + $0x18] sm:$0xff] %v1190_v36  ;;  %457 = vst [vmem:[#allocation2 + $0x8] sm:$0xff] %v1190_v36 }
  0x5c PF: > { %v1080_v37 = vld [vmem:[%s1408_s1 + $0x78] sm:$0xff]   ;;  %v1082_v39 = vld [vmem:[%s1408_s1 + $0x70] sm:$0xff]   ;;  %v1084_v41 = vld [vmem:[%s1408_s1 + $0x68] sm:$0xff]   ;;  %p920_p5 = scmp.ne.s32.totalorder %s1172_s18, 4 }
  0x5d   : > { %v1081_v38 = vld [vmem:[%s1408_s1 + $0x38] sm:$0xff]   ;;  %947 = vmatprep.subr.bf16.mxu0 %v1080_v37  ;;  %975 = vmatprep.subr.bf16.mxu1 %v1080_v37  ;;  %v1083_v40 = vld [vmem:[%s1408_s1 + $0x30] sm:$0xff]   ;;  %v1085_v42 = vld [vmem:[%s1408_s1 + $0x28] sm:$0xff]  }
  0x5e   : > { %948 = vmatpush3.bf16.msra.mxu0 %v1081_v38  ;;  %983 = vmatpush3.bf16.msra.mxu1 %v1081_v38  ;;  %v1086_v43 = vld [vmem:[%s1408_s1 + $0x60] sm:$0xff]   ;;  %v1088_v45 = vld [vmem:[%s1408_s1 + $0x58] sm:$0xff]   ;;  %v1090_v47 = vld [vmem:[%s1408_s1 + $0x50] sm:$0xff]  }
  0x5f   : > { %949 = vmatprep.subr.bf16.mxu0 %v1082_v39  ;;  %976 = vmatprep.subr.bf16.mxu1 %v1082_v39  ;;  %v1087_v44 = vld [vmem:[%s1408_s1 + $0x20] sm:$0xff]   ;;  %v1089_v46 = vld [vmem:[%s1408_s1 + $0x18] sm:$0xff]   ;;  %v1091_v50 = vld [vmem:[%s1408_s1 + $0x10] sm:$0xff]  }
  0x60   : > { %v1098_v48 = vld [vmem:[%s1406_s6 + $0x4] ss:$8 sps:$4 sm:$0xff]   ;;  %v1101_v49 = vld [vmem:[%s1406_s6 + $0x14] ss:$8 sps:$4 sm:$0xff]   ;;  %v1096_v55 = vld [vmem:[%s1406_s6] ss:$8 sps:$4 sm:$0xff]  }
  0x61   : > { %v1092_v51 = vld [vmem:[%s1408_s1 + $0x48] sm:$0xff]   ;;  %646 = vmatprep.mubr.bf16.mxu0 %v1098_v48  ;;  %654 = vmatprep.mubr.bf16.mxu1 %v1101_v49  ;;  %v1094_v53 = vld [vmem:[%s1408_s1 + $0x40] sm:$0xff]   ;;  %v1099_v56 = vld [vmem:[%s1406_s6 + $0x10] ss:$8 sps:$4 sm:$0xff]  }
  0x62   : > { %950 = vmatpush3.bf16.msra.mxu0 %v1083_v40  ;;  %984 = vmatpush3.bf16.msra.mxu1 %v1083_v40  ;;  %v1093_v52 = vld [vmem:[%s1408_s1 + $0x8] sm:$0xff]   ;;  %v1095_v54 = vld [vmem:[%s1408_s1] sm:$0xff]   ;;  %v458_v59 = vld [vmem:[#allocation2 + $0x10] sm:$0xff] }
  0x63   : > { %951 = vmatprep.subr.bf16.mxu0 %v1084_v41  ;;  %977 = vmatprep.subr.bf16.mxu1 %v1084_v41  ;;  %v460_v61 = vld [vmem:[#allocation2 + $0x18] sm:$0xff]  ;;  %v459_v5 = vld [vmem:[#allocation2] sm:$0xff]  ;;  %v461_v7 = vld [vmem:[#allocation2 + $0x8] sm:$0xff] }
  0x66   : > { %952 = vmatpush3.bf16.msra.mxu0 %v1085_v42  ;;  %985 = vmatpush3.bf16.msra.mxu1 %v1085_v42 }
  0x67   : > { %953 = vmatprep.subr.bf16.mxu0 %v1086_v43  ;;  %978 = vmatprep.subr.bf16.mxu1 %v1086_v43 }
  0x6a   : > { %954 = vmatpush3.bf16.msra.mxu0 %v1087_v44  ;;  %986 = vmatpush3.bf16.msra.mxu1 %v1087_v44 }
  0x6b   : > { %955 = vmatprep.subr.bf16.mxu0 %v1088_v45  ;;  %979 = vmatprep.subr.bf16.mxu1 %v1088_v45 }
  0x6e   : > { %956 = vmatpush3.bf16.msra.mxu0 %v1089_v46  ;;  %987 = vmatpush3.bf16.msra.mxu1 %v1089_v46 }
  0x6f   : > { %957 = vmatprep.subr.bf16.mxu0 %v1090_v47  ;;  %980 = vmatprep.subr.bf16.mxu1 %v1090_v47 }
  0x72   : > { %958 = vmatpush3.bf16.msra.mxu0 %v1091_v50  ;;  %988 = vmatpush3.bf16.msra.mxu1 %v1091_v50 }
  0x73   : > { %959 = vmatprep.subr.bf16.mxu0 %v1092_v51  ;;  %981 = vmatprep.subr.bf16.mxu1 %v1092_v51 }
  0x76   : > { %960 = vmatpush3.bf16.msra.mxu0 %v1093_v52  ;;  %989 = vmatpush3.bf16.msra.mxu1 %v1093_v52 }
  0x77   : > { %961 = vmatprep.subr.bf16.mxu0 %v1094_v53  ;;  %982 = vmatprep.subr.bf16.mxu1 %v1094_v53 }
  0x7a   : > { %962 = vmatpush3.bf16.msra.mxu0 %v1095_v54  ;;  %990 = vmatpush3.bf16.msra.mxu1 %v1095_v54 }
  0x7d   : > { %647 = vmatmul.mubr.bf16.vlgmr.msra.gmra.mxu0 %v1096_v55  ;;  %655 = vmatmul.mubr.bf16.vlgmr.msra.gmra.mxu1 %v1099_v56 }
 0x13d   : > { %v963_v57 = vpop.f32.mrf.mxu0  ;;  %v969_v58 = vpop.f32.mrf.mxu1 }
 0x13f   : > { %v964_v60 = vpop.f32.mrf.mxu0  ;;  %v970_v62 = vpop.f32.mrf.mxu1 }
 0x140   : > { %v965_v63 = vadd.f32 %v964_v60, %v963_v57  ;;  %v971_v0 = vadd.f32 %v970_v62, %v969_v58 }
 0x141   : > { %v966_v1 = vpop.f32.mrf.mxu0  ;;  %v972_v2 = vpop.f32.mrf.mxu1 }
 0x142   : > { %v663_v3 = vadd.f32 %v965_v63, %v458_v59  ;;  %v665_v4 = vadd.f32 %v971_v0, %v460_v61 }
 0x143   : > { %v967_v6 = vpop.f32.mrf.mxu0  ;;  %v973_v8 = vpop.f32.mrf.mxu1 }
 0x144   : > { %667 = vst [vmem:[#allocation2 + $0x10] sm:$0xff] %v663_v3  ;;  %669 = vst [vmem:[#allocation2 + $0x18] sm:$0xff] %v665_v4  ;;  %v968_v9 = vadd.f32 %v967_v6, %v966_v1  ;;  %v974_v10 = vadd.f32 %v973_v8, %v972_v2  ;;  %674 = sbr.rel (%p920_p5) target bundleno = 343 (0x157), region = 119 }
 0x146   : > { %v664_v11 = vadd.f32 %v968_v9, %v459_v5  ;;  %v666_v12 = vadd.f32 %v974_v10, %v461_v7 }
 0x148   : > { %668 = vst [vmem:[#allocation2] sm:$0xff] %v664_v11  ;;  %670 = vst [vmem:[#allocation2 + $0x8] sm:$0xff] %v666_v12 }
 0x149   : > { %v921_v15 = vld [vmem:[%s447_s27] ss:$0 sm:$0xff] }
 0x14b   : > { %v675_v13 = vld [vmem:[#allocation2 + $0x10] sm:$0xff]  ;;  %v677_v18 = vld [vmem:[#allocation2 + $0x18] sm:$0xff] }
 0x14c   : > { %v686_v16 = vadd.f32 %v921_v15, %v675_v13  ;;  %v688_v20 = vadd.f32 %v921_v15, %v677_v18 }
 0x14e   : > { %v690_v22 = vmax.f32 %v686_v16, 0.0  ;;  %v692_v24 = vmax.f32 %v688_v20, 0.0 }
 0x14f   : > { %v676_v14 = vld [vmem:[#allocation2] sm:$0xff]  ;;  %v678_v19 = vld [vmem:[#allocation2 + $0x8] sm:$0xff] }
 0x150   : > { %v687_v17 = vadd.f32 %v921_v15, %v676_v14  ;;  %v689_v21 = vadd.f32 %v921_v15, %v678_v19 }
 0x152   : > { %v691_v23 = vmax.f32 %v687_v17, 0.0  ;;  %v693_v25 = vmax.f32 %v689_v21, 0.0 }
 0x154   : > { %v939_v26 = vpack.c.bf16 %v691_v23, %v690_v22  ;;  %v944_v27 = vpack.c.bf16 %v693_v25, %v692_v24 }
 0x156   : > { %940 = vst [vmem:[%s1410_s25] sm:$0xff] %v939_v26   ;;  %946 = vst [vmem:[%s1410_s25 + $0x8] sm:$0xff] %v944_v27  }
 0x157 PF: > { %720 = sbr.rel (!%p1305_p12) target bundleno = 352 (0x160), region = 123  ;;  %s927_s14 = sshll.u32 (%p1305_p12), %s1176_s19, 2 }
 0x158   : > { %s725_s0 = scalar_lea.vmem (%p1305_p12), %s1487_s3, %s927_s14 }
 0x15d   : > { %v742_v28 = vld [vmem:[%s1410_s25] sm:$0xf]  ;;  %v744_v29 = vld [vmem:[%s1410_s25 + $0x4] sm:$0xf]  ;;  %v746_v30 = vld [vmem:[%s1410_s25 + $0x8] sm:$0xf] }
 0x15e   : > { %v748_v31 = vld [vmem:[%s1410_s25 + $0xc] sm:$0xf]  ;;  %743 = vst [vmem:[%s725_s0] sm:$0xf] %v742_v28  ;;  %745 = vst [vmem:[%s725_s0 + $0x8] sm:$0xf] %v744_v29 }
 0x15f   : > { %747 = vst [vmem:[%s725_s0 + $0x10] sm:$0xf] %v746_v30  ;;  %749 = vst [vmem:[%s725_s0 + $0x18] sm:$0xf] %v748_v31 }
 0x160 PF: > { %s13_s22 = sadd.s32 1, %s1188_s22   ;;  %s1497_s10 = sld [smem:[#allocation6_spill]] }
 0x161   : > { %p10_p6 = scmp.ge.s32.totalorder %s13_s22, 12   ;;  %s1498_s12 = smov %s1152_s13 }
 0x162   : > { %s1499_s13 = smov %s1303_s9  ;;  %s1500_s14 = smov %s1160_s15 }
 0x163   : > { %s1501_s15 = smov %s1300_s8  ;;  %s1502_s16 = smov %s1168_s17 }
 0x164   : > { %s1503_s17 = smov %s1286_s30  ;;  %s1504_s18 = smov %s1180_s20 }
 0x165   : > { %s1505_s19 = smov %s1184_s21  ;;  %s1506_s20 = smov %s1509_s24 }
 0x166   : > { %s1507_s21 = smov %s1497_s10  ;;  %12 = sbr.rel (!%p10_p6) target bundleno = 9 (0x9), region = 206 }

// kernel: resnet_forward.21
= control target key start
LH: loop header
LB: loop body
LE: loop exit
PB: predicated region body
PF: predicated region fallthrough
CT: control target
= control target key end

     0   :  { %s879_s12 = smov 0   ;;  %s881_s13 = smov 0   ;;  %s984_s0 = inlined_call_operand.vmem [shape: bf16[32,128], index: 0, kind: input, shape index: {}]   ;;  %s985_s1 = inlined_call_operand.vmem [shape: bf16[128,256], index: 1, kind: input, shape index: {}]   ;;  %s986_s2 = inlined_call_operand.vmem [shape: f32[1,256], index: 2, kind: input, shape index: {}]   ;;  %s987_s3 = inlined_call_operand.vmem [shape: bf16[32,256], index: 3, kind: output, shape index: {}]  }
   0x1   :  { %s883_s14 = smov 0   ;;  %s885_s15 = smov 0  }
   0x2   :  { %s887_s16 = smov 0  }
   0x3 LB: > { %s28_s17 = sadd.s32 1, %s853_s15  ;;  %s695_s18 = sadd.s32 4294967295, %s857_s16   ;;  %s857_s16 = sphi %s887_s16, %s13_s16   ;;  %s853_s15 = sphi %s885_s15, %s992_s15   ;;  %s849_s14 = sphi %s883_s14, %s991_s14   ;;  %s845_s13 = sphi %s881_s13, %s990_s13   ;;  %s841_s12 = sphi %s879_s12, %s989_s12  }
   0x4   : > { %p30_p0 = scmp.ge.s32.totalorder %s28_s17, 2  ;;  %p76_p1 = scmp.ne.s32.totalorder %s845_s13, %s841_s12 }
   0x5   : > { %p77_p2 = scmp.eq.s32.totalorder %s857_s16, 0  ;;  %p134_p4 = scmp.eq.s32.totalorder %s695_s18, 1 }
   0x6   : > { %s994_s17 = smov (%p30_p0, %s28_s17), 0  ;;  %s69_s20 = sadd.s32 1, %s845_s13 }
   0x7   : > { %p78_p3 = por %p77_p2, %p76_p1  ;;  %s65_s19 = ssub.s32 %s853_s15, %s994_s17 }
   0x8   : > { %p67_p5 = scmp.eq.s32.totalorder %s65_s19, 0  ;;  %p914_p6 = por %p134_p4, %p76_p1 }
   0x9   : > { %p699_p7 = scmp.ge.s32.totalorder %s857_s16, 2 }
   0xa   : > { %s919_s22 = scalar_select %p67_p5, %s845_s13, %s69_s20  }
   0xb   : > { %168 = sbr.rel (%p699_p7) target bundleno = 30 (0x1e), region = 20 }
  0x10   : > { %171 = sbr.rel (!%p78_p3) target bundleno = 30 (0x1e), region = 24  ;;  %s173_s23 = sand.u32 (%p78_p3), 1, %s845_s13  }
  0x11   : > { %s701_s24 = sshll.u32 (%p78_p3), %s853_s15, 2  ;;  %s700_s25 = sshll.u32 (%p78_p3), %s173_s23, 6 }
  0x12   : > { %s927_s28 = scalar_lea.vmem (%p78_p3), %s985_s1, %s701_s24  ;;  %s175_s29 = scalar_lea.vmem (%p78_p3), [#allocation3], %s700_s25 }
  0x13   : > { %v197_v0 = vld [vmem:[%s927_s28] sm:$0xf] (%p78_p3)  ;;  %v199_v1 = vld [vmem:[%s927_s28 + $0x8] sm:$0xf] (%p78_p3)  ;;  %v201_v2 = vld [vmem:[%s927_s28 + $0x10] sm:$0xf] (%p78_p3) }
  0x14   : > { %198 = vst [vmem:[%s175_s29] sm:$0xf] (%p78_p3), %v197_v0  ;;  %200 = vst [vmem:[%s175_s29 + $0x4] sm:$0xf] (%p78_p3), %v199_v1  ;;  %v203_v3 = vld [vmem:[%s927_s28 + $0x18] sm:$0xf] (%p78_p3) }
  0x15   : > { %v205_v4 = vld [vmem:[%s927_s28 + $0x20] sm:$0xf]  ;;  %202 = vst [vmem:[%s175_s29 + $0x8] sm:$0xf] %v201_v2  ;;  %204 = vst [vmem:[%s175_s29 + $0xc] sm:$0xf] %v203_v3 }
  0x16   : > { %206 = vst [vmem:[%s175_s29 + $0x10] sm:$0xf] %v205_v4  ;;  %v207_v5 = vld [vmem:[%s927_s28 + $0x28] sm:$0xf]  ;;  %v209_v6 = vld [vmem:[%s927_s28 + $0x30] sm:$0xf] }
  0x17   : > { %v211_v7 = vld [vmem:[%s927_s28 + $0x38] sm:$0xf]  ;;  %208 = vst [vmem:[%s175_s29 + $0x14] sm:$0xf] %v207_v5  ;;  %210 = vst [vmem:[%s175_s29 + $0x18] sm:$0xf] %v209_v6 }
  0x18   : > { %212 = vst [vmem:[%s175_s29 + $0x1c] sm:$0xf] %v211_v7  ;;  %v213_v8 = vld [vmem:[%s927_s28 + $0x40] sm:$0xf]  ;;  %v215_v9 = vld [vmem:[%s927_s28 + $0x48] sm:$0xf] }
  0x19   : > { %v217_v10 = vld [vmem:[%s927_s28 + $0x50] sm:$0xf]  ;;  %214 = vst [vmem:[%s175_s29 + $0x20] sm:$0xf] %v213_v8  ;;  %216 = vst [vmem:[%s175_s29 + $0x24] sm:$0xf] %v215_v9 }
  0x1a   : > { %218 = vst [vmem:[%s175_s29 + $0x28] sm:$0xf] %v217_v10  ;;  %v219_v11 = vld [vmem:[%s927_s28 + $0x58] sm:$0xf]  ;;  %v221_v12 = vld [vmem:[%s927_s28 + $0x60] sm:$0xf] }
  0x1b   : > { %v223_v13 = vld [vmem:[%s927_s28 + $0x68] sm:$0xf]  ;;  %220 = vst [vmem:[%s175_s29 + $0x2c] sm:$0xf] %v219_v11  ;;  %222 = vst [vmem:[%s175_s29 + $0x30] sm:$0xf] %v221_v12 }
  0x1c   : > { %224 = vst [vmem:[%s175_s29 + $0x34] sm:$0xf] %v223_v13  ;;  %v225_v14 = vld [vmem:[%s927_s28 + $0x70] sm:$0xf]  ;;  %v227_v15 = vld [vmem:[%s927_s28 + $0x78] sm:$0xf] }
  0x1d   : > { %226 = vst [vmem:[%s175_s29 + $0x38] sm:$0xf] %v225_v14  ;;  %228 = vst [vmem:[%s175_s29 + $0x3c] sm:$0xf] %v227_v15 }
  0x1e PF: > { %p702_p8 = scmp.ge.s32.totalorder %s857_s16, 1  ;;  %p289_p9 = scmp.lt.s32.totalorder %s857_s16, 3 }
  0x20   : > { %p290_p10 = pnand %p702_p8, %p289_p9 }
  0x21   : > { %s296_s30 = sand.u32 (!%p290_p10), 1, %s841_s12   ;;  %p339_p11 = scmp.lt.s32.totalorder (!%p290_p10), %s849_s14, 1 }
  0x22   : > { %293 = sbr.rel (%p290_p10) target bundleno = 284 (0x11c), region = 69  ;;  %s703_s6 = sshll.u32 (!%p290_p10), %s296_s30, 6 }
  0x23   : > { %s298_s7 = scalar_lea.vmem (!%p290_p10), [#allocation3], %s703_s6  ;;  %s704_s20 = sshll.u32 (!%p290_p10), %s296_s30, 4 }
  0x24   : > { %s328_s23 = scalar_lea.vmem (!%p290_p10), [#allocation4], %s704_s20 }
  0x27   : > { %v817_v16 = vld [vmem:[%s984_s0] sm:$0xff]   ;;  %v809_v17 = vld [vmem:[%s298_s7 + $0x38] sm:$0xff]   ;;  %v810_v18 = vld [vmem:[%s298_s7 + $0x30] sm:$0xff]   ;;  %s340_s10 = scalar_select %p339_p11, %s849_s14, 1 }
  0x28   : > { %765 = vmatprep.mubr.bf16.mxu0 %v817_v16  ;;  %749 = vmatprep.subr.bf16.mxu0 %v809_v17  ;;  %v811_v19 = vld [vmem:[%s298_s7 + $0x28] sm:$0xff]   ;;  %v812_v20 = vld [vmem:[%s298_s7 + $0x20] sm:$0xff]   ;;  %v813_v21 = vld [vmem:[%s298_s7 + $0x18] sm:$0xff]   ;;  %s721_s24 = sshll.u32 (%p914_p6), %s849_s14, 2 }
  0x29   : > { %750 = vmatpush3.bf16.msra.mxu0 %v809_v17  ;;  %v814_v22 = vld [vmem:[%s298_s7 + $0x10] sm:$0xff]   ;;  %v815_v23 = vld [vmem:[%s298_s7 + $0x8] sm:$0xff]   ;;  %v816_v24 = vld [vmem:[%s298_s7] sm:$0xff]   ;;  %s341_s19 = scalar_lea.vmem %s986_s2, %s340_s10  ;;  %s542_s26 = scalar_lea.vmem (%p914_p6), %s987_s3, %s721_s24 }
  0x2a   : > { %751 = vmatprep.subr.bf16.mxu0 %v810_v18  ;;  %v818_v25 = vld [vmem:[%s984_s0 + $0x8] sm:$0xff]   ;;  %v715_v27 = vld [vmem:[%s341_s19] ss:$0 sm:$0xff] }
  0x2d   : > { %752 = vmatpush3.bf16.msra.mxu0 %v810_v18 }
  0x2e   : > { %753 = vmatprep.subr.bf16.mxu0 %v811_v19 }
  0x31   : > { %754 = vmatpush3.bf16.msra.mxu0 %v811_v19 }
  0x32   : > { %755 = vmatprep.subr.bf16.mxu0 %v812_v20 }
  0x35   : > { %756 = vmatpush3.bf16.msra.mxu0 %v812_v20 }
  0x36   : > { %757 = vmatprep.subr.bf16.mxu0 %v813_v21 }
  0x39   : > { %758 = vmatpush3.bf16.msra.mxu0 %v813_v21 }
  0x3a   : > { %759 = vmatprep.subr.bf16.mxu0 %v814_v22 }
  0x3d   : > { %760 = vmatpush3.bf16.msra.mxu0 %v814_v22 }
  0x3e   : > { %761 = vmatprep.subr.bf16.mxu0 %v815_v23 }
  0x41   : > { %762 = vmatpush3.bf16.msra.mxu0 %v815_v23 }
  0x42   : > { %763 = vmatprep.subr.bf16.mxu0 %v816_v24 }
  0x45   : > { %764 = vmatpush3.bf16.msra.mxu0 %v816_v24 }
  0x48   : > { %766 = vmatmul.mubr.bf16.vlgmr.msra.gmra.mxu0 %v818_v25 }
 0x108   : > { %v767_v26 = vpop.f32.mrf.mxu0 }
 0x109   : > { %v509_v30 = vadd.f32 %v767_v26, %v715_v27 }
 0x10a   : > { %v470_v28 = vpop.f32.mrf.mxu0 }
 0x10b   : > { %v507_v33 = vadd.f32 %v715_v27, %v470_v28 }
 0x10c   : > { %v768_v29 = vpop.f32.mrf.mxu0 }
 0x10d   : > { %v510_v31 = vadd.f32 %v768_v29, %v715_v27 }
 0x10e   : > { %v473_v32 = vpop.f32.mrf.mxu0 }
 0x10f   : > { %v736_v34 = vpack.c.bf16 %v510_v31, %v509_v30  ;;  %v508_v35 = vadd.f32 %v715_v27, %v473_v32  ;;  %537 = sbr.rel (!%p914_p6) target bundleno = 284 (0x11c), region = 85 }
 0x111   : > { %738 = vst [vmem:[%s328_s23 + $0x8] sm:$0xff] %v736_v34   ;;  %v731_v36 = vpack.c.bf16 %v508_v35, %v507_v33 }
 0x113   : > { %732 = vst [vmem:[%s328_s23] sm:$0xff] %v731_v36  }
 0x118   : > { %v563_v39 = vld [vmem:[%s328_s23 + $0x8] sm:$0xf]  ;;  %v565_v40 = vld [vmem:[%s328_s23 + $0xc] sm:$0xf] }
 0x119   : > { %564 = vst [vmem:[%s542_s26 + $0x10] sm:$0xf] %v563_v39  ;;  %566 = vst [vmem:[%s542_s26 + $0x18] sm:$0xf] %v565_v40 }
 0x11a   : > { %v559_v37 = vld [vmem:[%s328_s23] sm:$0xf]  ;;  %v561_v38 = vld [vmem:[%s328_s23 + $0x4] sm:$0xf] }
 0x11b   : > { %560 = vst [vmem:[%s542_s26] sm:$0xf] %v559_v37  ;;  %562 = vst [vmem:[%s542_s26 + $0x8] sm:$0xf] %v561_v38 }
 0x11c PF: > { %s13_s16 = sadd.s32 1, %s857_s16   ;;  %s989_s12 = smov %s845_s13 }
 0x11d   : > { %p10_p12 = scmp.ge.s32.totalorder %s13_s16, 4   ;;  %s990_s13 = smov %s919_s22 }
 0x11e   : > { %s991_s14 = smov %s853_s15  ;;  %s992_s15 = smov %s994_s17 }
 0x11f   :  { %12 = sbr.rel (!%p10_p12) target bundleno = 3 (0x3), region = 163 }

// kernel: resnet_forward.23
= control target key start
LH: loop header
LB: loop body
LE: loop exit
PB: predicated region body
PF: predicated region fallthrough
CT: control target
= control target key end

     0   :  { %s1652_s0 = inlined_call_operand.vmem [shape: bf16[32,2304], index: 0, kind: input, shape index: {}]   ;;  %s1653_s1 = inlined_call_operand.vmem [shape: bf16[2304,256], index: 1, kind: input, shape index: {}]   ;;  %s1654_s2 = inlined_call_operand.vmem [shape: f32[1,256], index: 2, kind: input, shape index: {}]   ;;  %s1655_s3 = inlined_call_operand.vmem [shape: bf16[32,256], index: 3, kind: input, shape index: {}]   ;;  %s1656_s4 = inlined_call_operand.vmem [shape: bf16[32,256], index: 4, kind: output, shape index: {}]  }
   0x1   :  { %1659 = sst [smem:[#allocation9_spill]] %s1652_s0 }
   0x2   :  { %1660 = sst [smem:[#allocation10_spill]] %s1653_s1 }
   0x3   :  { %1661 = sst [smem:[#allocation11_spill]] %s1655_s3 }
   0x4   :  { %s1362_s15 = smov 0   ;;  %s1364_s16 = smov 0  }
   0x5   :  { %s1366_s17 = smov 0   ;;  %s1368_s18 = smov 0  }
   0x6   :  { %s1370_s19 = smov 0   ;;  %s1372_s20 = smov 0  }
   0x7   :  { %s1374_s21 = smov 0   ;;  %s1376_s22 = smov 0  }
   0x8   :  { %s1378_s23 = smov 0   ;;  %s1380_s24 = smov 0  }
   0x9   :  { %s1382_s25 = smov 0  }
   0xa LB: > { %s1020_s26 = sadd.s32 4294967295, %s1335_s25   ;;  %s26_s27 = sadd.s32 1, %s1327_s23  ;;  %s1335_s25 = sphi %s1382_s25, %s14_s25   ;;  %s1331_s24 = sphi %s1380_s24, %s1682_s24   ;;  %s1327_s23 = sphi %s1378_s23, %s1681_s23   ;;  %s1323_s22 = sphi %s1376_s22, %s1680_s22   ;;  %s1319_s21 = sphi %s1374_s21, %s1679_s21   ;;  %s1315_s20 = sphi %s1372_s20, %s1678_s20   ;;  %s1311_s19 = sphi %s1370_s19, %s1677_s19   ;;  %s1307_s18 = sphi %s1368_s18, %s1676_s18   ;;  %s1303_s17 = sphi %s1366_s17, %s1675_s17   ;;  %s1299_s16 = sphi %s1364_s16, %s1674_s16   ;;  %s1295_s15 = sphi %s1362_s15, %s1673_s15  }
   0xb   : > { %p27_p0 = scmp.ge.s32.totalorder %s26_s27, 9  ;;  %s29_s28 = sadd.s32 1, %s1331_s24 }
   0xc   : > { %s42_s29 = sadd.s32 1, %s1315_s20  ;;  %p49_p1 = scmp.ne.s32.totalorder %s1315_s20, %s1311_s19 }
   0xd   : > { %s1684_s27 = smov (%p27_p0, %s26_s27), 0  ;;  %s1686_s28 = smov (!%p27_p0, %s29_s28), %s1331_s24 }
   0xe   : > { %1662 = sst [smem:[#allocation7_spill]] %s1684_s27  ;;  %s38_s30 = ssub.s32 %s1327_s23, %s1684_s27 }
   0xf   : > { %p50_p2 = scmp.eq.s32.totalorder %s1335_s25, 0  ;;  %p31_p3 = scmp.ge.s32.totalorder %s1686_s28, 2 }
  0x10   : > { %p40_p4 = scmp.eq.s32.totalorder %s38_s30, 0  ;;  %s70_s6 = sadd.s32 1, %s1307_s18 }
  0x11   : > { %p1431_p5 = por %p50_p2, %p49_p1  ;;  %s1688_s28 = smov (%p31_p3, %s1686_s28), 0 }
  0x12   : > { %1664 = sst [smem:[#allocation8_spill]] %s1688_s28  ;;  %s66_s8 = ssub.s32 %s1331_s24, %s1688_s28 }
  0x13   : > { %s1439_s7 = scalar_select %p40_p4, %s1315_s20, %s42_s29  }
  0x14   : > { %p77_p6 = scmp.ne.s32.totalorder %s1307_s18, %s1303_s17  ;;  %s67_s9 = sor.u32 %s66_s8, %s38_s30 }
  0x15   : > { %p122_p7 = scmp.eq.s32.totalorder %s66_s8, 0  ;;  %p68_p8 = scmp.eq.s32.totalorder %s67_s9, 0 }
  0x16   : > { %p1447_p9 = por %p77_p6, %p50_p2  ;;  %s124_s11 = sadd.s32 1, %s1299_s16 }
  0x17   : > { %p131_p10 = scmp.ne.s32.totalorder %s1299_s16, %s1295_s15  ;;  %p163_p12 = scmp.eq.s32.totalorder %s1020_s26, 17 }
  0x18   : > { %s1455_s12 = scalar_select %p68_p8, %s1307_s18, %s70_s6  }
  0x19   : > { %s1458_s13 = scalar_select %p122_p7, %s1299_s16, %s124_s11  }
  0x1a   : > { %p1462_p11 = por %p131_p10, %p50_p2  ;;  %p1466_p13 = por %p163_p12, %p131_p10 }
  0x1b   : > { %p1023_p0 = scmp.ge.s32.totalorder %s1335_s25, 18 }
  0x1d   : > { %185 = sbr.rel (%p1023_p0) target bundleno = 89 (0x59), region = 16 }
  0x22   : > { %188 = sbr.rel (!%p1431_p5) target bundleno = 46 (0x2e), region = 20  ;;  %s190_s30 = sand.u32 (%p1431_p5), 1, %s1315_s20  }
  0x23   : > { %s1069_s6 = sshll.u32 (%p1431_p5), %s1327_s23, 3  ;;  %s1024_s8 = sshll.u32 (%p1431_p5), %s190_s30, 5 }
  0x24   : > { %s1668_s0 = sld [smem:[#allocation9_spill]] (%p1431_p5)  ;;  %s192_s26 = scalar_lea.vmem (%p1431_p5), [#allocation3], %s1024_s8 }
  0x2a   : > { %s198_s28 = scalar_lea.vmem %s1668_s0, %s1069_s6 }
  0x2b   : > { %v233_v0 = vld [vmem:[%s198_s28] sm:$0xff]  ;;  %v235_v1 = vld [vmem:[%s198_s28 + $0x48] sm:$0xff]  ;;  %v237_v2 = vld [vmem:[%s198_s28 + $0x90] sm:$0xff] }
  0x2c   : > { %234 = vst [vmem:[%s192_s26] sm:$0xff] %v233_v0  ;;  %236 = vst [vmem:[%s192_s26 + $0x8] sm:$0xff] %v235_v1  ;;  %v239_v3 = vld [vmem:[%s198_s28 + $0xd8] sm:$0xff] }
  0x2d   : > { %238 = vst [vmem:[%s192_s26 + $0x10] sm:$0xff] %v237_v2  ;;  %240 = vst [vmem:[%s192_s26 + $0x18] sm:$0xff] %v239_v3 }
  0x2e PF: > { %246 = sbr.rel (!%p1447_p9) target bundleno = 77 (0x4d), region = 58  ;;  %s248_s5 = sand.u32 (%p1447_p9), 1, %s1307_s18  }
  0x2f   : > { %s1070_s30 = sshll.u32 (%p1447_p9), %s1327_s23, 6  ;;  %s1027_s9 = sshll.u32 (%p1447_p9), %s248_s5, 7 }
  0x30   : > { %s253_s6 = sadd.s32 (%p1447_p9), %s1331_s24, %s1070_s30  ;;  %s1669_s1 = sld [smem:[#allocation10_spill]] (%p1447_p9) }
  0x31   : > { %s1030_s11 = sshll.u32 (%p1447_p9), %s253_s6, 2  ;;  %s1491_s28 = scalar_lea.vmem (%p1447_p9), [#allocation4], %s1027_s9 }
  0x36   : > { %s1486_s8 = scalar_lea.vmem %s1669_s1, %s1030_s11 }
  0x37   : > { %v272_v4 = vld [vmem:[%s1486_s8] sm:$0xf]  ;;  %v274_v5 = vld [vmem:[%s1486_s8 + $0x8] sm:$0xf]  ;;  %v276_v6 = vld [vmem:[%s1486_s8 + $0x10] sm:$0xf] }
  0x38   : > { %273 = vst [vmem:[%s1491_s28] sm:$0xf] %v272_v4  ;;  %275 = vst [vmem:[%s1491_s28 + $0x4] sm:$0xf] %v274_v5  ;;  %v278_v7 = vld [vmem:[%s1486_s8 + $0x18] sm:$0xf] }
  0x39   : > { %277 = vst [vmem:[%s1491_s28 + $0x8] sm:$0xf] %v276_v6  ;;  %v280_v8 = vld [vmem:[%s1486_s8 + $0x20] sm:$0xf]  ;;  %v282_v9 = vld [vmem:[%s1486_s8 + $0x28] sm:$0xf] }
  0x3a   : > { %279 = vst [vmem:[%s1491_s28 + $0xc] sm:$0xf] %v278_v7  ;;  %281 = vst [vmem:[%s1491_s28 + $0x10] sm:$0xf] %v280_v8  ;;  %v284_v10 = vld [vmem:[%s1486_s8 + $0x30] sm:$0xf] }
  0x3b   : > { %283 = vst [vmem:[%s1491_s28 + $0x14] sm:$0xf] %v282_v9  ;;  %v286_v11 = vld [vmem:[%s1486_s8 + $0x38] sm:$0xf]  ;;  %v288_v12 = vld [vmem:[%s1486_s8 + $0x40] sm:$0xf] }
  0x3c   : > { %285 = vst [vmem:[%s1491_s28 + $0x18] sm:$0xf] %v284_v10  ;;  %287 = vst [vmem:[%s1491_s28 + $0x1c] sm:$0xf] %v286_v11  ;;  %v290_v13 = vld [vmem:[%s1486_s8 + $0x48] sm:$0xf] }
  0x3d   : > { %289 = vst [vmem:[%s1491_s28 + $0x20] sm:$0xf] %v288_v12  ;;  %v292_v14 = vld [vmem:[%s1486_s8 + $0x50] sm:$0xf]  ;;  %v294_v15 = vld [vmem:[%s1486_s8 + $0x58] sm:$0xf] }
  0x3e   : > { %291 = vst [vmem:[%s1491_s28 + $0x24] sm:$0xf] %v290_v13  ;;  %293 = vst [vmem:[%s1491_s28 + $0x28] sm:$0xf] %v292_v14  ;;  %v296_v16 = vld [vmem:[%s1486_s8 + $0x60] sm:$0xf] }
  0x3f   : > { %295 = vst [vmem:[%s1491_s28 + $0x2c] sm:$0xf] %v294_v15  ;;  %v298_v17 = vld [vmem:[%s1486_s8 + $0x68] sm:$0xf]  ;;  %v300_v18 = vld [vmem:[%s1486_s8 + $0x70] sm:$0xf] }
  0x40   : > { %297 = vst [vmem:[%s1491_s28 + $0x30] sm:$0xf] %v296_v16  ;;  %299 = vst [vmem:[%s1491_s28 + $0x34] sm:$0xf] %v298_v17  ;;  %v302_v19 = vld [vmem:[%s1486_s8 + $0x78] sm:$0xf] }
  0x41   : > { %301 = vst [vmem:[%s1491_s28 + $0x38] sm:$0xf] %v300_v18  ;;  %v304_v20 = vld [vmem:[%s1486_s8 + $0x80] sm:$0xf]  ;;  %v306_v21 = vld [vmem:[%s1486_s8 + $0x88] sm:$0xf] }
  0x42   : > { %303 = vst [vmem:[%s1491_s28 + $0x3c] sm:$0xf] %v302_v19  ;;  %305 = vst [vmem:[%s1491_s28 + $0x40] sm:$0xf] %v304_v20  ;;  %v308_v22 = vld [vmem:[%s1486_s8 + $0x90] sm:$0xf] }
  0x43   : > { %307 = vst [vmem:[%s1491_s28 + $0x44] sm:$0xf] %v306_v21  ;;  %v310_v23 = vld [vmem:[%s1486_s8 + $0x98] sm:$0xf]  ;;  %v312_v24 = vld [vmem:[%s1486_s8 + $0xa0] sm:$0xf] }
  0x44   : > { %309 = vst [vmem:[%s1491_s28 + $0x48] sm:$0xf] %v308_v22  ;;  %311 = vst [vmem:[%s1491_s28 + $0x4c] sm:$0xf] %v310_v23  ;;  %v314_v25 = vld [vmem:[%s1486_s8 + $0xa8] sm:$0xf] }
  0x45   : > { %313 = vst [vmem:[%s1491_s28 + $0x50] sm:$0xf] %v312_v24  ;;  %v316_v26 = vld [vmem:[%s1486_s8 + $0xb0] sm:$0xf]  ;;  %v318_v27 = vld [vmem:[%s1486_s8 + $0xb8] sm:$0xf] }
  0x46   : > { %315 = vst [vmem:[%s1491_s28 + $0x54] sm:$0xf] %v314_v25  ;;  %317 = vst [vmem:[%s1491_s28 + $0x58] sm:$0xf] %v316_v26  ;;  %v320_v28 = vld [vmem:[%s1486_s8 + $0xc0] sm:$0xf] }
  0x47   : > { %319 = vst [vmem:[%s1491_s28 + $0x5c] sm:$0xf] %v318_v27  ;;  %v322_v29 = vld [vmem:[%s1486_s8 + $0xc8] sm:$0xf]  ;;  %v324_v30 = vld [vmem:[%s1486_s8 + $0xd0] sm:$0xf] }
  0x48   : > { %321 = vst [vmem:[%s1491_s28 + $0x60] sm:$0xf] %v320_v28  ;;  %323 = vst [vmem:[%s1491_s28 + $0x64] sm:$0xf] %v322_v29  ;;  %v326_v31 = vld [vmem:[%s1486_s8 + $0xd8] sm:$0xf] }
  0x49   : > { %325 = vst [vmem:[%s1491_s28 + $0x68] sm:$0xf] %v324_v30  ;;  %v328_v32 = vld [vmem:[%s1486_s8 + $0xe0] sm:$0xf]  ;;  %v330_v33 = vld [vmem:[%s1486_s8 + $0xe8] sm:$0xf] }
  0x4a   : > { %327 = vst [vmem:[%s1491_s28 + $0x6c] sm:$0xf] %v326_v31  ;;  %329 = vst [vmem:[%s1491_s28 + $0x70] sm:$0xf] %v328_v32  ;;  %v332_v34 = vld [vmem:[%s1486_s8 + $0xf0] sm:$0xf] }
  0x4b   : > { %331 = vst [vmem:[%s1491_s28 + $0x74] sm:$0xf] %v330_v33  ;;  %v334_v35 = vld [vmem:[%s1486_s8 + $0xf8] sm:$0xf]  ;;  %333 = vst [vmem:[%s1491_s28 + $0x78] sm:$0xf] %v332_v34 }
  0x4c   : > { %335 = vst [vmem:[%s1491_s28 + $0x7c] sm:$0xf] %v334_v35 }
  0x4d PF: > { %429 = sbr.rel (!%p1462_p11) target bundleno = 89 (0x59), region = 103  ;;  %s431_s0 = sand.u32 (%p1462_p11), 1, %s1299_s16  }
  0x4e   : > { %s1032_s27 = sshll.u32 (%p1462_p11), %s1331_s24, 2  ;;  %s1031_s10 = sshll.u32 (%p1462_p11), %s431_s0, 4 }
  0x4f   : > { %s1670_s3 = sld [smem:[#allocation11_spill]] (%p1462_p11)  ;;  %s433_s9 = scalar_lea.vmem (%p1462_p11), [#allocation5], %s1031_s10 }
  0x55   : > { %s438_s30 = scalar_lea.vmem %s1670_s3, %s1032_s27 }
  0x56   : > { %v455_v36 = vld [vmem:[%s438_s30] sm:$0xf]  ;;  %v457_v37 = vld [vmem:[%s438_s30 + $0x8] sm:$0xf]  ;;  %v459_v38 = vld [vmem:[%s438_s30 + $0x10] sm:$0xf] }
  0x57   : > { %456 = vst [vmem:[%s433_s9] sm:$0xf] %v455_v36  ;;  %458 = vst [vmem:[%s433_s9 + $0x4] sm:$0xf] %v457_v37  ;;  %v461_v39 = vld [vmem:[%s438_s30 + $0x18] sm:$0xf] }
  0x58   : > { %460 = vst [vmem:[%s433_s9 + $0x8] sm:$0xf] %v459_v38  ;;  %462 = vst [vmem:[%s433_s9 + $0xc] sm:$0xf] %v461_v39 }
  0x59 PF: > { %p1033_p1 = scmp.ge.s32.totalorder %s1335_s25, 1  ;;  %p493_p2 = scmp.lt.s32.totalorder %s1335_s25, 19 }
  0x5b   : > { %p494_p3 = pnand %p1033_p1, %p493_p2 }
  0x5c   : > { %s500_s14 = sand.u32 (!%p494_p3), 1, %s1311_s19   ;;  %s507_s6 = sand.u32 (!%p494_p3), 1, %s1303_s17  }
  0x5d   : > { %497 = sbr.rel (%p494_p3) target bundleno = 371 (0x173), region = 144  ;;  %s1034_s11 = sshll.u32 (!%p494_p3), %s500_s14, 5 }
  0x5e   : > { %s1035_s8 = sshll.u32 (!%p494_p3), %s507_s6, 7  ;;  %s514_s28 = sand.u32 (!%p494_p3), 1, %s1295_s15  }
  0x5f   : > { %p552_p4 = scmp.lt.s32.totalorder (!%p494_p3), %s1323_s22, 1  ;;  %s1036_s0 = sshll.u32 (!%p494_p3), %s514_s28, 4 }
  0x60   : > { %s1574_s30 = scalar_lea.vmem (!%p494_p3), [#allocation3], %s1034_s11  ;;  %s1576_s9 = scalar_lea.vmem (!%p494_p3), [#allocation4], %s1035_s8 }
  0x61   : > { %s516_s1 = scalar_lea.vmem (!%p494_p3), [#allocation5], %s1036_s0  ;;  %s1578_s3 = scalar_lea.vmem (!%p494_p3), [#allocation6], %s1036_s0 }
  0x62   : > { %s1568_s27 = scalar_select %p552_p4, %s1323_s22, 1 }
  0x63   : > { %p1038_p5 = scmp.ne.s32.totalorder %s1319_s21, 0 }
  0x64   : > { %s554_s5 = scalar_lea.vmem %s1654_s2, %s1568_s27 }
  0x65   : > { %561 = sbr.rel (%p1038_p5) target bundleno = 111 (0x6f), region = 160 }
  0x6a   : > { %v1076_v40 = vld [vmem:[%s516_s1] sm:$0xff]   ;;  %v1093_v41 = vld [vmem:[%s516_s1 + $0x8] sm:$0xff]  }
  0x6b   : > { %v1077_v42 = vunpack.c.l.bf16 %v1076_v40  ;;  %v1078_v43 = vunpack.c.h.bf16 %v1076_v40  ;;  %v1081_v44 = vunpack.c.l.bf16 %v1093_v41  ;;  %v1082_v45 = vunpack.c.h.bf16 %v1093_v41 }
  0x6d   : > { %570 = vst [vmem:[#allocation2 + $0x10] sm:$0xff] %v1077_v42  ;;  %571 = vst [vmem:[#allocation2] sm:$0xff] %v1078_v43 }
  0x6e   : > { %572 = vst [vmem:[#allocation2 + $0x18] sm:$0xff] %v1081_v44  ;;  %573 = vst [vmem:[#allocation2 + $0x8] sm:$0xff] %v1082_v45 }
  0x6f PF: > { %v1227_v46 = vld [vmem:[%s1576_s9 + $0x78] sm:$0xff]   ;;  %v1229_v48 = vld [vmem:[%s1576_s9 + $0x70] sm:$0xff]   ;;  %v1231_v50 = vld [vmem:[%s1576_s9 + $0x68] sm:$0xff]   ;;  %p1059_p6 = scmp.ne.s32.totalorder %s1319_s21, 8 }
  0x70   : > { %v1228_v47 = vld [vmem:[%s1576_s9 + $0x38] sm:$0xff]   ;;  %1095 = vmatprep.subr.bf16.mxu0 %v1227_v46  ;;  %1123 = vmatprep.subr.bf16.mxu1 %v1227_v46  ;;  %v1230_v49 = vld [vmem:[%s1576_s9 + $0x30] sm:$0xff]   ;;  %v1232_v51 = vld [vmem:[%s1576_s9 + $0x28] sm:$0xff]  }
  0x71   : > { %1096 = vmatpush3.bf16.msra.mxu0 %v1228_v47  ;;  %1131 = vmatpush3.bf16.msra.mxu1 %v1228_v47  ;;  %v1233_v52 = vld [vmem:[%s1576_s9 + $0x60] sm:$0xff]   ;;  %v1235_v54 = vld [vmem:[%s1576_s9 + $0x58] sm:$0xff]   ;;  %v1237_v56 = vld [vmem:[%s1576_s9 + $0x50] sm:$0xff]  }
  0x72   : > { %1097 = vmatprep.subr.bf16.mxu0 %v1229_v48  ;;  %1124 = vmatprep.subr.bf16.mxu1 %v1229_v48  ;;  %v1234_v53 = vld [vmem:[%s1576_s9 + $0x20] sm:$0xff]   ;;  %v1236_v55 = vld [vmem:[%s1576_s9 + $0x18] sm:$0xff]   ;;  %v1238_v59 = vld [vmem:[%s1576_s9 + $0x10] sm:$0xff]  }
  0x73   : > { %v1245_v57 = vld [vmem:[%s1574_s30 + $0x4] ss:$8 sps:$4 sm:$0xff]   ;;  %v1248_v58 = vld [vmem:[%s1574_s30 + $0x14] ss:$8 sps:$4 sm:$0xff]   ;;  %v1243_v0 = vld [vmem:[%s1574_s30] ss:$8 sps:$4 sm:$0xff]  }
  0x74   : > { %v1239_v60 = vld [vmem:[%s1576_s9 + $0x48] sm:$0xff]   ;;  %762 = vmatprep.mubr.bf16.mxu0 %v1245_v57  ;;  %770 = vmatprep.mubr.bf16.mxu1 %v1248_v58  ;;  %v1241_v62 = vld [vmem:[%s1576_s9 + $0x40] sm:$0xff]   ;;  %v1246_v1 = vld [vmem:[%s1574_s30 + $0x10] ss:$8 sps:$4 sm:$0xff]  }
  0x75   : > { %1098 = vmatpush3.bf16.msra.mxu0 %v1230_v49  ;;  %1132 = vmatpush3.bf16.msra.mxu1 %v1230_v49  ;;  %v1240_v61 = vld [vmem:[%s1576_s9 + $0x8] sm:$0xff]   ;;  %v1242_v63 = vld [vmem:[%s1576_s9] sm:$0xff]   ;;  %v574_v4 = vld [vmem:[#allocation2 + $0x10] sm:$0xff] }
  0x76   : > { %1099 = vmatprep.subr.bf16.mxu0 %v1231_v50  ;;  %1125 = vmatprep.subr.bf16.mxu1 %v1231_v50  ;;  %v576_v6 = vld [vmem:[#allocation2 + $0x18] sm:$0xff]  ;;  %v575_v14 = vld [vmem:[#allocation2] sm:$0xff]  ;;  %v577_v16 = vld [vmem:[#allocation2 + $0x8] sm:$0xff] }
  0x79   : > { %1100 = vmatpush3.bf16.msra.mxu0 %v1232_v51  ;;  %1133 = vmatpush3.bf16.msra.mxu1 %v1232_v51 }
  0x7a   : > { %1101 = vmatprep.subr.bf16.mxu0 %v1233_v52  ;;  %1126 = vmatprep.subr.bf16.mxu1 %v1233_v52 }
  0x7d   : > { %1102 = vmatpush3.bf16.msra.mxu0 %v1234_v53  ;;  %1134 = vmatpush3.bf16.msra.mxu1 %v1234_v53 }
  0x7e   : > { %1103 = vmatprep.subr.bf16.mxu0 %v1235_v54  ;;  %1127 = vmatprep.subr.bf16.mxu1 %v1235_v54 }
  0x81   : > { %1104 = vmatpush3.bf16.msra.mxu0 %v1236_v55  ;;  %1135 = vmatpush3.bf16.msra.mxu1 %v1236_v55 }
  0x82   : > { %1105 = vmatprep.subr.bf16.mxu0 %v1237_v56  ;;  %1128 = vmatprep.subr.bf16.mxu1 %v1237_v56 }
  0x85   : > { %1106 = vmatpush3.bf16.msra.mxu0 %v1238_v59  ;;  %1136 = vmatpush3.bf16.msra.mxu1 %v1238_v59 }
  0x86   : > { %1107 = vmatprep.subr.bf16.mxu0 %v1239_v60  ;;  %1129 = vmatprep.subr.bf16.mxu1 %v1239_v60 }
  0x89   : > { %1108 = vmatpush3.bf16.msra.mxu0 %v1240_v61  ;;  %1137 = vmatpush3.bf16.msra.mxu1 %v1240_v61 }
  0x8a   : > { %1109 = vmatprep.subr.bf16.mxu0 %v1241_v62  ;;  %1130 = vmatprep.subr.bf16.mxu1 %v1241_v62 }
  0x8d   : > { %1110 = vmatpush3.bf16.msra.mxu0 %v1242_v63  ;;  %1138 = vmatpush3.bf16.msra.mxu1 %v1242_v63 }
  0x90   : > { %763 = vmatmul.mubr.bf16.vlgmr.msra.gmra.mxu0 %v1243_v0  ;;  %771 = vmatmul.mubr.bf16.vlgmr.msra.gmra.mxu1 %v1246_v1 }
 0x150   : > { %v1111_v2 = vpop.f32.mrf.mxu0  ;;  %v1117_v3 = vpop.f32.mrf.mxu1 }
 0x152   : > { %v1112_v5 = vpop.f32.mrf.mxu0  ;;  %v1118_v7 = vpop.f32.mrf.mxu1 }
 0x153   : > { %v1113_v8 = vadd.f32 %v1112_v5, %v1111_v2  ;;  %v1119_v9 = vadd.f32 %v1118_v7, %v1117_v3 }
 0x154   : > { %v1114_v10 = vpop.f32.mrf.mxu0  ;;  %v1120_v11 = vpop.f32.mrf.mxu1 }
 0x155   : > { %v779_v12 = vadd.f32 %v1113_v8, %v574_v4  ;;  %v781_v13 = vadd.f32 %v1119_v9, %v576_v6 }
 0x156   : > { %v1115_v15 = vpop.f32.mrf.mxu0  ;;  %v1121_v17 = vpop.f32.mrf.mxu1 }
 0x157   : > { %783 = vst [vmem:[#allocation2 + $0x10] sm:$0xff] %v779_v12  ;;  %785 = vst [vmem:[#allocation2 + $0x18] sm:$0xff] %v781_v13  ;;  %v1116_v18 = vadd.f32 %v1115_v15, %v1114_v10  ;;  %v1122_v19 = vadd.f32 %v1121_v17, %v1120_v11  ;;  %790 = sbr.rel (%p1059_p6) target bundleno = 362 (0x16a), region = 164 }
 0x159   : > { %v780_v20 = vadd.f32 %v1116_v18, %v575_v14  ;;  %v782_v21 = vadd.f32 %v1122_v19, %v577_v16 }
 0x15b   : > { %784 = vst [vmem:[#allocation2] sm:$0xff] %v780_v20  ;;  %786 = vst [vmem:[#allocation2 + $0x8] sm:$0xff] %v782_v21 }
 0x15c   : > { %v1060_v24 = vld [vmem:[%s554_s5] ss:$0 sm:$0xff] }
 0x15e   : > { %v791_v22 = vld [vmem:[#allocation2 + $0x10] sm:$0xff]  ;;  %v793_v27 = vld [vmem:[#allocation2 + $0x18] sm:$0xff] }
 0x15f   : > { %v802_v25 = vadd.f32 %v1060_v24, %v791_v22  ;;  %v804_v29 = vadd.f32 %v1060_v24, %v793_v27 }
 0x161   : > { %v806_v31 = vmax.f32 %v802_v25, 0.0  ;;  %v808_v33 = vmax.f32 %v804_v29, 0.0 }
 0x162   : > { %v792_v23 = vld [vmem:[#allocation2] sm:$0xff]  ;;  %v794_v28 = vld [vmem:[#allocation2 + $0x8] sm:$0xff] }
 0x163   : > { %v803_v26 = vadd.f32 %v1060_v24, %v792_v23  ;;  %v805_v30 = vadd.f32 %v1060_v24, %v794_v28 }
 0x165   : > { %v807_v32 = vmax.f32 %v803_v26, 0.0  ;;  %v809_v34 = vmax.f32 %v805_v30, 0.0 }
 0x167   : > { %v1086_v35 = vpack.c.bf16 %v807_v32, %v806_v31  ;;  %v1091_v36 = vpack.c.bf16 %v809_v34, %v808_v33 }
 0x169   : > { %1087 = vst [vmem:[%s1578_s3] sm:$0xff] %v1086_v35   ;;  %1094 = vst [vmem:[%s1578_s3 + $0x8] sm:$0xff] %v1091_v36  }
 0x16a PF: > { %836 = sbr.rel (!%p1466_p13) target bundleno = 371 (0x173), region = 168  ;;  %s1066_s17 = sshll.u32 (%p1466_p13), %s1323_s22, 2 }
 0x16b   : > { %s841_s14 = scalar_lea.vmem (%p1466_p13), %s1656_s4, %s1066_s17 }
 0x170   : > { %v858_v37 = vld [vmem:[%s1578_s3] sm:$0xf]  ;;  %v860_v38 = vld [vmem:[%s1578_s3 + $0x4] sm:$0xf]  ;;  %v862_v39 = vld [vmem:[%s1578_s3 + $0x8] sm:$0xf] }
 0x171   : > { %v864_v40 = vld [vmem:[%s1578_s3 + $0xc] sm:$0xf]  ;;  %859 = vst [vmem:[%s841_s14] sm:$0xf] %v858_v37  ;;  %861 = vst [vmem:[%s841_s14 + $0x8] sm:$0xf] %v860_v38 }
 0x172   : > { %863 = vst [vmem:[%s841_s14 + $0x10] sm:$0xf] %v862_v39  ;;  %865 = vst [vmem:[%s841_s14 + $0x18] sm:$0xf] %v864_v40 }
 0x173 PF: > { %s14_s25 = sadd.s32 1, %s1335_s25   ;;  %s1671_s29 = sld [smem:[#allocation7_spill]] }
 0x174   : > { %p11_p7 = scmp.ge.s32.totalorder %s14_s25, 20   ;;  %s1672_s6 = sld [smem:[#allocation8_spill]] }
 0x175   : > { %s1673_s15 = smov %s1299_s16  ;;  %s1674_s16 = smov %s1458_s13 }
 0x176   : > { %s1675_s17 = smov %s1307_s18  ;;  %s1676_s18 = smov %s1455_s12 }
 0x177   : > { %s1677_s19 = smov %s1315_s20  ;;  %s1678_s20 = smov %s1439_s7 }
 0x178   : > { %s1679_s21 = smov %s1327_s23  ;;  %s1680_s22 = smov %s1331_s24 }
 0x179   : > { %s1681_s23 = smov %s1671_s29  ;;  %13 = sbr.rel (!%p11_p7) target bundleno = 10 (0xa), region = 259 }
 0x17a   : > { %s1682_s24 = smov %s1672_s6 }

// kernel: resnet_forward.25
= control target key start
LH: loop header
LB: loop body
LE: loop exit
PB: predicated region body
PF: predicated region fallthrough
CT: control target
= control target key end

     0   :  { %s1221_s12 = smov 0   ;;  %s1223_s13 = smov 0   ;;  %s1508_s0 = inlined_call_operand.vmem [shape: bf16[16,2304], index: 0, kind: input, shape index: {}]   ;;  %s1509_s1 = inlined_call_operand.vmem [shape: bf16[2304,512], index: 1, kind: input, shape index: {}]   ;;  %s1510_s2 = inlined_call_operand.vmem [shape: f32[1,512], index: 2, kind: input, shape index: {}]   ;;  %s1511_s3 = inlined_call_operand.vmem [shape: bf16[16,512], index: 3, kind: output, shape index: {}]  }
   0x1   :  { %s1225_s14 = smov 0   ;;  %s1227_s15 = smov 0  }
   0x2   :  { %s1229_s16 = smov 0   ;;  %s1231_s17 = smov 0  }
   0x3   :  { %s1233_s18 = smov 0   ;;  %s1235_s19 = smov 0  }
   0x4   :  { %s1237_s20 = smov 0   ;;  %s1239_s21 = smov 0  }
   0x5   :  { %s1241_s22 = smov 0  }
   0x6 LB: > { %s907_s23 = sadd.s32 4294967295, %s1198_s22   ;;  %s25_s24 = sadd.s32 1, %s1190_s20  ;;  %s1198_s22 = sphi %s1241_s22, %s13_s22   ;;  %s1194_s21 = sphi %s1239_s21, %s1532_s21   ;;  %s1190_s20 = sphi %s1237_s20, %s1531_s20   ;;  %s1186_s19 = sphi %s1235_s19, %s1530_s19   ;;  %s1182_s18 = sphi %s1233_s18, %s1529_s18   ;;  %s1178_s17 = sphi %s1231_s17, %s1528_s17   ;;  %s1174_s16 = sphi %s1229_s16, %s1527_s16   ;;  %s1170_s15 = sphi %s1227_s15, %s1526_s15   ;;  %s1166_s14 = sphi %s1225_s14, %s1525_s14   ;;  %s1162_s13 = sphi %s1223_s13, %s1524_s13   ;;  %s1158_s12 = sphi %s1221_s12, %s1523_s12  }
   0x7   : > { %p26_p0 = scmp.ge.s32.totalorder %s25_s24, 9  ;;  %s28_s25 = sadd.s32 1, %s1194_s21 }
   0x8   : > { %s41_s26 = sadd.s32 1, %s1178_s17  ;;  %p48_p1 = scmp.ne.s32.totalorder %s1178_s17, %s1174_s16 }
   0x9   : > { %s1534_s24 = smov (%p26_p0, %s25_s24), 0  ;;  %s1536_s25 = smov (!%p26_p0, %s28_s25), %s1194_s21 }
   0xa   : > { %1514 = sst [smem:[#allocation6_spill]] %s1534_s24  ;;  %s37_s27 = ssub.s32 %s1190_s20, %s1534_s24 }
   0xb   : > { %p49_p2 = scmp.eq.s32.totalorder %s1198_s22, 0  ;;  %p30_p3 = scmp.ge.s32.totalorder %s1536_s25, 2 }
   0xc   : > { %p39_p4 = scmp.eq.s32.totalorder %s37_s27, 0  ;;  %s69_s29 = sadd.s32 1, %s1170_s15 }
   0xd   : > { %p1288_p5 = por %p49_p2, %p48_p1  ;;  %s1538_s25 = smov (%p30_p3, %s1536_s25), 0 }
   0xe   : > { %1516 = sst [smem:[#allocation7_spill]] %s1538_s25  ;;  %s65_s4 = ssub.s32 %s1194_s21, %s1538_s25 }
   0xf   : > { %s1296_s30 = scalar_select %p39_p4, %s1178_s17, %s41_s26  }
  0x10   : > { %p76_p6 = scmp.ne.s32.totalorder %s1170_s15, %s1166_s14  ;;  %s66_s5 = sor.u32 %s65_s4, %s37_s27 }
  0x11   : > { %1517 = sst [smem:[#allocation8_spill]] %s1296_s30  ;;  %p121_p7 = scmp.eq.s32.totalorder %s65_s4, 0 }
  0x12   : > { %p67_p8 = scmp.eq.s32.totalorder %s66_s5, 0  ;;  %p1302_p9 = por %p76_p6, %p49_p2 }
  0x13   : > { %s123_s7 = sadd.s32 1, %s1162_s13  ;;  %p133_p10 = scmp.ne.s32.totalorder %s1162_s13, %s1158_s12 }
  0x14   : > { %s1310_s8 = scalar_select %p67_p8, %s1170_s15, %s69_s29  }
  0x15   : > { %s1313_s9 = scalar_select %p121_p7, %s1162_s13, %s123_s7  }
  0x16   : > { %p134_p11 = scmp.eq.s32.totalorder %s907_s23, 17  ;;  %p910_p13 = scmp.ge.s32.totalorder %s1198_s22, 18 }
  0x18   : > { %p1315_p12 = por %p134_p11, %p133_p10  ;;  %156 = sbr.rel (%p910_p13) target bundleno = 57 (0x39), region = 16 }
  0x1d   : > { %159 = sbr.rel (!%p1288_p5) target bundleno = 34 (0x22), region = 20  ;;  %s161_s11 = sand.u32 (%p1288_p5), 1, %s1178_s17  }
  0x1e   : > { %s967_s26 = sshll.u32 (%p1288_p5), %s1190_s20, 3  ;;  %s911_s27 = sshll.u32 (%p1288_p5), %s161_s11, 4 }
  0x1f   : > { %s169_s5 = scalar_lea.vmem (%p1288_p5), %s1508_s0, %s967_s26  ;;  %s163_s23 = scalar_lea.vmem (%p1288_p5), [#allocation3], %s911_s27 }
  0x20   : > { %v200_v0 = vld [vmem:[%s169_s5] sm:$0xff] (%p1288_p5)  ;;  %v202_v1 = vld [vmem:[%s169_s5 + $0x48] sm:$0xff] (%p1288_p5) }
  0x21   : > { %201 = vst [vmem:[%s163_s23] sm:$0xff] (%p1288_p5), %v200_v0  ;;  %203 = vst [vmem:[%s163_s23 + $0x8] sm:$0xff] (%p1288_p5), %v202_v1 }
  0x22 PF: > { %209 = sbr.rel (!%p1302_p9) target bundleno = 57 (0x39), region = 58  ;;  %s211_s28 = sand.u32 (%p1302_p9), 1, %s1170_s15  }
  0x23   : > { %s916_s7 = sshll.u32 (%p1302_p9), %s1194_s21, 1  ;;  %s914_s25 = sshll.u32 (%p1302_p9), %s211_s28, 8 }
  0x24   : > { %s968_s11 = sshll.u32 (%p1302_p9), %s1190_s20, 7  ;;  %s1340_s6 = scalar_lea.vmem (%p1302_p9), [#allocation4], %s914_s25 }
  0x25   : > { %s217_s24 = sadd.s32 (%p1302_p9), %s968_s11, %s916_s7 }
  0x26   : > { %s918_s30 = sshll.u32 (%p1302_p9), %s217_s24, 2 }
  0x27   : > { %s1335_s4 = scalar_lea.vmem %s1509_s1, %s918_s30 }
  0x28   : > { %v310_v2 = vld [vmem:[%s1335_s4] sm:$0xff]  ;;  %v312_v3 = vld [vmem:[%s1335_s4 + $0x10] sm:$0xff] }
  0x29   : > { %v314_v4 = vld [vmem:[%s1335_s4 + $0x20] sm:$0xff]  ;;  %311 = vst [vmem:[%s1340_s6] sm:$0xff] %v310_v2  ;;  %313 = vst [vmem:[%s1340_s6 + $0x8] sm:$0xff] %v312_v3  ;;  %v316_v5 = vld [vmem:[%s1335_s4 + $0x30] sm:$0xff] }
  0x2a   : > { %315 = vst [vmem:[%s1340_s6 + $0x10] sm:$0xff] %v314_v4  ;;  %v318_v6 = vld [vmem:[%s1335_s4 + $0x40] sm:$0xff]  ;;  %v320_v7 = vld [vmem:[%s1335_s4 + $0x50] sm:$0xff]  ;;  %317 = vst [vmem:[%s1340_s6 + $0x18] sm:$0xff] %v316_v5 }
  0x2b   : > { %319 = vst [vmem:[%s1340_s6 + $0x20] sm:$0xff] %v318_v6  ;;  %321 = vst [vmem:[%s1340_s6 + $0x28] sm:$0xff] %v320_v7  ;;  %v322_v8 = vld [vmem:[%s1335_s4 + $0x60] sm:$0xff]  ;;  %v324_v9 = vld [vmem:[%s1335_s4 + $0x70] sm:$0xff] }
  0x2c   : > { %v326_v10 = vld [vmem:[%s1335_s4 + $0x80] sm:$0xff]  ;;  %323 = vst [vmem:[%s1340_s6 + $0x30] sm:$0xff] %v322_v8  ;;  %325 = vst [vmem:[%s1340_s6 + $0x38] sm:$0xff] %v324_v9  ;;  %v328_v11 = vld [vmem:[%s1335_s4 + $0x90] sm:$0xff] }
  0x2d   : > { %327 = vst [vmem:[%s1340_s6 + $0x40] sm:$0xff] %v326_v10  ;;  %v330_v12 = vld [vmem:[%s1335_s4 + $0xa0] sm:$0xff]  ;;  %v332_v13 = vld [vmem:[%s1335_s4 + $0xb0] sm:$0xff]  ;;  %329 = vst [vmem:[%s1340_s6 + $0x48] sm:$0xff] %v328_v11 }
  0x2e   : > { %331 = vst [vmem:[%s1340_s6 + $0x50] sm:$0xff] %v330_v12  ;;  %333 = vst [vmem:[%s1340_s6 + $0x58] sm:$0xff] %v332_v13  ;;  %v334_v14 = vld [vmem:[%s1335_s4 + $0xc0] sm:$0xff]  ;;  %v336_v15 = vld [vmem:[%s1335_s4 + $0xd0] sm:$0xff] }
  0x2f   : > { %v338_v16 = vld [vmem:[%s1335_s4 + $0xe0] sm:$0xff]  ;;  %335 = vst [vmem:[%s1340_s6 + $0x60] sm:$0xff] %v334_v14  ;;  %337 = vst [vmem:[%s1340_s6 + $0x68] sm:$0xff] %v336_v15  ;;  %v340_v17 = vld [vmem:[%s1335_s4 + $0xf0] sm:$0xff] }
  0x30   : > { %339 = vst [vmem:[%s1340_s6 + $0x70] sm:$0xff] %v338_v16  ;;  %v342_v18 = vld [vmem:[%s1335_s4 + $0x100] sm:$0xff]  ;;  %v344_v19 = vld [vmem:[%s1335_s4 + $0x110] sm:$0xff]  ;;  %341 = vst [vmem:[%s1340_s6 + $0x78] sm:$0xff] %v340_v17 }
  0x31   : > { %343 = vst [vmem:[%s1340_s6 + $0x80] sm:$0xff] %v342_v18  ;;  %345 = vst [vmem:[%s1340_s6 + $0x88] sm:$0xff] %v344_v19  ;;  %v346_v20 = vld [vmem:[%s1335_s4 + $0x120] sm:$0xff]  ;;  %v348_v21 = vld [vmem:[%s1335_s4 + $0x130] sm:$0xff] }
  0x32   : > { %v350_v22 = vld [vmem:[%s1335_s4 + $0x140] sm:$0xff]  ;;  %347 = vst [vmem:[%s1340_s6 + $0x90] sm:$0xff] %v346_v20  ;;  %349 = vst [vmem:[%s1340_s6 + $0x98] sm:$0xff] %v348_v21  ;;  %v352_v23 = vld [vmem:[%s1335_s4 + $0x150] sm:$0xff] }
  0x33   : > { %351 = vst [vmem:[%s1340_s6 + $0xa0] sm:$0xff] %v350_v22  ;;  %v354_v24 = vld [vmem:[%s1335_s4 + $0x160] sm:$0xff]  ;;  %v356_v25 = vld [vmem:[%s1335_s4 + $0x170] sm:$0xff]  ;;  %353 = vst [vmem:[%s1340_s6 + $0xa8] sm:$0xff] %v352_v23 }
  0x34   : > { %355 = vst [vmem:[%s1340_s6 + $0xb0] sm:$0xff] %v354_v24  ;;  %357 = vst [vmem:[%s1340_s6 + $0xb8] sm:$0xff] %v356_v25  ;;  %v358_v26 = vld [vmem:[%s1335_s4 + $0x180] sm:$0xff]  ;;  %v360_v27 = vld [vmem:[%s1335_s4 + $0x190] sm:$0xff] }
  0x35   : > { %v362_v28 = vld [vmem:[%s1335_s4 + $0x1a0] sm:$0xff]  ;;  %359 = vst [vmem:[%s1340_s6 + $0xc0] sm:$0xff] %v358_v26  ;;  %361 = vst [vmem:[%s1340_s6 + $0xc8] sm:$0xff] %v360_v27  ;;  %v364_v29 = vld [vmem:[%s1335_s4 + $0x1b0] sm:$0xff] }
  0x36   : > { %363 = vst [vmem:[%s1340_s6 + $0xd0] sm:$0xff] %v362_v28  ;;  %v366_v30 = vld [vmem:[%s1335_s4 + $0x1c0] sm:$0xff]  ;;  %v368_v31 = vld [vmem:[%s1335_s4 + $0x1d0] sm:$0xff]  ;;  %365 = vst [vmem:[%s1340_s6 + $0xd8] sm:$0xff] %v364_v29 }
  0x37   : > { %367 = vst [vmem:[%s1340_s6 + $0xe0] sm:$0xff] %v366_v30  ;;  %369 = vst [vmem:[%s1340_s6 + $0xe8] sm:$0xff] %v368_v31  ;;  %v370_v32 = vld [vmem:[%s1335_s4 + $0x1e0] sm:$0xff]  ;;  %v372_v33 = vld [vmem:[%s1335_s4 + $0x1f0] sm:$0xff] }
  0x38   : > { %371 = vst [vmem:[%s1340_s6 + $0xf0] sm:$0xff] %v370_v32  ;;  %373 = vst [vmem:[%s1340_s6 + $0xf8] sm:$0xff] %v372_v33 }
  0x39 PF: > { %p919_p0 = scmp.ge.s32.totalorder %s1198_s22, 1  ;;  %p386_p1 = scmp.lt.s32.totalorder %s1198_s22, 19 }
  0x3b   : > { %p387_p2 = pnand %p919_p0, %p386_p1 }
  0x3c   : > { %s393_s24 = sand.u32 (!%p387_p2), 1, %s1174_s16   ;;  %s400_s25 = sand.u32 (!%p387_p2), 1, %s1166_s14  }
  0x3d   : > { %390 = sbr.rel (%p387_p2) target bundleno = 366 (0x16e), region = 100  ;;  %s1407_s30 = sshll.u32 (!%p387_p2), %s393_s24, 4 }
  0x3e   : > { %s921_s27 = sshll.u32 (!%p387_p2), %s400_s25, 8  ;;  %s427_s5 = sand.u32 (!%p387_p2), 1, %s1158_s12  }
  0x3f   : > { %s923_s23 = sshll.u32 (!%p387_p2), %s1186_s19, 1  ;;  %s922_s28 = sshll.u32 (!%p387_p2), %s427_s5, 4 }
  0x40   : > { %p435_p3 = scmp.lt.s32.totalorder (!%p387_p2), %s923_s23, 3  ;;  %s395_s26 = scalar_lea.vmem (!%p387_p2), [#allocation3], %s1407_s30 }
  0x41   : > { %s1418_s4 = scalar_lea.vmem (!%p387_p2), [#allocation4], %s921_s27  ;;  %s1420_s16 = scalar_lea.vmem (!%p387_p2), [#allocation5], %s922_s28 }
  0x42   : > { %s1540_s23 = smov (!%p435_p3, %s923_s23), 3  ;;  %p924_p4 = scmp.ne.s32.totalorder %s1182_s18, 0 }
  0x43   : > { %s437_s29 = scalar_lea.vmem %s1510_s2, %s1540_s23 }
  0x44   : > { %444 = sbr.rel (%p924_p4) target bundleno = 76 (0x4c), region = 112 }
  0x49   : > { %v1200_v34 = vmov 0.0  }
  0x4a   : > { %445 = vst [vmem:[#allocation2 + $0x10] sm:$0xff] %v1200_v34  ;;  %446 = vst [vmem:[#allocation2] sm:$0xff] %v1200_v34 }
  0x4b   : > { %447 = vst [vmem:[#allocation2 + $0x18] sm:$0xff] %v1200_v34  ;;  %448 = vst [vmem:[#allocation2 + $0x8] sm:$0xff] %v1200_v34 }
  0x4c PF: > { %v1061_v35 = vld [vmem:[%s1418_s4 + $0x74] ss:$8 sps:$4 sm:$0xff]   ;;  %v1063_v36 = vld [vmem:[%s1418_s4 + $0x70] ss:$8 sps:$4 sm:$0xff]   ;;  %v1064_v37 = vld [vmem:[%s1418_s4 + $0x64] ss:$8 sps:$4 sm:$0xff]  }
  0x4d   : > { %657 = vmatprep.subr.bf16.mxu0 %v1061_v35  ;;  %v1066_v38 = vld [vmem:[%s1418_s4 + $0x60] ss:$8 sps:$4 sm:$0xff]   ;;  %v1067_v39 = vld [vmem:[%s1418_s4 + $0x54] ss:$8 sps:$4 sm:$0xff]   ;;  %v1069_v40 = vld [vmem:[%s1418_s4 + $0x50] ss:$8 sps:$4 sm:$0xff]  }
  0x4e   : > { %658 = vmatpush1.bf16.msra.mxu0 %v1063_v36  ;;  %v1070_v41 = vld [vmem:[%s1418_s4 + $0x44] ss:$8 sps:$4 sm:$0xff]   ;;  %v1072_v42 = vld [vmem:[%s1418_s4 + $0x40] ss:$8 sps:$4 sm:$0xff]   ;;  %v1073_v43 = vld [vmem:[%s1418_s4 + $0x34] ss:$8 sps:$4 sm:$0xff]  }
  0x4f   : > { %659 = vmatprep.subr.bf16.mxu0 %v1064_v37  ;;  %v1075_v44 = vld [vmem:[%s1418_s4 + $0x30] ss:$8 sps:$4 sm:$0xff]   ;;  %v1076_v45 = vld [vmem:[%s1418_s4 + $0x24] ss:$8 sps:$4 sm:$0xff]   ;;  %v1078_v46 = vld [vmem:[%s1418_s4 + $0x20] ss:$8 sps:$4 sm:$0xff]  }
  0x50   : > { %v1079_v47 = vld [vmem:[%s1418_s4 + $0x14] ss:$8 sps:$4 sm:$0xff]   ;;  %v1081_v49 = vld [vmem:[%s1418_s4 + $0x10] ss:$8 sps:$4 sm:$0xff]   ;;  %v1082_v50 = vld [vmem:[%s1418_s4 + $0x4] ss:$8 sps:$4 sm:$0xff]  }
  0x51   : > { %v1111_v48 = vld [vmem:[%s395_s26 + $0x4] ss:$8 sps:$4 sm:$0xff]   ;;  %v1084_v51 = vld [vmem:[%s1418_s4] ss:$8 sps:$4 sm:$0xff]   ;;  %v1087_v53 = vld [vmem:[%s1418_s4 + $0xf0] ss:$8 sps:$4 sm:$0xff]  }
  0x52   : > { %660 = vmatpush1.bf16.msra.mxu0 %v1066_v38  ;;  %689 = vmatprep.mubr.bf16.mxu0 %v1111_v48  ;;  %v1085_v52 = vld [vmem:[%s1418_s4 + $0xf4] ss:$8 sps:$4 sm:$0xff]   ;;  %v1088_v54 = vld [vmem:[%s1418_s4 + $0xe4] ss:$8 sps:$4 sm:$0xff]   ;;  %v1090_v55 = vld [vmem:[%s1418_s4 + $0xe0] ss:$8 sps:$4 sm:$0xff]  }
  0x53   : > { %661 = vmatprep.subr.bf16.mxu0 %v1067_v39  ;;  %v1091_v56 = vld [vmem:[%s1418_s4 + $0xd4] ss:$8 sps:$4 sm:$0xff]   ;;  %v1093_v57 = vld [vmem:[%s1418_s4 + $0xd0] ss:$8 sps:$4 sm:$0xff]   ;;  %v1094_v58 = vld [vmem:[%s1418_s4 + $0xc4] ss:$8 sps:$4 sm:$0xff]  }
  0x54   : > { %v1096_v59 = vld [vmem:[%s1418_s4 + $0xc0] ss:$8 sps:$4 sm:$0xff]   ;;  %v1097_v60 = vld [vmem:[%s1418_s4 + $0xb4] ss:$8 sps:$4 sm:$0xff]   ;;  %v1099_v61 = vld [vmem:[%s1418_s4 + $0xb0] ss:$8 sps:$4 sm:$0xff]  }
  0x55   : > { %v1100_v62 = vld [vmem:[%s1418_s4 + $0xa4] ss:$8 sps:$4 sm:$0xff]   ;;  %v1102_v63 = vld [vmem:[%s1418_s4 + $0xa0] ss:$8 sps:$4 sm:$0xff]   ;;  %v1103_v0 = vld [vmem:[%s1418_s4 + $0x94] ss:$8 sps:$4 sm:$0xff]  }
  0x56   : > { %662 = vmatpush1.bf16.msra.mxu0 %v1069_v40  ;;  %v1105_v1 = vld [vmem:[%s1418_s4 + $0x90] ss:$8 sps:$4 sm:$0xff]   ;;  %v1106_v2 = vld [vmem:[%s1418_s4 + $0x84] ss:$8 sps:$4 sm:$0xff]   ;;  %v1108_v3 = vld [vmem:[%s1418_s4 + $0x80] ss:$8 sps:$4 sm:$0xff]  }
  0x57   : > { %663 = vmatprep.subr.bf16.mxu0 %v1070_v41  ;;  %v1109_v4 = vld [vmem:[%s395_s26] ss:$8 sps:$4 sm:$0xff]   ;;  %p959_p5 = scmp.ne.s32.totalorder %s1182_s18, 8 }
  0x58   : > { %v449_v5 = vld [vmem:[#allocation2 + $0x10] sm:$0xff]  ;;  %v450_v7 = vld [vmem:[#allocation2] sm:$0xff]  ;;  %v451_v10 = vld [vmem:[#allocation2 + $0x18] sm:$0xff] }
  0x59   : > { %v452_v13 = vld [vmem:[#allocation2 + $0x8] sm:$0xff] }
  0x5a   : > { %664 = vmatpush1.bf16.msra.mxu0 %v1072_v42 }
  0x5b   : > { %665 = vmatprep.subr.bf16.mxu0 %v1073_v43 }
  0x5e   : > { %666 = vmatpush1.bf16.msra.mxu0 %v1075_v44 }
  0x5f   : > { %667 = vmatprep.subr.bf16.mxu0 %v1076_v45 }
  0x62   : > { %668 = vmatpush1.bf16.msra.mxu0 %v1078_v46 }
  0x63   : > { %669 = vmatprep.subr.bf16.mxu0 %v1079_v47 }
  0x66   : > { %670 = vmatpush1.bf16.msra.mxu0 %v1081_v49 }
  0x67   : > { %671 = vmatprep.subr.bf16.mxu0 %v1082_v50 }
  0x6a   : > { %672 = vmatpush1.bf16.msra.mxu0 %v1084_v51 }
  0x6b   : > { %673 = vmatprep.subr.bf16.mxu0 %v1085_v52 }
  0x6e   : > { %674 = vmatpush2.bf16.msra.mxu0 %v1087_v53 }
  0x6f   : > { %675 = vmatprep.subr.bf16.mxu0 %v1088_v54 }
  0x72   : > { %676 = vmatpush2.bf16.msra.mxu0 %v1090_v55 }
  0x73   : > { %677 = vmatprep.subr.bf16.mxu0 %v1091_v56 }
  0x76   : > { %678 = vmatpush2.bf16.msra.mxu0 %v1093_v57 }
  0x77   : > { %679 = vmatprep.subr.bf16.mxu0 %v1094_v58 }
  0x7a   : > { %680 = vmatpush2.bf16.msra.mxu0 %v1096_v59 }
  0x7b   : > { %681 = vmatprep.subr.bf16.mxu0 %v1097_v60 }
  0x7e   : > { %682 = vmatpush2.bf16.msra.mxu0 %v1099_v61 }
  0x7f   : > { %683 = vmatprep.subr.bf16.mxu0 %v1100_v62 }
  0x82   : > { %684 = vmatpush2.bf16.msra.mxu0 %v1102_v63 }
  0x83   : > { %685 = vmatprep.subr.bf16.mxu0 %v1103_v0 }
  0x86   : > { %686 = vmatpush2.bf16.msra.mxu0 %v1105_v1 }
  0x87   : > { %687 = vmatprep.subr.bf16.mxu0 %v1106_v2 }
  0x8a   : > { %688 = vmatpush2.bf16.msra.mxu0 %v1108_v3 }
  0x8d   : > { %690 = vmatmul.mubr.bf16.vlgmr.msra.gmra.mxu0 %v1109_v4 }
 0x14d   : > { %v691_v6 = vpop.f32.mrf.mxu0 }
 0x14e   : > { %v700_v8 = vadd.f32 %v691_v6, %v449_v5 }
 0x14f   : > { %v693_v9 = vpop.f32.mrf.mxu0 }
 0x150   : > { %704 = vst [vmem:[#allocation2 + $0x10] sm:$0xff] %v700_v8  ;;  %v701_v11 = vadd.f32 %v693_v9, %v450_v7 }
 0x151   : > { %v695_v12 = vpop.f32.mrf.mxu0 }
 0x152   : > { %705 = vst [vmem:[#allocation2] sm:$0xff] %v701_v11  ;;  %v702_v14 = vadd.f32 %v695_v12, %v451_v10  ;;  %711 = sbr.rel (%p959_p5) target bundleno = 358 (0x166), region = 116 }
 0x153   : > { %v697_v15 = vpop.f32.mrf.mxu0 }
 0x154   : > { %706 = vst [vmem:[#allocation2 + $0x18] sm:$0xff] %v702_v14  ;;  %v703_v16 = vadd.f32 %v697_v15, %v452_v13 }
 0x156   : > { %707 = vst [vmem:[#allocation2 + $0x8] sm:$0xff] %v703_v16 }
 0x157   : > { %v718_v17 = vlaneseq  ;;  %v716_v19 = vld [vmem:[%s437_s29] sm:$0x3]  ;;  %v712_v20 = vld [vmem:[#allocation2 + $0x10] sm:$0xff] }
 0x159   : > { %v719_v18 = vshrl.u32 %v718_v17, 7  ;;  %v713_v23 = vld [vmem:[#allocation2] sm:$0xff] }
 0x15b   : > { %v720_v21 = vsub.s32 0, %v719_v18  ;;  %v724_v22 = vsub.s32 1, %v719_v18  ;;  %v714_v24 = vld [vmem:[#allocation2 + $0x18] sm:$0xff] }
 0x15d   : > { %v715_v25 = vld [vmem:[#allocation2 + $0x8] sm:$0xff]  ;;  %v721_v26 = vrot.slane %v716_v19, %v720_v21  ;;  %v725_v27 = vrot.slane %v716_v19, %v724_v22 }
 0x15f   : > { %v728_v28 = vadd.f32 %v721_v26, %v712_v20  ;;  %v729_v29 = vadd.f32 %v725_v27, %v713_v23  ;;  %v730_v30 = vadd.f32 %v721_v26, %v714_v24  ;;  %v731_v31 = vadd.f32 %v725_v27, %v715_v25 }
 0x161   : > { %v732_v32 = vmax.f32 %v728_v28, 0.0  ;;  %v733_v33 = vmax.f32 %v729_v29, 0.0  ;;  %v734_v34 = vmax.f32 %v730_v30, 0.0  ;;  %v735_v35 = vmax.f32 %v731_v31, 0.0 }
 0x163   : > { %v969_v36 = vpack.c.bf16 %v733_v33, %v732_v32  ;;  %v970_v37 = vpack.c.bf16 %v735_v35, %v734_v34 }
 0x165   : > { %748 = vst [vmem:[%s1420_s16] sm:$0xff] %v969_v36  ;;  %749 = vst [vmem:[%s1420_s16 + $0x8] sm:$0xff] %v970_v37 }
 0x166 PF: > { %756 = sbr.rel (!%p1315_p12) target bundleno = 366 (0x16e), region = 120  ;;  %s971_s18 = sshll.u32 (%p1315_p12), %s1186_s19, 3 }
 0x167   : > { %s762_s25 = scalar_lea.vmem (%p1315_p12), %s1511_s3, %s971_s18 }
 0x16c   : > { %v793_v38 = vld [vmem:[%s1420_s16] sm:$0xff]  ;;  %v795_v39 = vld [vmem:[%s1420_s16 + $0x8] sm:$0xff] }
 0x16d   : > { %794 = vst [vmem:[%s762_s25] sm:$0xff] %v793_v38  ;;  %796 = vst [vmem:[%s762_s25 + $0x10] sm:$0xff] %v795_v39 }
 0x16e PF: > { %s13_s22 = sadd.s32 1, %s1198_s22   ;;  %s1520_s10 = sld [smem:[#allocation8_spill]] }
 0x16f   : > { %p10_p6 = scmp.ge.s32.totalorder %s13_s22, 20   ;;  %s1521_s30 = sld [smem:[#allocation6_spill]] }
 0x170   : > { %s1522_s27 = sld [smem:[#allocation7_spill]]  ;;  %s1523_s12 = smov %s1162_s13 }
 0x171   : > { %s1524_s13 = smov %s1313_s9  ;;  %s1525_s14 = smov %s1170_s15 }
 0x172   : > { %s1526_s15 = smov %s1310_s8  ;;  %s1527_s16 = smov %s1178_s17 }
 0x173   : > { %s1529_s18 = smov %s1190_s20  ;;  %s1530_s19 = smov %s1194_s21 }
 0x174   : > { %s1528_s17 = smov %s1520_s10  ;;  %12 = sbr.rel (!%p10_p6) target bundleno = 6 (0x6), region = 200 }
 0x175   : > { %s1531_s20 = smov %s1521_s30 }
 0x176   : > { %s1532_s21 = smov %s1522_s27 }

// kernel: resnet_forward.24
= control target key start
LH: loop header
LB: loop body
LE: loop exit
PB: predicated region body
PF: predicated region fallthrough
CT: control target
= control target key end

     0   :  { %s1081_s12 = smov 0   ;;  %s1083_s13 = smov 0   ;;  %s1269_s0 = inlined_call_operand.vmem [shape: bf16[16,256], index: 0, kind: input, shape index: {}]   ;;  %s1270_s1 = inlined_call_operand.vmem [shape: bf16[256,512], index: 1, kind: input, shape index: {}]   ;;  %s1271_s2 = inlined_call_operand.vmem [shape: f32[1,512], index: 2, kind: input, shape index: {}]   ;;  %s1272_s3 = inlined_call_operand.vmem [shape: bf16[16,512], index: 3, kind: output, shape index: {}]  }
   0x1   :  { %s1085_s14 = smov 0   ;;  %s1087_s15 = smov 0  }
   0x2   :  { %s1089_s16 = smov 0  }
   0x3 LB: > { %s28_s17 = sadd.s32 1, %s1055_s15  ;;  %s873_s18 = sadd.s32 4294967295, %s1059_s16   ;;  %s1059_s16 = sphi %s1089_s16, %s13_s16   ;;  %s1055_s15 = sphi %s1087_s15, %s1277_s15   ;;  %s1051_s14 = sphi %s1085_s14, %s1276_s14   ;;  %s1047_s13 = sphi %s1083_s13, %s1275_s13   ;;  %s1043_s12 = sphi %s1081_s12, %s1274_s12  }
   0x4   : > { %p30_p0 = scmp.ge.s32.totalorder %s28_s17, 2  ;;  %p76_p1 = scmp.ne.s32.totalorder %s1047_s13, %s1043_s12 }
   0x5   : > { %p77_p2 = scmp.eq.s32.totalorder %s1059_s16, 0  ;;  %p134_p4 = scmp.eq.s32.totalorder %s873_s18, 1 }
   0x6   : > { %s1279_s17 = smov (%p30_p0, %s28_s17), 0  ;;  %s69_s20 = sadd.s32 1, %s1047_s13 }
   0x7   : > { %p78_p3 = por %p77_p2, %p76_p1  ;;  %s65_s19 = ssub.s32 %s1055_s15, %s1279_s17 }
   0x8   : > { %p67_p5 = scmp.eq.s32.totalorder %s65_s19, 0  ;;  %p1116_p6 = por %p134_p4, %p76_p1 }
   0x9   : > { %p877_p7 = scmp.ge.s32.totalorder %s1059_s16, 2 }
   0xa   : > { %s1121_s22 = scalar_select %p67_p5, %s1047_s13, %s69_s20  }
   0xb   : > { %171 = sbr.rel (%p877_p7) target bundleno = 36 (0x24), region = 20 }
  0x10   : > { %174 = sbr.rel (!%p78_p3) target bundleno = 36 (0x24), region = 24  ;;  %s176_s23 = sand.u32 (%p78_p3), 1, %s1047_s13  }
  0x11   : > { %s926_s24 = sshll.u32 (%p78_p3), %s1055_s15, 3  ;;  %s878_s25 = sshll.u32 (%p78_p3), %s176_s23, 8 }
  0x12   : > { %s1129_s28 = scalar_lea.vmem (%p78_p3), %s1270_s1, %s926_s24  ;;  %s1134_s29 = scalar_lea.vmem (%p78_p3), [#allocation3], %s878_s25 }
  0x13   : > { %v275_v0 = vld [vmem:[%s1129_s28] sm:$0xff] (%p78_p3)  ;;  %v277_v1 = vld [vmem:[%s1129_s28 + $0x10] sm:$0xff] (%p78_p3) }
  0x14   : > { %v279_v2 = vld [vmem:[%s1129_s28 + $0x20] sm:$0xff] (%p78_p3)  ;;  %276 = vst [vmem:[%s1134_s29] sm:$0xff] (%p78_p3), %v275_v0  ;;  %278 = vst [vmem:[%s1134_s29 + $0x8] sm:$0xff] (%p78_p3), %v277_v1  ;;  %v281_v3 = vld [vmem:[%s1129_s28 + $0x30] sm:$0xff] (%p78_p3) }
  0x15   : > { %280 = vst [vmem:[%s1134_s29 + $0x10] sm:$0xff] %v279_v2  ;;  %v283_v4 = vld [vmem:[%s1129_s28 + $0x40] sm:$0xff]  ;;  %v285_v5 = vld [vmem:[%s1129_s28 + $0x50] sm:$0xff]  ;;  %282 = vst [vmem:[%s1134_s29 + $0x18] sm:$0xff] %v281_v3 }
  0x16   : > { %284 = vst [vmem:[%s1134_s29 + $0x20] sm:$0xff] %v283_v4  ;;  %286 = vst [vmem:[%s1134_s29 + $0x28] sm:$0xff] %v285_v5  ;;  %v287_v6 = vld [vmem:[%s1129_s28 + $0x60] sm:$0xff]  ;;  %v289_v7 = vld [vmem:[%s1129_s28 + $0x70] sm:$0xff] }
  0x17   : > { %v291_v8 = vld [vmem:[%s1129_s28 + $0x80] sm:$0xff]  ;;  %288 = vst [vmem:[%s1134_s29 + $0x30] sm:$0xff] %v287_v6  ;;  %290 = vst [vmem:[%s1134_s29 + $0x38] sm:$0xff] %v289_v7  ;;  %v293_v9 = vld [vmem:[%s1129_s28 + $0x90] sm:$0xff] }
  0x18   : > { %292 = vst [vmem:[%s1134_s29 + $0x40] sm:$0xff] %v291_v8  ;;  %v295_v10 = vld [vmem:[%s1129_s28 + $0xa0] sm:$0xff]  ;;  %v297_v11 = vld [vmem:[%s1129_s28 + $0xb0] sm:$0xff]  ;;  %294 = vst [vmem:[%s1134_s29 + $0x48] sm:$0xff] %v293_v9 }
  0x19   : > { %296 = vst [vmem:[%s1134_s29 + $0x50] sm:$0xff] %v295_v10  ;;  %298 = vst [vmem:[%s1134_s29 + $0x58] sm:$0xff] %v297_v11  ;;  %v299_v12 = vld [vmem:[%s1129_s28 + $0xc0] sm:$0xff]  ;;  %v301_v13 = vld [vmem:[%s1129_s28 + $0xd0] sm:$0xff] }
  0x1a   : > { %v303_v14 = vld [vmem:[%s1129_s28 + $0xe0] sm:$0xff]  ;;  %300 = vst [vmem:[%s1134_s29 + $0x60] sm:$0xff] %v299_v12  ;;  %302 = vst [vmem:[%s1134_s29 + $0x68] sm:$0xff] %v301_v13  ;;  %v305_v15 = vld [vmem:[%s1129_s28 + $0xf0] sm:$0xff] }
  0x1b   : > { %304 = vst [vmem:[%s1134_s29 + $0x70] sm:$0xff] %v303_v14  ;;  %v307_v16 = vld [vmem:[%s1129_s28 + $0x100] sm:$0xff]  ;;  %v309_v17 = vld [vmem:[%s1129_s28 + $0x110] sm:$0xff]  ;;  %306 = vst [vmem:[%s1134_s29 + $0x78] sm:$0xff] %v305_v15 }
  0x1c   : > { %308 = vst [vmem:[%s1134_s29 + $0x80] sm:$0xff] %v307_v16  ;;  %310 = vst [vmem:[%s1134_s29 + $0x88] sm:$0xff] %v309_v17  ;;  %v311_v18 = vld [vmem:[%s1129_s28 + $0x120] sm:$0xff]  ;;  %v313_v19 = vld [vmem:[%s1129_s28 + $0x130] sm:$0xff] }
  0x1d   : > { %v315_v20 = vld [vmem:[%s1129_s28 + $0x140] sm:$0xff]  ;;  %312 = vst [vmem:[%s1134_s29 + $0x90] sm:$0xff] %v311_v18  ;;  %314 = vst [vmem:[%s1134_s29 + $0x98] sm:$0xff] %v313_v19  ;;  %v317_v21 = vld [vmem:[%s1129_s28 + $0x150] sm:$0xff] }
  0x1e   : > { %316 = vst [vmem:[%s1134_s29 + $0xa0] sm:$0xff] %v315_v20  ;;  %v319_v22 = vld [vmem:[%s1129_s28 + $0x160] sm:$0xff]  ;;  %v321_v23 = vld [vmem:[%s1129_s28 + $0x170] sm:$0xff]  ;;  %318 = vst [vmem:[%s1134_s29 + $0xa8] sm:$0xff] %v317_v21 }
  0x1f   : > { %320 = vst [vmem:[%s1134_s29 + $0xb0] sm:$0xff] %v319_v22  ;;  %322 = vst [vmem:[%s1134_s29 + $0xb8] sm:$0xff] %v321_v23  ;;  %v323_v24 = vld [vmem:[%s1129_s28 + $0x180] sm:$0xff]  ;;  %v325_v25 = vld [vmem:[%s1129_s28 + $0x190] sm:$0xff] }
  0x20   : > { %v327_v26 = vld [vmem:[%s1129_s28 + $0x1a0] sm:$0xff]  ;;  %324 = vst [vmem:[%s1134_s29 + $0xc0] sm:$0xff] %v323_v24  ;;  %326 = vst [vmem:[%s1134_s29 + $0xc8] sm:$0xff] %v325_v25  ;;  %v329_v27 = vld [vmem:[%s1129_s28 + $0x1b0] sm:$0xff] }
  0x21   : > { %328 = vst [vmem:[%s1134_s29 + $0xd0] sm:$0xff] %v327_v26  ;;  %v331_v28 = vld [vmem:[%s1129_s28 + $0x1c0] sm:$0xff]  ;;  %v333_v29 = vld [vmem:[%s1129_s28 + $0x1d0] sm:$0xff]  ;;  %330 = vst [vmem:[%s1134_s29 + $0xd8] sm:$0xff] %v329_v27 }
  0x22   : > { %332 = vst [vmem:[%s1134_s29 + $0xe0] sm:$0xff] %v331_v28  ;;  %334 = vst [vmem:[%s1134_s29 + $0xe8] sm:$0xff] %v333_v29  ;;  %v335_v30 = vld [vmem:[%s1129_s28 + $0x1e0] sm:$0xff]  ;;  %v337_v31 = vld [vmem:[%s1129_s28 + $0x1f0] sm:$0xff] }
  0x23   : > { %336 = vst [vmem:[%s1134_s29 + $0xf0] sm:$0xff] %v335_v30  ;;  %338 = vst [vmem:[%s1134_s29 + $0xf8] sm:$0xff] %v337_v31 }
  0x24 PF: > { %p881_p8 = scmp.ge.s32.totalorder %s1059_s16, 1  ;;  %p351_p9 = scmp.lt.s32.totalorder %s1059_s16, 3 }
  0x26   : > { %p352_p10 = pnand %p881_p8, %p351_p9 }
  0x27   : > { %s358_s30 = sand.u32 (!%p352_p10), 1, %s1043_s12   ;;  %s884_s10 = sshll.u32 (!%p352_p10), %s1051_s14, 1 }
  0x28   : > { %355 = sbr.rel (%p352_p10) target bundleno = 322 (0x142), region = 66  ;;  %s882_s4 = sshll.u32 (!%p352_p10), %s358_s30, 8 }
  0x29   : > { %s1205_s7 = scalar_lea.vmem (!%p352_p10), [#allocation3], %s882_s4  ;;  %p409_p11 = scmp.lt.s32.totalorder (!%p352_p10), %s884_s10, 3 }
  0x2a   : > { %s883_s20 = sshll.u32 (!%p352_p10), %s358_s30, 4 }
  0x2b   : > { %s393_s23 = scalar_lea.vmem (!%p352_p10), [#allocation4], %s883_s20 }
  0x2d   : > { %v1020_v32 = vld [vmem:[%s1269_s0 + $0x4] ss:$8 sps:$4 sm:$0xff]   ;;  %v970_v33 = vld [vmem:[%s1205_s7 + $0x74] ss:$8 sps:$4 sm:$0xff]   ;;  %v972_v34 = vld [vmem:[%s1205_s7 + $0x70] ss:$8 sps:$4 sm:$0xff]   ;;  %v691_v2 = vlaneseq }
  0x2e   : > { %663 = vmatprep.mubr.bf16.mxu0 %v1020_v32  ;;  %631 = vmatprep.subr.bf16.mxu0 %v970_v33  ;;  %v973_v35 = vld [vmem:[%s1205_s7 + $0x64] ss:$8 sps:$4 sm:$0xff]   ;;  %v975_v36 = vld [vmem:[%s1205_s7 + $0x60] ss:$8 sps:$4 sm:$0xff]   ;;  %v976_v37 = vld [vmem:[%s1205_s7 + $0x54] ss:$8 sps:$4 sm:$0xff]  }
  0x2f   : > { %632 = vmatpush1.bf16.msra.mxu0 %v972_v34  ;;  %v978_v38 = vld [vmem:[%s1205_s7 + $0x50] ss:$8 sps:$4 sm:$0xff]   ;;  %v979_v39 = vld [vmem:[%s1205_s7 + $0x44] ss:$8 sps:$4 sm:$0xff]   ;;  %v981_v40 = vld [vmem:[%s1205_s7 + $0x40] ss:$8 sps:$4 sm:$0xff]  }
  0x30   : > { %633 = vmatprep.subr.bf16.mxu0 %v973_v35  ;;  %v982_v41 = vld [vmem:[%s1205_s7 + $0x34] ss:$8 sps:$4 sm:$0xff]   ;;  %v984_v42 = vld [vmem:[%s1205_s7 + $0x30] ss:$8 sps:$4 sm:$0xff]   ;;  %v985_v43 = vld [vmem:[%s1205_s7 + $0x24] ss:$8 sps:$4 sm:$0xff]  }
  0x31   : > { %v987_v44 = vld [vmem:[%s1205_s7 + $0x20] ss:$8 sps:$4 sm:$0xff]   ;;  %v988_v45 = vld [vmem:[%s1205_s7 + $0x14] ss:$8 sps:$4 sm:$0xff]   ;;  %v990_v46 = vld [vmem:[%s1205_s7 + $0x10] ss:$8 sps:$4 sm:$0xff]  }
  0x32   : > { %v991_v47 = vld [vmem:[%s1205_s7 + $0x4] ss:$8 sps:$4 sm:$0xff]   ;;  %v993_v48 = vld [vmem:[%s1205_s7] ss:$8 sps:$4 sm:$0xff]   ;;  %v994_v49 = vld [vmem:[%s1205_s7 + $0xf4] ss:$8 sps:$4 sm:$0xff]  }
  0x33   : > { %634 = vmatpush1.bf16.msra.mxu0 %v975_v36  ;;  %v996_v50 = vld [vmem:[%s1205_s7 + $0xf0] ss:$8 sps:$4 sm:$0xff]   ;;  %v997_v51 = vld [vmem:[%s1205_s7 + $0xe4] ss:$8 sps:$4 sm:$0xff]   ;;  %v999_v52 = vld [vmem:[%s1205_s7 + $0xe0] ss:$8 sps:$4 sm:$0xff]  }
  0x34   : > { %635 = vmatprep.subr.bf16.mxu0 %v976_v37  ;;  %v1000_v53 = vld [vmem:[%s1205_s7 + $0xd4] ss:$8 sps:$4 sm:$0xff]   ;;  %v1002_v54 = vld [vmem:[%s1205_s7 + $0xd0] ss:$8 sps:$4 sm:$0xff]   ;;  %v1003_v55 = vld [vmem:[%s1205_s7 + $0xc4] ss:$8 sps:$4 sm:$0xff]  }
  0x35   : > { %v1005_v56 = vld [vmem:[%s1205_s7 + $0xc0] ss:$8 sps:$4 sm:$0xff]   ;;  %v1006_v57 = vld [vmem:[%s1205_s7 + $0xb4] ss:$8 sps:$4 sm:$0xff]   ;;  %v1008_v58 = vld [vmem:[%s1205_s7 + $0xb0] ss:$8 sps:$4 sm:$0xff]  }
  0x36   : > { %v1009_v59 = vld [vmem:[%s1205_s7 + $0xa4] ss:$8 sps:$4 sm:$0xff]   ;;  %v1011_v60 = vld [vmem:[%s1205_s7 + $0xa0] ss:$8 sps:$4 sm:$0xff]   ;;  %v1012_v61 = vld [vmem:[%s1205_s7 + $0x94] ss:$8 sps:$4 sm:$0xff]  }
  0x37   : > { %636 = vmatpush1.bf16.msra.mxu0 %v978_v38  ;;  %v1014_v62 = vld [vmem:[%s1205_s7 + $0x90] ss:$8 sps:$4 sm:$0xff]   ;;  %v1015_v63 = vld [vmem:[%s1205_s7 + $0x84] ss:$8 sps:$4 sm:$0xff]   ;;  %v1017_v0 = vld [vmem:[%s1205_s7 + $0x80] ss:$8 sps:$4 sm:$0xff]  }
  0x38   : > { %637 = vmatprep.subr.bf16.mxu0 %v979_v39  ;;  %v1018_v1 = vld [vmem:[%s1269_s0] ss:$8 sps:$4 sm:$0xff]   ;;  %s1281_s10 = smov (!%p409_p11, %s884_s10), 3  ;;  %v692_v3 = vshrl.u32 %v691_v2, 7  ;;  %s929_s24 = sshll.u32 (%p1116_p6), %s1051_s14, 3 }
  0x39   : > { %s411_s19 = scalar_lea.vmem %s1271_s2, %s1281_s10  ;;  %s731_s26 = scalar_lea.vmem (%p1116_p6), %s1272_s3, %s929_s24 }
  0x3a   : > { %v693_v4 = vsub.s32 0, %v692_v3  ;;  %v697_v5 = vsub.s32 1, %v692_v3  ;;  %v689_v6 = vld [vmem:[%s411_s19] sm:$0x3] }
  0x3b   : > { %638 = vmatpush1.bf16.msra.mxu0 %v981_v40 }
  0x3c   : > { %639 = vmatprep.subr.bf16.mxu0 %v982_v41  ;;  %v694_v7 = vrot.slane %v689_v6, %v693_v4  ;;  %v698_v8 = vrot.slane %v689_v6, %v697_v5 }
  0x3f   : > { %640 = vmatpush1.bf16.msra.mxu0 %v984_v42 }
  0x40   : > { %641 = vmatprep.subr.bf16.mxu0 %v985_v43 }
  0x43   : > { %642 = vmatpush1.bf16.msra.mxu0 %v987_v44 }
  0x44   : > { %643 = vmatprep.subr.bf16.mxu0 %v988_v45 }
  0x47   : > { %644 = vmatpush1.bf16.msra.mxu0 %v990_v46 }
  0x48   : > { %645 = vmatprep.subr.bf16.mxu0 %v991_v47 }
  0x4b   : > { %646 = vmatpush1.bf16.msra.mxu0 %v993_v48 }
  0x4c   : > { %647 = vmatprep.subr.bf16.mxu0 %v994_v49 }
  0x4f   : > { %648 = vmatpush2.bf16.msra.mxu0 %v996_v50 }
  0x50   : > { %649 = vmatprep.subr.bf16.mxu0 %v997_v51 }
  0x53   : > { %650 = vmatpush2.bf16.msra.mxu0 %v999_v52 }
  0x54   : > { %651 = vmatprep.subr.bf16.mxu0 %v1000_v53 }
  0x57   : > { %652 = vmatpush2.bf16.msra.mxu0 %v1002_v54 }
  0x58   : > { %653 = vmatprep.subr.bf16.mxu0 %v1003_v55 }
  0x5b   : > { %654 = vmatpush2.bf16.msra.mxu0 %v1005_v56 }
  0x5c   : > { %655 = vmatprep.subr.bf16.mxu0 %v1006_v57 }
  0x5f   : > { %656 = vmatpush2.bf16.msra.mxu0 %v1008_v58 }
  0x60   : > { %657 = vmatprep.subr.bf16.mxu0 %v1009_v59 }
  0x63   : > { %658 = vmatpush2.bf16.msra.mxu0 %v1011_v60 }
  0x64   : > { %659 = vmatprep.subr.bf16.mxu0 %v1012_v61 }
  0x67   : > { %660 = vmatpush2.bf16.msra.mxu0 %v1014_v62 }
  0x68   : > { %661 = vmatprep.subr.bf16.mxu0 %v1015_v63 }
  0x6b   : > { %662 = vmatpush2.bf16.msra.mxu0 %v1017_v0 }
  0x6e   : > { %664 = vmatmul.mubr.bf16.vlgmr.msra.gmra.mxu0 %v1018_v1 }
 0x12e   : > { %v665_v9 = vpop.f32.mrf.mxu0 }
 0x12f   : > { %v701_v11 = vadd.f32 %v694_v7, %v665_v9 }
 0x130   : > { %v667_v10 = vpop.f32.mrf.mxu0 }
 0x131   : > { %v702_v12 = vadd.f32 %v698_v8, %v667_v10 }
 0x132   : > { %v669_v13 = vpop.f32.mrf.mxu0 }
 0x133   : > { %v927_v14 = vpack.c.bf16 %v702_v12, %v701_v11  ;;  %v703_v16 = vadd.f32 %v694_v7, %v669_v13 }
 0x134   : > { %v671_v15 = vpop.f32.mrf.mxu0 }
 0x135   : > { %717 = vst [vmem:[%s393_s23] sm:$0xff] %v927_v14  ;;  %v704_v17 = vadd.f32 %v698_v8, %v671_v15  ;;  %725 = sbr.rel (!%p1116_p6) target bundleno = 322 (0x142), region = 82 }
 0x137   : > { %v928_v18 = vpack.c.bf16 %v704_v17, %v703_v16 }
 0x139   : > { %718 = vst [vmem:[%s393_s23 + $0x8] sm:$0xff] %v928_v18 }
 0x13c   : > { %v762_v19 = vld [vmem:[%s393_s23] sm:$0xff] }
 0x13d   : > { %763 = vst [vmem:[%s731_s26] sm:$0xff] %v762_v19 }
 0x140   : > { %v764_v20 = vld [vmem:[%s393_s23 + $0x8] sm:$0xff] }
 0x141   : > { %765 = vst [vmem:[%s731_s26 + $0x10] sm:$0xff] %v764_v20 }
 0x142 PF: > { %s13_s16 = sadd.s32 1, %s1059_s16   ;;  %s1274_s12 = smov %s1047_s13 }
 0x143   : > { %p10_p12 = scmp.ge.s32.totalorder %s13_s16, 4   ;;  %s1275_s13 = smov %s1121_s22 }
 0x144   : > { %s1276_s14 = smov %s1055_s15  ;;  %s1277_s15 = smov %s1279_s17 }
 0x145   :  { %12 = sbr.rel (!%p10_p12) target bundleno = 3 (0x3), region = 157 }

// kernel: resnet_forward.26
= control target key start
LH: loop header
LB: loop body
LE: loop exit
PB: predicated region body
PF: predicated region fallthrough
CT: control target
= control target key end

     0   :  { %s2195_s0 = inlined_call_operand.vmem [shape: bf16[16,4608], index: 0, kind: input, shape index: {}]   ;;  %s2196_s1 = inlined_call_operand.vmem [shape: bf16[4608,512], index: 1, kind: input, shape index: {}]   ;;  %s2197_s2 = inlined_call_operand.vmem [shape: f32[1,512], index: 2, kind: input, shape index: {}]   ;;  %s2198_s3 = inlined_call_operand.vmem [shape: bf16[16,512], index: 3, kind: input, shape index: {}]   ;;  %s2199_s4 = inlined_call_operand.vmem [shape: bf16[16,512], index: 4, kind: output, shape index: {}]  }
   0x1   :  { %2202 = sst [smem:[#allocation10_spill]] %s2195_s0 }
   0x2   :  { %s1796_s15 = smov 0   ;;  %s1798_s16 = smov 0  }
   0x3   :  { %s1800_s17 = smov 0   ;;  %s1802_s18 = smov 0  }
   0x4   :  { %s1804_s19 = smov 0   ;;  %s1806_s20 = smov 0  }
   0x5   :  { %s1808_s21 = smov 0   ;;  %s1810_s22 = smov 0  }
   0x6   :  { %s1812_s23 = smov 0   ;;  %s1814_s24 = smov 0  }
   0x7   :  { %s1816_s25 = smov 0  }
   0x8 LB: > { %s1389_s26 = sadd.s32 4294967295, %s1769_s25   ;;  %s26_s27 = sadd.s32 1, %s1761_s23  ;;  %s1769_s25 = sphi %s1816_s25, %s14_s25   ;;  %s1765_s24 = sphi %s1814_s24, %s2223_s24   ;;  %s1761_s23 = sphi %s1812_s23, %s2222_s23   ;;  %s1757_s22 = sphi %s1810_s22, %s2221_s22   ;;  %s1753_s21 = sphi %s1808_s21, %s2220_s21   ;;  %s1749_s20 = sphi %s1806_s20, %s2219_s20   ;;  %s1745_s19 = sphi %s1804_s19, %s2218_s19   ;;  %s1741_s18 = sphi %s1802_s18, %s2217_s18   ;;  %s1737_s17 = sphi %s1800_s17, %s2216_s17   ;;  %s1733_s16 = sphi %s1798_s16, %s2215_s16   ;;  %s1729_s15 = sphi %s1796_s15, %s2214_s15  }
   0x9   : > { %p27_p0 = scmp.ge.s32.totalorder %s26_s27, 9  ;;  %s29_s28 = sadd.s32 1, %s1765_s24 }
   0xa   : > { %s42_s29 = sadd.s32 1, %s1749_s20  ;;  %p49_p1 = scmp.ne.s32.totalorder %s1749_s20, %s1745_s19 }
   0xb   : > { %s2225_s27 = smov (%p27_p0, %s26_s27), 0  ;;  %s2227_s28 = smov (!%p27_p0, %s29_s28), %s1765_s24 }
   0xc   : > { %2203 = sst [smem:[#allocation7_spill]] %s2225_s27  ;;  %s38_s30 = ssub.s32 %s1761_s23, %s2225_s27 }
   0xd   : > { %p50_p2 = scmp.eq.s32.totalorder %s1769_s25, 0  ;;  %p31_p3 = scmp.ge.s32.totalorder %s2227_s28, 2 }
   0xe   : > { %p40_p4 = scmp.eq.s32.totalorder %s38_s30, 0  ;;  %s70_s6 = sadd.s32 1, %s1741_s18 }
   0xf   : > { %p1865_p5 = por %p50_p2, %p49_p1  ;;  %s2229_s28 = smov (%p31_p3, %s2227_s28), 0 }
  0x10   : > { %2205 = sst [smem:[#allocation8_spill]] %s2229_s28  ;;  %s66_s8 = ssub.s32 %s1765_s24, %s2229_s28 }
  0x11   : > { %s1873_s7 = scalar_select %p40_p4, %s1749_s20, %s42_s29  }
  0x12   : > { %p77_p6 = scmp.ne.s32.totalorder %s1741_s18, %s1737_s17  ;;  %s67_s9 = sor.u32 %s66_s8, %s38_s30 }
  0x13   : > { %2206 = sst [smem:[#allocation9_spill]] %s1873_s7  ;;  %p122_p7 = scmp.eq.s32.totalorder %s66_s8, 0 }
  0x14   : > { %p68_p8 = scmp.eq.s32.totalorder %s67_s9, 0  ;;  %p1881_p9 = por %p77_p6, %p50_p2 }
  0x15   : > { %s124_s11 = sadd.s32 1, %s1733_s16  ;;  %p131_p10 = scmp.ne.s32.totalorder %s1733_s16, %s1729_s15 }
  0x16   : > { %s1889_s12 = scalar_select %p68_p8, %s1741_s18, %s70_s6  }
  0x17   : > { %s1892_s13 = scalar_select %p122_p7, %s1733_s16, %s124_s11  }
  0x18   : > { %p1896_p11 = por %p131_p10, %p50_p2  ;;  %p163_p12 = scmp.eq.s32.totalorder %s1389_s26, 17 }
  0x19   : > { %p1392_p0 = scmp.ge.s32.totalorder %s1769_s25, 18 }
  0x1a   : > { %p1900_p13 = por %p163_p12, %p131_p10 }
  0x1b   : > { %185 = sbr.rel (%p1392_p0) target bundleno = 88 (0x58), region = 16 }
  0x20   : > { %188 = sbr.rel (!%p1865_p5) target bundleno = 44 (0x2c), region = 20  ;;  %s190_s30 = sand.u32 (%p1865_p5), 1, %s1749_s20  }
  0x21   : > { %s1487_s6 = sshll.u32 (%p1865_p5), %s1761_s23, 4  ;;  %s1393_s8 = sshll.u32 (%p1865_p5), %s190_s30, 5 }
  0x22   : > { %s2210_s0 = sld [smem:[#allocation10_spill]] (%p1865_p5)  ;;  %s192_s26 = scalar_lea.vmem (%p1865_p5), [#allocation3], %s1393_s8 }
  0x28   : > { %s198_s28 = scalar_lea.vmem %s2210_s0, %s1487_s6 }
  0x29   : > { %v211_v0 = vld [vmem:[%s198_s28] sm:$0xff]  ;;  %v213_v1 = vld [vmem:[%s198_s28 + $0x8] sm:$0xff]  ;;  %v215_v2 = vld [vmem:[%s198_s28 + $0x90] sm:$0xff] }
  0x2a   : > { %212 = vst [vmem:[%s192_s26] sm:$0xff] %v211_v0  ;;  %214 = vst [vmem:[%s192_s26 + $0x8] sm:$0xff] %v213_v1  ;;  %v217_v3 = vld [vmem:[%s198_s28 + $0x98] sm:$0xff] }
  0x2b   : > { %216 = vst [vmem:[%s192_s26 + $0x10] sm:$0xff] %v215_v2  ;;  %218 = vst [vmem:[%s192_s26 + $0x18] sm:$0xff] %v217_v3 }
  0x2c PF: > { %224 = sbr.rel (!%p1881_p9) target bundleno = 83 (0x53), region = 43  ;;  %s226_s5 = sand.u32 (%p1881_p9), 1, %s1741_s18  }
  0x2d   : > { %s1398_s30 = sshll.u32 (%p1881_p9), %s1765_s24, 1  ;;  %s1396_s9 = sshll.u32 (%p1881_p9), %s226_s5, 9 }
  0x2e   : > { %s1488_s6 = sshll.u32 (%p1881_p9), %s1761_s23, 8  ;;  %s1925_s28 = scalar_lea.vmem (%p1881_p9), [#allocation4], %s1396_s9 }
  0x2f   : > { %s232_s11 = sadd.s32 (%p1881_p9), %s1488_s6, %s1398_s30 }
  0x30   : > { %s1400_s0 = sshll.u32 (%p1881_p9), %s232_s11, 2 }
  0x31   : > { %s1920_s7 = scalar_lea.vmem %s2196_s1, %s1400_s0 }
  0x32   : > { %v389_v4 = vld [vmem:[%s1920_s7] sm:$0xff]  ;;  %v391_v5 = vld [vmem:[%s1920_s7 + $0x10] sm:$0xff] }
  0x33   : > { %v393_v6 = vld [vmem:[%s1920_s7 + $0x20] sm:$0xff]  ;;  %390 = vst [vmem:[%s1925_s28] sm:$0xff] %v389_v4  ;;  %392 = vst [vmem:[%s1925_s28 + $0x8] sm:$0xff] %v391_v5  ;;  %v395_v7 = vld [vmem:[%s1920_s7 + $0x30] sm:$0xff] }
  0x34   : > { %394 = vst [vmem:[%s1925_s28 + $0x10] sm:$0xff] %v393_v6  ;;  %v397_v8 = vld [vmem:[%s1920_s7 + $0x40] sm:$0xff]  ;;  %v399_v9 = vld [vmem:[%s1920_s7 + $0x50] sm:$0xff]  ;;  %396 = vst [vmem:[%s1925_s28 + $0x18] sm:$0xff] %v395_v7 }
  0x35   : > { %398 = vst [vmem:[%s1925_s28 + $0x20] sm:$0xff] %v397_v8  ;;  %400 = vst [vmem:[%s1925_s28 + $0x28] sm:$0xff] %v399_v9  ;;  %v401_v10 = vld [vmem:[%s1920_s7 + $0x60] sm:$0xff]  ;;  %v403_v11 = vld [vmem:[%s1920_s7 + $0x70] sm:$0xff] }
  0x36   : > { %v405_v12 = vld [vmem:[%s1920_s7 + $0x80] sm:$0xff]  ;;  %402 = vst [vmem:[%s1925_s28 + $0x30] sm:$0xff] %v401_v10  ;;  %404 = vst [vmem:[%s1925_s28 + $0x38] sm:$0xff] %v403_v11  ;;  %v407_v13 = vld [vmem:[%s1920_s7 + $0x90] sm:$0xff] }
  0x37   : > { %406 = vst [vmem:[%s1925_s28 + $0x40] sm:$0xff] %v405_v12  ;;  %v409_v14 = vld [vmem:[%s1920_s7 + $0xa0] sm:$0xff]  ;;  %v411_v15 = vld [vmem:[%s1920_s7 + $0xb0] sm:$0xff]  ;;  %408 = vst [vmem:[%s1925_s28 + $0x48] sm:$0xff] %v407_v13 }
  0x38   : > { %410 = vst [vmem:[%s1925_s28 + $0x50] sm:$0xff] %v409_v14  ;;  %412 = vst [vmem:[%s1925_s28 + $0x58] sm:$0xff] %v411_v15  ;;  %v413_v16 = vld [vmem:[%s1920_s7 + $0xc0] sm:$0xff]  ;;  %v415_v17 = vld [vmem:[%s1920_s7 + $0xd0] sm:$0xff] }
  0x39   : > { %v417_v18 = vld [vmem:[%s1920_s7 + $0xe0] sm:$0xff]  ;;  %414 = vst [vmem:[%s1925_s28 + $0x60] sm:$0xff] %v413_v16  ;;  %416 = vst [vmem:[%s1925_s28 + $0x68] sm:$0xff] %v415_v17  ;;  %v419_v19 = vld [vmem:[%s1920_s7 + $0xf0] sm:$0xff] }
  0x3a   : > { %418 = vst [vmem:[%s1925_s28 + $0x70] sm:$0xff] %v417_v18  ;;  %v421_v20 = vld [vmem:[%s1920_s7 + $0x100] sm:$0xff]  ;;  %v423_v21 = vld [vmem:[%s1920_s7 + $0x110] sm:$0xff]  ;;  %420 = vst [vmem:[%s1925_s28 + $0x78] sm:$0xff] %v419_v19 }
  0x3b   : > { %422 = vst [vmem:[%s1925_s28 + $0x80] sm:$0xff] %v421_v20  ;;  %424 = vst [vmem:[%s1925_s28 + $0x88] sm:$0xff] %v423_v21  ;;  %v425_v22 = vld [vmem:[%s1920_s7 + $0x120] sm:$0xff]  ;;  %v427_v23 = vld [vmem:[%s1920_s7 + $0x130] sm:$0xff] }
  0x3c   : > { %v429_v24 = vld [vmem:[%s1920_s7 + $0x140] sm:$0xff]  ;;  %426 = vst [vmem:[%s1925_s28 + $0x90] sm:$0xff] %v425_v22  ;;  %428 = vst [vmem:[%s1925_s28 + $0x98] sm:$0xff] %v427_v23  ;;  %v431_v25 = vld [vmem:[%s1920_s7 + $0x150] sm:$0xff] }
  0x3d   : > { %430 = vst [vmem:[%s1925_s28 + $0xa0] sm:$0xff] %v429_v24  ;;  %v433_v26 = vld [vmem:[%s1920_s7 + $0x160] sm:$0xff]  ;;  %v435_v27 = vld [vmem:[%s1920_s7 + $0x170] sm:$0xff]  ;;  %432 = vst [vmem:[%s1925_s28 + $0xa8] sm:$0xff] %v431_v25 }
  0x3e   : > { %434 = vst [vmem:[%s1925_s28 + $0xb0] sm:$0xff] %v433_v26  ;;  %436 = vst [vmem:[%s1925_s28 + $0xb8] sm:$0xff] %v435_v27  ;;  %v437_v28 = vld [vmem:[%s1920_s7 + $0x180] sm:$0xff]  ;;  %v439_v29 = vld [vmem:[%s1920_s7 + $0x190] sm:$0xff] }
  0x3f   : > { %v441_v30 = vld [vmem:[%s1920_s7 + $0x1a0] sm:$0xff]  ;;  %438 = vst [vmem:[%s1925_s28 + $0xc0] sm:$0xff] %v437_v28  ;;  %440 = vst [vmem:[%s1925_s28 + $0xc8] sm:$0xff] %v439_v29  ;;  %v443_v31 = vld [vmem:[%s1920_s7 + $0x1b0] sm:$0xff] }
  0x40   : > { %442 = vst [vmem:[%s1925_s28 + $0xd0] sm:$0xff] %v441_v30  ;;  %v445_v32 = vld [vmem:[%s1920_s7 + $0x1c0] sm:$0xff]  ;;  %v447_v33 = vld [vmem:[%s1920_s7 + $0x1d0] sm:$0xff]  ;;  %444 = vst [vmem:[%s1925_s28 + $0xd8] sm:$0xff] %v443_v31 }
  0x41   : > { %446 = vst [vmem:[%s1925_s28 + $0xe0] sm:$0xff] %v445_v32  ;;  %448 = vst [vmem:[%s1925_s28 + $0xe8] sm:$0xff] %v447_v33  ;;  %v449_v34 = vld [vmem:[%s1920_s7 + $0x1e0] sm:$0xff]  ;;  %v451_v35 = vld [vmem:[%s1920_s7 + $0x1f0] sm:$0xff] }
  0x42   : > { %v453_v36 = vld [vmem:[%s1920_s7 + $0x200] sm:$0xff]  ;;  %450 = vst [vmem:[%s1925_s28 + $0xf0] sm:$0xff] %v449_v34  ;;  %452 = vst [vmem:[%s1925_s28 + $0xf8] sm:$0xff] %v451_v35  ;;  %v455_v37 = vld [vmem:[%s1920_s7 + $0x210] sm:$0xff] }
  0x43   : > { %454 = vst [vmem:[%s1925_s28 + $0x100] sm:$0xff] %v453_v36  ;;  %v457_v38 = vld [vmem:[%s1920_s7 + $0x220] sm:$0xff]  ;;  %v459_v39 = vld [vmem:[%s1920_s7 + $0x230] sm:$0xff]  ;;  %456 = vst [vmem:[%s1925_s28 + $0x108] sm:$0xff] %v455_v37 }
  0x44   : > { %458 = vst [vmem:[%s1925_s28 + $0x110] sm:$0xff] %v457_v38  ;;  %460 = vst [vmem:[%s1925_s28 + $0x118] sm:$0xff] %v459_v39  ;;  %v461_v40 = vld [vmem:[%s1920_s7 + $0x240] sm:$0xff]  ;;  %v463_v41 = vld [vmem:[%s1920_s7 + $0x250] sm:$0xff] }
  0x45   : > { %v465_v42 = vld [vmem:[%s1920_s7 + $0x260] sm:$0xff]  ;;  %462 = vst [vmem:[%s1925_s28 + $0x120] sm:$0xff] %v461_v40  ;;  %464 = vst [vmem:[%s1925_s28 + $0x128] sm:$0xff] %v463_v41  ;;  %v467_v43 = vld [vmem:[%s1920_s7 + $0x270] sm:$0xff] }
  0x46   : > { %466 = vst [vmem:[%s1925_s28 + $0x130] sm:$0xff] %v465_v42  ;;  %v469_v44 = vld [vmem:[%s1920_s7 + $0x280] sm:$0xff]  ;;  %v471_v45 = vld [vmem:[%s1920_s7 + $0x290] sm:$0xff]  ;;  %468 = vst [vmem:[%s1925_s28 + $0x138] sm:$0xff] %v467_v43 }
  0x47   : > { %470 = vst [vmem:[%s1925_s28 + $0x140] sm:$0xff] %v469_v44  ;;  %472 = vst [vmem:[%s1925_s28 + $0x148] sm:$0xff] %v471_v45  ;;  %v473_v46 = vld [vmem:[%s1920_s7 + $0x2a0] sm:$0xff]  ;;  %v475_v47 = vld [vmem:[%s1920_s7 + $0x2b0] sm:$0xff] }
  0x48   : > { %v477_v48 = vld [vmem:[%s1920_s7 + $0x2c0] sm:$0xff]  ;;  %474 = vst [vmem:[%s1925_s28 + $0x150] sm:$0xff] %v473_v46  ;;  %476 = vst [vmem:[%s1925_s28 + $0x158] sm:$0xff] %v475_v47  ;;  %v479_v49 = vld [vmem:[%s1920_s7 + $0x2d0] sm:$0xff] }
  0x49   : > { %478 = vst [vmem:[%s1925_s28 + $0x160] sm:$0xff] %v477_v48  ;;  %v481_v50 = vld [vmem:[%s1920_s7 + $0x2e0] sm:$0xff]  ;;  %v483_v51 = vld [vmem:[%s1920_s7 + $0x2f0] sm:$0xff]  ;;  %480 = vst [vmem:[%s1925_s28 + $0x168] sm:$0xff] %v479_v49 }
  0x4a   : > { %482 = vst [vmem:[%s1925_s28 + $0x170] sm:$0xff] %v481_v50  ;;  %484 = vst [vmem:[%s1925_s28 + $0x178] sm:$0xff] %v483_v51  ;;  %v485_v52 = vld [vmem:[%s1920_s7 + $0x300] sm:$0xff]  ;;  %v487_v53 = vld [vmem:[%s1920_s7 + $0x310] sm:$0xff] }
  0x4b   : > { %v489_v54 = vld [vmem:[%s1920_s7 + $0x320] sm:$0xff]  ;;  %486 = vst [vmem:[%s1925_s28 + $0x180] sm:$0xff] %v485_v52  ;;  %488 = vst [vmem:[%s1925_s28 + $0x188] sm:$0xff] %v487_v53  ;;  %v491_v55 = vld [vmem:[%s1920_s7 + $0x330] sm:$0xff] }
  0x4c   : > { %490 = vst [vmem:[%s1925_s28 + $0x190] sm:$0xff] %v489_v54  ;;  %v493_v56 = vld [vmem:[%s1920_s7 + $0x340] sm:$0xff]  ;;  %v495_v57 = vld [vmem:[%s1920_s7 + $0x350] sm:$0xff]  ;;  %492 = vst [vmem:[%s1925_s28 + $0x198] sm:$0xff] %v491_v55 }
  0x4d   : > { %494 = vst [vmem:[%s1925_s28 + $0x1a0] sm:$0xff] %v493_v56  ;;  %496 = vst [vmem:[%s1925_s28 + $0x1a8] sm:$0xff] %v495_v57  ;;  %v497_v58 = vld [vmem:[%s1920_s7 + $0x360] sm:$0xff]  ;;  %v499_v59 = vld [vmem:[%s1920_s7 + $0x370] sm:$0xff] }
  0x4e   : > { %v501_v60 = vld [vmem:[%s1920_s7 + $0x380] sm:$0xff]  ;;  %498 = vst [vmem:[%s1925_s28 + $0x1b0] sm:$0xff] %v497_v58  ;;  %500 = vst [vmem:[%s1925_s28 + $0x1b8] sm:$0xff] %v499_v59  ;;  %v503_v61 = vld [vmem:[%s1920_s7 + $0x390] sm:$0xff] }
  0x4f   : > { %502 = vst [vmem:[%s1925_s28 + $0x1c0] sm:$0xff] %v501_v60  ;;  %v505_v62 = vld [vmem:[%s1920_s7 + $0x3a0] sm:$0xff]  ;;  %v507_v63 = vld [vmem:[%s1920_s7 + $0x3b0] sm:$0xff]  ;;  %504 = vst [vmem:[%s1925_s28 + $0x1c8] sm:$0xff] %v503_v61 }
  0x50   : > { %506 = vst [vmem:[%s1925_s28 + $0x1d0] sm:$0xff] %v505_v62  ;;  %508 = vst [vmem:[%s1925_s28 + $0x1d8] sm:$0xff] %v507_v63  ;;  %v509_v0 = vld [vmem:[%s1920_s7 + $0x3c0] sm:$0xff]  ;;  %v511_v1 = vld [vmem:[%s1920_s7 + $0x3d0] sm:$0xff] }
  0x51   : > { %v513_v2 = vld [vmem:[%s1920_s7 + $0x3e0] sm:$0xff]  ;;  %510 = vst [vmem:[%s1925_s28 + $0x1e0] sm:$0xff] %v509_v0  ;;  %512 = vst [vmem:[%s1925_s28 + $0x1e8] sm:$0xff] %v511_v1  ;;  %v515_v3 = vld [vmem:[%s1920_s7 + $0x3f0] sm:$0xff] }
  0x52   : > { %514 = vst [vmem:[%s1925_s28 + $0x1f0] sm:$0xff] %v513_v2  ;;  %516 = vst [vmem:[%s1925_s28 + $0x1f8] sm:$0xff] %v515_v3 }
  0x53 PF: > { %530 = sbr.rel (!%p1896_p11) target bundleno = 88 (0x58), region = 85  ;;  %s532_s0 = sand.u32 (%p1896_p11), 1, %s1733_s16  }
  0x54   : > { %s1489_s27 = sshll.u32 (%p1896_p11), %s1765_s24, 3  ;;  %s1401_s10 = sshll.u32 (%p1896_p11), %s532_s0, 4 }
  0x55   : > { %s540_s30 = scalar_lea.vmem (%p1896_p11), %s2198_s3, %s1489_s27  ;;  %s534_s9 = scalar_lea.vmem (%p1896_p11), [#allocation5], %s1401_s10 }
  0x56   : > { %v571_v4 = vld [vmem:[%s540_s30] sm:$0xff] (%p1896_p11)  ;;  %v573_v5 = vld [vmem:[%s540_s30 + $0x10] sm:$0xff] (%p1896_p11) }
  0x57   : > { %572 = vst [vmem:[%s534_s9] sm:$0xff] (%p1896_p11), %v571_v4  ;;  %574 = vst [vmem:[%s534_s9 + $0x8] sm:$0xff] (%p1896_p11), %v573_v5 }
  0x58 PF: > { %p1404_p1 = scmp.ge.s32.totalorder %s1769_s25, 1  ;;  %p579_p2 = scmp.lt.s32.totalorder %s1769_s25, 19 }
  0x5a   : > { %p580_p3 = pnand %p1404_p1, %p579_p2 }
  0x5b   : > { %s586_s7 = sand.u32 (!%p580_p3), 1, %s1745_s19   ;;  %s593_s14 = sand.u32 (!%p580_p3), 1, %s1737_s17  }
  0x5c   : > { %583 = sbr.rel (%p580_p3) target bundleno = 403 (0x193), region = 123  ;;  %s1405_s6 = sshll.u32 (!%p580_p3), %s586_s7, 5 }
  0x5d   : > { %s1406_s11 = sshll.u32 (!%p580_p3), %s593_s14, 9  ;;  %s600_s8 = sand.u32 (!%p580_p3), 1, %s1729_s15  }
  0x5e   : > { %s1409_s28 = sshll.u32 (!%p580_p3), %s1757_s22, 1  ;;  %s1407_s0 = sshll.u32 (!%p580_p3), %s600_s8, 4 }
  0x5f   : > { %p641_p4 = scmp.lt.s32.totalorder (!%p580_p3), %s1409_s28, 3  ;;  %s2071_s5 = scalar_lea.vmem (!%p580_p3), [#allocation3], %s1405_s6 }
  0x60   : > { %s2073_s30 = scalar_lea.vmem (!%p580_p3), [#allocation4], %s1406_s11  ;;  %s602_s9 = scalar_lea.vmem (!%p580_p3), [#allocation5], %s1407_s0 }
  0x61   : > { %s2231_s28 = smov (!%p641_p4, %s1409_s28), 3  ;;  %s2075_s19 = scalar_lea.vmem [#allocation6], %s1407_s0 }
  0x62   : > { %s643_s26 = scalar_lea.vmem %s2197_s2, %s2231_s28  ;;  %p1410_p5 = scmp.ne.s32.totalorder %s1753_s21, 0 }
  0x64   : > { %652 = sbr.rel (%p1410_p5) target bundleno = 110 (0x6e), region = 139 }
  0x69   : > { %v653_v6 = vld [vmem:[%s602_s9] sm:$0xff]  ;;  %v654_v7 = vld [vmem:[%s602_s9 + $0x8] sm:$0xff] }
  0x6a   : > { %v655_v8 = vunpack.c.l.bf16 %v653_v6  ;;  %v656_v9 = vunpack.c.h.bf16 %v653_v6  ;;  %v657_v10 = vunpack.c.l.bf16 %v654_v7  ;;  %v658_v11 = vunpack.c.h.bf16 %v654_v7 }
  0x6c   : > { %659 = vst [vmem:[#allocation2 + $0x10] sm:$0xff] %v655_v8  ;;  %660 = vst [vmem:[#allocation2] sm:$0xff] %v656_v9 }
  0x6d   : > { %661 = vst [vmem:[#allocation2 + $0x18] sm:$0xff] %v657_v10  ;;  %662 = vst [vmem:[#allocation2 + $0x8] sm:$0xff] %v658_v11 }
  0x6e PF: > { %v1581_v12 = vld [vmem:[%s2073_s30 + $0x74] ss:$8 sps:$4 sm:$0xff]   ;;  %v1585_v14 = vld [vmem:[%s2073_s30 + $0x70] ss:$8 sps:$4 sm:$0xff]   ;;  %v1587_v16 = vld [vmem:[%s2073_s30 + $0x64] ss:$8 sps:$4 sm:$0xff]  }
  0x6f   : > { %v1583_v13 = vld [vmem:[%s2073_s30 + $0x174] ss:$8 sps:$4 sm:$0xff]   ;;  %1075 = vmatprep.subr.bf16.mxu0 %v1581_v12  ;;  %v1586_v15 = vld [vmem:[%s2073_s30 + $0x170] ss:$8 sps:$4 sm:$0xff]   ;;  %v1589_v17 = vld [vmem:[%s2073_s30 + $0x164] ss:$8 sps:$4 sm:$0xff]  }
  0x70   : > { %1118 = vmatprep.subr.bf16.mxu1 %v1583_v13  ;;  %1076 = vmatpush1.bf16.msra.mxu0 %v1585_v14  ;;  %v1591_v18 = vld [vmem:[%s2073_s30 + $0x60] ss:$8 sps:$4 sm:$0xff]   ;;  %v1593_v20 = vld [vmem:[%s2073_s30 + $0x54] ss:$8 sps:$4 sm:$0xff]   ;;  %v1597_v22 = vld [vmem:[%s2073_s30 + $0x50] ss:$8 sps:$4 sm:$0xff]  }
  0x71   : > { %1119 = vmatpush1.bf16.msra.mxu1 %v1586_v15  ;;  %1077 = vmatprep.subr.bf16.mxu0 %v1587_v16  ;;  %v1592_v19 = vld [vmem:[%s2073_s30 + $0x160] ss:$8 sps:$4 sm:$0xff]   ;;  %v1595_v21 = vld [vmem:[%s2073_s30 + $0x154] ss:$8 sps:$4 sm:$0xff]   ;;  %v1598_v23 = vld [vmem:[%s2073_s30 + $0x150] ss:$8 sps:$4 sm:$0xff]  }
  0x72   : > { %1120 = vmatprep.subr.bf16.mxu1 %v1589_v17  ;;  %v1599_v24 = vld [vmem:[%s2073_s30 + $0x44] ss:$8 sps:$4 sm:$0xff]   ;;  %v1603_v26 = vld [vmem:[%s2073_s30 + $0x40] ss:$8 sps:$4 sm:$0xff]   ;;  %v1605_v28 = vld [vmem:[%s2073_s30 + $0x34] ss:$8 sps:$4 sm:$0xff]  }
  0x73   : > { %v1601_v25 = vld [vmem:[%s2073_s30 + $0x144] ss:$8 sps:$4 sm:$0xff]   ;;  %v1604_v27 = vld [vmem:[%s2073_s30 + $0x140] ss:$8 sps:$4 sm:$0xff]   ;;  %v1607_v29 = vld [vmem:[%s2073_s30 + $0x134] ss:$8 sps:$4 sm:$0xff]  }
  0x74   : > { %1078 = vmatpush1.bf16.msra.mxu0 %v1591_v18  ;;  %v1609_v30 = vld [vmem:[%s2073_s30 + $0x30] ss:$8 sps:$4 sm:$0xff]   ;;  %v1611_v32 = vld [vmem:[%s2073_s30 + $0x24] ss:$8 sps:$4 sm:$0xff]   ;;  %v1615_v34 = vld [vmem:[%s2073_s30 + $0x20] ss:$8 sps:$4 sm:$0xff]  }
  0x75   : > { %1121 = vmatpush1.bf16.msra.mxu1 %v1592_v19  ;;  %1079 = vmatprep.subr.bf16.mxu0 %v1593_v20  ;;  %v1610_v31 = vld [vmem:[%s2073_s30 + $0x130] ss:$8 sps:$4 sm:$0xff]   ;;  %v1613_v33 = vld [vmem:[%s2073_s30 + $0x124] ss:$8 sps:$4 sm:$0xff]   ;;  %v1616_v35 = vld [vmem:[%s2073_s30 + $0x120] ss:$8 sps:$4 sm:$0xff]  }
  0x76   : > { %1122 = vmatprep.subr.bf16.mxu1 %v1595_v21  ;;  %v1617_v36 = vld [vmem:[%s2073_s30 + $0x14] ss:$8 sps:$4 sm:$0xff]   ;;  %v1621_v38 = vld [vmem:[%s2073_s30 + $0x10] ss:$8 sps:$4 sm:$0xff]   ;;  %v1623_v40 = vld [vmem:[%s2073_s30 + $0x4] ss:$8 sps:$4 sm:$0xff]  }
  0x77   : > { %v1619_v37 = vld [vmem:[%s2073_s30 + $0x114] ss:$8 sps:$4 sm:$0xff]   ;;  %v1622_v39 = vld [vmem:[%s2073_s30 + $0x110] ss:$8 sps:$4 sm:$0xff]   ;;  %v1625_v41 = vld [vmem:[%s2073_s30 + $0x104] ss:$8 sps:$4 sm:$0xff]  }
  0x78   : > { %1080 = vmatpush1.bf16.msra.mxu0 %v1597_v22  ;;  %v1627_v42 = vld [vmem:[%s2073_s30] ss:$8 sps:$4 sm:$0xff]   ;;  %v1629_v44 = vld [vmem:[%s2073_s30 + $0xf4] ss:$8 sps:$4 sm:$0xff]   ;;  %v1633_v46 = vld [vmem:[%s2073_s30 + $0xf0] ss:$8 sps:$4 sm:$0xff]  }
  0x79   : > { %1123 = vmatpush1.bf16.msra.mxu1 %v1598_v23  ;;  %1081 = vmatprep.subr.bf16.mxu0 %v1599_v24  ;;  %v1628_v43 = vld [vmem:[%s2073_s30 + $0x100] ss:$8 sps:$4 sm:$0xff]   ;;  %v1631_v45 = vld [vmem:[%s2073_s30 + $0x1f4] ss:$8 sps:$4 sm:$0xff]   ;;  %v1634_v47 = vld [vmem:[%s2073_s30 + $0x1f0] ss:$8 sps:$4 sm:$0xff]  }
  0x7a   : > { %1124 = vmatprep.subr.bf16.mxu1 %v1601_v25  ;;  %v1635_v48 = vld [vmem:[%s2073_s30 + $0xe4] ss:$8 sps:$4 sm:$0xff]   ;;  %v1639_v50 = vld [vmem:[%s2073_s30 + $0xe0] ss:$8 sps:$4 sm:$0xff]   ;;  %v1641_v52 = vld [vmem:[%s2073_s30 + $0xd4] ss:$8 sps:$4 sm:$0xff]  }
  0x7b   : > { %v1637_v49 = vld [vmem:[%s2073_s30 + $0x1e4] ss:$8 sps:$4 sm:$0xff]   ;;  %v1640_v51 = vld [vmem:[%s2073_s30 + $0x1e0] ss:$8 sps:$4 sm:$0xff]   ;;  %v1643_v53 = vld [vmem:[%s2073_s30 + $0x1d4] ss:$8 sps:$4 sm:$0xff]  }
  0x7c   : > { %1082 = vmatpush1.bf16.msra.mxu0 %v1603_v26  ;;  %v1645_v54 = vld [vmem:[%s2073_s30 + $0xd0] ss:$8 sps:$4 sm:$0xff]   ;;  %v1647_v56 = vld [vmem:[%s2073_s30 + $0xc4] ss:$8 sps:$4 sm:$0xff]   ;;  %v1651_v58 = vld [vmem:[%s2073_s30 + $0xc0] ss:$8 sps:$4 sm:$0xff]  }
  0x7d   : > { %1125 = vmatpush1.bf16.msra.mxu1 %v1604_v27  ;;  %1083 = vmatprep.subr.bf16.mxu0 %v1605_v28  ;;  %v1646_v55 = vld [vmem:[%s2073_s30 + $0x1d0] ss:$8 sps:$4 sm:$0xff]   ;;  %v1649_v57 = vld [vmem:[%s2073_s30 + $0x1c4] ss:$8 sps:$4 sm:$0xff]   ;;  %v1652_v60 = vld [vmem:[%s2073_s30 + $0x1c0] ss:$8 sps:$4 sm:$0xff]  }
  0x7e   : > { %1126 = vmatprep.subr.bf16.mxu1 %v1607_v29  ;;  %v1679_v59 = vld [vmem:[%s2071_s5 + $0x4] ss:$16 sps:$4 sm:$0xff]   ;;  %v1682_v63 = vld [vmem:[%s2071_s5 + $0xc] ss:$16 sps:$4 sm:$0xff]   ;;  %v1657_v0 = vld [vmem:[%s2073_s30 + $0xb0] ss:$8 sps:$4 sm:$0xff]  }
  0x7f   : > { %v1653_v61 = vld [vmem:[%s2073_s30 + $0xb4] ss:$8 sps:$4 sm:$0xff]   ;;  %1107 = vmatprep.mubr.bf16.mxu0 %v1679_v59  ;;  %1150 = vmatprep.mubr.bf16.mxu1 %v1682_v63  ;;  %v1658_v1 = vld [vmem:[%s2073_s30 + $0x1b0] ss:$8 sps:$4 sm:$0xff]   ;;  %v1659_v2 = vld [vmem:[%s2073_s30 + $0xa4] ss:$8 sps:$4 sm:$0xff]  }
  0x80   : > { %1084 = vmatpush1.bf16.msra.mxu0 %v1609_v30  ;;  %v1655_v62 = vld [vmem:[%s2073_s30 + $0x1b4] ss:$8 sps:$4 sm:$0xff]   ;;  %v1661_v3 = vld [vmem:[%s2073_s30 + $0x1a4] ss:$8 sps:$4 sm:$0xff]   ;;  %v1663_v4 = vld [vmem:[%s2073_s30 + $0xa0] ss:$8 sps:$4 sm:$0xff]  }
  0x81   : > { %1127 = vmatpush1.bf16.msra.mxu1 %v1610_v31  ;;  %1085 = vmatprep.subr.bf16.mxu0 %v1611_v32  ;;  %v1664_v5 = vld [vmem:[%s2073_s30 + $0x1a0] ss:$8 sps:$4 sm:$0xff]   ;;  %v1665_v6 = vld [vmem:[%s2073_s30 + $0x94] ss:$8 sps:$4 sm:$0xff]   ;;  %v1669_v8 = vld [vmem:[%s2073_s30 + $0x90] ss:$8 sps:$4 sm:$0xff]  }
  0x82   : > { %1128 = vmatprep.subr.bf16.mxu1 %v1613_v33  ;;  %v1667_v7 = vld [vmem:[%s2073_s30 + $0x194] ss:$8 sps:$4 sm:$0xff]   ;;  %v1670_v9 = vld [vmem:[%s2073_s30 + $0x190] ss:$8 sps:$4 sm:$0xff]   ;;  %v1671_v10 = vld [vmem:[%s2073_s30 + $0x84] ss:$8 sps:$4 sm:$0xff]  }
  0x83   : > { %v1673_v11 = vld [vmem:[%s2073_s30 + $0x184] ss:$8 sps:$4 sm:$0xff]   ;;  %v1675_v12 = vld [vmem:[%s2073_s30 + $0x80] ss:$8 sps:$4 sm:$0xff]   ;;  %v663_v17 = vld [vmem:[#allocation2 + $0x10] sm:$0xff]  ;;  %p1479_p6 = scmp.ne.s32.totalorder %s1753_s21, 8 }
  0x84   : > { %1086 = vmatpush1.bf16.msra.mxu0 %v1615_v34  ;;  %v1676_v13 = vld [vmem:[%s2073_s30 + $0x180] ss:$8 sps:$4 sm:$0xff]   ;;  %v665_v26 = vld [vmem:[#allocation2 + $0x18] sm:$0xff] }
  0x85   : > { %1129 = vmatpush1.bf16.msra.mxu1 %v1616_v35  ;;  %1087 = vmatprep.subr.bf16.mxu0 %v1617_v36  ;;  %v1677_v14 = vld [vmem:[%s2071_s5] ss:$16 sps:$4 sm:$0xff]   ;;  %v1680_v15 = vld [vmem:[%s2071_s5 + $0x8] ss:$16 sps:$4 sm:$0xff]  }
  0x86   : > { %1130 = vmatprep.subr.bf16.mxu1 %v1619_v37  ;;  %v664_v21 = vld [vmem:[#allocation2] sm:$0xff]  ;;  %v666_v31 = vld [vmem:[#allocation2 + $0x8] sm:$0xff] }
  0x88   : > { %1088 = vmatpush1.bf16.msra.mxu0 %v1621_v38 }
  0x89   : > { %1131 = vmatpush1.bf16.msra.mxu1 %v1622_v39  ;;  %1089 = vmatprep.subr.bf16.mxu0 %v1623_v40 }
  0x8a   : > { %1132 = vmatprep.subr.bf16.mxu1 %v1625_v41 }
  0x8c   : > { %1090 = vmatpush1.bf16.msra.mxu0 %v1627_v42 }
  0x8d   : > { %1133 = vmatpush1.bf16.msra.mxu1 %v1628_v43  ;;  %1091 = vmatprep.subr.bf16.mxu0 %v1629_v44 }
  0x8e   : > { %1134 = vmatprep.subr.bf16.mxu1 %v1631_v45 }
  0x90   : > { %1092 = vmatpush2.bf16.msra.mxu0 %v1633_v46 }
  0x91   : > { %1135 = vmatpush2.bf16.msra.mxu1 %v1634_v47  ;;  %1093 = vmatprep.subr.bf16.mxu0 %v1635_v48 }
  0x92   : > { %1136 = vmatprep.subr.bf16.mxu1 %v1637_v49 }
  0x94   : > { %1094 = vmatpush2.bf16.msra.mxu0 %v1639_v50 }
  0x95   : > { %1137 = vmatpush2.bf16.msra.mxu1 %v1640_v51  ;;  %1095 = vmatprep.subr.bf16.mxu0 %v1641_v52 }
  0x96   : > { %1138 = vmatprep.subr.bf16.mxu1 %v1643_v53 }
  0x98   : > { %1096 = vmatpush2.bf16.msra.mxu0 %v1645_v54 }
  0x99   : > { %1139 = vmatpush2.bf16.msra.mxu1 %v1646_v55  ;;  %1097 = vmatprep.subr.bf16.mxu0 %v1647_v56 }
  0x9a   : > { %1140 = vmatprep.subr.bf16.mxu1 %v1649_v57 }
  0x9c   : > { %1098 = vmatpush2.bf16.msra.mxu0 %v1651_v58 }
  0x9d   : > { %1141 = vmatpush2.bf16.msra.mxu1 %v1652_v60  ;;  %1099 = vmatprep.subr.bf16.mxu0 %v1653_v61 }
  0x9e   : > { %1142 = vmatprep.subr.bf16.mxu1 %v1655_v62 }
  0xa0   : > { %1100 = vmatpush2.bf16.msra.mxu0 %v1657_v0 }
  0xa1   : > { %1143 = vmatpush2.bf16.msra.mxu1 %v1658_v1  ;;  %1101 = vmatprep.subr.bf16.mxu0 %v1659_v2 }
  0xa2   : > { %1144 = vmatprep.subr.bf16.mxu1 %v1661_v3 }
  0xa4   : > { %1102 = vmatpush2.bf16.msra.mxu0 %v1663_v4 }
  0xa5   : > { %1145 = vmatpush2.bf16.msra.mxu1 %v1664_v5  ;;  %1103 = vmatprep.subr.bf16.mxu0 %v1665_v6 }
  0xa6   : > { %1146 = vmatprep.subr.bf16.mxu1 %v1667_v7 }
  0xa8   : > { %1104 = vmatpush2.bf16.msra.mxu0 %v1669_v8 }
  0xa9   : > { %1147 = vmatpush2.bf16.msra.mxu1 %v1670_v9  ;;  %1105 = vmatprep.subr.bf16.mxu0 %v1671_v10 }
  0xaa   : > { %1148 = vmatprep.subr.bf16.mxu1 %v1673_v11 }
  0xac   : > { %1106 = vmatpush2.bf16.msra.mxu0 %v1675_v12 }
  0xad   : > { %1149 = vmatpush2.bf16.msra.mxu1 %v1676_v13 }
  0xaf   : > { %1108 = vmatmul.mubr.bf16.vlgmr.msra.gmra.mxu0 %v1677_v14 }
  0xb0   : > { %1151 = vmatmul.mubr.bf16.vlgmr.msra.gmra.mxu1 %v1680_v15 }
 0x16f   : > { %v1109_v16 = vpop.f32.mrf.mxu0 }
 0x170   : > { %v1152_v18 = vpop.f32.mrf.mxu1 }
 0x171   : > { %v1153_v19 = vadd.f32 %v1152_v18, %v1109_v16  ;;  %v1111_v20 = vpop.f32.mrf.mxu0 }
 0x172   : > { %v1154_v22 = vpop.f32.mrf.mxu1 }
 0x173   : > { %v1161_v23 = vadd.f32 %v1153_v19, %v663_v17  ;;  %v1155_v24 = vadd.f32 %v1154_v22, %v1111_v20  ;;  %v1113_v25 = vpop.f32.mrf.mxu0 }
 0x174   : > { %v1156_v27 = vpop.f32.mrf.mxu1 }
 0x175   : > { %1165 = vst [vmem:[#allocation2 + $0x10] sm:$0xff] %v1161_v23  ;;  %v1162_v28 = vadd.f32 %v1155_v24, %v664_v21  ;;  %v1157_v29 = vadd.f32 %v1156_v27, %v1113_v25  ;;  %v1115_v30 = vpop.f32.mrf.mxu0 }
 0x176   : > { %v1158_v32 = vpop.f32.mrf.mxu1 }
 0x177   : > { %1166 = vst [vmem:[#allocation2] sm:$0xff] %v1162_v28  ;;  %v1163_v33 = vadd.f32 %v1157_v29, %v665_v26  ;;  %v1159_v34 = vadd.f32 %v1158_v32, %v1115_v30  ;;  %1172 = sbr.rel (%p1479_p6) target bundleno = 395 (0x18b), region = 143 }
 0x179   : > { %1167 = vst [vmem:[#allocation2 + $0x18] sm:$0xff] %v1163_v33  ;;  %v1164_v35 = vadd.f32 %v1159_v34, %v666_v31 }
 0x17b   : > { %1168 = vst [vmem:[#allocation2 + $0x8] sm:$0xff] %v1164_v35 }
 0x17c   : > { %v1179_v36 = vlaneseq  ;;  %v1177_v38 = vld [vmem:[%s643_s26] sm:$0x3]  ;;  %v1173_v39 = vld [vmem:[#allocation2 + $0x10] sm:$0xff] }
 0x17e   : > { %v1180_v37 = vshrl.u32 %v1179_v36, 7  ;;  %v1174_v42 = vld [vmem:[#allocation2] sm:$0xff] }
 0x180   : > { %v1181_v40 = vsub.s32 0, %v1180_v37  ;;  %v1185_v41 = vsub.s32 1, %v1180_v37  ;;  %v1175_v43 = vld [vmem:[#allocation2 + $0x18] sm:$0xff] }
 0x182   : > { %v1176_v44 = vld [vmem:[#allocation2 + $0x8] sm:$0xff]  ;;  %v1182_v45 = vrot.slane %v1177_v38, %v1181_v40  ;;  %v1186_v46 = vrot.slane %v1177_v38, %v1185_v41 }
 0x184   : > { %v1189_v47 = vadd.f32 %v1182_v45, %v1173_v39  ;;  %v1190_v48 = vadd.f32 %v1186_v46, %v1174_v42  ;;  %v1191_v49 = vadd.f32 %v1182_v45, %v1175_v43  ;;  %v1192_v50 = vadd.f32 %v1186_v46, %v1176_v44 }
 0x186   : > { %v1193_v51 = vmax.f32 %v1189_v47, 0.0  ;;  %v1194_v52 = vmax.f32 %v1190_v48, 0.0  ;;  %v1195_v53 = vmax.f32 %v1191_v49, 0.0  ;;  %v1196_v54 = vmax.f32 %v1192_v50, 0.0 }
 0x188   : > { %v1490_v55 = vpack.c.bf16 %v1194_v52, %v1193_v51  ;;  %v1491_v56 = vpack.c.bf16 %v1196_v54, %v1195_v53 }
 0x18a   : > { %1209 = vst [vmem:[%s2075_s19] sm:$0xff] %v1490_v55  ;;  %1210 = vst [vmem:[%s2075_s19 + $0x8] sm:$0xff] %v1491_v56 }
 0x18b PF: > { %1217 = sbr.rel (!%p1900_p13) target bundleno = 403 (0x193), region = 147  ;;  %s1492_s21 = sshll.u32 (%p1900_p13), %s1757_s22, 3 }
 0x18c   : > { %s1223_s6 = scalar_lea.vmem (%p1900_p13), %s2199_s4, %s1492_s21 }
 0x191   : > { %v1254_v57 = vld [vmem:[%s2075_s19] sm:$0xff]  ;;  %v1256_v58 = vld [vmem:[%s2075_s19 + $0x8] sm:$0xff] }
 0x192   : > { %1255 = vst [vmem:[%s1223_s6] sm:$0xff] %v1254_v57  ;;  %1257 = vst [vmem:[%s1223_s6 + $0x10] sm:$0xff] %v1256_v58 }
 0x193 PF: > { %s14_s25 = sadd.s32 1, %s1769_s25   ;;  %s2211_s29 = sld [smem:[#allocation9_spill]] }
 0x194   : > { %p11_p7 = scmp.ge.s32.totalorder %s14_s25, 20   ;;  %s2212_s11 = sld [smem:[#allocation7_spill]] }
 0x195   : > { %s2213_s8 = sld [smem:[#allocation8_spill]]  ;;  %s2214_s15 = smov %s1733_s16 }
 0x196   : > { %s2215_s16 = smov %s1892_s13  ;;  %s2216_s17 = smov %s1741_s18 }
 0x197   : > { %s2217_s18 = smov %s1889_s12  ;;  %s2218_s19 = smov %s1749_s20 }
 0x198   : > { %s2220_s21 = smov %s1761_s23  ;;  %s2221_s22 = smov %s1765_s24 }
 0x199   : > { %s2219_s20 = smov %s2211_s29  ;;  %13 = sbr.rel (!%p11_p7) target bundleno = 8 (0x8), region = 235 }
 0x19a   : > { %s2222_s23 = smov %s2212_s11 }
 0x19b   : > { %s2223_s24 = smov %s2213_s8 }

// kernel: resnet_forward.27
= control target key start
LH: loop header
LB: loop body
LE: loop exit
PB: predicated region body
PF: predicated region fallthrough
CT: control target
= control target key end

     0   :  { %vm33_vm0 = vcmask 1043456   ;;  %s674_s0 = inlined_call_operand.vmem [shape: bf16[2,4,512], index: 0, kind: input, shape index: {}]   ;;  %s675_s1 = inlined_call_operand.vmem [shape: f32[512,10], index: 1, kind: input, shape index: {}]   ;;  %s676_s2 = inlined_call_operand.vmem [shape: f32[1,10], index: 2, kind: input, shape index: {}]   ;;  %s677_s3 = inlined_call_operand.hbm [shape: f32[2,10], index: 3, kind: output, shape index: {}]  }
   0x1   :  { %v130_v0 = vld [vmem:[%s675_s1 + $0xf8] sm:$0xff]  ;;  %v129_v4 = vld [vmem:[%s675_s1 + $0xf0] sm:$0xff]  ;;  %v128_v8 = vld [vmem:[%s675_s1 + $0xe8] sm:$0xff] }
   0x2   :  { %v162_v1 = vld [vmem:[%s675_s1 + $0x1f8] sm:$0xff]  ;;  %344 = vmatprep.subr.mxu0 %v130_v0  ;;  %v161_v5 = vld [vmem:[%s675_s1 + $0x1f0] sm:$0xff]  ;;  %v160_v9 = vld [vmem:[%s675_s1 + $0x1e8] sm:$0xff] }
   0x3   :  { %v114_v2 = vld [vmem:[%s675_s1 + $0x78] sm:$0xff]  ;;  %379 = vmatprep.subr.mxu1 %v162_v1  ;;  %v113_v6 = vld [vmem:[%s675_s1 + $0x70] sm:$0xff]  ;;  %v112_v10 = vld [vmem:[%s675_s1 + $0x68] sm:$0xff] }
   0x4   :  { %v146_v3 = vld [vmem:[%s675_s1 + $0x178] sm:$0xff]  ;;  %345 = vmatpush3.msra.mxu0 %v114_v2  ;;  %v145_v7 = vld [vmem:[%s675_s1 + $0x170] sm:$0xff]  ;;  %v144_v11 = vld [vmem:[%s675_s1 + $0x168] sm:$0xff] }
   0x5   :  { %380 = vmatpush3.msra.mxu1 %v146_v3  ;;  %346 = vmatprep.subr.mxu0 %v129_v4  ;;  %v127_v12 = vld [vmem:[%s675_s1 + $0xe0] sm:$0xff]  ;;  %v126_v16 = vld [vmem:[%s675_s1 + $0xd8] sm:$0xff]  ;;  %v125_v20 = vld [vmem:[%s675_s1 + $0xd0] sm:$0xff] }
   0x6   :  { %381 = vmatprep.subr.mxu1 %v161_v5  ;;  %347 = vmatpush3.msra.mxu0 %v113_v6  ;;  %v159_v13 = vld [vmem:[%s675_s1 + $0x1e0] sm:$0xff]  ;;  %v158_v17 = vld [vmem:[%s675_s1 + $0x1d8] sm:$0xff]  ;;  %v157_v21 = vld [vmem:[%s675_s1 + $0x1d0] sm:$0xff] }
   0x7   :  { %382 = vmatpush3.msra.mxu1 %v145_v7  ;;  %348 = vmatprep.subr.mxu0 %v128_v8  ;;  %v111_v14 = vld [vmem:[%s675_s1 + $0x60] sm:$0xff]  ;;  %v110_v18 = vld [vmem:[%s675_s1 + $0x58] sm:$0xff]  ;;  %v109_v22 = vld [vmem:[%s675_s1 + $0x50] sm:$0xff] }
   0x8   :  { %383 = vmatprep.subr.mxu1 %v160_v9  ;;  %v143_v15 = vld [vmem:[%s675_s1 + $0x160] sm:$0xff]  ;;  %349 = vmatpush3.msra.mxu0 %v112_v10  ;;  %v142_v19 = vld [vmem:[%s675_s1 + $0x158] sm:$0xff]  ;;  %v141_v23 = vld [vmem:[%s675_s1 + $0x150] sm:$0xff] }
   0x9   :  { %384 = vmatpush3.msra.mxu1 %v144_v11  ;;  %350 = vmatprep.subr.mxu0 %v127_v12  ;;  %v124_v24 = vld [vmem:[%s675_s1 + $0xc8] sm:$0xff]  ;;  %v123_v28 = vld [vmem:[%s675_s1 + $0xc0] sm:$0xff]  ;;  %v122_v32 = vld [vmem:[%s675_s1 + $0xb8] sm:$0xff] }
   0xa   :  { %385 = vmatprep.subr.mxu1 %v159_v13  ;;  %351 = vmatpush3.msra.mxu0 %v111_v14  ;;  %v156_v25 = vld [vmem:[%s675_s1 + $0x1c8] sm:$0xff]  ;;  %v155_v29 = vld [vmem:[%s675_s1 + $0x1c0] sm:$0xff]  ;;  %v154_v33 = vld [vmem:[%s675_s1 + $0x1b8] sm:$0xff] }
   0xb   :  { %386 = vmatpush3.msra.mxu1 %v143_v15  ;;  %352 = vmatprep.subr.mxu0 %v126_v16  ;;  %v108_v26 = vld [vmem:[%s675_s1 + $0x48] sm:$0xff]  ;;  %v107_v30 = vld [vmem:[%s675_s1 + $0x40] sm:$0xff]  ;;  %v106_v34 = vld [vmem:[%s675_s1 + $0x38] sm:$0xff] }
   0xc   :  { %387 = vmatprep.subr.mxu1 %v158_v17  ;;  %353 = vmatpush3.msra.mxu0 %v110_v18  ;;  %v140_v27 = vld [vmem:[%s675_s1 + $0x148] sm:$0xff]  ;;  %v139_v31 = vld [vmem:[%s675_s1 + $0x140] sm:$0xff]  ;;  %v138_v35 = vld [vmem:[%s675_s1 + $0x138] sm:$0xff] }
   0xd   :  { %388 = vmatpush3.msra.mxu1 %v142_v19  ;;  %354 = vmatprep.subr.mxu0 %v125_v20  ;;  %v121_v36 = vld [vmem:[%s675_s1 + $0xb0] sm:$0xff]  ;;  %v120_v40 = vld [vmem:[%s675_s1 + $0xa8] sm:$0xff]  ;;  %v119_v44 = vld [vmem:[%s675_s1 + $0xa0] sm:$0xff] }
   0xe   :  { %389 = vmatprep.subr.mxu1 %v157_v21  ;;  %355 = vmatpush3.msra.mxu0 %v109_v22  ;;  %v153_v37 = vld [vmem:[%s675_s1 + $0x1b0] sm:$0xff]  ;;  %v152_v41 = vld [vmem:[%s675_s1 + $0x1a8] sm:$0xff]  ;;  %v151_v45 = vld [vmem:[%s675_s1 + $0x1a0] sm:$0xff] }
   0xf   :  { %390 = vmatpush3.msra.mxu1 %v141_v23  ;;  %356 = vmatprep.subr.mxu0 %v124_v24  ;;  %v105_v38 = vld [vmem:[%s675_s1 + $0x30] sm:$0xff]  ;;  %v104_v42 = vld [vmem:[%s675_s1 + $0x28] sm:$0xff]  ;;  %v103_v46 = vld [vmem:[%s675_s1 + $0x20] sm:$0xff] }
  0x10   :  { %391 = vmatprep.subr.mxu1 %v156_v25  ;;  %357 = vmatpush3.msra.mxu0 %v108_v26  ;;  %v137_v39 = vld [vmem:[%s675_s1 + $0x130] sm:$0xff]  ;;  %v136_v43 = vld [vmem:[%s675_s1 + $0x128] sm:$0xff]  ;;  %v135_v47 = vld [vmem:[%s675_s1 + $0x120] sm:$0xff] }
  0x11   :  { %392 = vmatpush3.msra.mxu1 %v140_v27  ;;  %358 = vmatprep.subr.mxu0 %v123_v28  ;;  %v15_v48 = vld [vmem:[%s674_s0] sm:$0xff]  ;;  %v16_v49 = vld [vmem:[%s674_s0 + $0x8] sm:$0xff]  ;;  %v118_v50 = vld [vmem:[%s675_s1 + $0x98] sm:$0xff] }
  0x12   :  { %393 = vmatprep.subr.mxu1 %v155_v29  ;;  %359 = vmatpush3.msra.mxu0 %v107_v30  ;;  %v150_v51 = vld [vmem:[%s675_s1 + $0x198] sm:$0xff]  ;;  %v17_v52 = vunpack.c.l.bf16 %v15_v48  ;;  %v19_v53 = vunpack.c.l.bf16 %v16_v49  ;;  %v18_v54 = vunpack.c.h.bf16 %v15_v48  ;;  %v20_v55 = vunpack.c.h.bf16 %v16_v49 }
  0x13   :  { %394 = vmatpush3.msra.mxu1 %v139_v31  ;;  %360 = vmatprep.subr.mxu0 %v122_v32 }
  0x14   :  { %395 = vmatprep.subr.mxu1 %v154_v33  ;;  %361 = vmatpush3.msra.mxu0 %v106_v34 }
  0x15   :  { %396 = vmatpush3.msra.mxu1 %v138_v35  ;;  %362 = vmatprep.subr.mxu0 %v121_v36 }
  0x16   :  { %397 = vmatprep.subr.mxu1 %v153_v37  ;;  %363 = vmatpush3.msra.mxu0 %v105_v38 }
  0x17   :  { %398 = vmatpush3.msra.mxu1 %v137_v39  ;;  %364 = vmatprep.subr.mxu0 %v120_v40 }
  0x18   :  { %399 = vmatprep.subr.mxu1 %v152_v41  ;;  %365 = vmatpush3.msra.mxu0 %v104_v42 }
  0x19   :  { %400 = vmatpush3.msra.mxu1 %v136_v43 }
  0x1a   :  { %8 = vsyncpa [#allocation3], 0  ;;  %366 = vmatprep.subr.mxu0 %v119_v44  ;;  %401 = vmatprep.subr.mxu1 %v151_v45  ;;  %v102_v56 = vld [vmem:[%s675_s1 + $0x18] sm:$0xff]  ;;  %v117_v58 = vld [vmem:[%s675_s1 + $0x90] sm:$0xff]  ;;  %v25_v60 = vcombine.high %v17_v52, %v17_v52  ;;  %v27_v61 = vcombine.high %v19_v53, %v19_v53  ;;  %v26_v62 = vcombine.high %v18_v54, %v18_v54  ;;  %v34_v63 = vsel %vm33_vm0, %v17_v52, 0.0  ;;  %s437_s0 = smov [#allocation2]  }
  0x1b   :  { %v134_v57 = vld [vmem:[%s675_s1 + $0x118] sm:$0xff]  ;;  %367 = vmatpush3.msra.mxu0 %v103_v46  ;;  %402 = vmatpush3.msra.mxu1 %v135_v47  ;;  %v149_v59 = vld [vmem:[%s675_s1 + $0x190] sm:$0xff]  ;;  %v28_v2 = vcombine.high %v20_v55, %v20_v55  ;;  %v35_v3 = vrot.slane %v34_v63, 4  ;;  %v62_v4 = vsel %vm33_vm0, %v19_v53, 0.0  ;;  %v48_v5 = vsel %vm33_vm0, %v18_v54, 0.0  ;;  %v116_v6 = vld [vmem:[%s675_s1 + $0x88] sm:$0xff] }
  0x1c   :  { %368 = vmatprep.subr.mxu0 %v118_v50  ;;  %403 = vmatprep.subr.mxu1 %v150_v51  ;;  %v101_v0 = vld [vmem:[%s675_s1 + $0x10] sm:$0xff]  ;;  %v148_v7 = vld [vmem:[%s675_s1 + $0x188] sm:$0xff]  ;;  %v41_v8 = vsel %vm33_vm0, %v25_v60, 0.0  ;;  %v69_v9 = vsel %vm33_vm0, %v27_v61, 0.0  ;;  %v55_v10 = vsel %vm33_vm0, %v26_v62, 0.0  ;;  %v63_v11 = vrot.slane %v62_v4, 4 }
  0x1d   :  { %v133_v1 = vld [vmem:[%s675_s1 + $0x110] sm:$0xff]  ;;  %369 = vmatpush3.msra.mxu0 %v102_v56  ;;  %404 = vmatpush3.msra.mxu1 %v134_v57  ;;  %v100_v12 = vld [vmem:[%s675_s1 + $0x8] sm:$0xff]  ;;  %v42_v14 = vrot.slane %v41_v8, 4  ;;  %v70_v15 = vrot.slane %v69_v9, 4  ;;  %v56_v16 = vrot.slane %v55_v10, 4  ;;  %v83_v17 = vsel %vm33_vm0, %v28_v2, 0.0 }
  0x1e   :  { %370 = vmatprep.subr.mxu0 %v117_v58  ;;  %405 = vmatprep.subr.mxu1 %v149_v59  ;;  %v132_v13 = vld [vmem:[%s675_s1 + $0x108] sm:$0xff]  ;;  %v115_v18 = vld [vmem:[%s675_s1 + $0x80] sm:$0xff]  ;;  %v84_v20 = vrot.slane %v83_v17, 4  ;;  %v36_v21 = vadd.f32 %v35_v3, %v34_v63  ;;  %v64_v22 = vadd.f32 %v63_v11, %v62_v4  ;;  %v49_v23 = vrot.slane %v48_v5, 4  ;;  %s335_s9 = sshll.u32 %s437_s0, 4  ;;  %s336_s9 = int_to_ptr.vmem [resolvable:$true] %s335_s9 }
  0x1f   :  { %371 = vmatpush3.msra.mxu0 %v101_v0  ;;  %406 = vmatpush3.msra.mxu1 %v133_v1  ;;  %v147_v19 = vld [vmem:[%s675_s1 + $0x180] sm:$0xff]  ;;  %v43_v25 = vadd.f32 %v42_v14, %v41_v8  ;;  %v71_v26 = vadd.f32 %v70_v15, %v69_v9  ;;  %vm178_vm1 = vcmask 1041409   ;;  %v57_v28 = vadd.f32 %v56_v16, %v55_v10  ;;  %s415_s10 = scalar_lea.vmem %s336_s9, 32  ;;  %p420_p1 = scmp.lt.s32.totalorder %s336_s9, %s336_s9 }
  0x20   :  { %372 = vmatprep.subr.mxu0 %v116_v6  ;;  %407 = vmatprep.subr.mxu1 %v148_v7  ;;  %v99_v24 = vld [vmem:[%s675_s1] sm:$0xff]  ;;  %v76_v29 = vsel %vm33_vm0, %v20_v55, 0.0  ;;  %v85_v30 = vadd.f32 %v84_v20, %v83_v17  ;;  %v37_v31 = vrot.slane %v36_v21, 2  ;;  %v65_v32 = vrot.slane %v64_v22, 2  ;;  %p416_p0 = scmp.ne.s32.totalorder %s336_s9, %s415_s10  ;;  %p421_p2 = scmp.lt.s32.totalorder %s415_s10, %s415_s10 }
  0x21   :  { %v131_v27 = vld [vmem:[%s675_s1 + $0x100] sm:$0xff]  ;;  %373 = vmatpush3.msra.mxu0 %v100_v12  ;;  %408 = vmatpush3.msra.mxu1 %v132_v13  ;;  %v50_v33 = vadd.f32 %v49_v23, %v48_v5  ;;  %v44_v34 = vrot.slane %v43_v25, 2  ;;  %v72_v35 = vrot.slane %v71_v26, 2  ;;  %v58_v36 = vrot.slane %v57_v28, 2 }
  0x22   :  { %374 = vmatprep.subr.mxu0 %v115_v18  ;;  %409 = vmatprep.subr.mxu1 %v147_v19  ;;  %v77_v37 = vrot.slane %v76_v29, 4  ;;  %v86_v38 = vrot.slane %v85_v30, 2  ;;  %v38_v39 = vadd.f32 %v37_v31, %v36_v21  ;;  %v66_v40 = vadd.f32 %v65_v32, %v64_v22  ;;  %v343_v15 = vld [vmem:[%s676_s2] ss:$0 sm:$0xff]  ;;  %p422_p3 = por %p421_p2, %p420_p1 }
  0x23   :  { %375 = vmatpush3.msra.mxu0 %v99_v24  ;;  %410 = vmatpush3.msra.mxu1 %v131_v27  ;;  %v51_v41 = vrot.slane %v50_v33, 2  ;;  %v45_v42 = vadd.f32 %v44_v34, %v43_v25  ;;  %v73_v43 = vadd.f32 %v72_v35, %v71_v26  ;;  %v59_v44 = vadd.f32 %v58_v36, %v57_v28 }
  0x24   :  { %v78_v45 = vadd.f32 %v77_v37, %v76_v29  ;;  %v87_v46 = vadd.f32 %v86_v38, %v85_v30  ;;  %v39_v47 = vrot.slane %v38_v39, 1  ;;  %v67_v48 = vrot.slane %v66_v40, 1  ;;  %p423_p4 = pnand %p422_p3, %p416_p0 }
  0x25   :  { %v52_v49 = vadd.f32 %v51_v41, %v50_v33  ;;  %v46_v50 = vrot.slane %v45_v42, 1  ;;  %v74_v51 = vrot.slane %v73_v43, 1  ;;  %v60_v52 = vrot.slane %v59_v44, 1 }
  0x26   :  { %v79_v53 = vrot.slane %v78_v45, 2  ;;  %v88_v54 = vrot.slane %v87_v46, 1  ;;  %v40_v55 = vadd.f32 %v39_v47, %v38_v39  ;;  %v68_v56 = vadd.f32 %v67_v48, %v66_v40 }
  0x27   :  { %v53_v57 = vrot.slane %v52_v49, 1  ;;  %v47_v58 = vadd.f32 %v46_v50, %v45_v42  ;;  %v75_v59 = vadd.f32 %v74_v51, %v73_v43  ;;  %v61_v60 = vadd.f32 %v60_v52, %v59_v44 }
  0x28   :  { %v80_v61 = vadd.f32 %v79_v53, %v78_v45  ;;  %v89_v62 = vadd.f32 %v88_v54, %v87_v46  ;;  %v91_v63 = vmul.f32 0.25, %v40_v55  ;;  %v95_v0 = vmul.f32 0.25, %v68_v56 }
  0x29   :  { %v54_v1 = vadd.f32 %v53_v57, %v52_v49  ;;  %v92_v2 = vmul.f32 0.25, %v47_v58  ;;  %v96_v3 = vmul.f32 0.25, %v75_v59  ;;  %v94_v4 = vmul.f32 0.25, %v61_v60 }
  0x2a   :  { %v81_v5 = vrot.slane %v80_v61, 1  ;;  %v98_v6 = vmul.f32 0.25, %v89_v62  ;;  %v179_v7 = vsel %vm178_vm1, %v95_v0, %v91_v63  ;;  %vm327_vm2 = vcmask 74752  }
  0x2b   :  { %v180_v8 = vsel %vm178_vm1, %v96_v3, %v92_v2  ;;  %v93_v10 = vmul.f32 0.25, %v54_v1 }
  0x2c   :  { %v82_v9 = vadd.f32 %v81_v5, %v80_v61  ;;  %251 = vmatprep.mubr.f32.mxu0 %v180_v8  ;;  %v182_v11 = vsel %vm178_vm1, %v98_v6, %v94_v4 }
  0x2d   :  { %321 = vmatprep.mubr.f32.mxu1 %v182_v11  ;;  %252 = vmatmul.mubr.f32.vlgmr.msra.gmra.mxu0 %v179_v7 }
  0x2e   :  { %v97_v12 = vmul.f32 0.25, %v82_v9 }
  0x30   :  { %v181_v13 = vsel %vm178_vm1, %v97_v12, %v93_v10 }
  0x31   :  { %322 = vmatmul.mubr.f32.vlgmr.msra.gmra.mxu1 %v181_v13 }
  0xed   :  { %v376_v14 = vpop.f32.mrf.mxu0 }
  0xef   :  { %v377_v16 = vpop.f32.mrf.mxu0 }
  0xf0   :  { %v378_v18 = vadd.f32 %v377_v16, %v376_v14 }
  0xf1   :  { %v411_v17 = vpop.f32.mrf.mxu1 }
  0xf2   :  { %v254_v19 = vadd.f32 %v378_v18, %v343_v15 }
  0xf3   :  { %v412_v20 = vpop.f32.mrf.mxu1 }
  0xf4   :  { %v413_v21 = vadd.f32 %v412_v20, %v411_v17 }
  0xf6   :  { %v324_v22 = vadd.f32 %v413_v21, %v254_v19 }
  0xf8   :  { %328 = vst.msk [vmem:[#allocation2] sm:$0x3] %vm327_vm2, %v324_v22 }
  0xf9   :  { %426 = shalt.err (!%p423_p4)
}
  0xfa   :  { %338 = dma.vmem_to_hbm [thread:$0]  %s336_s9, 32, %s677_s3, [#allocation3]  }
  0xfb   :  { %435 = dma.done.wait [#allocation3], 32  }
  0xfc   :  { %436 = vsyncadd [#allocation3], 4294967264 }
  0xfd   :  { %342 = vsyncpa [#allocation3], 1 }

</bundles_post_ra>
